<compile_context>
chip_gen: v6e
topology: v6e:2x2x1
jax: 0.10.0
libtpu: 0.0.40
codegen_flags: <defaults>
</compile_context>

<pallas_src>
import functools

import jax
import jax.numpy as jnp
from jax import lax
from jax.experimental import pallas as pl
from jax.experimental.pallas import tpu as pltpu

NEG_SLOPE = 0.01   # nn.LeakyReLU() default
BN_EPS = 1e-5


def _round_up(v, m):
    return ((v + m - 1) // m) * m


# ----------------------------------------------------------------------------
# Fused kernel: 4 x (3x3 conv + folded BN + LeakyReLU) + GAP + softmax.
# One grid step == one batch element.
# ----------------------------------------------------------------------------
def _conv3x3_bn_lrelu(h, w_ref, scale_ref, bias_ref, cshift_ref, width):
    """One conv block on a flattened (H*W, Cin) activation (value in, value out)."""
    n, cin = h.shape
    cout = w_ref.shape[-1]
    h_bf = h.astype(jnp.bfloat16)

    # Column (x) shifts by -1 / +1 with boundary zeroing, done as exact 0/1
    # selection matmuls on the MXU (stays lane/sublane aligned; result is an
    # exact copy of bf16 values, so casting back to bf16 is lossless).
    col_m = jnp.dot(cshift_ref[0], h_bf,
                    preferred_element_type=jnp.float32).astype(jnp.bfloat16)
    col_p = jnp.dot(cshift_ref[1], h_bf,
                    preferred_element_type=jnp.float32).astype(jnp.bfloat16)
    cols = (col_m, h_bf, col_p)            # dx = 0, 1, 2  (ox = -1, 0, +1)
    zrow = jnp.zeros((width, cin), jnp.bfloat16)

    acc = jnp.zeros((n, cout), jnp.float32)
    for dy in range(3):                    # oy = dy - 1
        for dx in range(3):
            u = cols[dx]
            if dy == 0:                    # tap[i] = u[i - W], zero for top row
                v = jnp.concatenate([zrow, u[:n - width]], axis=0)
            elif dy == 2:                  # tap[i] = u[i + W], zero for bottom row
                v = jnp.concatenate([u[width:], zrow], axis=0)
            else:                          # oy = 0
                v = u
            acc = acc + jnp.dot(v, w_ref[dy, dx],
                                preferred_element_type=jnp.float32)

    acc = acc * scale_ref[...] + bias_ref[...]         # folded BatchNorm (+ conv bias)
    return jnp.where(acc >= 0, acc, NEG_SLOPE * acc)   # LeakyReLU


def _discriminator_kernel(cshift_ref, x_ref, *refs, width, num_classes):
    o_ref = refs[-1]
    layer_refs = refs[:-1]

    h = x_ref[...].astype(jnp.float32)                 # (H*W, C0_padded)
    for i in range(0, len(layer_refs), 3):
        h = _conv3x3_bn_lrelu(h, layer_refs[i], layer_refs[i + 1],
                              layer_refs[i + 2], cshift_ref, width)

    # Global average pooling over the flattened spatial axis.
    n = h.shape[0]
    pooled = jnp.sum(h, axis=0, keepdims=True) * (1.0 / n)      # (1, C_last_padded)

    # Softmax over the real classes only (padded lanes masked out).
    lane = lax.broadcasted_iota(jnp.int32, pooled.shape, 1)
    pooled = jnp.where(lane < num_classes, pooled, -1e30)
    m = jnp.max(pooled, axis=1, keepdims=True)
    e = jnp.exp(pooled - m)
    o_ref[...] = (e / jnp.sum(e, axis=1, keepdims=True)).astype(o_ref.dtype)


# ----------------------------------------------------------------------------
# Wrapper: layout, channel padding, constant shift matrices, pallas_call.
# ----------------------------------------------------------------------------
def _make_col_shift_mats(height, width):
    """(2, H*W, H*W) bf16 0/1 matrices implementing x-shift by -1 / +1 with
    zero padding at the row boundaries (in flattened row-major order)."""
    n = height * width
    idx = jnp.arange(n)
    ii = idx[:, None]
    jj = idx[None, :]
    xcol = ii % width
    shift_m = (jj == ii - 1) & (xcol >= 1)            # u[i] = h[i-1]  (ox = -1)
    shift_p = (jj == ii + 1) & (xcol <= width - 2)    # u[i] = h[i+1]  (ox = +1)
    return jnp.stack([shift_m, shift_p], axis=0).astype(jnp.bfloat16)


def _pad_layer(w, scale, bias, cin_pad, cout_pad):
    kh, kw, cin, cout = w.shape
    w_p = jnp.zeros((kh, kw, cin_pad, cout_pad), jnp.float32)
    w_p = w_p.at[:, :, :cin, :cout].set(w)
    s_p = jnp.zeros((1, cout_pad), jnp.float32).at[:, :cout].set(scale)
    b_p = jnp.zeros((1, cout_pad), jnp.float32).at[:, :cout].set(bias)
    return w_p.astype(jnp.bfloat16), s_p, b_p


def discriminator_forward(x_nchw, params):
    """x_nchw: (B, Cin, H, W) f32; params: list of (w_hwio, scale, bias) per block."""
    B, c_in, H, W = x_nchw.shape
    n = H * W
    num_classes = params[-1][0].shape[-1]

    # Padded channel widths along the layer chain (lane/sublane friendly;
    # final layer lane-dense at 128).
    chain = [_round_up(c_in, 8)]
    for li, (w, _, _) in enumerate(params):
        cout = w.shape[-1]
        chain.append(_round_up(cout, 128) if li == len(params) - 1
                     else _round_up(cout, 8))

    # NHWC, flatten spatial (channels -> lane axis), pad input channels.
    x = jnp.transpose(x_nchw, (0, 2, 3, 1)).astype(jnp.float32).reshape(B, n, c_in)
    if chain[0] != c_in:
        x = jnp.pad(x, ((0, 0), (0, 0), (0, chain[0] - c_in)))

    cshift = _make_col_shift_mats(H, W)

    padded = []
    for li, (w, s, b) in enumerate(params):
        padded.extend(_pad_layer(w, s, b, chain[li], chain[li + 1]))

    in_specs = [
        pl.BlockSpec((2, n, n), lambda b: (0, 0, 0)),             # column-shift mats
        pl.BlockSpec((None, n, chain[0]), lambda b: (b, 0, 0)),   # input activation
    ]
    for li in range(len(params)):
        ci, co = chain[li], chain[li + 1]
        in_specs.append(pl.BlockSpec((3, 3, ci, co), lambda b: (0, 0, 0, 0)))
        in_specs.append(pl.BlockSpec((1, co), lambda b: (0, 0)))
        in_specs.append(pl.BlockSpec((1, co), lambda b: (0, 0)))

    out3 = pl.pallas_call(
        functools.partial(_discriminator_kernel, width=W, num_classes=num_classes),
        out_shape=jax.ShapeDtypeStruct((B, 1, chain[-1]), jnp.float32),
        grid=(B,),
        in_specs=in_specs,
        out_specs=pl.BlockSpec((None, 1, chain[-1]), lambda b: (b, 0, 0)),
        compiler_params=pltpu.CompilerParams(dimension_semantics=("parallel",)),
    )(cshift, x, *padded)
    return out3[:, 0, :num_classes]


# ----------------------------------------------------------------------------
# Parameter init (deterministic, synthetic). BN running stats + conv bias are
# folded into per-channel (scale, bias).
# ----------------------------------------------------------------------------
def init_block_params(key, cin, cout):
    kw, kb, kg, kbe, km, kv = jax.random.split(key, 6)
    w = 0.1 * jax.random.normal(kw, (3, 3, cin, cout), jnp.float32)
    conv_b = 0.1 * jax.random.normal(kb, (cout,), jnp.float32)
    gamma = 1.0 + 0.1 * jax.random.normal(kg, (cout,), jnp.float32)
    beta = 0.1 * jax.random.normal(kbe, (cout,), jnp.float32)
    run_mean = 0.1 * jax.random.normal(km, (cout,), jnp.float32)
    run_var = 1.0 + 0.1 * jnp.abs(jax.random.normal(kv, (cout,), jnp.float32))
    scale = gamma / jnp.sqrt(run_var + BN_EPS)
    bias = (conv_b - run_mean) * scale + beta
    return w, scale, bias


def reference_forward(x_nchw, params):
    """Pure-XLA reference with the same bf16-operand / f32-accumulate numerics."""
    x = jnp.transpose(x_nchw, (0, 2, 3, 1)).astype(jnp.float32)
    for (w, scale, bias) in params:
        y = lax.conv_general_dilated(
            x.astype(jnp.bfloat16), w.astype(jnp.bfloat16),
            window_strides=(1, 1), padding=((1, 1), (1, 1)),
            dimension_numbers=("NHWC", "HWIO", "NHWC"),
            preferred_element_type=jnp.float32)
        y = y * scale + bias
        x = jnp.where(y >= 0, y, NEG_SLOPE * y)
    pooled = jnp.mean(x, axis=(1, 2))
    return jax.nn.softmax(pooled, axis=-1)


if __name__ == "__main__":
    B, C_IN, H, W = 2, 4, 16, 16
    MID = 64

    key = jax.random.PRNGKey(0)
    k_in, k1, k2, k3, k4 = jax.random.split(key, 5)
    x = jax.random.normal(k_in, (B, C_IN, H, W), jnp.float32)

    chans = [(C_IN, MID), (MID, MID), (MID, MID), (MID, 2)]
    params = [init_block_params(k, ci, co)
              for k, (ci, co) in zip((k1, k2, k3, k4), chans)]

    out = jax.block_until_ready(jax.jit(discriminator_forward)(x, params))
    ref = jax.block_until_ready(reference_forward(x, params))

    assert out.shape == (B, 2)
    assert jnp.allclose(jnp.sum(out, axis=1), jnp.ones((B,)), atol=1e-5)
    assert jnp.allclose(out, ref, atol=2e-3, rtol=2e-3), (out, ref)
    print("KERNEL_OK")
</pallas_src>

<mosaic_0001>
module attributes {stable_mosaic.version = 11 : i64} {
  func.func @_discriminator_kernel(%arg0: i32, %arg1: memref<2x256x256xbf16, #tpu.memory_space<vmem>>, %arg2: memref<1x256x8xf32, #tpu.memory_space<vmem>>, %arg3: memref<3x3x8x64xbf16, #tpu.memory_space<vmem>>, %arg4: memref<1x64xf32, #tpu.memory_space<vmem>>, %arg5: memref<1x64xf32, #tpu.memory_space<vmem>>, %arg6: memref<3x3x64x64xbf16, #tpu.memory_space<vmem>>, %arg7: memref<1x64xf32, #tpu.memory_space<vmem>>, %arg8: memref<1x64xf32, #tpu.memory_space<vmem>>, %arg9: memref<3x3x64x64xbf16, #tpu.memory_space<vmem>>, %arg10: memref<1x64xf32, #tpu.memory_space<vmem>>, %arg11: memref<1x64xf32, #tpu.memory_space<vmem>>, %arg12: memref<3x3x64x128xbf16, #tpu.memory_space<vmem>>, %arg13: memref<1x128xf32, #tpu.memory_space<vmem>>, %arg14: memref<1x128xf32, #tpu.memory_space<vmem>>, %arg15: memref<1x1x128xf32, #tpu.memory_space<vmem>>) attributes {dimension_semantics = [#tpu.dimension_semantics<parallel>], iteration_bounds = array<i64: 2>, scalar_prefetch = 0 : i64, scratch_operands = 0 : i64, tpu.core_type = #tpu.core_type<tc>, window_params = [{pipeline_mode = #tpu.pipeline_mode<synchronous>, transform_indices = @transform_0, window_bounds = array<i64: 2, 256, 256>}, {transform_indices = @transform_1, window_bounds = array<i64: 1, 256, 8>}, {pipeline_mode = #tpu.pipeline_mode<synchronous>, transform_indices = @transform_2, window_bounds = array<i64: 3, 3, 8, 64>}, {pipeline_mode = #tpu.pipeline_mode<synchronous>, transform_indices = @transform_3, window_bounds = array<i64: 1, 64>}, {pipeline_mode = #tpu.pipeline_mode<synchronous>, transform_indices = @transform_4, window_bounds = array<i64: 1, 64>}, {pipeline_mode = #tpu.pipeline_mode<synchronous>, transform_indices = @transform_5, window_bounds = array<i64: 3, 3, 64, 64>}, {pipeline_mode = #tpu.pipeline_mode<synchronous>, transform_indices = @transform_6, window_bounds = array<i64: 1, 64>}, {pipeline_mode = #tpu.pipeline_mode<synchronous>, transform_indices = @transform_7, window_bounds = array<i64: 1, 64>}, {pipeline_mode = #tpu.pipeline_mode<synchronous>, transform_indices = @transform_8, window_bounds = array<i64: 3, 3, 64, 64>}, {pipeline_mode = #tpu.pipeline_mode<synchronous>, transform_indices = @transform_9, window_bounds = array<i64: 1, 64>}, {pipeline_mode = #tpu.pipeline_mode<synchronous>, transform_indices = @transform_10, window_bounds = array<i64: 1, 64>}, {pipeline_mode = #tpu.pipeline_mode<synchronous>, transform_indices = @transform_11, window_bounds = array<i64: 3, 3, 64, 128>}, {pipeline_mode = #tpu.pipeline_mode<synchronous>, transform_indices = @transform_12, window_bounds = array<i64: 1, 128>}, {pipeline_mode = #tpu.pipeline_mode<synchronous>, transform_indices = @transform_13, window_bounds = array<i64: 1, 128>}, {transform_indices = @transform_14, window_bounds = array<i64: 1, 1, 128>}]} {
    %c0 = arith.constant 0 : index
    %c0_0 = arith.constant 0 : index
    %c0_1 = arith.constant 0 : index
    %0 = vector.load %arg2[%c0, %c0_0, %c0_1] : memref<1x256x8xf32, #tpu.memory_space<vmem>>, vector<1x256x8xf32>
    %1 = vector.shape_cast %0 : vector<1x256x8xf32> to vector<256x8xf32>
    %2 = arith.truncf %1 : vector<256x8xf32> to vector<256x8xbf16>
    %c0_2 = arith.constant 0 : index
    %c0_3 = arith.constant 0 : index
    %c0_4 = arith.constant 0 : index
    %3 = vector.load %arg1[%c0_2, %c0_3, %c0_4] : memref<2x256x256xbf16, #tpu.memory_space<vmem>>, vector<1x256x256xbf16>
    %4 = vector.shape_cast %3 : vector<1x256x256xbf16> to vector<256x256xbf16>
    %cst = arith.constant dense<0.000000e+00> : vector<256x8xf32>
    %5 = tpu.matmul %4, %2, %cst {dimension_numbers = #tpu.dot_dimension_numbers<[1], [0], [0], [1], [0, 0, 1, 1], [], []>} : vector<256x256xbf16>, vector<256x8xbf16>, vector<256x8xf32> -> vector<256x8xf32>
    %6 = arith.truncf %5 : vector<256x8xf32> to vector<256x8xbf16>
    %c1 = arith.constant 1 : index
    %c0_5 = arith.constant 0 : index
    %c0_6 = arith.constant 0 : index
    %7 = vector.load %arg1[%c1, %c0_5, %c0_6] : memref<2x256x256xbf16, #tpu.memory_space<vmem>>, vector<1x256x256xbf16>
    %8 = vector.shape_cast %7 : vector<1x256x256xbf16> to vector<256x256xbf16>
    %cst_7 = arith.constant dense<0.000000e+00> : vector<256x8xf32>
    %9 = tpu.matmul %8, %2, %cst_7 {dimension_numbers = #tpu.dot_dimension_numbers<[1], [0], [0], [1], [0, 0, 1, 1], [], []>} : vector<256x256xbf16>, vector<256x8xbf16>, vector<256x8xf32> -> vector<256x8xf32>
    %10 = arith.truncf %9 : vector<256x8xf32> to vector<256x8xbf16>
    %cst_8 = arith.constant 0.000000e+00 : bf16
    %11 = vector.broadcast %cst_8 : bf16 to vector<16x8xbf16>
    %cst_9 = arith.constant 0.000000e+00 : f32
    %12 = vector.broadcast %cst_9 : f32 to vector<256x64xf32>
    %13 = vector.extract_strided_slice %6 {offsets = [0, 0], sizes = [240, 8], strides = [1, 1]} : vector<256x8xbf16> to vector<240x8xbf16>
    %14 = tpu.concatenate %11, %13 in 0 : vector<16x8xbf16>, vector<240x8xbf16> -> vector<256x8xbf16>
    %c0_10 = arith.constant 0 : index
    %c0_11 = arith.constant 0 : index
    %c0_12 = arith.constant 0 : index
    %c0_13 = arith.constant 0 : index
    %15 = vector.load %arg3[%c0_10, %c0_11, %c0_12, %c0_13] : memref<3x3x8x64xbf16, #tpu.memory_space<vmem>>, vector<1x1x8x64xbf16>
    %16 = vector.shape_cast %15 : vector<1x1x8x64xbf16> to vector<8x64xbf16>
    %cst_14 = arith.constant dense<0.000000e+00> : vector<256x64xf32>
    %17 = tpu.matmul %14, %16, %cst_14 {dimension_numbers = #tpu.dot_dimension_numbers<[1], [0], [0], [1], [0, 0, 1, 1], [], []>} : vector<256x8xbf16>, vector<8x64xbf16>, vector<256x64xf32> -> vector<256x64xf32>
    %18 = arith.addf %12, %17 : vector<256x64xf32>
    %19 = vector.extract_strided_slice %2 {offsets = [0, 0], sizes = [240, 8], strides = [1, 1]} : vector<256x8xbf16> to vector<240x8xbf16>
    %20 = tpu.concatenate %11, %19 in 0 : vector<16x8xbf16>, vector<240x8xbf16> -> vector<256x8xbf16>
    %c0_15 = arith.constant 0 : index
    %c1_16 = arith.constant 1 : index
    %c0_17 = arith.constant 0 : index
    %c0_18 = arith.constant 0 : index
    %21 = vector.load %arg3[%c0_15, %c1_16, %c0_17, %c0_18] : memref<3x3x8x64xbf16, #tpu.memory_space<vmem>>, vector<1x1x8x64xbf16>
    %22 = vector.shape_cast %21 : vector<1x1x8x64xbf16> to vector<8x64xbf16>
    %cst_19 = arith.constant dense<0.000000e+00> : vector<256x64xf32>
    %23 = tpu.matmul %20, %22, %cst_19 {dimension_numbers = #tpu.dot_dimension_numbers<[1], [0], [0], [1], [0, 0, 1, 1], [], []>} : vector<256x8xbf16>, vector<8x64xbf16>, vector<256x64xf32> -> vector<256x64xf32>
    %24 = arith.addf %18, %23 : vector<256x64xf32>
    %25 = vector.extract_strided_slice %10 {offsets = [0, 0], sizes = [240, 8], strides = [1, 1]} : vector<256x8xbf16> to vector<240x8xbf16>
    %26 = tpu.concatenate %11, %25 in 0 : vector<16x8xbf16>, vector<240x8xbf16> -> vector<256x8xbf16>
    %c0_20 = arith.constant 0 : index
    %c2 = arith.constant 2 : index
    %c0_21 = arith.constant 0 : index
    %c0_22 = arith.constant 0 : index
    %27 = vector.load %arg3[%c0_20, %c2, %c0_21, %c0_22] : memref<3x3x8x64xbf16, #tpu.memory_space<vmem>>, vector<1x1x8x64xbf16>
    %28 = vector.shape_cast %27 : vector<1x1x8x64xbf16> to vector<8x64xbf16>
    %cst_23 = arith.constant dense<0.000000e+00> : vector<256x64xf32>
    %29 = tpu.matmul %26, %28, %cst_23 {dimension_numbers = #tpu.dot_dimension_numbers<[1], [0], [0], [1], [0, 0, 1, 1], [], []>} : vector<256x8xbf16>, vector<8x64xbf16>, vector<256x64xf32> -> vector<256x64xf32>
    %30 = arith.addf %24, %29 : vector<256x64xf32>
    %c1_24 = arith.constant 1 : index
    %c0_25 = arith.constant 0 : index
    %c0_26 = arith.constant 0 : index
    %c0_27 = arith.constant 0 : index
    %31 = vector.load %arg3[%c1_24, %c0_25, %c0_26, %c0_27] : memref<3x3x8x64xbf16, #tpu.memory_space<vmem>>, vector<1x1x8x64xbf16>
    %32 = vector.shape_cast %31 : vector<1x1x8x64xbf16> to vector<8x64xbf16>
    %cst_28 = arith.constant dense<0.000000e+00> : vector<256x64xf32>
    %33 = tpu.matmul %6, %32, %cst_28 {dimension_numbers = #tpu.dot_dimension_numbers<[1], [0], [0], [1], [0, 0, 1, 1], [], []>} : vector<256x8xbf16>, vector<8x64xbf16>, vector<256x64xf32> -> vector<256x64xf32>
    %34 = arith.addf %30, %33 : vector<256x64xf32>
    %c1_29 = arith.constant 1 : index
    %c1_30 = arith.constant 1 : index
    %c0_31 = arith.constant 0 : index
    %c0_32 = arith.constant 0 : index
    %35 = vector.load %arg3[%c1_29, %c1_30, %c0_31, %c0_32] : memref<3x3x8x64xbf16, #tpu.memory_space<vmem>>, vector<1x1x8x64xbf16>
    %36 = vector.shape_cast %35 : vector<1x1x8x64xbf16> to vector<8x64xbf16>
    %cst_33 = arith.constant dense<0.000000e+00> : vector<256x64xf32>
    %37 = tpu.matmul %2, %36, %cst_33 {dimension_numbers = #tpu.dot_dimension_numbers<[1], [0], [0], [1], [0, 0, 1, 1], [], []>} : vector<256x8xbf16>, vector<8x64xbf16>, vector<256x64xf32> -> vector<256x64xf32>
    %38 = arith.addf %34, %37 : vector<256x64xf32>
    %c1_34 = arith.constant 1 : index
    %c2_35 = arith.constant 2 : index
    %c0_36 = arith.constant 0 : index
    %c0_37 = arith.constant 0 : index
    %39 = vector.load %arg3[%c1_34, %c2_35, %c0_36, %c0_37] : memref<3x3x8x64xbf16, #tpu.memory_space<vmem>>, vector<1x1x8x64xbf16>
    %40 = vector.shape_cast %39 : vector<1x1x8x64xbf16> to vector<8x64xbf16>
    %cst_38 = arith.constant dense<0.000000e+00> : vector<256x64xf32>
    %41 = tpu.matmul %10, %40, %cst_38 {dimension_numbers = #tpu.dot_dimension_numbers<[1], [0], [0], [1], [0, 0, 1, 1], [], []>} : vector<256x8xbf16>, vector<8x64xbf16>, vector<256x64xf32> -> vector<256x64xf32>
    %42 = arith.addf %38, %41 : vector<256x64xf32>
    %43 = vector.extract_strided_slice %6 {offsets = [16, 0], sizes = [240, 8], strides = [1, 1]} : vector<256x8xbf16> to vector<240x8xbf16>
    %44 = tpu.concatenate %43, %11 in 0 : vector<240x8xbf16>, vector<16x8xbf16> -> vector<256x8xbf16>
    %c2_39 = arith.constant 2 : index
    %c0_40 = arith.constant 0 : index
    %c0_41 = arith.constant 0 : index
    %c0_42 = arith.constant 0 : index
    %45 = vector.load %arg3[%c2_39, %c0_40, %c0_41, %c0_42] : memref<3x3x8x64xbf16, #tpu.memory_space<vmem>>, vector<1x1x8x64xbf16>
    %46 = vector.shape_cast %45 : vector<1x1x8x64xbf16> to vector<8x64xbf16>
    %cst_43 = arith.constant dense<0.000000e+00> : vector<256x64xf32>
    %47 = tpu.matmul %44, %46, %cst_43 {dimension_numbers = #tpu.dot_dimension_numbers<[1], [0], [0], [1], [0, 0, 1, 1], [], []>} : vector<256x8xbf16>, vector<8x64xbf16>, vector<256x64xf32> -> vector<256x64xf32>
    %48 = arith.addf %42, %47 : vector<256x64xf32>
    %49 = vector.extract_strided_slice %2 {offsets = [16, 0], sizes = [240, 8], strides = [1, 1]} : vector<256x8xbf16> to vector<240x8xbf16>
    %50 = tpu.concatenate %49, %11 in 0 : vector<240x8xbf16>, vector<16x8xbf16> -> vector<256x8xbf16>
    %c2_44 = arith.constant 2 : index
    %c1_45 = arith.constant 1 : index
    %c0_46 = arith.constant 0 : index
    %c0_47 = arith.constant 0 : index
    %51 = vector.load %arg3[%c2_44, %c1_45, %c0_46, %c0_47] : memref<3x3x8x64xbf16, #tpu.memory_space<vmem>>, vector<1x1x8x64xbf16>
    %52 = vector.shape_cast %51 : vector<1x1x8x64xbf16> to vector<8x64xbf16>
    %cst_48 = arith.constant dense<0.000000e+00> : vector<256x64xf32>
    %53 = tpu.matmul %50, %52, %cst_48 {dimension_numbers = #tpu.dot_dimension_numbers<[1], [0], [0], [1], [0, 0, 1, 1], [], []>} : vector<256x8xbf16>, vector<8x64xbf16>, vector<256x64xf32> -> vector<256x64xf32>
    %54 = arith.addf %48, %53 : vector<256x64xf32>
    %55 = vector.extract_strided_slice %10 {offsets = [16, 0], sizes = [240, 8], strides = [1, 1]} : vector<256x8xbf16> to vector<240x8xbf16>
    %56 = tpu.concatenate %55, %11 in 0 : vector<240x8xbf16>, vector<16x8xbf16> -> vector<256x8xbf16>
    %c2_49 = arith.constant 2 : index
    %c2_50 = arith.constant 2 : index
    %c0_51 = arith.constant 0 : index
    %c0_52 = arith.constant 0 : index
    %57 = vector.load %arg3[%c2_49, %c2_50, %c0_51, %c0_52] : memref<3x3x8x64xbf16, #tpu.memory_space<vmem>>, vector<1x1x8x64xbf16>
    %58 = vector.shape_cast %57 : vector<1x1x8x64xbf16> to vector<8x64xbf16>
    %cst_53 = arith.constant dense<0.000000e+00> : vector<256x64xf32>
    %59 = tpu.matmul %56, %58, %cst_53 {dimension_numbers = #tpu.dot_dimension_numbers<[1], [0], [0], [1], [0, 0, 1, 1], [], []>} : vector<256x8xbf16>, vector<8x64xbf16>, vector<256x64xf32> -> vector<256x64xf32>
    %60 = arith.addf %54, %59 : vector<256x64xf32>
    %c0_54 = arith.constant 0 : index
    %c0_55 = arith.constant 0 : index
    %61 = vector.load %arg4[%c0_54, %c0_55] : memref<1x64xf32, #tpu.memory_space<vmem>>, vector<1x64xf32>
    %62 = vector.broadcast %61 : vector<1x64xf32> to vector<256x64xf32>
    %63 = arith.mulf %60, %62 : vector<256x64xf32>
    %c0_56 = arith.constant 0 : index
    %c0_57 = arith.constant 0 : index
    %64 = vector.load %arg5[%c0_56, %c0_57] : memref<1x64xf32, #tpu.memory_space<vmem>>, vector<1x64xf32>
    %65 = vector.broadcast %64 : vector<1x64xf32> to vector<256x64xf32>
    %66 = arith.addf %63, %65 : vector<256x64xf32>
    %cst_58 = arith.constant 0.000000e+00 : f32
    %67 = vector.broadcast %cst_58 : f32 to vector<256x64xf32>
    %68 = arith.cmpf oge, %66, %67 : vector<256x64xf32>
    %cst_59 = arith.constant 0.00999999977 : f32
    %69 = vector.broadcast %cst_59 : f32 to vector<256x64xf32>
    %70 = arith.mulf %69, %66 : vector<256x64xf32>
    %71 = arith.select %68, %66, %70 : vector<256x64xi1>, vector<256x64xf32>
    %72 = arith.truncf %71 : vector<256x64xf32> to vector<256x64xbf16>
    %c0_60 = arith.constant 0 : index
    %c0_61 = arith.constant 0 : index
    %c0_62 = arith.constant 0 : index
    %73 = vector.load %arg1[%c0_60, %c0_61, %c0_62] : memref<2x256x256xbf16, #tpu.memory_space<vmem>>, vector<1x256x256xbf16>
    %74 = vector.shape_cast %73 : vector<1x256x256xbf16> to vector<256x256xbf16>
    %cst_63 = arith.constant dense<0.000000e+00> : vector<256x64xf32>
    %75 = tpu.matmul %74, %72, %cst_63 {dimension_numbers = #tpu.dot_dimension_numbers<[1], [0], [0], [1], [0, 0, 1, 1], [], []>} : vector<256x256xbf16>, vector<256x64xbf16>, vector<256x64xf32> -> vector<256x64xf32>
    %76 = arith.truncf %75 : vector<256x64xf32> to vector<256x64xbf16>
    %c1_64 = arith.constant 1 : index
    %c0_65 = arith.constant 0 : index
    %c0_66 = arith.constant 0 : index
    %77 = vector.load %arg1[%c1_64, %c0_65, %c0_66] : memref<2x256x256xbf16, #tpu.memory_space<vmem>>, vector<1x256x256xbf16>
    %78 = vector.shape_cast %77 : vector<1x256x256xbf16> to vector<256x256xbf16>
    %cst_67 = arith.constant dense<0.000000e+00> : vector<256x64xf32>
    %79 = tpu.matmul %78, %72, %cst_67 {dimension_numbers = #tpu.dot_dimension_numbers<[1], [0], [0], [1], [0, 0, 1, 1], [], []>} : vector<256x256xbf16>, vector<256x64xbf16>, vector<256x64xf32> -> vector<256x64xf32>
    %80 = arith.truncf %79 : vector<256x64xf32> to vector<256x64xbf16>
    %cst_68 = arith.constant 0.000000e+00 : bf16
    %81 = vector.broadcast %cst_68 : bf16 to vector<16x64xbf16>
    %cst_69 = arith.constant 0.000000e+00 : f32
    %82 = vector.broadcast %cst_69 : f32 to vector<256x64xf32>
    %83 = vector.extract_strided_slice %76 {offsets = [0, 0], sizes = [240, 64], strides = [1, 1]} : vector<256x64xbf16> to vector<240x64xbf16>
    %84 = tpu.concatenate %81, %83 in 0 : vector<16x64xbf16>, vector<240x64xbf16> -> vector<256x64xbf16>
    %c0_70 = arith.constant 0 : index
    %c0_71 = arith.constant 0 : index
    %c0_72 = arith.constant 0 : index
    %c0_73 = arith.constant 0 : index
    %85 = vector.load %arg6[%c0_70, %c0_71, %c0_72, %c0_73] : memref<3x3x64x64xbf16, #tpu.memory_space<vmem>>, vector<1x1x64x64xbf16>
    %86 = vector.shape_cast %85 : vector<1x1x64x64xbf16> to vector<64x64xbf16>
    %cst_74 = arith.constant dense<0.000000e+00> : vector<256x64xf32>
    %87 = tpu.matmul %84, %86, %cst_74 {dimension_numbers = #tpu.dot_dimension_numbers<[1], [0], [0], [1], [0, 0, 1, 1], [], []>} : vector<256x64xbf16>, vector<64x64xbf16>, vector<256x64xf32> -> vector<256x64xf32>
    %88 = arith.addf %82, %87 : vector<256x64xf32>
    %89 = vector.extract_strided_slice %72 {offsets = [0, 0], sizes = [240, 64], strides = [1, 1]} : vector<256x64xbf16> to vector<240x64xbf16>
    %90 = tpu.concatenate %81, %89 in 0 : vector<16x64xbf16>, vector<240x64xbf16> -> vector<256x64xbf16>
    %c0_75 = arith.constant 0 : index
    %c1_76 = arith.constant 1 : index
    %c0_77 = arith.constant 0 : index
    %c0_78 = arith.constant 0 : index
    %91 = vector.load %arg6[%c0_75, %c1_76, %c0_77, %c0_78] : memref<3x3x64x64xbf16, #tpu.memory_space<vmem>>, vector<1x1x64x64xbf16>
    %92 = vector.shape_cast %91 : vector<1x1x64x64xbf16> to vector<64x64xbf16>
    %cst_79 = arith.constant dense<0.000000e+00> : vector<256x64xf32>
    %93 = tpu.matmul %90, %92, %cst_79 {dimension_numbers = #tpu.dot_dimension_numbers<[1], [0], [0], [1], [0, 0, 1, 1], [], []>} : vector<256x64xbf16>, vector<64x64xbf16>, vector<256x64xf32> -> vector<256x64xf32>
    %94 = arith.addf %88, %93 : vector<256x64xf32>
    %95 = vector.extract_strided_slice %80 {offsets = [0, 0], sizes = [240, 64], strides = [1, 1]} : vector<256x64xbf16> to vector<240x64xbf16>
    %96 = tpu.concatenate %81, %95 in 0 : vector<16x64xbf16>, vector<240x64xbf16> -> vector<256x64xbf16>
    %c0_80 = arith.constant 0 : index
    %c2_81 = arith.constant 2 : index
    %c0_82 = arith.constant 0 : index
    %c0_83 = arith.constant 0 : index
    %97 = vector.load %arg6[%c0_80, %c2_81, %c0_82, %c0_83] : memref<3x3x64x64xbf16, #tpu.memory_space<vmem>>, vector<1x1x64x64xbf16>
    %98 = vector.shape_cast %97 : vector<1x1x64x64xbf16> to vector<64x64xbf16>
    %cst_84 = arith.constant dense<0.000000e+00> : vector<256x64xf32>
    %99 = tpu.matmul %96, %98, %cst_84 {dimension_numbers = #tpu.dot_dimension_numbers<[1], [0], [0], [1], [0, 0, 1, 1], [], []>} : vector<256x64xbf16>, vector<64x64xbf16>, vector<256x64xf32> -> vector<256x64xf32>
    %100 = arith.addf %94, %99 : vector<256x64xf32>
    %c1_85 = arith.constant 1 : index
    %c0_86 = arith.constant 0 : index
    %c0_87 = arith.constant 0 : index
    %c0_88 = arith.constant 0 : index
    %101 = vector.load %arg6[%c1_85, %c0_86, %c0_87, %c0_88] : memref<3x3x64x64xbf16, #tpu.memory_space<vmem>>, vector<1x1x64x64xbf16>
    %102 = vector.shape_cast %101 : vector<1x1x64x64xbf16> to vector<64x64xbf16>
    %cst_89 = arith.constant dense<0.000000e+00> : vector<256x64xf32>
    %103 = tpu.matmul %76, %102, %cst_89 {dimension_numbers = #tpu.dot_dimension_numbers<[1], [0], [0], [1], [0, 0, 1, 1], [], []>} : vector<256x64xbf16>, vector<64x64xbf16>, vector<256x64xf32> -> vector<256x64xf32>
    %104 = arith.addf %100, %103 : vector<256x64xf32>
    %c1_90 = arith.constant 1 : index
    %c1_91 = arith.constant 1 : index
    %c0_92 = arith.constant 0 : index
    %c0_93 = arith.constant 0 : index
    %105 = vector.load %arg6[%c1_90, %c1_91, %c0_92, %c0_93] : memref<3x3x64x64xbf16, #tpu.memory_space<vmem>>, vector<1x1x64x64xbf16>
    %106 = vector.shape_cast %105 : vector<1x1x64x64xbf16> to vector<64x64xbf16>
    %cst_94 = arith.constant dense<0.000000e+00> : vector<256x64xf32>
    %107 = tpu.matmul %72, %106, %cst_94 {dimension_numbers = #tpu.dot_dimension_numbers<[1], [0], [0], [1], [0, 0, 1, 1], [], []>} : vector<256x64xbf16>, vector<64x64xbf16>, vector<256x64xf32> -> vector<256x64xf32>
    %108 = arith.addf %104, %107 : vector<256x64xf32>
    %c1_95 = arith.constant 1 : index
    %c2_96 = arith.constant 2 : index
    %c0_97 = arith.constant 0 : index
    %c0_98 = arith.constant 0 : index
    %109 = vector.load %arg6[%c1_95, %c2_96, %c0_97, %c0_98] : memref<3x3x64x64xbf16, #tpu.memory_space<vmem>>, vector<1x1x64x64xbf16>
    %110 = vector.shape_cast %109 : vector<1x1x64x64xbf16> to vector<64x64xbf16>
    %cst_99 = arith.constant dense<0.000000e+00> : vector<256x64xf32>
    %111 = tpu.matmul %80, %110, %cst_99 {dimension_numbers = #tpu.dot_dimension_numbers<[1], [0], [0], [1], [0, 0, 1, 1], [], []>} : vector<256x64xbf16>, vector<64x64xbf16>, vector<256x64xf32> -> vector<256x64xf32>
    %112 = arith.addf %108, %111 : vector<256x64xf32>
    %113 = vector.extract_strided_slice %76 {offsets = [16, 0], sizes = [240, 64], strides = [1, 1]} : vector<256x64xbf16> to vector<240x64xbf16>
    %114 = tpu.concatenate %113, %81 in 0 : vector<240x64xbf16>, vector<16x64xbf16> -> vector<256x64xbf16>
    %c2_100 = arith.constant 2 : index
    %c0_101 = arith.constant 0 : index
    %c0_102 = arith.constant 0 : index
    %c0_103 = arith.constant 0 : index
    %115 = vector.load %arg6[%c2_100, %c0_101, %c0_102, %c0_103] : memref<3x3x64x64xbf16, #tpu.memory_space<vmem>>, vector<1x1x64x64xbf16>
    %116 = vector.shape_cast %115 : vector<1x1x64x64xbf16> to vector<64x64xbf16>
    %cst_104 = arith.constant dense<0.000000e+00> : vector<256x64xf32>
    %117 = tpu.matmul %114, %116, %cst_104 {dimension_numbers = #tpu.dot_dimension_numbers<[1], [0], [0], [1], [0, 0, 1, 1], [], []>} : vector<256x64xbf16>, vector<64x64xbf16>, vector<256x64xf32> -> vector<256x64xf32>
    %118 = arith.addf %112, %117 : vector<256x64xf32>
    %119 = vector.extract_strided_slice %72 {offsets = [16, 0], sizes = [240, 64], strides = [1, 1]} : vector<256x64xbf16> to vector<240x64xbf16>
    %120 = tpu.concatenate %119, %81 in 0 : vector<240x64xbf16>, vector<16x64xbf16> -> vector<256x64xbf16>
    %c2_105 = arith.constant 2 : index
    %c1_106 = arith.constant 1 : index
    %c0_107 = arith.constant 0 : index
    %c0_108 = arith.constant 0 : index
    %121 = vector.load %arg6[%c2_105, %c1_106, %c0_107, %c0_108] : memref<3x3x64x64xbf16, #tpu.memory_space<vmem>>, vector<1x1x64x64xbf16>
    %122 = vector.shape_cast %121 : vector<1x1x64x64xbf16> to vector<64x64xbf16>
    %cst_109 = arith.constant dense<0.000000e+00> : vector<256x64xf32>
    %123 = tpu.matmul %120, %122, %cst_109 {dimension_numbers = #tpu.dot_dimension_numbers<[1], [0], [0], [1], [0, 0, 1, 1], [], []>} : vector<256x64xbf16>, vector<64x64xbf16>, vector<256x64xf32> -> vector<256x64xf32>
    %124 = arith.addf %118, %123 : vector<256x64xf32>
    %125 = vector.extract_strided_slice %80 {offsets = [16, 0], sizes = [240, 64], strides = [1, 1]} : vector<256x64xbf16> to vector<240x64xbf16>
    %126 = tpu.concatenate %125, %81 in 0 : vector<240x64xbf16>, vector<16x64xbf16> -> vector<256x64xbf16>
    %c2_110 = arith.constant 2 : index
    %c2_111 = arith.constant 2 : index
    %c0_112 = arith.constant 0 : index
    %c0_113 = arith.constant 0 : index
    %127 = vector.load %arg6[%c2_110, %c2_111, %c0_112, %c0_113] : memref<3x3x64x64xbf16, #tpu.memory_space<vmem>>, vector<1x1x64x64xbf16>
    %128 = vector.shape_cast %127 : vector<1x1x64x64xbf16> to vector<64x64xbf16>
    %cst_114 = arith.constant dense<0.000000e+00> : vector<256x64xf32>
    %129 = tpu.matmul %126, %128, %cst_114 {dimension_numbers = #tpu.dot_dimension_numbers<[1], [0], [0], [1], [0, 0, 1, 1], [], []>} : vector<256x64xbf16>, vector<64x64xbf16>, vector<256x64xf32> -> vector<256x64xf32>
    %130 = arith.addf %124, %129 : vector<256x64xf32>
    %c0_115 = arith.constant 0 : index
    %c0_116 = arith.constant 0 : index
    %131 = vector.load %arg7[%c0_115, %c0_116] : memref<1x64xf32, #tpu.memory_space<vmem>>, vector<1x64xf32>
    %132 = vector.broadcast %131 : vector<1x64xf32> to vector<256x64xf32>
    %133 = arith.mulf %130, %132 : vector<256x64xf32>
    %c0_117 = arith.constant 0 : index
    %c0_118 = arith.constant 0 : index
    %134 = vector.load %arg8[%c0_117, %c0_118] : memref<1x64xf32, #tpu.memory_space<vmem>>, vector<1x64xf32>
    %135 = vector.broadcast %134 : vector<1x64xf32> to vector<256x64xf32>
    %136 = arith.addf %133, %135 : vector<256x64xf32>
    %cst_119 = arith.constant 0.000000e+00 : f32
    %137 = vector.broadcast %cst_119 : f32 to vector<256x64xf32>
    %138 = arith.cmpf oge, %136, %137 : vector<256x64xf32>
    %cst_120 = arith.constant 0.00999999977 : f32
    %139 = vector.broadcast %cst_120 : f32 to vector<256x64xf32>
    %140 = arith.mulf %139, %136 : vector<256x64xf32>
    %141 = arith.select %138, %136, %140 : vector<256x64xi1>, vector<256x64xf32>
    %142 = arith.truncf %141 : vector<256x64xf32> to vector<256x64xbf16>
    %c0_121 = arith.constant 0 : index
    %c0_122 = arith.constant 0 : index
    %c0_123 = arith.constant 0 : index
    %143 = vector.load %arg1[%c0_121, %c0_122, %c0_123] : memref<2x256x256xbf16, #tpu.memory_space<vmem>>, vector<1x256x256xbf16>
    %144 = vector.shape_cast %143 : vector<1x256x256xbf16> to vector<256x256xbf16>
    %cst_124 = arith.constant dense<0.000000e+00> : vector<256x64xf32>
    %145 = tpu.matmul %144, %142, %cst_124 {dimension_numbers = #tpu.dot_dimension_numbers<[1], [0], [0], [1], [0, 0, 1, 1], [], []>} : vector<256x256xbf16>, vector<256x64xbf16>, vector<256x64xf32> -> vector<256x64xf32>
    %146 = arith.truncf %145 : vector<256x64xf32> to vector<256x64xbf16>
    %c1_125 = arith.constant 1 : index
    %c0_126 = arith.constant 0 : index
    %c0_127 = arith.constant 0 : index
    %147 = vector.load %arg1[%c1_125, %c0_126, %c0_127] : memref<2x256x256xbf16, #tpu.memory_space<vmem>>, vector<1x256x256xbf16>
    %148 = vector.shape_cast %147 : vector<1x256x256xbf16> to vector<256x256xbf16>
    %cst_128 = arith.constant dense<0.000000e+00> : vector<256x64xf32>
    %149 = tpu.matmul %148, %142, %cst_128 {dimension_numbers = #tpu.dot_dimension_numbers<[1], [0], [0], [1], [0, 0, 1, 1], [], []>} : vector<256x256xbf16>, vector<256x64xbf16>, vector<256x64xf32> -> vector<256x64xf32>
    %150 = arith.truncf %149 : vector<256x64xf32> to vector<256x64xbf16>
    %cst_129 = arith.constant 0.000000e+00 : bf16
    %151 = vector.broadcast %cst_129 : bf16 to vector<16x64xbf16>
    %cst_130 = arith.constant 0.000000e+00 : f32
    %152 = vector.broadcast %cst_130 : f32 to vector<256x64xf32>
    %153 = vector.extract_strided_slice %146 {offsets = [0, 0], sizes = [240, 64], strides = [1, 1]} : vector<256x64xbf16> to vector<240x64xbf16>
    %154 = tpu.concatenate %151, %153 in 0 : vector<16x64xbf16>, vector<240x64xbf16> -> vector<256x64xbf16>
    %c0_131 = arith.constant 0 : index
    %c0_132 = arith.constant 0 : index
    %c0_133 = arith.constant 0 : index
    %c0_134 = arith.constant 0 : index
    %155 = vector.load %arg9[%c0_131, %c0_132, %c0_133, %c0_134] : memref<3x3x64x64xbf16, #tpu.memory_space<vmem>>, vector<1x1x64x64xbf16>
    %156 = vector.shape_cast %155 : vector<1x1x64x64xbf16> to vector<64x64xbf16>
    %cst_135 = arith.constant dense<0.000000e+00> : vector<256x64xf32>
    %157 = tpu.matmul %154, %156, %cst_135 {dimension_numbers = #tpu.dot_dimension_numbers<[1], [0], [0], [1], [0, 0, 1, 1], [], []>} : vector<256x64xbf16>, vector<64x64xbf16>, vector<256x64xf32> -> vector<256x64xf32>
    %158 = arith.addf %152, %157 : vector<256x64xf32>
    %159 = vector.extract_strided_slice %142 {offsets = [0, 0], sizes = [240, 64], strides = [1, 1]} : vector<256x64xbf16> to vector<240x64xbf16>
    %160 = tpu.concatenate %151, %159 in 0 : vector<16x64xbf16>, vector<240x64xbf16> -> vector<256x64xbf16>
    %c0_136 = arith.constant 0 : index
    %c1_137 = arith.constant 1 : index
    %c0_138 = arith.constant 0 : index
    %c0_139 = arith.constant 0 : index
    %161 = vector.load %arg9[%c0_136, %c1_137, %c0_138, %c0_139] : memref<3x3x64x64xbf16, #tpu.memory_space<vmem>>, vector<1x1x64x64xbf16>
    %162 = vector.shape_cast %161 : vector<1x1x64x64xbf16> to vector<64x64xbf16>
    %cst_140 = arith.constant dense<0.000000e+00> : vector<256x64xf32>
    %163 = tpu.matmul %160, %162, %cst_140 {dimension_numbers = #tpu.dot_dimension_numbers<[1], [0], [0], [1], [0, 0, 1, 1], [], []>} : vector<256x64xbf16>, vector<64x64xbf16>, vector<256x64xf32> -> vector<256x64xf32>
    %164 = arith.addf %158, %163 : vector<256x64xf32>
    %165 = vector.extract_strided_slice %150 {offsets = [0, 0], sizes = [240, 64], strides = [1, 1]} : vector<256x64xbf16> to vector<240x64xbf16>
    %166 = tpu.concatenate %151, %165 in 0 : vector<16x64xbf16>, vector<240x64xbf16> -> vector<256x64xbf16>
    %c0_141 = arith.constant 0 : index
    %c2_142 = arith.constant 2 : index
    %c0_143 = arith.constant 0 : index
    %c0_144 = arith.constant 0 : index
    %167 = vector.load %arg9[%c0_141, %c2_142, %c0_143, %c0_144] : memref<3x3x64x64xbf16, #tpu.memory_space<vmem>>, vector<1x1x64x64xbf16>
    %168 = vector.shape_cast %167 : vector<1x1x64x64xbf16> to vector<64x64xbf16>
    %cst_145 = arith.constant dense<0.000000e+00> : vector<256x64xf32>
    %169 = tpu.matmul %166, %168, %cst_145 {dimension_numbers = #tpu.dot_dimension_numbers<[1], [0], [0], [1], [0, 0, 1, 1], [], []>} : vector<256x64xbf16>, vector<64x64xbf16>, vector<256x64xf32> -> vector<256x64xf32>
    %170 = arith.addf %164, %169 : vector<256x64xf32>
    %c1_146 = arith.constant 1 : index
    %c0_147 = arith.constant 0 : index
    %c0_148 = arith.constant 0 : index
    %c0_149 = arith.constant 0 : index
    %171 = vector.load %arg9[%c1_146, %c0_147, %c0_148, %c0_149] : memref<3x3x64x64xbf16, #tpu.memory_space<vmem>>, vector<1x1x64x64xbf16>
    %172 = vector.shape_cast %171 : vector<1x1x64x64xbf16> to vector<64x64xbf16>
    %cst_150 = arith.constant dense<0.000000e+00> : vector<256x64xf32>
    %173 = tpu.matmul %146, %172, %cst_150 {dimension_numbers = #tpu.dot_dimension_numbers<[1], [0], [0], [1], [0, 0, 1, 1], [], []>} : vector<256x64xbf16>, vector<64x64xbf16>, vector<256x64xf32> -> vector<256x64xf32>
    %174 = arith.addf %170, %173 : vector<256x64xf32>
    %c1_151 = arith.constant 1 : index
    %c1_152 = arith.constant 1 : index
    %c0_153 = arith.constant 0 : index
    %c0_154 = arith.constant 0 : index
    %175 = vector.load %arg9[%c1_151, %c1_152, %c0_153, %c0_154] : memref<3x3x64x64xbf16, #tpu.memory_space<vmem>>, vector<1x1x64x64xbf16>
    %176 = vector.shape_cast %175 : vector<1x1x64x64xbf16> to vector<64x64xbf16>
    %cst_155 = arith.constant dense<0.000000e+00> : vector<256x64xf32>
    %177 = tpu.matmul %142, %176, %cst_155 {dimension_numbers = #tpu.dot_dimension_numbers<[1], [0], [0], [1], [0, 0, 1, 1], [], []>} : vector<256x64xbf16>, vector<64x64xbf16>, vector<256x64xf32> -> vector<256x64xf32>
    %178 = arith.addf %174, %177 : vector<256x64xf32>
    %c1_156 = arith.constant 1 : index
    %c2_157 = arith.constant 2 : index
    %c0_158 = arith.constant 0 : index
    %c0_159 = arith.constant 0 : index
    %179 = vector.load %arg9[%c1_156, %c2_157, %c0_158, %c0_159] : memref<3x3x64x64xbf16, #tpu.memory_space<vmem>>, vector<1x1x64x64xbf16>
    %180 = vector.shape_cast %179 : vector<1x1x64x64xbf16> to vector<64x64xbf16>
    %cst_160 = arith.constant dense<0.000000e+00> : vector<256x64xf32>
    %181 = tpu.matmul %150, %180, %cst_160 {dimension_numbers = #tpu.dot_dimension_numbers<[1], [0], [0], [1], [0, 0, 1, 1], [], []>} : vector<256x64xbf16>, vector<64x64xbf16>, vector<256x64xf32> -> vector<256x64xf32>
    %182 = arith.addf %178, %181 : vector<256x64xf32>
    %183 = vector.extract_strided_slice %146 {offsets = [16, 0], sizes = [240, 64], strides = [1, 1]} : vector<256x64xbf16> to vector<240x64xbf16>
    %184 = tpu.concatenate %183, %151 in 0 : vector<240x64xbf16>, vector<16x64xbf16> -> vector<256x64xbf16>
    %c2_161 = arith.constant 2 : index
    %c0_162 = arith.constant 0 : index
    %c0_163 = arith.constant 0 : index
    %c0_164 = arith.constant 0 : index
    %185 = vector.load %arg9[%c2_161, %c0_162, %c0_163, %c0_164] : memref<3x3x64x64xbf16, #tpu.memory_space<vmem>>, vector<1x1x64x64xbf16>
    %186 = vector.shape_cast %185 : vector<1x1x64x64xbf16> to vector<64x64xbf16>
    %cst_165 = arith.constant dense<0.000000e+00> : vector<256x64xf32>
    %187 = tpu.matmul %184, %186, %cst_165 {dimension_numbers = #tpu.dot_dimension_numbers<[1], [0], [0], [1], [0, 0, 1, 1], [], []>} : vector<256x64xbf16>, vector<64x64xbf16>, vector<256x64xf32> -> vector<256x64xf32>
    %188 = arith.addf %182, %187 : vector<256x64xf32>
    %189 = vector.extract_strided_slice %142 {offsets = [16, 0], sizes = [240, 64], strides = [1, 1]} : vector<256x64xbf16> to vector<240x64xbf16>
    %190 = tpu.concatenate %189, %151 in 0 : vector<240x64xbf16>, vector<16x64xbf16> -> vector<256x64xbf16>
    %c2_166 = arith.constant 2 : index
    %c1_167 = arith.constant 1 : index
    %c0_168 = arith.constant 0 : index
    %c0_169 = arith.constant 0 : index
    %191 = vector.load %arg9[%c2_166, %c1_167, %c0_168, %c0_169] : memref<3x3x64x64xbf16, #tpu.memory_space<vmem>>, vector<1x1x64x64xbf16>
    %192 = vector.shape_cast %191 : vector<1x1x64x64xbf16> to vector<64x64xbf16>
    %cst_170 = arith.constant dense<0.000000e+00> : vector<256x64xf32>
    %193 = tpu.matmul %190, %192, %cst_170 {dimension_numbers = #tpu.dot_dimension_numbers<[1], [0], [0], [1], [0, 0, 1, 1], [], []>} : vector<256x64xbf16>, vector<64x64xbf16>, vector<256x64xf32> -> vector<256x64xf32>
    %194 = arith.addf %188, %193 : vector<256x64xf32>
    %195 = vector.extract_strided_slice %150 {offsets = [16, 0], sizes = [240, 64], strides = [1, 1]} : vector<256x64xbf16> to vector<240x64xbf16>
    %196 = tpu.concatenate %195, %151 in 0 : vector<240x64xbf16>, vector<16x64xbf16> -> vector<256x64xbf16>
    %c2_171 = arith.constant 2 : index
    %c2_172 = arith.constant 2 : index
    %c0_173 = arith.constant 0 : index
    %c0_174 = arith.constant 0 : index
    %197 = vector.load %arg9[%c2_171, %c2_172, %c0_173, %c0_174] : memref<3x3x64x64xbf16, #tpu.memory_space<vmem>>, vector<1x1x64x64xbf16>
    %198 = vector.shape_cast %197 : vector<1x1x64x64xbf16> to vector<64x64xbf16>
    %cst_175 = arith.constant dense<0.000000e+00> : vector<256x64xf32>
    %199 = tpu.matmul %196, %198, %cst_175 {dimension_numbers = #tpu.dot_dimension_numbers<[1], [0], [0], [1], [0, 0, 1, 1], [], []>} : vector<256x64xbf16>, vector<64x64xbf16>, vector<256x64xf32> -> vector<256x64xf32>
    %200 = arith.addf %194, %199 : vector<256x64xf32>
    %c0_176 = arith.constant 0 : index
    %c0_177 = arith.constant 0 : index
    %201 = vector.load %arg10[%c0_176, %c0_177] : memref<1x64xf32, #tpu.memory_space<vmem>>, vector<1x64xf32>
    %202 = vector.broadcast %201 : vector<1x64xf32> to vector<256x64xf32>
    %203 = arith.mulf %200, %202 : vector<256x64xf32>
    %c0_178 = arith.constant 0 : index
    %c0_179 = arith.constant 0 : index
    %204 = vector.load %arg11[%c0_178, %c0_179] : memref<1x64xf32, #tpu.memory_space<vmem>>, vector<1x64xf32>
    %205 = vector.broadcast %204 : vector<1x64xf32> to vector<256x64xf32>
    %206 = arith.addf %203, %205 : vector<256x64xf32>
    %cst_180 = arith.constant 0.000000e+00 : f32
    %207 = vector.broadcast %cst_180 : f32 to vector<256x64xf32>
    %208 = arith.cmpf oge, %206, %207 : vector<256x64xf32>
    %cst_181 = arith.constant 0.00999999977 : f32
    %209 = vector.broadcast %cst_181 : f32 to vector<256x64xf32>
    %210 = arith.mulf %209, %206 : vector<256x64xf32>
    %211 = arith.select %208, %206, %210 : vector<256x64xi1>, vector<256x64xf32>
    %212 = arith.truncf %211 : vector<256x64xf32> to vector<256x64xbf16>
    %c0_182 = arith.constant 0 : index
    %c0_183 = arith.constant 0 : index
    %c0_184 = arith.constant 0 : index
    %213 = vector.load %arg1[%c0_182, %c0_183, %c0_184] : memref<2x256x256xbf16, #tpu.memory_space<vmem>>, vector<1x256x256xbf16>
    %214 = vector.shape_cast %213 : vector<1x256x256xbf16> to vector<256x256xbf16>
    %cst_185 = arith.constant dense<0.000000e+00> : vector<256x64xf32>
    %215 = tpu.matmul %214, %212, %cst_185 {dimension_numbers = #tpu.dot_dimension_numbers<[1], [0], [0], [1], [0, 0, 1, 1], [], []>} : vector<256x256xbf16>, vector<256x64xbf16>, vector<256x64xf32> -> vector<256x64xf32>
    %216 = arith.truncf %215 : vector<256x64xf32> to vector<256x64xbf16>
    %c1_186 = arith.constant 1 : index
    %c0_187 = arith.constant 0 : index
    %c0_188 = arith.constant 0 : index
    %217 = vector.load %arg1[%c1_186, %c0_187, %c0_188] : memref<2x256x256xbf16, #tpu.memory_space<vmem>>, vector<1x256x256xbf16>
    %218 = vector.shape_cast %217 : vector<1x256x256xbf16> to vector<256x256xbf16>
    %cst_189 = arith.constant dense<0.000000e+00> : vector<256x64xf32>
    %219 = tpu.matmul %218, %212, %cst_189 {dimension_numbers = #tpu.dot_dimension_numbers<[1], [0], [0], [1], [0, 0, 1, 1], [], []>} : vector<256x256xbf16>, vector<256x64xbf16>, vector<256x64xf32> -> vector<256x64xf32>
    %220 = arith.truncf %219 : vector<256x64xf32> to vector<256x64xbf16>
    %cst_190 = arith.constant 0.000000e+00 : bf16
    %221 = vector.broadcast %cst_190 : bf16 to vector<16x64xbf16>
    %cst_191 = arith.constant 0.000000e+00 : f32
    %222 = vector.broadcast %cst_191 : f32 to vector<256x128xf32>
    %223 = vector.extract_strided_slice %216 {offsets = [0, 0], sizes = [240, 64], strides = [1, 1]} : vector<256x64xbf16> to vector<240x64xbf16>
    %224 = tpu.concatenate %221, %223 in 0 : vector<16x64xbf16>, vector<240x64xbf16> -> vector<256x64xbf16>
    %c0_192 = arith.constant 0 : index
    %c0_193 = arith.constant 0 : index
    %c0_194 = arith.constant 0 : index
    %c0_195 = arith.constant 0 : index
    %225 = vector.load %arg12[%c0_192, %c0_193, %c0_194, %c0_195] : memref<3x3x64x128xbf16, #tpu.memory_space<vmem>>, vector<1x1x64x128xbf16>
    %226 = vector.shape_cast %225 : vector<1x1x64x128xbf16> to vector<64x128xbf16>
    %cst_196 = arith.constant dense<0.000000e+00> : vector<256x128xf32>
    %227 = tpu.matmul %224, %226, %cst_196 {dimension_numbers = #tpu.dot_dimension_numbers<[1], [0], [0], [1], [0, 0, 1, 1], [], []>} : vector<256x64xbf16>, vector<64x128xbf16>, vector<256x128xf32> -> vector<256x128xf32>
    %228 = arith.addf %222, %227 : vector<256x128xf32>
    %229 = vector.extract_strided_slice %212 {offsets = [0, 0], sizes = [240, 64], strides = [1, 1]} : vector<256x64xbf16> to vector<240x64xbf16>
    %230 = tpu.concatenate %221, %229 in 0 : vector<16x64xbf16>, vector<240x64xbf16> -> vector<256x64xbf16>
    %c0_197 = arith.constant 0 : index
    %c1_198 = arith.constant 1 : index
    %c0_199 = arith.constant 0 : index
    %c0_200 = arith.constant 0 : index
    %231 = vector.load %arg12[%c0_197, %c1_198, %c0_199, %c0_200] : memref<3x3x64x128xbf16, #tpu.memory_space<vmem>>, vector<1x1x64x128xbf16>
    %232 = vector.shape_cast %231 : vector<1x1x64x128xbf16> to vector<64x128xbf16>
    %cst_201 = arith.constant dense<0.000000e+00> : vector<256x128xf32>
    %233 = tpu.matmul %230, %232, %cst_201 {dimension_numbers = #tpu.dot_dimension_numbers<[1], [0], [0], [1], [0, 0, 1, 1], [], []>} : vector<256x64xbf16>, vector<64x128xbf16>, vector<256x128xf32> -> vector<256x128xf32>
    %234 = arith.addf %228, %233 : vector<256x128xf32>
    %235 = vector.extract_strided_slice %220 {offsets = [0, 0], sizes = [240, 64], strides = [1, 1]} : vector<256x64xbf16> to vector<240x64xbf16>
    %236 = tpu.concatenate %221, %235 in 0 : vector<16x64xbf16>, vector<240x64xbf16> -> vector<256x64xbf16>
    %c0_202 = arith.constant 0 : index
    %c2_203 = arith.constant 2 : index
    %c0_204 = arith.constant 0 : index
    %c0_205 = arith.constant 0 : index
    %237 = vector.load %arg12[%c0_202, %c2_203, %c0_204, %c0_205] : memref<3x3x64x128xbf16, #tpu.memory_space<vmem>>, vector<1x1x64x128xbf16>
    %238 = vector.shape_cast %237 : vector<1x1x64x128xbf16> to vector<64x128xbf16>
    %cst_206 = arith.constant dense<0.000000e+00> : vector<256x128xf32>
    %239 = tpu.matmul %236, %238, %cst_206 {dimension_numbers = #tpu.dot_dimension_numbers<[1], [0], [0], [1], [0, 0, 1, 1], [], []>} : vector<256x64xbf16>, vector<64x128xbf16>, vector<256x128xf32> -> vector<256x128xf32>
    %240 = arith.addf %234, %239 : vector<256x128xf32>
    %c1_207 = arith.constant 1 : index
    %c0_208 = arith.constant 0 : index
    %c0_209 = arith.constant 0 : index
    %c0_210 = arith.constant 0 : index
    %241 = vector.load %arg12[%c1_207, %c0_208, %c0_209, %c0_210] : memref<3x3x64x128xbf16, #tpu.memory_space<vmem>>, vector<1x1x64x128xbf16>
    %242 = vector.shape_cast %241 : vector<1x1x64x128xbf16> to vector<64x128xbf16>
    %cst_211 = arith.constant dense<0.000000e+00> : vector<256x128xf32>
    %243 = tpu.matmul %216, %242, %cst_211 {dimension_numbers = #tpu.dot_dimension_numbers<[1], [0], [0], [1], [0, 0, 1, 1], [], []>} : vector<256x64xbf16>, vector<64x128xbf16>, vector<256x128xf32> -> vector<256x128xf32>
    %244 = arith.addf %240, %243 : vector<256x128xf32>
    %c1_212 = arith.constant 1 : index
    %c1_213 = arith.constant 1 : index
    %c0_214 = arith.constant 0 : index
    %c0_215 = arith.constant 0 : index
    %245 = vector.load %arg12[%c1_212, %c1_213, %c0_214, %c0_215] : memref<3x3x64x128xbf16, #tpu.memory_space<vmem>>, vector<1x1x64x128xbf16>
    %246 = vector.shape_cast %245 : vector<1x1x64x128xbf16> to vector<64x128xbf16>
    %cst_216 = arith.constant dense<0.000000e+00> : vector<256x128xf32>
    %247 = tpu.matmul %212, %246, %cst_216 {dimension_numbers = #tpu.dot_dimension_numbers<[1], [0], [0], [1], [0, 0, 1, 1], [], []>} : vector<256x64xbf16>, vector<64x128xbf16>, vector<256x128xf32> -> vector<256x128xf32>
    %248 = arith.addf %244, %247 : vector<256x128xf32>
    %c1_217 = arith.constant 1 : index
    %c2_218 = arith.constant 2 : index
    %c0_219 = arith.constant 0 : index
    %c0_220 = arith.constant 0 : index
    %249 = vector.load %arg12[%c1_217, %c2_218, %c0_219, %c0_220] : memref<3x3x64x128xbf16, #tpu.memory_space<vmem>>, vector<1x1x64x128xbf16>
    %250 = vector.shape_cast %249 : vector<1x1x64x128xbf16> to vector<64x128xbf16>
    %cst_221 = arith.constant dense<0.000000e+00> : vector<256x128xf32>
    %251 = tpu.matmul %220, %250, %cst_221 {dimension_numbers = #tpu.dot_dimension_numbers<[1], [0], [0], [1], [0, 0, 1, 1], [], []>} : vector<256x64xbf16>, vector<64x128xbf16>, vector<256x128xf32> -> vector<256x128xf32>
    %252 = arith.addf %248, %251 : vector<256x128xf32>
    %253 = vector.extract_strided_slice %216 {offsets = [16, 0], sizes = [240, 64], strides = [1, 1]} : vector<256x64xbf16> to vector<240x64xbf16>
    %254 = tpu.concatenate %253, %221 in 0 : vector<240x64xbf16>, vector<16x64xbf16> -> vector<256x64xbf16>
    %c2_222 = arith.constant 2 : index
    %c0_223 = arith.constant 0 : index
    %c0_224 = arith.constant 0 : index
    %c0_225 = arith.constant 0 : index
    %255 = vector.load %arg12[%c2_222, %c0_223, %c0_224, %c0_225] : memref<3x3x64x128xbf16, #tpu.memory_space<vmem>>, vector<1x1x64x128xbf16>
    %256 = vector.shape_cast %255 : vector<1x1x64x128xbf16> to vector<64x128xbf16>
    %cst_226 = arith.constant dense<0.000000e+00> : vector<256x128xf32>
    %257 = tpu.matmul %254, %256, %cst_226 {dimension_numbers = #tpu.dot_dimension_numbers<[1], [0], [0], [1], [0, 0, 1, 1], [], []>} : vector<256x64xbf16>, vector<64x128xbf16>, vector<256x128xf32> -> vector<256x128xf32>
    %258 = arith.addf %252, %257 : vector<256x128xf32>
    %259 = vector.extract_strided_slice %212 {offsets = [16, 0], sizes = [240, 64], strides = [1, 1]} : vector<256x64xbf16> to vector<240x64xbf16>
    %260 = tpu.concatenate %259, %221 in 0 : vector<240x64xbf16>, vector<16x64xbf16> -> vector<256x64xbf16>
    %c2_227 = arith.constant 2 : index
    %c1_228 = arith.constant 1 : index
    %c0_229 = arith.constant 0 : index
    %c0_230 = arith.constant 0 : index
    %261 = vector.load %arg12[%c2_227, %c1_228, %c0_229, %c0_230] : memref<3x3x64x128xbf16, #tpu.memory_space<vmem>>, vector<1x1x64x128xbf16>
    %262 = vector.shape_cast %261 : vector<1x1x64x128xbf16> to vector<64x128xbf16>
    %cst_231 = arith.constant dense<0.000000e+00> : vector<256x128xf32>
    %263 = tpu.matmul %260, %262, %cst_231 {dimension_numbers = #tpu.dot_dimension_numbers<[1], [0], [0], [1], [0, 0, 1, 1], [], []>} : vector<256x64xbf16>, vector<64x128xbf16>, vector<256x128xf32> -> vector<256x128xf32>
    %264 = arith.addf %258, %263 : vector<256x128xf32>
    %265 = vector.extract_strided_slice %220 {offsets = [16, 0], sizes = [240, 64], strides = [1, 1]} : vector<256x64xbf16> to vector<240x64xbf16>
    %266 = tpu.concatenate %265, %221 in 0 : vector<240x64xbf16>, vector<16x64xbf16> -> vector<256x64xbf16>
    %c2_232 = arith.constant 2 : index
    %c2_233 = arith.constant 2 : index
    %c0_234 = arith.constant 0 : index
    %c0_235 = arith.constant 0 : index
    %267 = vector.load %arg12[%c2_232, %c2_233, %c0_234, %c0_235] : memref<3x3x64x128xbf16, #tpu.memory_space<vmem>>, vector<1x1x64x128xbf16>
    %268 = vector.shape_cast %267 : vector<1x1x64x128xbf16> to vector<64x128xbf16>
    %cst_236 = arith.constant dense<0.000000e+00> : vector<256x128xf32>
    %269 = tpu.matmul %266, %268, %cst_236 {dimension_numbers = #tpu.dot_dimension_numbers<[1], [0], [0], [1], [0, 0, 1, 1], [], []>} : vector<256x64xbf16>, vector<64x128xbf16>, vector<256x128xf32> -> vector<256x128xf32>
    %270 = arith.addf %264, %269 : vector<256x128xf32>
    %c0_237 = arith.constant 0 : index
    %c0_238 = arith.constant 0 : index
    %271 = vector.load %arg13[%c0_237, %c0_238] : memref<1x128xf32, #tpu.memory_space<vmem>>, vector<1x128xf32>
    %272 = vector.broadcast %271 : vector<1x128xf32> to vector<256x128xf32>
    %273 = arith.mulf %270, %272 : vector<256x128xf32>
    %c0_239 = arith.constant 0 : index
    %c0_240 = arith.constant 0 : index
    %274 = vector.load %arg14[%c0_239, %c0_240] : memref<1x128xf32, #tpu.memory_space<vmem>>, vector<1x128xf32>
    %275 = vector.broadcast %274 : vector<1x128xf32> to vector<256x128xf32>
    %276 = arith.addf %273, %275 : vector<256x128xf32>
    %cst_241 = arith.constant 0.000000e+00 : f32
    %277 = vector.broadcast %cst_241 : f32 to vector<256x128xf32>
    %278 = arith.cmpf oge, %276, %277 : vector<256x128xf32>
    %cst_242 = arith.constant 0.00999999977 : f32
    %279 = vector.broadcast %cst_242 : f32 to vector<256x128xf32>
    %280 = arith.mulf %279, %276 : vector<256x128xf32>
    %281 = arith.select %278, %276, %280 : vector<256x128xi1>, vector<256x128xf32>
    %cst_243 = arith.constant dense<0.000000e+00> : vector<128xf32>
    %282 = vector.multi_reduction <add>, %281, %cst_243 [0] : vector<256x128xf32> to vector<128xf32>
    %283 = vector.shape_cast %282 : vector<128xf32> to vector<1x128xf32>
    %cst_244 = arith.constant 3.906250e-03 : f32
    %284 = vector.broadcast %cst_244 : f32 to vector<1x128xf32>
    %285 = arith.mulf %283, %284 : vector<1x128xf32>
    %286 = tpu.iota {dimensions = array<i32: 1>} : vector<1x128xi32>
    %c2_i32 = arith.constant 2 : i32
    %287 = vector.broadcast %c2_i32 : i32 to vector<1x128xi32>
    %288 = arith.cmpi slt, %286, %287 : vector<1x128xi32>
    %cst_245 = arith.constant -1.000000e+30 : f32
    %289 = vector.broadcast %cst_245 : f32 to vector<1x128xf32>
    %290 = arith.select %288, %285, %289 : vector<1x128xi1>, vector<1x128xf32>
    %cst_246 = arith.constant dense<0xFF800000> : vector<1xf32>
    %291 = vector.multi_reduction <maximumf>, %290, %cst_246 [1] : vector<1x128xf32> to vector<1xf32>
    %292 = vector.shape_cast %291 : vector<1xf32> to vector<1x1xf32>
    %293 = vector.broadcast %292 : vector<1x1xf32> to vector<1x128xf32>
    %294 = arith.subf %290, %293 : vector<1x128xf32>
    %295 = math.exp %294 : vector<1x128xf32>
    %cst_247 = arith.constant dense<0.000000e+00> : vector<1xf32>
    %296 = vector.multi_reduction <add>, %295, %cst_247 [1] : vector<1x128xf32> to vector<1xf32>
    %297 = vector.shape_cast %296 : vector<1xf32> to vector<1x1xf32>
    %298 = vector.broadcast %297 : vector<1x1xf32> to vector<1x128xf32>
    %299 = arith.divf %295, %298 : vector<1x128xf32>
    %c0_248 = arith.constant 0 : index
    %c0_249 = arith.constant 0 : index
    %c0_250 = arith.constant 0 : index
    %300 = vector.load %arg15[%c0_248, %c0_249, %c0_250] : memref<1x1x128xf32, #tpu.memory_space<vmem>>, vector<1x1x128xf32>
    %301 = vector.shape_cast %300 : vector<1x1x128xf32> to vector<1x128xf32>
    %302 = vector.shape_cast %299 : vector<1x128xf32> to vector<1x1x128xf32>
    tpu.vector_store %arg15[%c0_248, %c0_249, %c0_250], %302 {strides = array<i32>} : memref<1x1x128xf32, #tpu.memory_space<vmem>>, vector<1x1x128xf32>,
    return
  }
  func.func @transform_0(%arg0: i32) -> (i32, i32, i32) {
    %c0_i32 = arith.constant 0 : i32
    %c0_i32_0 = arith.constant 0 : i32
    %c0_i32_1 = arith.constant 0 : i32
    %c0_i32_2 = arith.constant 0 : i32
    return %c0_i32, %c0_i32_0, %c0_i32_1 : i32, i32, i32
  }
  func.func @transform_1(%arg0: i32) -> (i32, i32, i32) {
    %c0_i32 = arith.constant 0 : i32
    %c0_i32_0 = arith.constant 0 : i32
    %c0_i32_1 = arith.constant 0 : i32
    return %arg0, %c0_i32, %c0_i32_0 : i32, i32, i32
  }
  func.func @transform_2(%arg0: i32) -> (i32, i32, i32, i32) {
    %c0_i32 = arith.constant 0 : i32
    %c0_i32_0 = arith.constant 0 : i32
    %c0_i32_1 = arith.constant 0 : i32
    %c0_i32_2 = arith.constant 0 : i32
    %c0_i32_3 = arith.constant 0 : i32
    return %c0_i32, %c0_i32_0, %c0_i32_1, %c0_i32_2 : i32, i32, i32, i32
  }
  func.func @transform_3(%arg0: i32) -> (i32, i32) {
    %c0_i32 = arith.constant 0 : i32
    %c0_i32_0 = arith.constant 0 : i32
    %c0_i32_1 = arith.constant 0 : i32
    return %c0_i32, %c0_i32_0 : i32, i32
  }
  func.func @transform_4(%arg0: i32) -> (i32, i32) {
    %c0_i32 = arith.constant 0 : i32
    %c0_i32_0 = arith.constant 0 : i32
    %c0_i32_1 = arith.constant 0 : i32
    return %c0_i32, %c0_i32_0 : i32, i32
  }
  func.func @transform_5(%arg0: i32) -> (i32, i32, i32, i32) {
    %c0_i32 = arith.constant 0 : i32
    %c0_i32_0 = arith.constant 0 : i32
    %c0_i32_1 = arith.constant 0 : i32
    %c0_i32_2 = arith.constant 0 : i32
    %c0_i32_3 = arith.constant 0 : i32
    return %c0_i32, %c0_i32_0, %c0_i32_1, %c0_i32_2 : i32, i32, i32, i32
  }
  func.func @transform_6(%arg0: i32) -> (i32, i32) {
    %c0_i32 = arith.constant 0 : i32
    %c0_i32_0 = arith.constant 0 : i32
    %c0_i32_1 = arith.constant 0 : i32
    return %c0_i32, %c0_i32_0 : i32, i32
  }
  func.func @transform_7(%arg0: i32) -> (i32, i32) {
    %c0_i32 = arith.constant 0 : i32
    %c0_i32_0 = arith.constant 0 : i32
    %c0_i32_1 = arith.constant 0 : i32
    return %c0_i32, %c0_i32_0 : i32, i32
  }
  func.func @transform_8(%arg0: i32) -> (i32, i32, i32, i32) {
    %c0_i32 = arith.constant 0 : i32
    %c0_i32_0 = arith.constant 0 : i32
    %c0_i32_1 = arith.constant 0 : i32
    %c0_i32_2 = arith.constant 0 : i32
    %c0_i32_3 = arith.constant 0 : i32
    return %c0_i32, %c0_i32_0, %c0_i32_1, %c0_i32_2 : i32, i32, i32, i32
  }
  func.func @transform_9(%arg0: i32) -> (i32, i32) {
    %c0_i32 = arith.constant 0 : i32
    %c0_i32_0 = arith.constant 0 : i32
    %c0_i32_1 = arith.constant 0 : i32
    return %c0_i32, %c0_i32_0 : i32, i32
  }
  func.func @transform_10(%arg0: i32) -> (i32, i32) {
    %c0_i32 = arith.constant 0 : i32
    %c0_i32_0 = arith.constant 0 : i32
    %c0_i32_1 = arith.constant 0 : i32
    return %c0_i32, %c0_i32_0 : i32, i32
  }
  func.func @transform_11(%arg0: i32) -> (i32, i32, i32, i32) {
    %c0_i32 = arith.constant 0 : i32
    %c0_i32_0 = arith.constant 0 : i32
    %c0_i32_1 = arith.constant 0 : i32
    %c0_i32_2 = arith.constant 0 : i32
    %c0_i32_3 = arith.constant 0 : i32
    return %c0_i32, %c0_i32_0, %c0_i32_1, %c0_i32_2 : i32, i32, i32, i32
  }
  func.func @transform_12(%arg0: i32) -> (i32, i32) {
    %c0_i32 = arith.constant 0 : i32
    %c0_i32_0 = arith.constant 0 : i32
    %c0_i32_1 = arith.constant 0 : i32
    return %c0_i32, %c0_i32_0 : i32, i32
  }
  func.func @transform_13(%arg0: i32) -> (i32, i32) {
    %c0_i32 = arith.constant 0 : i32
    %c0_i32_0 = arith.constant 0 : i32
    %c0_i32_1 = arith.constant 0 : i32
    return %c0_i32, %c0_i32_0 : i32, i32
  }
  func.func @transform_14(%arg0: i32) -> (i32, i32, i32) {
    %c0_i32 = arith.constant 0 : i32
    %c0_i32_0 = arith.constant 0 : i32
    %c0_i32_1 = arith.constant 0 : i32
    return %arg0, %c0_i32, %c0_i32_0 : i32, i32, i32
  }
}

</mosaic_0001>

<bundles_post_ra>
// kernel: discriminator_forward.1
= control target key start
LH: loop header
LB: loop body
LE: loop exit
PB: predicated region body
PF: predicated region fallthrough
CT: control target
= control target key end

     0   :  { %s21265_s0 = inlined_call_operand.vmem [shape: bf16[2,256,256], index: 0, kind: input, shape index: {}]   ;;  %s21266_s1 = inlined_call_operand.vmem [shape: f32[2,256,8], index: 1, kind: input, shape index: {}]   ;;  %s21267_s2 = inlined_call_operand.vmem [shape: bf16[3,3,8,64], index: 2, kind: input, shape index: {}]   ;;  %s21268_s3 = inlined_call_operand.vmem [shape: f32[1,64], index: 3, kind: input, shape index: {}]   ;;  %s21269_s4 = inlined_call_operand.vmem [shape: f32[1,64], index: 4, kind: input, shape index: {}]   ;;  %s21270_s5 = inlined_call_operand.vmem [shape: bf16[3,3,64,64], index: 5, kind: input, shape index: {}]   ;;  %s21271_s6 = inlined_call_operand.vmem [shape: f32[1,64], index: 6, kind: input, shape index: {}]   ;;  %s21272_s7 = inlined_call_operand.vmem [shape: f32[1,64], index: 7, kind: input, shape index: {}]   ;;  %s21273_s8 = inlined_call_operand.vmem [shape: bf16[3,3,64,64], index: 8, kind: input, shape index: {}]   ;;  %s21274_s9 = inlined_call_operand.vmem [shape: f32[1,64], index: 9, kind: input, shape index: {}]   ;;  %s21275_s10 = inlined_call_operand.vmem [shape: f32[1,64], index: 10, kind: input, shape index: {}]   ;;  %s21276_s11 = inlined_call_operand.vmem [shape: bf16[3,3,64,128], index: 11, kind: input, shape index: {}]   ;;  %s21277_s12 = inlined_call_operand.vmem [shape: f32[1,128], index: 12, kind: input, shape index: {}]   ;;  %s21278_s13 = inlined_call_operand.vmem [shape: f32[1,128], index: 13, kind: input, shape index: {}]   ;;  %s21279_s14 = inlined_call_operand.hbm [shape: f32[2,1,128], index: 14, kind: output, shape index: {}]  }
   0x1   :  { %21332 = sst [smem:[#allocation44_spill]] %s21265_s0 }
   0x2   :  { %21333 = sst [smem:[#allocation45_spill]] %s21266_s1 }
   0x3   :  { %21334 = sst [smem:[#allocation46_spill]] %s21267_s2 }
   0x4   :  { %19 = vsyncpa [#allocation3], 0 }
   0x5   :  { %21 = vsyncpa [#allocation3 + $0x1], 0  ;;  %s15924_s29 = smov 0   ;;  %s15926_s30 = smov 0  }
   0x6   :  { %s15928_s15 = smov 0   ;;  %s15930_s16 = smov 0  }
   0x7 LB: > { %21335 = sst [smem:[#allocation5_spill]] %s15841_s15  ;;  %s15945_s17 = sadd.s32 4294967295, %s15845_s16   ;;  %s15845_s16 = sphi %s15930_s16, %s21751_s16   ;;  %s15841_s15 = sphi %s15928_s15, %s21748_s15   ;;  %s15837_s30 = sphi %s15926_s30, %s21750_s30   ;;  %s15833_s29 = sphi %s15924_s29, %s21749_s29  }
   0x8   : > { %s11387_s18 = sadd.s32 4294967294, %s15845_s16   ;;  %s15949_s19 = sadd.s32 1, %s15845_s16  }
   0x9   : > { %s333_s20 = sadd.s32 1, %s15841_s15  ;;  %s330_s21 = ssub.s32 %s15845_s16, %s15949_s19 }
   0xa   : > { %p343_p0 = scmp.ne.s32.totalorder %s15841_s15, %s15837_s30  ;;  %p331_p1 = scmp.eq.s32.totalorder %s330_s21, 0 }
   0xb   : > { %p344_p2 = scmp.eq.s32.totalorder %s15945_s17, 1  ;;  %p349_p3 = scmp.ne.s32.totalorder %s15837_s30, %s15833_s29 }
   0xc   : > { %p350_p4 = scmp.eq.s32.totalorder %s11387_s18, 1  ;;  %p11390_p7 = scmp.ge.s32.totalorder %s15845_s16, 1 }
   0xd   : > { %s15960_s22 = scalar_select %p331_p1, %s15841_s15, %s333_s20  }
   0xe   : > { %p15962_p5 = por %p344_p2, %p343_p0  ;;  %p15966_p6 = por %p350_p4, %p349_p3 }
   0xf   : > { %21336 = sst [smem:[#allocation6_spill]] %s15960_s22  ;;  %p415_p8 = scmp.lt.s32.totalorder %s15845_s16, 3 }
  0x11   : > { %p416_p9 = pnand %p11390_p7, %p415_p8 }
  0x13   : > { %419 = sbr.rel (%p416_p9) target bundleno = 3376 (0xd30), region = 76 }
  0x18   : > { %p460_p10 = scmp.lt.s32.totalorder %s15945_s17, 1  ;;  %s21339_s0 = sld [smem:[#allocation44_spill]]  ;;  %vm1305_vm0 = vcmask 1043456   ;;  %vm1256_vm1 = vcmask 64512  }
  0x19   : > { %s21340_s1 = sld [smem:[#allocation45_spill]]  ;;  %s458_s21 = sand.u32 1, %s15837_s30  }
  0x1a   : > { %s461_s18 = scalar_select %p460_p10, %s15945_s17, 1 }
  0x1b   : > { %s21351_s2 = sld [smem:[#allocation46_spill]]  ;;  %s12357_s22 = sshll.u32 %s15945_s17, 4 }
  0x1c   : > { %s12360_s20 = sshll.u32 %s461_s18, 8  ;;  %s459_s25 = scalar_lea.vmem [#allocation2], %s458_s21 }
  0x1d   : > { %s11332_s26 = sshll.u32 %s459_s25, 4  ;;  %s11330_s28 = scalar_lea.hbm %s21279_s14, %s12357_s22  ;;  %s11333_s26 = int_to_ptr.vmem [resolvable:$true] %s11332_s26 }
  0x1e   : > { %v15385_v0 = vld [vmem:[%s21339_s0 + $0x4] ss:$8 sps:$4 sm:$0xff]   ;;  %v15389_v50 = vld [vmem:[%s21339_s0] ss:$8 sps:$4 sm:$0xff]   ;;  %v15391_v52 = vld [vmem:[%s21339_s0 + $0x14] ss:$8 sps:$4 sm:$0xff]  }
  0x1f   : > { %v15387_v1 = vld [vmem:[%s21339_s0 + $0x104] ss:$8 sps:$4 sm:$0xff]   ;;  %738 = vmatprep.mubr.bf16.mxu0 %v15385_v0  ;;  %s15983_s15 = scalar_lea.vmem %s21340_s1, %s12360_s20  ;;  %v15390_v51 = vld [vmem:[%s21339_s0 + $0x100] ss:$8 sps:$4 sm:$0xff]   ;;  %v15393_v53 = vld [vmem:[%s21339_s0 + $0x114] ss:$8 sps:$4 sm:$0xff]  }
  0x20   : > { %1108 = vmatprep.mubr.bf16.mxu1 %v15387_v1  ;;  %v496_v2 = vld [vmem:[%s15983_s15 + $0xf0] sm:$0xff]  ;;  %v497_v3 = vld [vmem:[%s15983_s15 + $0xf8] sm:$0xff]  ;;  %v494_v7 = vld [vmem:[%s15983_s15 + $0xe0] sm:$0xff]  ;;  %s15785_s18 = scalar_lea.vmem %s11333_s26, 16  ;;  %s15848_s20 = smov [#allocation2]  }
  0x21   : > { %v480_v4 = vld [vmem:[%s15983_s15 + $0x70] sm:$0xff]  ;;  %v15988_v5 = vpack.c.bf16 %v497_v3, %v496_v2  ;;  %v481_v6 = vld [vmem:[%s15983_s15 + $0x78] sm:$0xff]  ;;  %v495_v8 = vld [vmem:[%s15983_s15 + $0xe8] sm:$0xff]  ;;  %p15786_p11 = scmp.ne.s32.totalorder %s11333_s26, %s15785_s18 }
  0x22   : > { %v15993_v9 = vpack.c.bf16 %v481_v6, %v480_v4  ;;  %v15995_v10 = vpack.c.bf16 %v495_v8, %v494_v7  ;;  %v478_v11 = vld [vmem:[%s15983_s15 + $0x60] sm:$0xff]  ;;  %v479_v12 = vld [vmem:[%s15983_s15 + $0x68] sm:$0xff]  ;;  %v492_v13 = vld [vmem:[%s15983_s15 + $0xd0] sm:$0xff] }
  0x23   : > { %12361 = vmatprep.subr.bf16.mxu0 %v15988_v5  ;;  %12473 = vmatprep.subr.bf16.mxu1 %v15988_v5  ;;  %v493_v14 = vld [vmem:[%s15983_s15 + $0xd8] sm:$0xff]  ;;  %v16005_v15 = vpack.c.bf16 %v479_v12, %v478_v11  ;;  %v476_v17 = vld [vmem:[%s15983_s15 + $0x50] sm:$0xff]  ;;  %v490_v19 = vld [vmem:[%s15983_s15 + $0xc0] sm:$0xff]  ;;  %p15787_p12 = pnand %p15786_p11, %p15962_p5 }
  0x24   : > { %21341 = vst [vmem:[#allocation7_spill] sm:$0xff] %v15993_v9  ;;  %21342 = vst [vmem:[#allocation8_spill] sm:$0xff] %v15995_v10  ;;  %12362 = vmatpush3.bf16.msra.mxu0 %v15993_v9  ;;  %12474 = vmatpush3.bf16.msra.mxu1 %v15993_v9  ;;  %v16009_v16 = vpack.c.bf16 %v493_v14, %v492_v13  ;;  %v477_v18 = vld [vmem:[%s15983_s15 + $0x58] sm:$0xff]  ;;  %v491_v20 = vld [vmem:[%s15983_s15 + $0xc8] sm:$0xff] }
  0x25   : > { %21343 = vst [vmem:[#allocation9_spill] sm:$0xff] %v16005_v15  ;;  %12363 = vmatprep.subr.bf16.mxu0 %v15995_v10  ;;  %12475 = vmatprep.subr.bf16.mxu1 %v15995_v10  ;;  %v16017_v21 = vpack.c.bf16 %v477_v18, %v476_v17  ;;  %v16021_v22 = vpack.c.bf16 %v491_v20, %v490_v19  ;;  %v474_v23 = vld [vmem:[%s15983_s15 + $0x40] sm:$0xff]  ;;  %v475_v24 = vld [vmem:[%s15983_s15 + $0x48] sm:$0xff]  ;;  %v488_v25 = vld [vmem:[%s15983_s15 + $0xb0] sm:$0xff]  ;;  %p15788_p13 = pneg %p15787_p12 }
  0x26   : > { %21344 = vst [vmem:[#allocation10_spill] sm:$0xff] %v16009_v16  ;;  %v489_v26 = vld [vmem:[%s15983_s15 + $0xb8] sm:$0xff]  ;;  %v16029_v27 = vpack.c.bf16 %v475_v24, %v474_v23  ;;  %v472_v28 = vld [vmem:[%s15983_s15 + $0x30] sm:$0xff]  ;;  %v486_v31 = vld [vmem:[%s15983_s15 + $0xa0] sm:$0xff] }
  0x27   : > { %21345 = vst [vmem:[#allocation11_spill] sm:$0xff] %v16017_v21  ;;  %21346 = vst [vmem:[#allocation12_spill] sm:$0xff] %v16021_v22  ;;  %v16034_v29 = vpack.c.bf16 %v489_v26, %v488_v25  ;;  %v473_v30 = vld [vmem:[%s15983_s15 + $0x38] sm:$0xff]  ;;  %v487_v32 = vld [vmem:[%s15983_s15 + $0xa8] sm:$0xff] }
  0x28   : > { %12364 = vmatpush3.bf16.msra.mxu0 %v16005_v15  ;;  %12476 = vmatpush3.bf16.msra.mxu1 %v16005_v15  ;;  %v16041_v33 = vpack.c.bf16 %v473_v30, %v472_v28  ;;  %v16045_v34 = vpack.c.bf16 %v487_v32, %v486_v31  ;;  %v470_v35 = vld [vmem:[%s15983_s15 + $0x20] sm:$0xff]  ;;  %v471_v36 = vld [vmem:[%s15983_s15 + $0x28] sm:$0xff]  ;;  %v484_v37 = vld [vmem:[%s15983_s15 + $0x90] sm:$0xff] }
  0x29   : > { %12365 = vmatprep.subr.bf16.mxu0 %v16009_v16  ;;  %12477 = vmatprep.subr.bf16.mxu1 %v16009_v16  ;;  %21347 = vst [vmem:[#allocation13_spill] sm:$0xff] %v16034_v29  ;;  %v485_v38 = vld [vmem:[%s15983_s15 + $0x98] sm:$0xff]  ;;  %v16053_v39 = vpack.c.bf16 %v471_v36, %v470_v35  ;;  %v468_v40 = vld [vmem:[%s15983_s15 + $0x10] sm:$0xff]  ;;  %v482_v43 = vld [vmem:[%s15983_s15 + $0x80] sm:$0xff] }
  0x2a   : > { %21348 = vst [vmem:[#allocation14_spill] sm:$0xff] %v16045_v34  ;;  %v16058_v41 = vpack.c.bf16 %v485_v38, %v484_v37  ;;  %v469_v42 = vld [vmem:[%s15983_s15 + $0x18] sm:$0xff]  ;;  %v483_v44 = vld [vmem:[%s15983_s15 + $0x88] sm:$0xff]  ;;  %v466_v47 = vld [vmem:[%s15983_s15] sm:$0xff] }
  0x2b   : > { %v16065_v45 = vpack.c.bf16 %v469_v42, %v468_v40  ;;  %v16069_v46 = vpack.c.bf16 %v483_v44, %v482_v43  ;;  %v467_v48 = vld [vmem:[%s15983_s15 + $0x8] sm:$0xff]  ;;  %v15395_v54 = vld [vmem:[%s21339_s0 + $0x10] ss:$8 sps:$4 sm:$0xff]   ;;  %v11489_v57 = vld [vmem:[%s21351_s2 + $0x4] sm:$0xf]  ;;  %s11320_s15 = scalar_lea.sflag [#allocation3], %s458_s21 }
  0x2c   : > { %12366 = vmatpush3.bf16.msra.mxu0 %v16017_v21  ;;  %12478 = vmatpush3.bf16.msra.mxu1 %v16017_v21  ;;  %21349 = vst [vmem:[#allocation15_spill] sm:$0xff] %v16058_v41  ;;  %v16075_v49 = vpack.c.bf16 %v467_v48, %v466_v47  ;;  %v15396_v55 = vld [vmem:[%s21339_s0 + $0x110] ss:$8 sps:$4 sm:$0xff]   ;;  %v15397_v56 = vld [vmem:[%s21339_s0 + $0x24] ss:$8 sps:$4 sm:$0xff]   ;;  %v1307_v59 = vsel %vm1305_vm0, %v11489_v57, 0 }
  0x2d   : > { %12367 = vmatprep.subr.bf16.mxu0 %v16021_v22  ;;  %12479 = vmatprep.subr.bf16.mxu1 %v16021_v22  ;;  %21350 = vst [vmem:[#allocation16_spill] sm:$0xff] %v16069_v46  ;;  %v15399_v58 = vld [vmem:[%s21339_s0 + $0x124] ss:$8 sps:$4 sm:$0xff]   ;;  %v15401_v60 = vld [vmem:[%s21339_s0 + $0x20] ss:$8 sps:$4 sm:$0xff]  }
  0x2e   : > { %v15402_v61 = vld [vmem:[%s21339_s0 + $0x120] ss:$8 sps:$4 sm:$0xff]   ;;  %v15403_v62 = vld [vmem:[%s21339_s0 + $0x34] ss:$8 sps:$4 sm:$0xff]   ;;  %v15407_v0 = vld [vmem:[%s21339_s0 + $0x30] ss:$8 sps:$4 sm:$0xff]  }
  0x2f   : > { %v15405_v63 = vld [vmem:[%s21339_s0 + $0x134] ss:$8 sps:$4 sm:$0xff]   ;;  %v15408_v1 = vld [vmem:[%s21339_s0 + $0x130] ss:$8 sps:$4 sm:$0xff]   ;;  %v15409_v2 = vld [vmem:[%s21339_s0 + $0x44] ss:$8 sps:$4 sm:$0xff]  }
  0x30   : > { %12368 = vmatpush3.bf16.msra.mxu0 %v16029_v27  ;;  %12480 = vmatpush3.bf16.msra.mxu1 %v16029_v27  ;;  %v15411_v3 = vld [vmem:[%s21339_s0 + $0x144] ss:$8 sps:$4 sm:$0xff]   ;;  %v1253_v4 = vld [vmem:[%s21351_s2] sm:$0xf]  ;;  %v15415_v11 = vld [vmem:[%s21339_s0 + $0x54] ss:$8 sps:$4 sm:$0xff]  }
  0x31   : > { %12369 = vmatprep.subr.bf16.mxu0 %v16034_v29  ;;  %12481 = vmatprep.subr.bf16.mxu1 %v16034_v29  ;;  %v1516_v6 = vsel %vm1305_vm0, %v1253_v4, 0  ;;  %v15413_v7 = vld [vmem:[%s21339_s0 + $0x40] ss:$8 sps:$4 sm:$0xff]   ;;  %v15417_v12 = vld [vmem:[%s21339_s0 + $0x154] ss:$8 sps:$4 sm:$0xff]  }
  0x32   : > { %v15414_v8 = vld [vmem:[%s21339_s0 + $0x140] ss:$8 sps:$4 sm:$0xff]   ;;  %v15419_v13 = vld [vmem:[%s21339_s0 + $0x50] ss:$8 sps:$4 sm:$0xff]   ;;  %v15421_v17 = vld [vmem:[%s21339_s0 + $0x64] ss:$8 sps:$4 sm:$0xff]  }
  0x33   : > { %v15420_v14 = vld [vmem:[%s21339_s0 + $0x150] ss:$8 sps:$4 sm:$0xff]   ;;  %v15423_v18 = vld [vmem:[%s21339_s0 + $0x164] ss:$8 sps:$4 sm:$0xff]   ;;  %v15425_v19 = vld [vmem:[%s21339_s0 + $0x60] ss:$8 sps:$4 sm:$0xff]  }
  0x34   : > { %12370 = vmatpush3.bf16.msra.mxu0 %v16041_v33  ;;  %12482 = vmatpush3.bf16.msra.mxu1 %v16041_v33  ;;  %v15426_v20 = vld [vmem:[%s21339_s0 + $0x160] ss:$8 sps:$4 sm:$0xff]   ;;  %v15427_v23 = vld [vmem:[%s21339_s0 + $0x74] ss:$8 sps:$4 sm:$0xff]   ;;  %v15431_v25 = vld [vmem:[%s21339_s0 + $0x70] ss:$8 sps:$4 sm:$0xff]  }
  0x35   : > { %12371 = vmatprep.subr.bf16.mxu0 %v16045_v34  ;;  %12483 = vmatprep.subr.bf16.mxu1 %v16045_v34  ;;  %v15429_v24 = vld [vmem:[%s21339_s0 + $0x174] ss:$8 sps:$4 sm:$0xff]   ;;  %v15432_v26 = vld [vmem:[%s21339_s0 + $0x170] ss:$8 sps:$4 sm:$0xff]   ;;  %v15433_v28 = vld [vmem:[%s21339_s0 + $0x84] ss:$8 sps:$4 sm:$0xff]  }
  0x36   : > { %v15435_v30 = vld [vmem:[%s21339_s0 + $0x184] ss:$8 sps:$4 sm:$0xff]   ;;  %v15437_v31 = vld [vmem:[%s21339_s0 + $0x80] ss:$8 sps:$4 sm:$0xff]   ;;  %v15439_v35 = vld [vmem:[%s21339_s0 + $0x94] ss:$8 sps:$4 sm:$0xff]  }
  0x37   : > { %v15438_v32 = vld [vmem:[%s21339_s0 + $0x180] ss:$8 sps:$4 sm:$0xff]   ;;  %v15441_v36 = vld [vmem:[%s21339_s0 + $0x194] ss:$8 sps:$4 sm:$0xff]   ;;  %v15443_v37 = vld [vmem:[%s21339_s0 + $0x90] ss:$8 sps:$4 sm:$0xff]  }
  0x38   : > { %12372 = vmatpush3.bf16.msra.mxu0 %v16053_v39  ;;  %12484 = vmatpush3.bf16.msra.mxu1 %v16053_v39  ;;  %v15444_v38 = vld [vmem:[%s21339_s0 + $0x190] ss:$8 sps:$4 sm:$0xff]   ;;  %v15445_v40 = vld [vmem:[%s21339_s0 + $0xa4] ss:$8 sps:$4 sm:$0xff]   ;;  %v11520_v43 = vld [vmem:[%s21351_s2 + $0x8] sm:$0xf] }
  0x39   : > { %12373 = vmatprep.subr.bf16.mxu0 %v16058_v41  ;;  %12485 = vmatprep.subr.bf16.mxu1 %v16058_v41  ;;  %v15447_v42 = vld [vmem:[%s21339_s0 + $0x1a4] ss:$8 sps:$4 sm:$0xff]   ;;  %v15449_v44 = vld [vmem:[%s21339_s0 + $0xa0] ss:$8 sps:$4 sm:$0xff]   ;;  %v15451_v48 = vld [vmem:[%s21339_s0 + $0xb4] ss:$8 sps:$4 sm:$0xff]  }
  0x3a   : > { %v15450_v47 = vld [vmem:[%s21339_s0 + $0x1a0] ss:$8 sps:$4 sm:$0xff]  }
  0x3c   : > { %12374 = vmatpush3.bf16.msra.mxu0 %v16065_v45  ;;  %12486 = vmatpush3.bf16.msra.mxu1 %v16065_v45 }
  0x3d   : > { %12375 = vmatprep.subr.bf16.mxu0 %v16069_v46  ;;  %12487 = vmatprep.subr.bf16.mxu1 %v16069_v46 }
  0x40   : > { %12376 = vmatpush3.bf16.msra.mxu0 %v16075_v49  ;;  %12488 = vmatpush3.bf16.msra.mxu1 %v16075_v49 }
  0x41   : > { %15336 = vmatprep.subr.msk.bf16.mxu0 %vm1305_vm0, %v11489_v57  ;;  %15337 = vmatprep.subr.msk.bf16.mxu1 %vm1305_vm0, %v1253_v4  ;;  %v15463_v57 = vld [vmem:[%s21339_s0 + $0xd4] ss:$8 sps:$4 sm:$0xff]   ;;  %v15480_v4 = vld [vmem:[%s21339_s0 + $0x1f0] ss:$8 sps:$4 sm:$0xff]  }
  0x43   : > { %739 = vmatmul.mubr.bf16.vlgmr.msra.gmra.mxu0 %v15389_v50  ;;  %1109 = vmatmul.mubr.bf16.vlgmr.msra.gmra.mxu1 %v15390_v51  ;;  %v15453_v50 = vld [vmem:[%s21339_s0 + $0x1b4] ss:$8 sps:$4 sm:$0xff]   ;;  %v15455_v51 = vld [vmem:[%s21339_s0 + $0xb0] ss:$8 sps:$4 sm:$0xff]  }
  0x44   : > { %746 = vmatprep.mubr.bf16.mxu0 %v15391_v52  ;;  %1116 = vmatprep.mubr.bf16.mxu1 %v15393_v53  ;;  %v15456_v52 = vld [vmem:[%s21339_s0 + $0x1b0] ss:$8 sps:$4 sm:$0xff]   ;;  %v15457_v53 = vld [vmem:[%s21339_s0 + $0xc4] ss:$8 sps:$4 sm:$0xff]  }
  0x45   : > { %13951 = vmatpush3.bf16.msra.mxu0 %v1307_v59  ;;  %13985 = vmatpush3.bf16.msra.mxu1 %v1516_v6  ;;  %v15467_v59 = vld [vmem:[%s21339_s0 + $0xd0] ss:$8 sps:$4 sm:$0xff]   ;;  %v21281_v6 = vmov 0  }
  0x46   : > { %15338 = vmatprep.subr.msk.bf16.mxu0 %vm1305_vm0, %v11520_v43 }
  0x4b   : > { %747 = vmatmul.mubr.bf16.gmra.mxu0 %v15395_v54  ;;  %1117 = vmatmul.mubr.bf16.gmra.mxu1 %v15396_v55  ;;  %v15459_v54 = vld [vmem:[%s21339_s0 + $0x1c4] ss:$8 sps:$4 sm:$0xff]   ;;  %v15461_v55 = vld [vmem:[%s21339_s0 + $0xc0] ss:$8 sps:$4 sm:$0xff]  }
  0x4c   : > { %754 = vmatprep.mubr.bf16.mxu0 %v15397_v56  ;;  %1124 = vmatprep.mubr.bf16.mxu1 %v15399_v58  ;;  %v15462_v56 = vld [vmem:[%s21339_s0 + $0x1c0] ss:$8 sps:$4 sm:$0xff]   ;;  %v15465_v58 = vld [vmem:[%s21339_s0 + $0x1d4] ss:$8 sps:$4 sm:$0xff]  }
  0x53   : > { %755 = vmatmul.mubr.bf16.gmra.mxu0 %v15401_v60  ;;  %1125 = vmatmul.mubr.bf16.gmra.mxu1 %v15402_v61  ;;  %v15468_v60 = vld [vmem:[%s21339_s0 + $0x1d0] ss:$8 sps:$4 sm:$0xff]   ;;  %v15469_v61 = vld [vmem:[%s21339_s0 + $0xe4] ss:$8 sps:$4 sm:$0xff]  }
  0x54   : > { %762 = vmatprep.mubr.bf16.mxu0 %v15403_v62  ;;  %1132 = vmatprep.mubr.bf16.mxu1 %v15405_v63  ;;  %v15471_v62 = vld [vmem:[%s21339_s0 + $0x1e4] ss:$8 sps:$4 sm:$0xff]   ;;  %v15473_v63 = vld [vmem:[%s21339_s0 + $0xe0] ss:$8 sps:$4 sm:$0xff]  }
  0x5b   : > { %763 = vmatmul.mubr.bf16.gmra.mxu0 %v15407_v0  ;;  %1133 = vmatmul.mubr.bf16.gmra.mxu1 %v15408_v1  ;;  %v15474_v0 = vld [vmem:[%s21339_s0 + $0x1e0] ss:$8 sps:$4 sm:$0xff]   ;;  %v15475_v1 = vld [vmem:[%s21339_s0 + $0xf4] ss:$8 sps:$4 sm:$0xff]  }
  0x5c   : > { %770 = vmatprep.mubr.bf16.mxu0 %v15409_v2  ;;  %1140 = vmatprep.mubr.bf16.mxu1 %v15411_v3  ;;  %v15478_v2 = vld [vmem:[%s21339_s0 + $0x1f4] ss:$8 sps:$4 sm:$0xff]   ;;  %v15477_v3 = vld [vmem:[%s21339_s0 + $0xf0] ss:$8 sps:$4 sm:$0xff]  }
  0x63   : > { %771 = vmatmul.mubr.bf16.gmra.mxu0 %v15413_v7  ;;  %1141 = vmatmul.mubr.bf16.gmra.mxu1 %v15414_v8  ;;  %v1727_v7 = vsel %vm1305_vm0, %v11520_v43, 0  ;;  %v11536_v8 = vld [vmem:[%s21351_s2 + $0xc] sm:$0xf] }
  0x64   : > { %778 = vmatprep.mubr.bf16.mxu0 %v15415_v11  ;;  %1148 = vmatprep.mubr.bf16.mxu1 %v15417_v12  ;;  %v11553_v11 = vld [vmem:[%s21351_s2 + $0x10] sm:$0xf] }
  0x65   : > { %15339 = vmatprep.subr.msk.bf16.mxu1 %vm1305_vm0, %v11536_v8 }
  0x6b   : > { %779 = vmatmul.mubr.bf16.gmra.mxu0 %v15419_v13  ;;  %1149 = vmatmul.mubr.bf16.gmra.mxu1 %v15420_v14 }
  0x6c   : > { %786 = vmatprep.mubr.bf16.mxu0 %v15421_v17  ;;  %1156 = vmatprep.mubr.bf16.mxu1 %v15423_v18 }
  0x73   : > { %787 = vmatmul.mubr.bf16.gmra.mxu0 %v15425_v19  ;;  %1157 = vmatmul.mubr.bf16.gmra.mxu1 %v15426_v20 }
  0x74   : > { %794 = vmatprep.mubr.bf16.mxu0 %v15427_v23  ;;  %1164 = vmatprep.mubr.bf16.mxu1 %v15429_v24 }
  0x7b   : > { %795 = vmatmul.mubr.bf16.gmra.mxu0 %v15431_v25  ;;  %1165 = vmatmul.mubr.bf16.gmra.mxu1 %v15432_v26 }
  0x7c   : > { %802 = vmatprep.mubr.bf16.mxu0 %v15433_v28  ;;  %1172 = vmatprep.mubr.bf16.mxu1 %v15435_v30 }
  0x83   : > { %803 = vmatmul.mubr.bf16.gmra.mxu0 %v15437_v31  ;;  %1173 = vmatmul.mubr.bf16.gmra.mxu1 %v15438_v32 }
  0x84   : > { %810 = vmatprep.mubr.bf16.mxu0 %v15439_v35  ;;  %1180 = vmatprep.mubr.bf16.mxu1 %v15441_v36  ;;  %v1928_v36 = vsel %vm1305_vm0, %v11536_v8, 0 }
  0x8b   : > { %811 = vmatmul.mubr.bf16.gmra.mxu0 %v15443_v37  ;;  %1181 = vmatmul.mubr.bf16.gmra.mxu1 %v15444_v38  ;;  %v2129_v37 = vsel %vm1305_vm0, %v11553_v11, 0 }
  0x8c   : > { %818 = vmatprep.mubr.bf16.mxu0 %v15445_v40  ;;  %1188 = vmatprep.mubr.bf16.mxu1 %v15447_v42 }
  0x93   : > { %819 = vmatmul.mubr.bf16.gmra.mxu0 %v15449_v44  ;;  %1189 = vmatmul.mubr.bf16.gmra.mxu1 %v15450_v47 }
  0x94   : > { %826 = vmatprep.mubr.bf16.mxu0 %v15451_v48  ;;  %1196 = vmatprep.mubr.bf16.mxu1 %v15453_v50 }
  0x9b   : > { %827 = vmatmul.mubr.bf16.gmra.mxu0 %v15455_v51  ;;  %1197 = vmatmul.mubr.bf16.gmra.mxu1 %v15456_v52 }
  0x9c   : > { %834 = vmatprep.mubr.bf16.mxu0 %v15457_v53  ;;  %1204 = vmatprep.mubr.bf16.mxu1 %v15459_v54 }
  0xa3   : > { %835 = vmatmul.mubr.bf16.gmra.mxu0 %v15461_v55  ;;  %1205 = vmatmul.mubr.bf16.gmra.mxu1 %v15462_v56 }
  0xa4   : > { %842 = vmatprep.mubr.bf16.mxu0 %v15463_v57  ;;  %1212 = vmatprep.mubr.bf16.mxu1 %v15465_v58 }
  0xab   : > { %843 = vmatmul.mubr.bf16.gmra.mxu0 %v15467_v59  ;;  %1213 = vmatmul.mubr.bf16.gmra.mxu1 %v15468_v60 }
  0xac   : > { %850 = vmatprep.mubr.bf16.mxu0 %v15469_v61  ;;  %1220 = vmatprep.mubr.bf16.mxu1 %v15471_v62 }
  0xb3   : > { %851 = vmatmul.mubr.bf16.gmra.mxu0 %v15473_v63  ;;  %1221 = vmatmul.mubr.bf16.gmra.mxu1 %v15474_v0 }
  0xb4   : > { %858 = vmatprep.mubr.bf16.mxu0 %v15475_v1  ;;  %1228 = vmatprep.mubr.bf16.mxu1 %v15478_v2 }
  0xbb   : > { %859 = vmatmul.mubr.bf16.gmra.mxu0 %v15477_v3  ;;  %1229 = vmatmul.mubr.bf16.gmra.mxu1 %v15480_v4 }
  0xbc   : > { %13952 = vmatprep.mubr.bf16.mxu0 %v21281_v6  ;;  %13986 = vmatprep.mubr.bf16.mxu1 %v21281_v6 }
  0xc3   : > { %13953 = vmatmul.mubr.msk.bf16.vlgmr.msra.gmra.mxu0 %vm1256_vm1, %v16075_v49 }
  0xc4   : > { %13956 = vmatprep.mubr.msk.bf16.mxu0 %vm1256_vm1, %v16065_v45  ;;  %14019 = vmatpush3.bf16.msra.mxu0 %v1727_v7 }
  0xc5   : > { %15340 = vmatprep.subr.msk.bf16.mxu0 %vm1305_vm0, %v11553_v11 }
  0xcb   : > { %13957 = vmatmul.mubr.msk.bf16.gmra.mxu0 %vm1256_vm1, %v16053_v39 }
  0xcc   : > { %13960 = vmatprep.mubr.msk.bf16.mxu0 %vm1256_vm1, %v16041_v33 }
  0xd3   : > { %13961 = vmatmul.mubr.msk.bf16.gmra.mxu0 %vm1256_vm1, %v16029_v27 }
  0xd4   : > { %13964 = vmatprep.mubr.msk.bf16.mxu0 %vm1256_vm1, %v16017_v21 }
  0xdb   : > { %13965 = vmatmul.mubr.msk.bf16.gmra.mxu0 %vm1256_vm1, %v16005_v15 }
  0xdc   : > { %13968 = vmatprep.mubr.msk.bf16.mxu0 %vm1256_vm1, %v15993_v9 }
  0xe3   : > { %13969 = vmatmul.mubr.msk.bf16.gmra.mxu0 %vm1256_vm1, %v16069_v46 }
  0xe4   : > { %13972 = vmatprep.mubr.msk.bf16.mxu0 %vm1256_vm1, %v16058_v41 }
  0xeb   : > { %13973 = vmatmul.mubr.msk.bf16.gmra.mxu0 %vm1256_vm1, %v16045_v34 }
  0xec   : > { %13976 = vmatprep.mubr.msk.bf16.mxu0 %vm1256_vm1, %v16034_v29 }
  0xf3   : > { %13977 = vmatmul.mubr.msk.bf16.gmra.mxu0 %vm1256_vm1, %v16021_v22 }
  0xf4   : > { %13980 = vmatprep.mubr.msk.bf16.mxu0 %vm1256_vm1, %v16009_v16 }
  0xfb   : > { %13981 = vmatmul.mubr.msk.bf16.gmra.mxu0 %vm1256_vm1, %v15995_v10 }
  0xfc   : > { %14020 = vmatprep.mubr.bf16.mxu0 %v21281_v6 }
 0x103   : > { %v12377_v12 = vpop.f32.mrf.mxu0  ;;  %v12489_v13 = vpop.f32.mrf.mxu1 }
 0x105   : > { %v12378_v14 = vpop.f32.mrf.mxu0  ;;  %v12490_v17 = vpop.f32.mrf.mxu1 }
 0x106   : > { %v12379_v24 = vadd.f32 %v12378_v14, %v12377_v12  ;;  %v12491_v25 = vadd.f32 %v12490_v17, %v12489_v13 }
 0x107   : > { %v12380_v18 = vpop.f32.mrf.mxu0  ;;  %v12492_v19 = vpop.f32.mrf.mxu1 }
 0x109   : > { %v12381_v20 = vpop.f32.mrf.mxu0  ;;  %v12493_v23 = vpop.f32.mrf.mxu1 }
 0x10a   : > { %v12382_v26 = vadd.f32 %v12381_v20, %v12380_v18  ;;  %v12494_v28 = vadd.f32 %v12493_v23, %v12492_v19 }
 0x10b   : > { %v12383_v30 = vpop.f32.mrf.mxu0  ;;  %v12495_v31 = vpop.f32.mrf.mxu1 }
 0x10c   : > { %v16323_v32 = vpack.c.bf16 %v12382_v26, %v12379_v24  ;;  %v16325_v35 = vpack.c.bf16 %v12494_v28, %v12491_v25 }
 0x10d   : > { %v12384_v38 = vpop.f32.mrf.mxu0  ;;  %v12496_v40 = vpop.f32.mrf.mxu1 }
 0x10e   : > { %13987 = vmatmul.mubr.msk.bf16.vlgmr.msra.gmra.mxu1 %vm1256_vm1, %v16323_v32  ;;  %14021 = vmatmul.mubr.msk.bf16.vlgmr.msra.gmra.mxu0 %vm1256_vm1, %v16325_v35  ;;  %v12385_v48 = vadd.f32 %v12384_v38, %v12383_v30  ;;  %v12497_v50 = vadd.f32 %v12496_v40, %v12495_v31 }
 0x10f   : > { %v12386_v42 = vpop.f32.mrf.mxu0  ;;  %v12498_v43 = vpop.f32.mrf.mxu1  ;;  %14053 = vmatpush3.bf16.msra.mxu1 %v1928_v36  ;;  %14087 = vmatpush3.bf16.msra.mxu0 %v2129_v37  ;;  %v16360_v37 = vld [vmem:[%s21351_s2 + $0x14] sm:$0xf] }
 0x110   : > { %15341 = vmatprep.subr.msk.bf16.mxu1 %vm1305_vm0, %v16360_v37 }
 0x111   : > { %v12387_v44 = vpop.f32.mrf.mxu0  ;;  %v12499_v47 = vpop.f32.mrf.mxu1 }
 0x112   : > { %v12388_v51 = vadd.f32 %v12387_v44, %v12386_v42  ;;  %v12500_v52 = vadd.f32 %v12499_v47, %v12498_v43  ;;  %v16367_v42 = vld [vmem:[%s21351_s2 + $0x18] sm:$0xf] }
 0x113   : > { %v12389_v53 = vpop.f32.mrf.mxu0  ;;  %v12501_v54 = vpop.f32.mrf.mxu1  ;;  %15342 = vmatprep.subr.msk.bf16.mxu0 %vm1305_vm0, %v16367_v42 }
 0x114   : > { %v16333_v55 = vpack.c.bf16 %v12388_v51, %v12385_v48  ;;  %v16335_v56 = vpack.c.bf16 %v12500_v52, %v12497_v50 }
 0x115   : > { %v12390_v57 = vpop.f32.mrf.mxu0  ;;  %v12502_v58 = vpop.f32.mrf.mxu1 }
 0x116   : > { %13990 = vmatprep.mubr.msk.bf16.mxu1 %vm1256_vm1, %v16333_v55  ;;  %14024 = vmatprep.mubr.msk.bf16.mxu0 %vm1256_vm1, %v16335_v56  ;;  %v12391_v63 = vadd.f32 %v12390_v57, %v12389_v53  ;;  %v12503_v0 = vadd.f32 %v12502_v58, %v12501_v54 }
 0x117   : > { %v12392_v59 = vpop.f32.mrf.mxu0  ;;  %v12504_v60 = vpop.f32.mrf.mxu1 }
 0x119   : > { %v12393_v61 = vpop.f32.mrf.mxu0  ;;  %v12505_v62 = vpop.f32.mrf.mxu1 }
 0x11a   : > { %v12394_v1 = vadd.f32 %v12393_v61, %v12392_v59  ;;  %v12506_v2 = vadd.f32 %v12505_v62, %v12504_v60 }
 0x11b   : > { %v12395_v3 = vpop.f32.mrf.mxu0  ;;  %v12507_v4 = vpop.f32.mrf.mxu1 }
 0x11c   : > { %v16341_v7 = vpack.c.bf16 %v12394_v1, %v12391_v63  ;;  %v16343_v8 = vpack.c.bf16 %v12506_v2, %v12503_v0 }
 0x11d   : > { %v12396_v11 = vpop.f32.mrf.mxu0  ;;  %v12508_v12 = vpop.f32.mrf.mxu1 }
 0x11e   : > { %13991 = vmatmul.mubr.msk.bf16.gmra.mxu1 %vm1256_vm1, %v16341_v7  ;;  %14025 = vmatmul.mubr.msk.bf16.gmra.mxu0 %vm1256_vm1, %v16343_v8  ;;  %v12397_v19 = vadd.f32 %v12396_v11, %v12395_v3  ;;  %v12509_v20 = vadd.f32 %v12508_v12, %v12507_v4 }
 0x11f   : > { %v12398_v13 = vpop.f32.mrf.mxu0  ;;  %v12510_v14 = vpop.f32.mrf.mxu1 }
 0x121   : > { %v12399_v17 = vpop.f32.mrf.mxu0  ;;  %v12511_v18 = vpop.f32.mrf.mxu1 }
 0x122   : > { %v12400_v23 = vadd.f32 %v12399_v17, %v12398_v13  ;;  %v12512_v24 = vadd.f32 %v12511_v18, %v12510_v14 }
 0x123   : > { %v12401_v25 = vpop.f32.mrf.mxu0  ;;  %v12513_v26 = vpop.f32.mrf.mxu1 }
 0x124   : > { %v16349_v28 = vpack.c.bf16 %v12400_v23, %v12397_v19  ;;  %v16351_v30 = vpack.c.bf16 %v12512_v24, %v12509_v20 }
 0x125   : > { %v12402_v31 = vpop.f32.mrf.mxu0  ;;  %v12514_v36 = vpop.f32.mrf.mxu1 }
 0x126   : > { %13994 = vmatprep.mubr.msk.bf16.mxu1 %vm1256_vm1, %v16349_v28  ;;  %14028 = vmatprep.mubr.msk.bf16.mxu0 %vm1256_vm1, %v16351_v30  ;;  %v12403_v47 = vadd.f32 %v12402_v31, %v12401_v25  ;;  %v12515_v48 = vadd.f32 %v12514_v36, %v12513_v26 }
 0x127   : > { %v12404_v38 = vpop.f32.mrf.mxu0  ;;  %v12516_v40 = vpop.f32.mrf.mxu1 }
 0x129   : > { %v12405_v43 = vpop.f32.mrf.mxu0  ;;  %v12517_v44 = vpop.f32.mrf.mxu1 }
 0x12a   : > { %v12406_v50 = vadd.f32 %v12405_v43, %v12404_v38  ;;  %v12518_v51 = vadd.f32 %v12517_v44, %v12516_v40 }
 0x12b   : > { %v12407_v52 = vpop.f32.mrf.mxu0  ;;  %v12519_v53 = vpop.f32.mrf.mxu1 }
 0x12c   : > { %v16371_v54 = vpack.c.bf16 %v12406_v50, %v12403_v47  ;;  %v16373_v57 = vpack.c.bf16 %v12518_v51, %v12515_v48 }
 0x12d   : > { %v12408_v58 = vpop.f32.mrf.mxu0  ;;  %v12520_v59 = vpop.f32.mrf.mxu1 }
 0x12e   : > { %13995 = vmatmul.mubr.msk.bf16.gmra.mxu1 %vm1256_vm1, %v16371_v54  ;;  %14029 = vmatmul.mubr.msk.bf16.gmra.mxu0 %vm1256_vm1, %v16373_v57  ;;  %v12409_v0 = vadd.f32 %v12408_v58, %v12407_v52  ;;  %v12521_v1 = vadd.f32 %v12520_v59, %v12519_v53 }
 0x12f   : > { %v12410_v60 = vpop.f32.mrf.mxu0  ;;  %v12522_v61 = vpop.f32.mrf.mxu1 }
 0x131   : > { %v12411_v62 = vpop.f32.mrf.mxu0  ;;  %v12523_v63 = vpop.f32.mrf.mxu1 }
 0x132   : > { %v12412_v2 = vadd.f32 %v12411_v62, %v12410_v60  ;;  %v12524_v3 = vadd.f32 %v12523_v63, %v12522_v61 }
 0x133   : > { %v12413_v4 = vpop.f32.mrf.mxu0  ;;  %v12525_v11 = vpop.f32.mrf.mxu1 }
 0x134   : > { %v16379_v12 = vpack.c.bf16 %v12412_v2, %v12409_v0  ;;  %v16381_v13 = vpack.c.bf16 %v12524_v3, %v12521_v1 }
 0x135   : > { %v12414_v14 = vpop.f32.mrf.mxu0  ;;  %v12526_v17 = vpop.f32.mrf.mxu1 }
 0x136   : > { %13998 = vmatprep.mubr.msk.bf16.mxu1 %vm1256_vm1, %v16379_v12  ;;  %14032 = vmatprep.mubr.msk.bf16.mxu0 %vm1256_vm1, %v16381_v13  ;;  %v12415_v24 = vadd.f32 %v12414_v14, %v12413_v4  ;;  %v12527_v25 = vadd.f32 %v12526_v17, %v12525_v11 }
 0x137   : > { %v12416_v18 = vpop.f32.mrf.mxu0  ;;  %v12528_v19 = vpop.f32.mrf.mxu1 }
 0x139   : > { %v12417_v20 = vpop.f32.mrf.mxu0  ;;  %v12529_v23 = vpop.f32.mrf.mxu1 }
 0x13a   : > { %v12418_v26 = vadd.f32 %v12417_v20, %v12416_v18  ;;  %v12530_v31 = vadd.f32 %v12529_v23, %v12528_v19 }
 0x13b   : > { %v12419_v36 = vpop.f32.mrf.mxu0  ;;  %v12531_v38 = vpop.f32.mrf.mxu1 }
 0x13c   : > { %v16387_v40 = vpack.c.bf16 %v12418_v26, %v12415_v24  ;;  %v16389_v43 = vpack.c.bf16 %v12530_v31, %v12527_v25 }
 0x13d   : > { %v12420_v44 = vpop.f32.mrf.mxu0  ;;  %v12532_v47 = vpop.f32.mrf.mxu1 }
 0x13e   : > { %13999 = vmatmul.mubr.msk.bf16.gmra.mxu1 %vm1256_vm1, %v16387_v40  ;;  %14033 = vmatmul.mubr.msk.bf16.gmra.mxu0 %vm1256_vm1, %v16389_v43  ;;  %v12421_v53 = vadd.f32 %v12420_v44, %v12419_v36  ;;  %v12533_v58 = vadd.f32 %v12532_v47, %v12531_v38 }
 0x13f   : > { %v12422_v48 = vpop.f32.mrf.mxu0  ;;  %v12534_v50 = vpop.f32.mrf.mxu1 }
 0x141   : > { %v12423_v51 = vpop.f32.mrf.mxu0  ;;  %v12535_v52 = vpop.f32.mrf.mxu1 }
 0x142   : > { %v12424_v59 = vadd.f32 %v12423_v51, %v12422_v48  ;;  %v12536_v60 = vadd.f32 %v12535_v52, %v12534_v50 }
 0x143   : > { %v12425_v61 = vpop.f32.mrf.mxu0  ;;  %v12537_v62 = vpop.f32.mrf.mxu1 }
 0x144   : > { %v16395_v63 = vpack.c.bf16 %v12424_v59, %v12421_v53  ;;  %v16397_v0 = vpack.c.bf16 %v12536_v60, %v12533_v58 }
 0x145   : > { %v12426_v1 = vpop.f32.mrf.mxu0  ;;  %v12538_v2 = vpop.f32.mrf.mxu1 }
 0x146   : > { %14002 = vmatprep.mubr.msk.bf16.mxu1 %vm1256_vm1, %v16395_v63  ;;  %14036 = vmatprep.mubr.msk.bf16.mxu0 %vm1256_vm1, %v16397_v0  ;;  %v12427_v17 = vadd.f32 %v12426_v1, %v12425_v61  ;;  %v12539_v18 = vadd.f32 %v12538_v2, %v12537_v62 }
 0x147   : > { %v12428_v3 = vpop.f32.mrf.mxu0  ;;  %v12540_v4 = vpop.f32.mrf.mxu1 }
 0x149   : > { %v12429_v11 = vpop.f32.mrf.mxu0  ;;  %v12541_v14 = vpop.f32.mrf.mxu1 }
 0x14a   : > { %v12430_v19 = vadd.f32 %v12429_v11, %v12428_v3  ;;  %v12542_v20 = vadd.f32 %v12541_v14, %v12540_v4 }
 0x14b   : > { %v12431_v23 = vpop.f32.mrf.mxu0  ;;  %v12543_v24 = vpop.f32.mrf.mxu1 }
 0x14c   : > { %v16403_v25 = vpack.c.bf16 %v12430_v19, %v12427_v17  ;;  %v16405_v26 = vpack.c.bf16 %v12542_v20, %v12539_v18 }
 0x14d   : > { %v12432_v31 = vpop.f32.mrf.mxu0  ;;  %v12544_v36 = vpop.f32.mrf.mxu1 }
 0x14e   : > { %14003 = vmatmul.mubr.msk.bf16.gmra.mxu1 %vm1256_vm1, %v16403_v25  ;;  %14037 = vmatmul.mubr.msk.bf16.gmra.mxu0 %vm1256_vm1, %v16405_v26  ;;  %v12433_v50 = vadd.f32 %v12432_v31, %v12431_v23  ;;  %v12545_v51 = vadd.f32 %v12544_v36, %v12543_v24 }
 0x14f   : > { %v12434_v38 = vpop.f32.mrf.mxu0  ;;  %v12546_v44 = vpop.f32.mrf.mxu1 }
 0x151   : > { %v12435_v47 = vpop.f32.mrf.mxu0  ;;  %v12547_v48 = vpop.f32.mrf.mxu1 }
 0x152   : > { %v12436_v52 = vadd.f32 %v12435_v47, %v12434_v38  ;;  %v12548_v53 = vadd.f32 %v12547_v48, %v12546_v44 }
 0x153   : > { %v12437_v58 = vpop.f32.mrf.mxu0  ;;  %v12549_v59 = vpop.f32.mrf.mxu1 }
 0x154   : > { %v16411_v60 = vpack.c.bf16 %v12436_v52, %v12433_v50  ;;  %v16413_v61 = vpack.c.bf16 %v12548_v53, %v12545_v51 }
 0x155   : > { %v12438_v62 = vpop.f32.mrf.mxu0  ;;  %v12550_v1 = vpop.f32.mrf.mxu1 }
 0x156   : > { %14006 = vmatprep.mubr.msk.bf16.mxu1 %vm1256_vm1, %v16411_v60  ;;  %14040 = vmatprep.mubr.msk.bf16.mxu0 %vm1256_vm1, %v16413_v61  ;;  %v12439_v14 = vadd.f32 %v12438_v62, %v12437_v58  ;;  %v12551_v17 = vadd.f32 %v12550_v1, %v12549_v59 }
 0x157   : > { %v12440_v2 = vpop.f32.mrf.mxu0  ;;  %v12552_v3 = vpop.f32.mrf.mxu1 }
 0x159   : > { %v12441_v4 = vpop.f32.mrf.mxu0  ;;  %v12553_v11 = vpop.f32.mrf.mxu1 }
 0x15a   : > { %v12442_v18 = vadd.f32 %v12441_v4, %v12440_v2  ;;  %v12554_v19 = vadd.f32 %v12553_v11, %v12552_v3 }
 0x15b   : > { %v12443_v20 = vpop.f32.mrf.mxu0  ;;  %v12555_v23 = vpop.f32.mrf.mxu1 }
 0x15c   : > { %v16419_v24 = vpack.c.bf16 %v12442_v18, %v12439_v14  ;;  %v16421_v31 = vpack.c.bf16 %v12554_v19, %v12551_v17 }
 0x15d   : > { %v12444_v36 = vpop.f32.mrf.mxu0  ;;  %v12556_v38 = vpop.f32.mrf.mxu1 }
 0x15e   : > { %14007 = vmatmul.mubr.msk.bf16.gmra.mxu1 %vm1256_vm1, %v16419_v24  ;;  %14041 = vmatmul.mubr.msk.bf16.gmra.mxu0 %vm1256_vm1, %v16421_v31  ;;  %v12445_v51 = vadd.f32 %v12444_v36, %v12443_v20  ;;  %v12557_v52 = vadd.f32 %v12556_v38, %v12555_v23 }
 0x15f   : > { %v12446_v44 = vpop.f32.mrf.mxu0  ;;  %v12558_v47 = vpop.f32.mrf.mxu1 }
 0x161   : > { %v12447_v48 = vpop.f32.mrf.mxu0  ;;  %v12559_v50 = vpop.f32.mrf.mxu1 }
 0x162   : > { %v12448_v53 = vadd.f32 %v12447_v48, %v12446_v44  ;;  %v12560_v58 = vadd.f32 %v12559_v50, %v12558_v47 }
 0x163   : > { %v12449_v59 = vpop.f32.mrf.mxu0  ;;  %v12561_v62 = vpop.f32.mrf.mxu1 }
 0x164   : > { %v16427_v1 = vpack.c.bf16 %v12448_v53, %v12445_v51  ;;  %v16429_v2 = vpack.c.bf16 %v12560_v58, %v12557_v52 }
 0x165   : > { %v12450_v3 = vpop.f32.mrf.mxu0  ;;  %v12562_v4 = vpop.f32.mrf.mxu1 }
 0x166   : > { %14010 = vmatprep.mubr.msk.bf16.mxu1 %vm1256_vm1, %v16427_v1  ;;  %14044 = vmatprep.mubr.msk.bf16.mxu0 %vm1256_vm1, %v16429_v2  ;;  %v12451_v19 = vadd.f32 %v12450_v3, %v12449_v59  ;;  %v12563_v20 = vadd.f32 %v12562_v4, %v12561_v62 }
 0x167   : > { %v12452_v11 = vpop.f32.mrf.mxu0  ;;  %v12564_v14 = vpop.f32.mrf.mxu1 }
 0x169   : > { %v12453_v17 = vpop.f32.mrf.mxu0  ;;  %v12565_v18 = vpop.f32.mrf.mxu1 }
 0x16a   : > { %v12454_v23 = vadd.f32 %v12453_v17, %v12452_v11  ;;  %v12566_v36 = vadd.f32 %v12565_v18, %v12564_v14 }
 0x16b   : > { %v12455_v38 = vpop.f32.mrf.mxu0  ;;  %v12567_v44 = vpop.f32.mrf.mxu1 }
 0x16c   : > { %v16435_v47 = vpack.c.bf16 %v12454_v23, %v12451_v19  ;;  %v16437_v48 = vpack.c.bf16 %v12566_v36, %v12563_v20 }
 0x16d   : > { %v12456_v50 = vpop.f32.mrf.mxu0  ;;  %v12568_v51 = vpop.f32.mrf.mxu1 }
 0x16e   : > { %14011 = vmatmul.mubr.msk.bf16.gmra.mxu1 %vm1256_vm1, %v16435_v47  ;;  %14045 = vmatmul.mubr.msk.bf16.gmra.mxu0 %vm1256_vm1, %v16437_v48  ;;  %v12457_v62 = vadd.f32 %v12456_v50, %v12455_v38  ;;  %v12569_v3 = vadd.f32 %v12568_v51, %v12567_v44 }
 0x16f   : > { %v12458_v52 = vpop.f32.mrf.mxu0  ;;  %v12570_v53 = vpop.f32.mrf.mxu1 }
 0x171   : > { %v12459_v58 = vpop.f32.mrf.mxu0  ;;  %v12571_v59 = vpop.f32.mrf.mxu1 }
 0x172   : > { %v12460_v4 = vadd.f32 %v12459_v58, %v12458_v52  ;;  %v12572_v11 = vadd.f32 %v12571_v59, %v12570_v53 }
 0x173   : > { %v12461_v14 = vpop.f32.mrf.mxu0  ;;  %v12573_v17 = vpop.f32.mrf.mxu1 }
 0x174   : > { %v16443_v18 = vpack.c.bf16 %v12460_v4, %v12457_v62  ;;  %v16445_v19 = vpack.c.bf16 %v12572_v11, %v12569_v3 }
 0x175   : > { %v12462_v20 = vpop.f32.mrf.mxu0  ;;  %v12574_v23 = vpop.f32.mrf.mxu1 }
 0x176   : > { %14014 = vmatprep.mubr.msk.bf16.mxu1 %vm1256_vm1, %v16443_v18  ;;  %14048 = vmatprep.mubr.msk.bf16.mxu0 %vm1256_vm1, %v16445_v19  ;;  %v12463_v50 = vadd.f32 %v12462_v20, %v12461_v14  ;;  %v12575_v51 = vadd.f32 %v12574_v23, %v12573_v17  ;;  %v2330_v17 = vsel %vm1305_vm0, %v16360_v37, 0  ;;  %v2528_v20 = vsel %vm1305_vm0, %v16367_v42, 0 }
 0x177   : > { %v12464_v36 = vpop.f32.mrf.mxu0  ;;  %v12576_v6 = vpop.f32.mrf.mxu1 }
 0x179   : > { %v12465_v38 = vpop.f32.mrf.mxu0  ;;  %v12577_v44 = vpop.f32.mrf.mxu1 }
 0x17a   : > { %v12466_v52 = vadd.f32 %v12465_v38, %v12464_v36  ;;  %v12578_v53 = vadd.f32 %v12577_v44, %v12576_v6 }
 0x17b   : > { %v16451_v58 = vpop.f32.mrf.mxu0 }
 0x17c   : > { %v16453_v59 = vpack.c.bf16 %v12466_v52, %v12463_v50  ;;  %v16455_v62 = vpack.c.bf16 %v12578_v53, %v12575_v51 }
 0x17d   : > { %v16457_v3 = vpop.f32.mrf.mxu0 }
 0x17e   : > { %14015 = vmatmul.mubr.msk.bf16.gmra.mxu1 %vm1256_vm1, %v16453_v59  ;;  %14049 = vmatmul.mubr.msk.bf16.gmra.mxu0 %vm1256_vm1, %v16455_v62 }
 0x17f   : > { %14054 = vmatprep.mubr.msk.bf16.mxu1 %vm1256_vm1, %v16323_v32  ;;  %14088 = vmatprep.mubr.msk.bf16.mxu0 %vm1256_vm1, %v16075_v49  ;;  %v16467_v6 = vpop.f32.mrf.mxu0  ;;  %v16486_v49 = vld [vmem:[%s21351_s2 + $0x1c] sm:$0xf]  ;;  %v16491_v32 = vld [vmem:[%s21351_s2 + $0x20] sm:$0xf] }
 0x181   : > { %v16469_v4 = vpop.f32.mrf.mxu0 }
 0x183   : > { %v16471_v11 = vpop.f32.mrf.mxu0 }
 0x185   : > { %v16473_v14 = vpop.f32.mrf.mxu0 }
 0x186   : > { %14055 = vmatmul.mubr.msk.bf16.vlgmr.msra.gmra.mxu1 %vm1256_vm1, %v16333_v55  ;;  %14089 = vmatmul.mubr.msk.bf16.vlgmr.msra.gmra.mxu0 %vm1256_vm1, %v16065_v45 }
 0x187   : > { %14058 = vmatprep.mubr.msk.bf16.mxu1 %vm1256_vm1, %v16341_v7  ;;  %14092 = vmatprep.mubr.msk.bf16.mxu0 %vm1256_vm1, %v16053_v39  ;;  %v16497_v37 = vpop.f32.mrf.mxu0 }
 0x188   : > { %14121 = vmatpush3.bf16.msra.mxu1 %v2330_v17  ;;  %14155 = vmatpush3.bf16.msra.mxu0 %v2528_v20 }
 0x189   : > { %v16499_v42 = vpop.f32.mrf.mxu0  ;;  %15343 = vmatprep.subr.msk.bf16.mxu1 %vm1305_vm0, %v16486_v49  ;;  %15344 = vmatprep.subr.msk.bf16.mxu0 %vm1305_vm0, %v16491_v32 }
 0x18a   : > { %21352 = vst [vmem:[#allocation17_spill] sm:$0xff] %v16499_v42 }
 0x18b   : > { %v16505_v23 = vpop.f32.mrf.mxu0 }
 0x18d   : > { %v16507_v36 = vpop.f32.mrf.mxu0 }
 0x18e   : > { %14059 = vmatmul.mubr.msk.bf16.gmra.mxu1 %vm1256_vm1, %v16349_v28  ;;  %14093 = vmatmul.mubr.msk.bf16.gmra.mxu0 %vm1256_vm1, %v16041_v33 }
 0x18f   : > { %14062 = vmatprep.mubr.msk.bf16.mxu1 %vm1256_vm1, %v16371_v54  ;;  %14096 = vmatprep.mubr.msk.bf16.mxu0 %vm1256_vm1, %v16029_v27  ;;  %v16517_v38 = vpop.f32.mrf.mxu0 }
 0x191   : > { %v16519_v44 = vpop.f32.mrf.mxu0 }
 0x192   : > { %21353 = vst [vmem:[#allocation18_spill] sm:$0xff] %v16519_v44 }
 0x193   : > { %v16521_v50 = vpop.f32.mrf.mxu0 }
 0x195   : > { %v16523_v51 = vpop.f32.mrf.mxu0 }
 0x196   : > { %14063 = vmatmul.mubr.msk.bf16.gmra.mxu1 %vm1256_vm1, %v16379_v12  ;;  %14097 = vmatmul.mubr.msk.bf16.gmra.mxu0 %vm1256_vm1, %v16017_v21 }
 0x197   : > { %14066 = vmatprep.mubr.msk.bf16.mxu1 %vm1256_vm1, %v16387_v40  ;;  %14100 = vmatprep.mubr.msk.bf16.mxu0 %vm1256_vm1, %v16005_v15  ;;  %v16533_v52 = vpop.f32.mrf.mxu0 }
 0x199   : > { %v16535_v53 = vpop.f32.mrf.mxu0 }
 0x19a   : > { %21354 = vst [vmem:[#allocation19_spill] sm:$0xff] %v16535_v53 }
 0x19b   : > { %v16537_v17 = vpop.f32.mrf.mxu0 }
 0x19d   : > { %v16539_v20 = vpop.f32.mrf.mxu0 }
 0x19e   : > { %14067 = vmatmul.mubr.msk.bf16.gmra.mxu1 %vm1256_vm1, %v16395_v63  ;;  %14101 = vmatmul.mubr.msk.bf16.gmra.mxu0 %vm1256_vm1, %v15993_v9 }
 0x19f   : > { %14070 = vmatprep.mubr.msk.bf16.mxu1 %vm1256_vm1, %v16403_v25  ;;  %14104 = vmatprep.mubr.msk.bf16.mxu0 %vm1256_vm1, %v16069_v46  ;;  %v16549_v42 = vpop.f32.mrf.mxu0 }
 0x1a1   : > { %v16551_v44 = vpop.f32.mrf.mxu0 }
 0x1a3   : > { %v16553_v53 = vpop.f32.mrf.mxu0 }
 0x1a4   : > { %21355 = vst [vmem:[#allocation20_spill] sm:$0xff] %v16553_v53 }
 0x1a5   : > { %v16555_v15 = vpop.f32.mrf.mxu0 }
 0x1a6   : > { %14071 = vmatmul.mubr.msk.bf16.gmra.mxu1 %vm1256_vm1, %v16411_v60  ;;  %14105 = vmatmul.mubr.msk.bf16.gmra.mxu0 %vm1256_vm1, %v16058_v41 }
 0x1a7   : > { %14074 = vmatprep.mubr.msk.bf16.mxu1 %vm1256_vm1, %v16419_v24  ;;  %14108 = vmatprep.mubr.msk.bf16.mxu0 %vm1256_vm1, %v16045_v34  ;;  %v16565_v46 = vpop.f32.mrf.mxu0 }
 0x1a9   : > { %v16567_v9 = vpop.f32.mrf.mxu0 }
 0x1aa   : > { %21356 = vst [vmem:[#allocation21_spill] sm:$0xff] %v16567_v9 }
 0x1ab   : > { %v16569_v21 = vpop.f32.mrf.mxu0 }
 0x1ac   : > { %21357 = vst [vmem:[#allocation22_spill] sm:$0xff] %v16569_v21 }
 0x1ad   : > { %v16571_v53 = vpop.f32.mrf.mxu0 }
 0x1ae   : > { %14075 = vmatmul.mubr.msk.bf16.gmra.mxu1 %vm1256_vm1, %v16427_v1  ;;  %14109 = vmatmul.mubr.msk.bf16.gmra.mxu0 %vm1256_vm1, %v16034_v29 }
 0x1af   : > { %14078 = vmatprep.mubr.msk.bf16.mxu1 %vm1256_vm1, %v16435_v47  ;;  %14112 = vmatprep.mubr.msk.bf16.mxu0 %vm1256_vm1, %v16021_v22  ;;  %v16581_v34 = vpop.f32.mrf.mxu0 }
 0x1b1   : > { %v16583_v41 = vpop.f32.mrf.mxu0 }
 0x1b2   : > { %21358 = vst [vmem:[#allocation23_spill] sm:$0xff] %v16583_v41  ;;  %v12469_v41 = vadd.f32 %v16457_v3, %v16451_v58  ;;  %v2924_v3 = vsel %vm1305_vm0, %v16491_v32, 0 }
 0x1b3   : > { %v16585_v9 = vpop.f32.mrf.mxu0 }
 0x1b4   : > { %21359 = vst [vmem:[#allocation24_spill] sm:$0xff] %v16585_v9 }
 0x1b5   : > { %v16587_v21 = vpop.f32.mrf.mxu0 }
 0x1b6   : > { %21360 = vst [vmem:[#allocation25_spill] sm:$0xff] %v16587_v21  ;;  %14079 = vmatmul.mubr.msk.bf16.gmra.mxu1 %vm1256_vm1, %v16443_v18  ;;  %14113 = vmatmul.mubr.msk.bf16.gmra.mxu0 %vm1256_vm1, %v16009_v16  ;;  %v12472_v21 = vadd.f32 %v16469_v4, %v16467_v6  ;;  %v16611_v16 = vpop.f32.mrf.mxu1 }
 0x1b7   : > { %14082 = vmatprep.mubr.msk.bf16.mxu1 %vm1256_vm1, %v16453_v59  ;;  %14116 = vmatprep.mubr.msk.bf16.mxu0 %vm1256_vm1, %v15995_v10  ;;  %v16597_v22 = vpop.f32.mrf.mxu0 }
 0x1b8   : > { %v16605_v29 = vpack.c.bf16 %v12472_v21, %v12469_v41  ;;  %v16619_v58 = vpop.f32.mrf.mxu1  ;;  %v2726_v41 = vsel %vm1305_vm0, %v16486_v49, 0 }
 0x1b9   : > { %v16603_v9 = vpop.f32.mrf.mxu0 }
 0x1ba   : > { %21361 = vst [vmem:[#allocation26_spill] sm:$0xff] %v16603_v9 }
 0x1bb   : > { %v16613_v10 = vpop.f32.mrf.mxu0 }
 0x1bc   : > { %21362 = vst [vmem:[#allocation27_spill] sm:$0xff] %v16613_v10 }
 0x1bd   : > { %v16621_v21 = vpop.f32.mrf.mxu0 }
 0x1be   : > { %14083 = vmatmul.mubr.msk.bf16.gmra.mxu1 %vm1256_vm1, %v16605_v29  ;;  %14117 = vmatmul.mubr.msk.bf16.gmra.mxu0 %vm1256_vm1, %v15988_v5  ;;  %21363 = vst [vmem:[#allocation28_spill] sm:$0xff] %v16621_v21 }
 0x1bf   : > { %14122 = vmatprep.mubr.msk.bf16.mxu1 %vm1256_vm1, %v16325_v35  ;;  %14156 = vmatprep.mubr.msk.bf16.mxu0 %vm1256_vm1, %v16333_v55  ;;  %v16631_v35 = vpop.f32.mrf.mxu1  ;;  %v16633_v6 = vpop.f32.mrf.mxu0 }
 0x1c0   : > { %21364 = vst [vmem:[#allocation29_spill] sm:$0xff] %v16633_v6 }
 0x1c1   : > { %v16639_v55 = vpop.f32.mrf.mxu1  ;;  %v16641_v4 = vpop.f32.mrf.mxu0 }
 0x1c2   : > { %21365 = vst [vmem:[#allocation30_spill] sm:$0xff] %v16641_v4 }
 0x1c6   : > { %14123 = vmatmul.mubr.msk.bf16.vlgmr.msra.gmra.mxu1 %vm1256_vm1, %v16335_v56  ;;  %14157 = vmatmul.mubr.msk.bf16.vlgmr.msra.gmra.mxu0 %vm1256_vm1, %v16341_v7 }
 0x1c7   : > { %14126 = vmatprep.mubr.msk.bf16.mxu1 %vm1256_vm1, %v16343_v8  ;;  %14160 = vmatprep.mubr.msk.bf16.mxu0 %vm1256_vm1, %v16349_v28 }
 0x1c8   : > { %14189 = vmatpush3.bf16.msra.mxu1 %v2726_v41  ;;  %14223 = vmatpush3.bf16.msra.mxu0 %v2924_v3 }
 0x1ce   : > { %v13988_v49 = vpop.f32.mrf.mxu1  ;;  %v14022_v32 = vpop.f32.mrf.mxu0  ;;  %14127 = vmatmul.mubr.msk.bf16.gmra.mxu1 %vm1256_vm1, %v16351_v30  ;;  %14161 = vmatmul.mubr.msk.bf16.gmra.mxu0 %vm1256_vm1, %v16371_v54 }
 0x1cf   : > { %v1561_v7 = vadd.f32 %v13988_v49, %v16471_v11  ;;  %14130 = vmatprep.mubr.msk.bf16.mxu1 %vm1256_vm1, %v16373_v57  ;;  %14164 = vmatprep.mubr.msk.bf16.mxu0 %vm1256_vm1, %v16379_v12 }
 0x1d0   : > { %v1552_v28 = vpop.f32.mrf.mxu1  ;;  %v1763_v41 = vpop.f32.mrf.mxu0 }
 0x1d1   : > { %v16652_v3 = vadd.f32 %v14022_v32, %v1561_v7  ;;  %v1553_v4 = vadd.f32 %v1552_v28, %v16473_v14 }
 0x1d2   : > { %v13989_v9 = vpop.f32.mrf.mxu1  ;;  %v14023_v54 = vpop.f32.mrf.mxu0 }
 0x1d3   : > { %v16655_v6 = vadd.f32 %v1763_v41, %v1553_v4  ;;  %v1564_v21 = vadd.f32 %v13989_v9, %v16497_v37 }
 0x1d4   : > { %v16668_v12 = vpop.f32.mrf.mxu1  ;;  %v16670_v11 = vpop.f32.mrf.mxu0 }
 0x1d5   : > { %v16658_v10 = vadd.f32 %v14023_v54, %v1564_v21  ;;  %21366 = vst [vmem:[#allocation31_spill] sm:$0xff] %v16670_v11 }
 0x1d6   : > { %14131 = vmatmul.mubr.msk.bf16.gmra.mxu1 %vm1256_vm1, %v16381_v13  ;;  %14165 = vmatmul.mubr.msk.bf16.gmra.mxu0 %vm1256_vm1, %v16387_v40 }
 0x1d7   : > { %14134 = vmatprep.mubr.msk.bf16.mxu1 %vm1256_vm1, %v16389_v43  ;;  %14168 = vmatprep.mubr.msk.bf16.mxu0 %vm1256_vm1, %v16395_v63 }
 0x1de   : > { %v13992_v9 = vpop.f32.mrf.mxu1  ;;  %v14026_v14 = vpop.f32.mrf.mxu0  ;;  %14135 = vmatmul.mubr.msk.bf16.gmra.mxu1 %vm1256_vm1, %v16397_v0  ;;  %14169 = vmatmul.mubr.msk.bf16.gmra.mxu0 %vm1256_vm1, %v16403_v25 }
 0x1df   : > { %v1577_v40 = vadd.f32 %v13992_v9, %v16505_v23  ;;  %14138 = vmatprep.mubr.msk.bf16.mxu1 %vm1256_vm1, %v16405_v26  ;;  %14172 = vmatprep.mubr.msk.bf16.mxu0 %vm1256_vm1, %v16411_v60 }
 0x1e0   : > { %v1568_v63 = vpop.f32.mrf.mxu1  ;;  %v1779_v37 = vpop.f32.mrf.mxu0 }
 0x1e1   : > { %v16681_v21 = vadd.f32 %v14026_v14, %v1577_v40  ;;  %v1569_v4 = vadd.f32 %v1568_v63, %v16507_v36 }
 0x1e2   : > { %v13993_v49 = vpop.f32.mrf.mxu1  ;;  %v14027_v25 = vpop.f32.mrf.mxu0 }
 0x1e3   : > { %v16684_v32 = vadd.f32 %v1779_v37, %v1569_v4  ;;  %v1580_v7 = vadd.f32 %v13993_v49, %v16517_v38 }
 0x1e4   : > { %v16697_v60 = vpop.f32.mrf.mxu1  ;;  %v16699_v23 = vpop.f32.mrf.mxu0 }
 0x1e5   : > { %v16687_v28 = vadd.f32 %v14027_v25, %v1580_v7  ;;  %v21367_v7 = vmov 0  }
 0x1e6   : > { %14139 = vmatmul.mubr.msk.bf16.gmra.mxu1 %vm1256_vm1, %v16413_v61  ;;  %14173 = vmatmul.mubr.msk.bf16.gmra.mxu0 %vm1256_vm1, %v16419_v24 }
 0x1e7   : > { %14142 = vmatprep.mubr.msk.bf16.mxu1 %vm1256_vm1, %v16421_v31  ;;  %14176 = vmatprep.mubr.msk.bf16.mxu0 %vm1256_vm1, %v16427_v1 }
 0x1ee   : > { %v13996_v36 = vpop.f32.mrf.mxu1  ;;  %v14030_v38 = vpop.f32.mrf.mxu0  ;;  %14143 = vmatmul.mubr.msk.bf16.gmra.mxu1 %vm1256_vm1, %v16429_v2  ;;  %14177 = vmatmul.mubr.msk.bf16.gmra.mxu0 %vm1256_vm1, %v16435_v47 }
 0x1ef   : > { %v1593_v24 = vadd.f32 %v13996_v36, %v16521_v50  ;;  %14146 = vmatprep.mubr.msk.bf16.mxu1 %vm1256_vm1, %v16437_v48  ;;  %14180 = vmatprep.mubr.msk.bf16.mxu0 %vm1256_vm1, %v16443_v18  ;;  %v12581_v18 = vadd.f32 %v16619_v58, %v16611_v16  ;;  %v12584_v50 = vadd.f32 %v16639_v55, %v16631_v35 }
 0x1f0   : > { %v1584_v1 = vpop.f32.mrf.mxu1  ;;  %v1795_v41 = vpop.f32.mrf.mxu0 }
 0x1f1   : > { %v16710_v54 = vadd.f32 %v14030_v38, %v1593_v24  ;;  %v1585_v9 = vadd.f32 %v1584_v1, %v16523_v51  ;;  %v16730_v51 = vpack.c.bf16 %v12584_v50, %v12581_v18  ;;  %v21370_v50 = vld [vmem:[#allocation9_spill] sm:$0xff] }
 0x1f2   : > { %v13997_v14 = vpop.f32.mrf.mxu1  ;;  %v14031_v47 = vpop.f32.mrf.mxu0 }
 0x1f3   : > { %v16713_v40 = vadd.f32 %v1795_v41, %v1585_v9  ;;  %v1596_v63 = vadd.f32 %v13997_v14, %v16533_v52 }
 0x1f4   : > { %v16732_v52 = vpop.f32.mrf.mxu1  ;;  %v16734_v4 = vpop.f32.mrf.mxu0 }
 0x1f5   : > { %v16716_v37 = vadd.f32 %v14031_v47, %v1596_v63 }
 0x1f6   : > { %14147 = vmatmul.mubr.msk.bf16.gmra.mxu1 %vm1256_vm1, %v16445_v19  ;;  %14181 = vmatmul.mubr.msk.bf16.gmra.mxu0 %vm1256_vm1, %v16453_v59 }
 0x1f7   : > { %14150 = vmatprep.mubr.msk.bf16.mxu1 %vm1256_vm1, %v16455_v62  ;;  %14184 = vmatprep.mubr.msk.bf16.mxu0 %vm1256_vm1, %v16605_v29 }
 0x1fe   : > { %v14000_v49 = vpop.f32.mrf.mxu1  ;;  %v14034_v59 = vpop.f32.mrf.mxu0  ;;  %14151 = vmatmul.mubr.msk.bf16.gmra.mxu1 %vm1256_vm1, %v16730_v51  ;;  %14185 = vmatmul.mubr.bf16.gmra.mxu0 %v21367_v7 }
 0x1ff   : > { %v1609_v29 = vadd.f32 %v14000_v49, %v16537_v17  ;;  %14224 = vmatprep.mubr.msk.bf16.mxu0 %vm1256_vm1, %v16335_v56  ;;  %14190 = vmatprep.mubr.msk.bf16.mxu1 %vm1256_vm1, %v16065_v45 }
 0x200   : > { %v1600_v16 = vpop.f32.mrf.mxu1  ;;  %v1811_v58 = vpop.f32.mrf.mxu0 }
 0x201   : > { %v16744_v35 = vadd.f32 %v14034_v59, %v1609_v29  ;;  %v1601_v55 = vadd.f32 %v1600_v16, %v16539_v20  ;;  %v21373_v29 = vld [vmem:[#allocation16_spill] sm:$0xff]  ;;  %v21374_v16 = vld [vmem:[#allocation22_spill] sm:$0xff] }
 0x202   : > { %v14001_v25 = vpop.f32.mrf.mxu1  ;;  %v14035_v36 = vpop.f32.mrf.mxu0 }
 0x203   : > { %v16747_v38 = vadd.f32 %v1811_v58, %v1601_v55  ;;  %v1612_v24 = vadd.f32 %v14001_v25, %v16549_v42 }
 0x204   : > { %v1603_v1 = vpop.f32.mrf.mxu1  ;;  %v1814_v41 = vpop.f32.mrf.mxu0 }
 0x205   : > { %v16750_v17 = vadd.f32 %v14035_v36, %v1612_v24  ;;  %v1604_v56 = vadd.f32 %v1603_v1, %v16551_v44 }
 0x206   : > { %14191 = vmatmul.mubr.msk.bf16.vlgmr.msra.gmra.mxu1 %vm1256_vm1, %v16053_v39  ;;  %14225 = vmatmul.mubr.msk.bf16.vlgmr.msra.gmra.mxu0 %vm1256_vm1, %v16343_v8  ;;  %v21368_v39 = vld [vmem:[#allocation20_spill] sm:$0xff]  ;;  %v21369_v8 = vld [vmem:[#allocation11_spill] sm:$0xff] }
 0x207   : > { %v16757_v45 = vadd.f32 %v1814_v41, %v1604_v56  ;;  %14228 = vmatprep.mubr.msk.bf16.mxu0 %vm1256_vm1, %v16351_v30  ;;  %14194 = vmatprep.mubr.msk.bf16.mxu1 %vm1256_vm1, %v16041_v33 }
 0x20e   : > { %v14004_v42 = vpop.f32.mrf.mxu1  ;;  %v14038_v20 = vpop.f32.mrf.mxu0  ;;  %14195 = vmatmul.mubr.msk.bf16.gmra.mxu1 %vm1256_vm1, %v16029_v27  ;;  %14229 = vmatmul.mubr.msk.bf16.gmra.mxu0 %vm1256_vm1, %v16373_v57 }
 0x20f   : > { %v1625_v44 = vadd.f32 %v14004_v42, %v21368_v39  ;;  %14232 = vmatprep.mubr.msk.bf16.mxu0 %vm1256_vm1, %v16381_v13  ;;  %14198 = vmatprep.mubr.msk.bf16.mxu1 %vm1256_vm1, %v21369_v8  ;;  %v21371_v13 = vld [vmem:[#allocation7_spill] sm:$0xff]  ;;  %v21376_v42 = vld [vmem:[#allocation14_spill] sm:$0xff]  ;;  %v21379_v8 = vld [vmem:[#allocation24_spill] sm:$0xff] }
 0x210   : > { %v1616_v30 = vpop.f32.mrf.mxu1  ;;  %v1827_v9 = vpop.f32.mrf.mxu0 }
 0x211   : > { %v16772_v14 = vadd.f32 %v14038_v20, %v1625_v44  ;;  %v1617_v33 = vadd.f32 %v1616_v30, %v16555_v15  ;;  %v21378_v44 = vld [vmem:[#allocation12_spill] sm:$0xff] }
 0x212   : > { %v14005_v63 = vpop.f32.mrf.mxu1  ;;  %v14039_v57 = vpop.f32.mrf.mxu0 }
 0x213   : > { %v16775_v47 = vadd.f32 %v1827_v9, %v1617_v33  ;;  %v1628_v27 = vadd.f32 %v14005_v63, %v16565_v46  ;;  %v21381_v63 = vld [vmem:[#allocation25_spill] sm:$0xff] }
 0x214   : > { %v16788_v15 = vpop.f32.mrf.mxu1  ;;  %v16790_v49 = vpop.f32.mrf.mxu0 }
 0x215   : > { %v16778_v18 = vadd.f32 %v14039_v57, %v1628_v27  ;;  %21372 = vst [vmem:[#allocation20_spill] sm:$0xff] %v16790_v49 }
 0x216   : > { %14199 = vmatmul.mubr.msk.bf16.gmra.mxu1 %vm1256_vm1, %v21370_v50  ;;  %14233 = vmatmul.mubr.msk.bf16.gmra.mxu0 %vm1256_vm1, %v16389_v43 }
 0x217   : > { %14236 = vmatprep.mubr.msk.bf16.mxu0 %vm1256_vm1, %v16397_v0  ;;  %14202 = vmatprep.mubr.msk.bf16.mxu1 %vm1256_vm1, %v21371_v13  ;;  %v21375_v0 = vld [vmem:[#allocation15_spill] sm:$0xff] }
 0x21e   : > { %v14008_v46 = vpop.f32.mrf.mxu1  ;;  %v14042_v59 = vpop.f32.mrf.mxu0  ;;  %14203 = vmatmul.mubr.msk.bf16.gmra.mxu1 %vm1256_vm1, %v21373_v29  ;;  %14237 = vmatmul.mubr.msk.bf16.gmra.mxu0 %vm1256_vm1, %v16405_v26 }
 0x21f   : > { %v1641_v43 = vadd.f32 %v14008_v46, %v21374_v16  ;;  %14240 = vmatprep.mubr.msk.bf16.mxu0 %vm1256_vm1, %v16413_v61  ;;  %14206 = vmatprep.mubr.msk.bf16.mxu1 %vm1256_vm1, %v21375_v0  ;;  %v21377_v61 = vld [vmem:[#allocation13_spill] sm:$0xff] }
 0x220   : > { %v1632_v58 = vpop.f32.mrf.mxu1  ;;  %v1843_v55 = vpop.f32.mrf.mxu0 }
 0x221   : > { %v16801_v25 = vadd.f32 %v14042_v59, %v1641_v43  ;;  %v1633_v36 = vadd.f32 %v1632_v58, %v16571_v53  ;;  %v21382_v59 = vld [vmem:[#allocation8_spill] sm:$0xff]  ;;  %v21383_v43 = vld [vmem:[#allocation27_spill] sm:$0xff] }
 0x222   : > { %v14009_v24 = vpop.f32.mrf.mxu1  ;;  %v14043_v26 = vpop.f32.mrf.mxu0 }
 0x223   : > { %v16804_v1 = vadd.f32 %v1843_v55, %v1633_v36  ;;  %v1644_v56 = vadd.f32 %v14009_v24, %v16581_v34  ;;  %v21384_v36 = vld [vmem:[#allocation28_spill] sm:$0xff] }
 0x224   : > { %v16817_v53 = vpop.f32.mrf.mxu1  ;;  %v16819_v20 = vpop.f32.mrf.mxu0 }
 0x225   : > { %v16807_v41 = vadd.f32 %v14043_v26, %v1644_v56 }
 0x226   : > { %14207 = vmatmul.mubr.msk.bf16.gmra.mxu1 %vm1256_vm1, %v21376_v42  ;;  %14241 = vmatmul.mubr.msk.bf16.gmra.mxu0 %vm1256_vm1, %v16421_v31 }
 0x227   : > { %14244 = vmatprep.mubr.msk.bf16.mxu0 %vm1256_vm1, %v16429_v2  ;;  %14210 = vmatprep.mubr.msk.bf16.mxu1 %vm1256_vm1, %v21377_v61  ;;  %v21380_v2 = vld [vmem:[#allocation10_spill] sm:$0xff]  ;;  %v21385_v61 = vld [vmem:[#allocation29_spill] sm:$0xff] }
 0x22e   : > { %v14012_v34 = vpop.f32.mrf.mxu1  ;;  %v14046_v39 = vpop.f32.mrf.mxu0  ;;  %14211 = vmatmul.mubr.msk.bf16.gmra.mxu1 %vm1256_vm1, %v21378_v44  ;;  %14245 = vmatmul.mubr.msk.bf16.gmra.mxu0 %vm1256_vm1, %v16437_v48 }
 0x22f   : > { %v1657_v31 = vadd.f32 %v14012_v34, %v21379_v8  ;;  %14248 = vmatprep.mubr.msk.bf16.mxu0 %vm1256_vm1, %v16445_v19  ;;  %14214 = vmatprep.mubr.msk.bf16.mxu1 %vm1256_vm1, %v21380_v2 }
 0x230   : > { %v1648_v30 = vpop.f32.mrf.mxu1  ;;  %v1859_v9 = vpop.f32.mrf.mxu0 }
 0x231   : > { %v16830_v33 = vadd.f32 %v14046_v39, %v1657_v31  ;;  %v1649_v27 = vadd.f32 %v1648_v30, %v21381_v63 }
 0x232   : > { %v14013_v57 = vpop.f32.mrf.mxu1  ;;  %v14047_v48 = vpop.f32.mrf.mxu0 }
 0x233   : > { %v16833_v50 = vadd.f32 %v1859_v9, %v1649_v27  ;;  %v1660_v13 = vadd.f32 %v14013_v57, %v16597_v22 }
 0x234   : > { %v16846_v19 = vpop.f32.mrf.mxu1  ;;  %v16848_v29 = vpop.f32.mrf.mxu0 }
 0x235   : > { %v16836_v46 = vadd.f32 %v14047_v48, %v1660_v13 }
 0x236   : > { %14215 = vmatmul.mubr.msk.bf16.gmra.mxu1 %vm1256_vm1, %v21382_v59  ;;  %14249 = vmatmul.mubr.msk.bf16.gmra.mxu0 %vm1256_vm1, %v16455_v62  ;;  %v15593_v62 = vld [vmem:[%s21339_s0 + $0x4] ss:$8 sps:$4 sm:$0xff]  }
 0x237   : > { %14252 = vmatprep.mubr.msk.bf16.mxu0 %vm1256_vm1, %v16730_v51  ;;  %14218 = vmatprep.mubr.msk.bf16.mxu1 %vm1256_vm1, %v15988_v5  ;;  %v15594_v5 = vld [vmem:[%s21339_s0 + $0x104] ss:$8 sps:$4 sm:$0xff]  }
 0x23e   : > { %v14016_v22 = vpop.f32.mrf.mxu1  ;;  %v14050_v16 = vpop.f32.mrf.mxu0  ;;  %14219 = vmatmul.mubr.bf16.gmra.mxu1 %v21367_v7  ;;  %14253 = vmatmul.mubr.bf16.gmra.mxu0 %v21367_v7 }
 0x23f   : > { %v1673_v0 = vadd.f32 %v14016_v22, %v21383_v43  ;;  %3341 = vmatprep.mubr.bf16.mxu1 %v15593_v62  ;;  %3518 = vmatprep.mubr.bf16.mxu0 %v15594_v5 }
 0x240   : > { %v1664_v51 = vpop.f32.mrf.mxu1  ;;  %v1875_v58 = vpop.f32.mrf.mxu0 }
 0x241   : > { %v16859_v55 = vadd.f32 %v14050_v16, %v1673_v0  ;;  %v1665_v24 = vadd.f32 %v1664_v51, %v21384_v36 }
 0x242   : > { %v14017_v56 = vpop.f32.mrf.mxu1  ;;  %v14051_v26 = vpop.f32.mrf.mxu0 }
 0x243   : > { %v16862_v42 = vadd.f32 %v1875_v58, %v1665_v24  ;;  %v1676_v34 = vadd.f32 %v14017_v56, %v21385_v61 }
 0x244   : > { %v16865_v39 = vpop.f32.mrf.mxu1  ;;  %v16867_v44 = vpop.f32.mrf.mxu0 }
 0x245   : > { %v16869_v8 = vadd.f32 %v14051_v26, %v1676_v34 }
 0x246   : > { %v14056_v31 = vpop.f32.mrf.mxu1  ;;  %v14090_v2 = vpop.f32.mrf.mxu0 }
 0x247   : > { %v2093_v30 = vadd.f32 %v14056_v31, %v16652_v3 }
 0x248   : > { %v1964_v9 = vpop.f32.mrf.mxu1  ;;  %v2165_v63 = vpop.f32.mrf.mxu0 }
 0x249   : > { %v16872_v27 = vadd.f32 %v14090_v2, %v2093_v30  ;;  %v2091_v57 = vadd.f32 %v1964_v9, %v16655_v6 }
 0x24a   : > { %v14057_v13 = vpop.f32.mrf.mxu1  ;;  %v14091_v48 = vpop.f32.mrf.mxu0 }
 0x24b   : > { %v16875_v59 = vadd.f32 %v2165_v63, %v2091_v57  ;;  %v2094_v22 = vadd.f32 %v14057_v13, %v16658_v10 }
 0x24c   : > { %v16878_v16 = vpop.f32.mrf.mxu1  ;;  %v16880_v43 = vpop.f32.mrf.mxu0 }
 0x24d   : > { %21386 = vst [vmem:[#allocation11_spill] sm:$0xff] %v16878_v16  ;;  %21387 = vst [vmem:[#allocation9_spill] sm:$0xff] %v16880_v43  ;;  %v16882_v0 = vadd.f32 %v14091_v48, %v2094_v22 }
 0x24e   : > { %v14060_v62 = vpop.f32.mrf.mxu1  ;;  %v14094_v3 = vpop.f32.mrf.mxu0 }
 0x24f   : > { %v2097_v5 = vadd.f32 %v14060_v62, %v16681_v21 }
 0x250   : > { %v1980_v51 = vpop.f32.mrf.mxu1  ;;  %v2181_v58 = vpop.f32.mrf.mxu0 }
 0x251   : > { %v16885_v36 = vadd.f32 %v14094_v3, %v2097_v5  ;;  %v2095_v6 = vadd.f32 %v1980_v51, %v16684_v32 }
 0x252   : > { %v14061_v24 = vpop.f32.mrf.mxu1  ;;  %v14095_v56 = vpop.f32.mrf.mxu0 }
 0x253   : > { %v16888_v26 = vadd.f32 %v2181_v58, %v2095_v6  ;;  %v2098_v10 = vadd.f32 %v14061_v24, %v16687_v28 }
 0x254   : > { %v16891_v61 = vpop.f32.mrf.mxu1  ;;  %v16893_v34 = vpop.f32.mrf.mxu0 }
 0x255   : > { %21388 = vst [vmem:[#allocation7_spill] sm:$0xff] %v16891_v61  ;;  %21389 = vst [vmem:[#allocation16_spill] sm:$0xff] %v16893_v34  ;;  %v16895_v31 = vadd.f32 %v14095_v56, %v2098_v10 }
 0x256   : > { %v14064_v2 = vpop.f32.mrf.mxu1  ;;  %v14098_v21 = vpop.f32.mrf.mxu0 }
 0x257   : > { %v2101_v30 = vadd.f32 %v14064_v2, %v16710_v54 }
 0x258   : > { %v1996_v9 = vpop.f32.mrf.mxu1  ;;  %v2197_v63 = vpop.f32.mrf.mxu0 }
 0x259   : > { %v16898_v57 = vadd.f32 %v14098_v21, %v2101_v30  ;;  %v2099_v32 = vadd.f32 %v1996_v9, %v16713_v40 }
 0x25a   : > { %v14065_v13 = vpop.f32.mrf.mxu1  ;;  %v14099_v48 = vpop.f32.mrf.mxu0 }
 0x25b   : > { %v16901_v22 = vadd.f32 %v2197_v63, %v2099_v32  ;;  %v2102_v28 = vadd.f32 %v14065_v13, %v16716_v37 }
 0x25c   : > { %v16904_v62 = vpop.f32.mrf.mxu1  ;;  %v16906_v3 = vpop.f32.mrf.mxu0 }
 0x25d   : > { %v16908_v5 = vadd.f32 %v14099_v48, %v2102_v28 }
 0x25e   : > { %v14068_v51 = vpop.f32.mrf.mxu1  ;;  %v14102_v54 = vpop.f32.mrf.mxu0 }
 0x25f   : > { %v2105_v58 = vadd.f32 %v14068_v51, %v16744_v35 }
 0x260   : > { %v2012_v6 = vpop.f32.mrf.mxu1  ;;  %v2213_v24 = vpop.f32.mrf.mxu0 }
 0x261   : > { %v16911_v56 = vadd.f32 %v14102_v54, %v2105_v58  ;;  %v2103_v40 = vadd.f32 %v2012_v6, %v16747_v38 }
 0x262   : > { %v14069_v10 = vpop.f32.mrf.mxu1  ;;  %v14103_v2 = vpop.f32.mrf.mxu0 }
 0x263   : > { %v16914_v21 = vadd.f32 %v2213_v24, %v2103_v40  ;;  %v2106_v37 = vadd.f32 %v14069_v10, %v16750_v17 }
 0x264   : > { %v16917_v30 = vpop.f32.mrf.mxu1  ;;  %v16919_v9 = vpop.f32.mrf.mxu0 }
 0x265   : > { %v16921_v63 = vadd.f32 %v14103_v2, %v2106_v37 }
 0x266   : > { %v14072_v32 = vpop.f32.mrf.mxu1  ;;  %v14106_v35 = vpop.f32.mrf.mxu0 }
 0x267   : > { %v2109_v13 = vadd.f32 %v14072_v32, %v16772_v14 }
 0x268   : > { %v2028_v48 = vpop.f32.mrf.mxu1  ;;  %v2229_v28 = vpop.f32.mrf.mxu0 }
 0x269   : > { %v16924_v51 = vadd.f32 %v14106_v35, %v2109_v13  ;;  %v2107_v38 = vadd.f32 %v2028_v48, %v16775_v47 }
 0x26a   : > { %v14073_v54 = vpop.f32.mrf.mxu1  ;;  %v14107_v58 = vpop.f32.mrf.mxu0 }
 0x26b   : > { %v16927_v6 = vadd.f32 %v2229_v28, %v2107_v38  ;;  %v2110_v17 = vadd.f32 %v14073_v54, %v16778_v18 }
 0x26c   : > { %v16930_v24 = vpop.f32.mrf.mxu1  ;;  %v16932_v40 = vpop.f32.mrf.mxu0 }
 0x26d   : > { %21390 = vst [vmem:[#allocation22_spill] sm:$0xff] %v16930_v24  ;;  %21391 = vst [vmem:[#allocation15_spill] sm:$0xff] %v16932_v40  ;;  %v16934_v10 = vadd.f32 %v14107_v58, %v2110_v17 }
 0x26e   : > { %v14076_v2 = vpop.f32.mrf.mxu1  ;;  %v14110_v14 = vpop.f32.mrf.mxu0 }
 0x26f   : > { %v2113_v37 = vadd.f32 %v14076_v2, %v16801_v25 }
 0x270   : > { %v2044_v32 = vpop.f32.mrf.mxu1  ;;  %v2245_v35 = vpop.f32.mrf.mxu0 }
 0x271   : > { %v16937_v13 = vadd.f32 %v14110_v14, %v2113_v37  ;;  %v2111_v47 = vadd.f32 %v2044_v32, %v16804_v1 }
 0x272   : > { %v14077_v48 = vpop.f32.mrf.mxu1  ;;  %v14111_v28 = vpop.f32.mrf.mxu0 }
 0x273   : > { %v16940_v38 = vadd.f32 %v2245_v35, %v2111_v47  ;;  %v2114_v18 = vadd.f32 %v14077_v48, %v16807_v41 }
 0x274   : > { %v16943_v54 = vpop.f32.mrf.mxu1  ;;  %v16945_v58 = vpop.f32.mrf.mxu0 }
 0x275   : > { %21392 = vst [vmem:[#allocation14_spill] sm:$0xff] %v16945_v58  ;;  %v16947_v17 = vadd.f32 %v14111_v28, %v2114_v18 }
 0x276   : > { %v14080_v7 = vpop.f32.mrf.mxu1  ;;  %v14114_v25 = vpop.f32.mrf.mxu0 }
 0x277   : > { %v2117_v2 = vadd.f32 %v14080_v7, %v16830_v33 }
 0x278   : > { %v2060_v14 = vpop.f32.mrf.mxu1  ;;  %v2261_v37 = vpop.f32.mrf.mxu0 }
 0x279   : > { %v16950_v43 = vadd.f32 %v14114_v25, %v2117_v2  ;;  %v2115_v1 = vadd.f32 %v2060_v14, %v16833_v50 }
 0x27a   : > { %v14081_v32 = vpop.f32.mrf.mxu1  ;;  %v14115_v35 = vpop.f32.mrf.mxu0 }
 0x27b   : > { %v16953_v47 = vadd.f32 %v2261_v37, %v2115_v1  ;;  %v2118_v41 = vadd.f32 %v14081_v32, %v16836_v46 }
 0x27c   : > { %v16956_v48 = vpop.f32.mrf.mxu1  ;;  %v16958_v28 = vpop.f32.mrf.mxu0 }
 0x27d   : > { %v16960_v18 = vadd.f32 %v14115_v35, %v2118_v41 }
 0x27e   : > { %v14084_v40 = vpop.f32.mrf.mxu1  ;;  %v14118_v7 = vpop.f32.mrf.mxu0 }
 0x27f   : > { %v2121_v33 = vadd.f32 %v14084_v40, %v16859_v55 }
 0x280   : > { %v2076_v25 = vpop.f32.mrf.mxu1  ;;  %v2277_v2 = vpop.f32.mrf.mxu0 }
 0x281   : > { %v16963_v24 = vadd.f32 %v14118_v7, %v2121_v33  ;;  %v2119_v50 = vadd.f32 %v2076_v25, %v16862_v42 }
 0x282   : > { %v14085_v14 = vpop.f32.mrf.mxu1  ;;  %v14119_v37 = vpop.f32.mrf.mxu0 }
 0x283   : > { %v16966_v1 = vadd.f32 %v2277_v2, %v2119_v50  ;;  %v2122_v46 = vadd.f32 %v14085_v14, %v16869_v8 }
 0x284   : > { %v16969_v32 = vpop.f32.mrf.mxu1  ;;  %v16971_v35 = vpop.f32.mrf.mxu0 }
 0x285   : > { %21393 = vst [vmem:[#allocation13_spill] sm:$0xff] %v16971_v35  ;;  %v16973_v41 = vadd.f32 %v14119_v37, %v2122_v46 }
 0x286   : > { %v14124_v34 = vpop.f32.mrf.mxu1  ;;  %v14158_v55 = vpop.f32.mrf.mxu0 }
 0x287   : > { %21394 = vst [vmem:[#allocation12_spill] sm:$0xff] %v16973_v41  ;;  %v2495_v40 = vadd.f32 %v14124_v34, %v16872_v27 }
 0x288   : > { %v2366_v7 = vpop.f32.mrf.mxu1  ;;  %v2564_v33 = vpop.f32.mrf.mxu0 }
 0x289   : > { %v16976_v16 = vadd.f32 %v14158_v55, %v2495_v40  ;;  %v2493_v42 = vadd.f32 %v2366_v7, %v16875_v59 }
 0x28a   : > { %v14125_v25 = vpop.f32.mrf.mxu1  ;;  %v14159_v2 = vpop.f32.mrf.mxu0 }
 0x28b   : > { %v16979_v50 = vadd.f32 %v2564_v33, %v2493_v42  ;;  %v2496_v8 = vadd.f32 %v14125_v25, %v16882_v0 }
 0x28c   : > { %v16982_v14 = vpop.f32.mrf.mxu1  ;;  %v16984_v37 = vpop.f32.mrf.mxu0 }
 0x28d   : > { %21395 = vst [vmem:[#allocation24_spill] sm:$0xff] %v16982_v14  ;;  %21396 = vst [vmem:[#allocation10_spill] sm:$0xff] %v16984_v37  ;;  %v16986_v46 = vadd.f32 %v14159_v2, %v2496_v8 }
 0x28e   : > { %v14128_v49 = vpop.f32.mrf.mxu1  ;;  %v14162_v27 = vpop.f32.mrf.mxu0 }
 0x28f   : > { %v2499_v34 = vadd.f32 %v14128_v49, %v16885_v36 }
 0x290   : > { %v2382_v55 = vpop.f32.mrf.mxu1  ;;  %v2580_v40 = vpop.f32.mrf.mxu0 }
 0x291   : > { %v16989_v58 = vadd.f32 %v14162_v27, %v2499_v34  ;;  %v2497_v59 = vadd.f32 %v2382_v55, %v16888_v26 }
 0x292   : > { %v14129_v7 = vpop.f32.mrf.mxu1  ;;  %v14163_v33 = vpop.f32.mrf.mxu0 }
 0x293   : > { %v16992_v42 = vadd.f32 %v2580_v40, %v2497_v59  ;;  %v2500_v0 = vadd.f32 %v14129_v7, %v16895_v31 }
 0x294   : > { %v16995_v25 = vpop.f32.mrf.mxu1  ;;  %v16997_v2 = vpop.f32.mrf.mxu0 }
 0x295   : > { %21397 = vst [vmem:[#allocation25_spill] sm:$0xff] %v16995_v25  ;;  %21398 = vst [vmem:[#allocation8_spill] sm:$0xff] %v16997_v2  ;;  %v16999_v8 = vadd.f32 %v14163_v33, %v2500_v0 }
 0x296   : > { %v14132_v37 = vpop.f32.mrf.mxu1  ;;  %v14166_v49 = vpop.f32.mrf.mxu0 }
 0x297   : > { %v2503_v36 = vadd.f32 %v14132_v37, %v16898_v57 }
 0x298   : > { %v2398_v27 = vpop.f32.mrf.mxu1  ;;  %v2596_v34 = vpop.f32.mrf.mxu0 }
 0x299   : > { %v17002_v14 = vadd.f32 %v14166_v49, %v2503_v36  ;;  %v2501_v26 = vadd.f32 %v2398_v27, %v16901_v22 }
 0x29a   : > { %v14133_v55 = vpop.f32.mrf.mxu1  ;;  %v14167_v40 = vpop.f32.mrf.mxu0 }
 0x29b   : > { %v17005_v59 = vadd.f32 %v2596_v34, %v2501_v26  ;;  %v2504_v31 = vadd.f32 %v14133_v55, %v16908_v5 }
 0x29c   : > { %v17008_v7 = vpop.f32.mrf.mxu1  ;;  %v17010_v33 = vpop.f32.mrf.mxu0 }
 0x29d   : > { %v17012_v0 = vadd.f32 %v14167_v40, %v2504_v31 }
 0x29e   : > { %v14136_v2 = vpop.f32.mrf.mxu1  ;;  %v14170_v57 = vpop.f32.mrf.mxu0 }
 0x29f   : > { %v2507_v37 = vadd.f32 %v14136_v2, %v16911_v56 }
 0x2a0   : > { %v2414_v49 = vpop.f32.mrf.mxu1  ;;  %v2612_v36 = vpop.f32.mrf.mxu0 }
 0x2a1   : > { %v17015_v25 = vadd.f32 %v14170_v57, %v2507_v37  ;;  %v2505_v22 = vadd.f32 %v2414_v49, %v16914_v21 }
 0x2a2   : > { %v14137_v27 = vpop.f32.mrf.mxu1  ;;  %v14171_v34 = vpop.f32.mrf.mxu0 }
 0x2a3   : > { %v17018_v26 = vadd.f32 %v2612_v36, %v2505_v22  ;;  %v2508_v5 = vadd.f32 %v14137_v27, %v16921_v63 }
 0x2a4   : > { %v17021_v55 = vpop.f32.mrf.mxu1  ;;  %v17023_v40 = vpop.f32.mrf.mxu0 }
 0x2a5   : > { %v17025_v31 = vadd.f32 %v14171_v34, %v2508_v5 }
 0x2a6   : > { %v14140_v41 = vpop.f32.mrf.mxu1  ;;  %v14174_v56 = vpop.f32.mrf.mxu0 }
 0x2a7   : > { %v2511_v2 = vadd.f32 %v14140_v41, %v16924_v51 }
 0x2a8   : > { %v2430_v57 = vpop.f32.mrf.mxu1  ;;  %v2628_v37 = vpop.f32.mrf.mxu0 }
 0x2a9   : > { %v17028_v11 = vadd.f32 %v14174_v56, %v2511_v2  ;;  %v2509_v21 = vadd.f32 %v2430_v57, %v16927_v6 }
 0x2aa   : > { %v14141_v49 = vpop.f32.mrf.mxu1  ;;  %v14175_v36 = vpop.f32.mrf.mxu0 }
 0x2ab   : > { %v17031_v22 = vadd.f32 %v2628_v37, %v2509_v21  ;;  %v2512_v63 = vadd.f32 %v14141_v49, %v16934_v10 }
 0x2ac   : > { %v17034_v27 = vpop.f32.mrf.mxu1  ;;  %v17036_v34 = vpop.f32.mrf.mxu0 }
 0x2ad   : > { %21399 = vst [vmem:[#allocation27_spill] sm:$0xff] %v17031_v22  ;;  %21400 = vst [vmem:[#allocation28_spill] sm:$0xff] %v17034_v27  ;;  %v17038_v5 = vadd.f32 %v14175_v36, %v2512_v63 }
 0x2ae   : > { %21401 = vst [vmem:[#allocation29_spill] sm:$0xff] %v17036_v34  ;;  %v14144_v35 = vpop.f32.mrf.mxu1  ;;  %v14178_v51 = vpop.f32.mrf.mxu0 }
 0x2af   : > { %v2515_v41 = vadd.f32 %v14144_v35, %v16937_v13 }
 0x2b0   : > { %v2446_v56 = vpop.f32.mrf.mxu1  ;;  %v2644_v2 = vpop.f32.mrf.mxu0 }
 0x2b1   : > { %v17041_v61 = vadd.f32 %v14178_v51, %v2515_v41  ;;  %v2513_v6 = vadd.f32 %v2446_v56, %v16940_v38 }
 0x2b2   : > { %v14145_v57 = vpop.f32.mrf.mxu1  ;;  %v14179_v37 = vpop.f32.mrf.mxu0 }
 0x2b3   : > { %v17044_v21 = vadd.f32 %v2644_v2, %v2513_v6  ;;  %v2516_v10 = vadd.f32 %v14145_v57, %v16947_v17 }
 0x2b4   : > { %v17047_v49 = vpop.f32.mrf.mxu1  ;;  %v17049_v36 = vpop.f32.mrf.mxu0 }
 0x2b5   : > { %21402 = vst [vmem:[#allocation32_spill] sm:$0xff] %v17044_v21  ;;  %21403 = vst [vmem:[#allocation33_spill] sm:$0xff] %v17047_v49  ;;  %v17051_v63 = vadd.f32 %v14179_v37, %v2516_v10 }
 0x2b6   : > { %21404 = vst [vmem:[#allocation34_spill] sm:$0xff] %v17049_v36  ;;  %v14148_v22 = vpop.f32.mrf.mxu1  ;;  %v14182_v13 = vpop.f32.mrf.mxu0 }
 0x2b7   : > { %v2519_v35 = vadd.f32 %v14148_v22, %v16950_v43 }
 0x2b8   : > { %v2462_v51 = vpop.f32.mrf.mxu1  ;;  %v2660_v41 = vpop.f32.mrf.mxu0 }
 0x2b9   : > { %v17054_v34 = vadd.f32 %v14182_v13, %v2519_v35  ;;  %v2517_v38 = vadd.f32 %v2462_v51, %v16953_v47 }
 0x2ba   : > { %v14149_v56 = vpop.f32.mrf.mxu1  ;;  %v14183_v2 = vpop.f32.mrf.mxu0 }
 0x2bb   : > { %v17057_v6 = vadd.f32 %v2660_v41, %v2517_v38  ;;  %v2520_v17 = vadd.f32 %v14149_v56, %v16960_v18 }
 0x2bc   : > { %v17060_v57 = vpop.f32.mrf.mxu1  ;;  %v17062_v37 = vpop.f32.mrf.mxu0 }
 0x2bd   : > { %21405 = vst [vmem:[#allocation35_spill] sm:$0xff] %v17057_v6  ;;  %21406 = vst [vmem:[#allocation36_spill] sm:$0xff] %v17062_v37  ;;  %v17064_v10 = vadd.f32 %v14183_v2, %v2520_v17  ;;  %v21411_v6 = vld [vmem:[#allocation19_spill] sm:$0xff] }
 0x2be   : > { %v14152_v21 = vpop.f32.mrf.mxu1  ;;  %v14186_v43 = vpop.f32.mrf.mxu0 }
 0x2bf   : > { %v2523_v22 = vadd.f32 %v14152_v21, %v16963_v24  ;;  %v17084_v21 = vld [vmem:[%s21268_s3] ss:$0 sm:$0xff] }
 0x2c0   : > { %v2478_v13 = vpop.f32.mrf.mxu1  ;;  %v2676_v35 = vpop.f32.mrf.mxu0 }
 0x2c1   : > { %v17067_v27 = vadd.f32 %v14186_v43, %v2523_v22  ;;  %v2521_v47 = vadd.f32 %v2478_v13, %v16966_v1 }
 0x2c2   : > { %v17070_v51 = vpop.f32.mrf.mxu1  ;;  %v17072_v41 = vpop.f32.mrf.mxu0 }
 0x2c3   : > { %21407 = vst [vmem:[#allocation37_spill] sm:$0xff] %v17067_v27  ;;  %21408 = vst [vmem:[#allocation38_spill] sm:$0xff] %v17072_v41  ;;  %v17074_v18 = vadd.f32 %v2676_v35, %v2521_v47  ;;  %v17090_v35 = vld [vmem:[%s21269_s4] ss:$0 sm:$0xff] }
 0x2c4   : > { %v17076_v38 = vpop.f32.mrf.mxu1  ;;  %v17078_v56 = vpop.f32.mrf.mxu0 }
 0x2c5   : > { %21409 = vst [vmem:[#allocation39_spill] sm:$0xff] %v17074_v18  ;;  %21410 = vst [vmem:[#allocation40_spill] sm:$0xff] %v17078_v56 }
 0x2c6   : > { %v14192_v2 = vpop.f32.mrf.mxu1  ;;  %v14226_v17 = vpop.f32.mrf.mxu0 }
 0x2c7   : > { %v2891_v24 = vadd.f32 %v14192_v2, %v16976_v16  ;;  %v1588_v16 = vadd.f32 %v16732_v52, %v21411_v6 }
 0x2c8   : > { %v2762_v1 = vpop.f32.mrf.mxu1  ;;  %v2960_v43 = vpop.f32.mrf.mxu0 }
 0x2c9   : > { %v3089_v22 = vadd.f32 %v14226_v17, %v2891_v24  ;;  %v2889_v13 = vadd.f32 %v2762_v1, %v16979_v50  ;;  %v1899_v27 = vadd.f32 %v16734_v4, %v1588_v16 }
 0x2ca   : > { %v14193_v47 = vpop.f32.mrf.mxu1  ;;  %v14227_v36 = vpop.f32.mrf.mxu0 }
 0x2cb   : > { %v3128_v2 = vmul.f32 %v17084_v21, %v3089_v22  ;;  %v17095_v56 = vadd.f32 %v2960_v43, %v2889_v13  ;;  %v2892_v41 = vadd.f32 %v14193_v47, %v16986_v46  ;;  %v2100_v22 = vadd.f32 %v16904_v62, %v1899_v27 }
 0x2cc   : > { %v17098_v18 = vpop.f32.mrf.mxu1  ;;  %v17100_v17 = vpop.f32.mrf.mxu0 }
 0x2cd   : > { %21412 = vst [vmem:[#allocation19_spill] sm:$0xff] %v17095_v56  ;;  %21413 = vst [vmem:[#allocation41_spill] sm:$0xff] %v17100_v17  ;;  %v3167_v50 = vadd.f32 %v17090_v35, %v3128_v2  ;;  %v3090_v24 = vadd.f32 %v14227_v36, %v2892_v41  ;;  %v2301_v27 = vadd.f32 %v16906_v3, %v2100_v22 }
 0x2ce   : > { %v14196_v1 = vpop.f32.mrf.mxu1  ;;  %v14230_v49 = vpop.f32.mrf.mxu0 }
 0x2cf   : > { %v3129_v37 = vmul.f32 %v17084_v21, %v3090_v24  ;;  %v2895_v52 = vadd.f32 %v14196_v1, %v16989_v58  ;;  %v3231_v46 = vmul.f32 0.01, %v3167_v50  ;;  %vm3199_vm2 = vcmp.ge.f32.partialorder %v3167_v50, 0.0 }
 0x2d0   : > { %v2778_v6 = vpop.f32.mrf.mxu1  ;;  %v2976_v43 = vpop.f32.mrf.mxu0 }
 0x2d1   : > { %v3168_v13 = vadd.f32 %v17090_v35, %v3129_v37  ;;  %v3093_v47 = vadd.f32 %v14230_v49, %v2895_v52  ;;  %v2893_v2 = vadd.f32 %v2778_v6, %v16992_v42  ;;  %v3263_v37 = vsel %vm3199_vm2, %v3167_v50, %v3231_v46 }
 0x2d2   : > { %v14197_v36 = vpop.f32.mrf.mxu1  ;;  %v14231_v41 = vpop.f32.mrf.mxu0 }
 0x2d3   : > { %vm3200_vm3 = vcmp.ge.f32.partialorder %v3168_v13, 0.0  ;;  %v3232_v56 = vmul.f32 0.01, %v3168_v13  ;;  %v2896_v4 = vadd.f32 %v14197_v36, %v16999_v8  ;;  %v3132_v16 = vmul.f32 %v17084_v21, %v3093_v47 }
 0x2d4   : > { %v17111_v58 = vadd.f32 %v2976_v43, %v2893_v2  ;;  %v17113_v24 = vpop.f32.mrf.mxu1  ;;  %v17115_v62 = vpop.f32.mrf.mxu0  ;;  %v2502_v8 = vadd.f32 %v17008_v7, %v2301_v27  ;;  %v2104_v2 = vadd.f32 %v16917_v30, %v16757_v45 }
 0x2d5   : > { %v3264_v49 = vsel %vm3200_vm3, %v3168_v13, %v3232_v56  ;;  %v3094_v1 = vadd.f32 %v14231_v41, %v2896_v4  ;;  %v3171_v52 = vadd.f32 %v17090_v35, %v3132_v16 }
 0x2d6   : > { %v17118_v42 = vpack.c.bf16 %v3264_v49, %v3263_v37  ;;  %v14200_v6 = vpop.f32.mrf.mxu1  ;;  %v14234_v17 = vpop.f32.mrf.mxu0  ;;  %v2700_v7 = vadd.f32 %v17010_v33, %v2502_v8 }
 0x2d7   : > { %v3133_v43 = vmul.f32 %v17084_v21, %v3094_v1  ;;  %v2899_v47 = vadd.f32 %v14200_v6, %v17002_v14  ;;  %v3235_v50 = vmul.f32 0.01, %v3171_v52  ;;  %vm3203_vm4 = vcmp.ge.f32.partialorder %v3171_v52, 0.0 }
 0x2d8   : > { %v2794_v36 = vpop.f32.mrf.mxu1  ;;  %v2992_v3 = vpop.f32.mrf.mxu0  ;;  %v2305_v14 = vadd.f32 %v16919_v9, %v2104_v2 }
 0x2d9   : > { %v3172_v56 = vadd.f32 %v17090_v35, %v3133_v43  ;;  %v3097_v22 = vadd.f32 %v14234_v17, %v2899_v47  ;;  %v2897_v46 = vadd.f32 %v2794_v36, %v17005_v59  ;;  %v3267_v49 = vsel %vm3203_vm4, %v3171_v52, %v3235_v50 }
 0x2da   : > { %v14201_v13 = vpop.f32.mrf.mxu1  ;;  %v14235_v41 = vpop.f32.mrf.mxu0  ;;  %v2506_v59 = vadd.f32 %v17021_v55, %v2305_v14 }
 0x2db   : > { %vm3204_vm5 = vcmp.ge.f32.partialorder %v3172_v56, 0.0  ;;  %v3236_v4 = vmul.f32 0.01, %v3172_v56  ;;  %v3136_v16 = vmul.f32 %v17084_v21, %v3097_v22  ;;  %v3095_v45 = vadd.f32 %v2992_v3, %v2897_v46 }
 0x2dc   : > { %v2900_v30 = vadd.f32 %v14201_v13, %v17012_v0  ;;  %v2797_v27 = vpop.f32.mrf.mxu1  ;;  %v2995_v37 = vpop.f32.mrf.mxu0 }
 0x2dd   : > { %v3268_v17 = vsel %vm3204_vm5, %v3172_v56, %v3236_v4  ;;  %v2898_v1 = vadd.f32 %v2797_v27, %v2700_v7  ;;  %v3175_v33 = vadd.f32 %v17090_v35, %v3136_v16  ;;  %v3134_v9 = vmul.f32 %v17084_v21, %v3095_v45 }
 0x2de   : > { %v17133_v6 = vpack.c.bf16 %v3268_v17, %v3267_v49  ;;  %v14204_v8 = vpop.f32.mrf.mxu1  ;;  %v14238_v43 = vpop.f32.mrf.mxu0  ;;  %v3098_v47 = vadd.f32 %v14235_v41, %v2900_v30  ;;  %v2704_v56 = vadd.f32 %v17023_v40, %v2506_v59 }
 0x2df   : > { %v3096_v2 = vadd.f32 %v2995_v37, %v2898_v1  ;;  %v2903_v36 = vadd.f32 %v14204_v8, %v17015_v25  ;;  %v3173_v52 = vadd.f32 %v17090_v35, %v3134_v9  ;;  %vm3207_vm6 = vcmp.ge.f32.partialorder %v3175_v33, 0.0 }
 0x2e0   : > { %v2810_v0 = vpop.f32.mrf.mxu1  ;;  %v3008_v3 = vpop.f32.mrf.mxu0  ;;  %v3137_v50 = vmul.f32 %v17084_v21, %v3098_v47  ;;  %v3239_v41 = vmul.f32 0.01, %v3175_v33 }
 0x2e1   : > { %v3135_v55 = vmul.f32 %v17084_v21, %v3096_v2  ;;  %v3101_v22 = vadd.f32 %v14238_v43, %v2903_v36  ;;  %v2901_v46 = vadd.f32 %v2810_v0, %v17018_v26  ;;  %v3237_v14 = vmul.f32 0.01, %v3173_v52 }
 0x2e2   : > { %v14205_v13 = vpop.f32.mrf.mxu1  ;;  %v14239_v7 = vpop.f32.mrf.mxu0  ;;  %v3176_v4 = vadd.f32 %v17090_v35, %v3137_v50  ;;  %vm3205_vm7 = vcmp.ge.f32.partialorder %v3173_v52, 0.0  ;;  %v3271_v43 = vsel %vm3207_vm6, %v3175_v33, %v3239_v41 }
 0x2e3   : > { %v3174_v25 = vadd.f32 %v17090_v35, %v3135_v55  ;;  %v3140_v16 = vmul.f32 %v17084_v21, %v3101_v22  ;;  %v3099_v45 = vadd.f32 %v3008_v3, %v2901_v46  ;;  %v2904_v30 = vadd.f32 %v14205_v13, %v17025_v31 }
 0x2e4   : > { %v2813_v27 = vpop.f32.mrf.mxu1  ;;  %v3011_v37 = vpop.f32.mrf.mxu0  ;;  %vm3208_vm8 = vcmp.ge.f32.partialorder %v3176_v4, 0.0  ;;  %v3240_v40 = vmul.f32 0.01, %v3176_v4  ;;  %v3269_v2 = vsel %vm3205_vm7, %v3173_v52, %v3237_v14 }
 0x2e5   : > { %vm3206_vm9 = vcmp.ge.f32.partialorder %v3174_v25, 0.0  ;;  %v3238_v26 = vmul.f32 0.01, %v3174_v25  ;;  %v3179_v49 = vadd.f32 %v17090_v35, %v3140_v16  ;;  %v3138_v17 = vmul.f32 %v17084_v21, %v3099_v45 }
 0x2e6   : > { %v3102_v1 = vadd.f32 %v14239_v7, %v2904_v30  ;;  %v14208_v59 = vpop.f32.mrf.mxu1  ;;  %v14242_v8 = vpop.f32.mrf.mxu0  ;;  %v3272_v9 = vsel %vm3208_vm8, %v3176_v4, %v3240_v40  ;;  %v2902_v47 = vadd.f32 %v2813_v27, %v2704_v56 }
 0x2e7   : > { %v2907_v31 = vadd.f32 %v14208_v59, %v17028_v11  ;;  %v17151_v36 = vpack.c.bf16 %v3272_v9, %v3271_v43  ;;  %v3270_v0 = vsel %vm3206_vm9, %v3174_v25, %v3238_v26  ;;  %v3177_v22 = vadd.f32 %v17090_v35, %v3138_v17  ;;  %v21415_v43 = vld [vmem:[#allocation26_spill] sm:$0xff] }
 0x2e8   : > { %v17153_v3 = vpop.f32.mrf.mxu1  ;;  %v17155_v50 = vpop.f32.mrf.mxu0  ;;  %v17157_v55 = vpack.c.bf16 %v3270_v0, %v3269_v2  ;;  %v3141_v46 = vmul.f32 %v17084_v21, %v3102_v1  ;;  %v3100_v13 = vadd.f32 %v3011_v37, %v2902_v47  ;;  %v3243_v33 = vmul.f32 0.01, %v3179_v49 }
 0x2e9   : > { %21414 = vst [vmem:[#allocation42_spill] sm:$0xff] %v17151_v36  ;;  %v3105_v7 = vadd.f32 %v14242_v8, %v2907_v31  ;;  %vm3211_vm10 = vcmp.ge.f32.partialorder %v3179_v49, 0.0  ;;  %v3241_v45 = vmul.f32 0.01, %v3177_v22  ;;  %vm3209_vm12 = vcmp.ge.f32.partialorder %v3177_v22, 0.0 }
 0x2ea   : > { %v14209_v56 = vpop.f32.mrf.mxu1  ;;  %v14243_v41 = vpop.f32.mrf.mxu0  ;;  %v3180_v11 = vadd.f32 %v17090_v35, %v3141_v46  ;;  %v3139_v52 = vmul.f32 %v17084_v21, %v3100_v13  ;;  %v3275_v37 = vsel %vm3211_vm10, %v3179_v49, %v3243_v33  ;;  %v1652_v9 = vadd.f32 %v16846_v19, %v21415_v43 }
 0x2eb   : > { %v3144_v4 = vmul.f32 %v17084_v21, %v3105_v7  ;;  %v2908_v25 = vadd.f32 %v14209_v56, %v17038_v5  ;;  %v3273_v49 = vsel %vm3209_vm12, %v3177_v22, %v3241_v45 }
 0x2ec   : > { %v17165_v14 = vpop.f32.mrf.mxu1  ;;  %v17167_v16 = vpop.f32.mrf.mxu0  ;;  %vm3212_vm11 = vcmp.ge.f32.partialorder %v3180_v11, 0.0  ;;  %v3244_v30 = vmul.f32 0.01, %v3180_v11  ;;  %v3178_v27 = vadd.f32 %v17090_v35, %v3139_v52 }
 0x2ed   : > { %v3183_v40 = vadd.f32 %v17090_v35, %v3144_v4  ;;  %v3106_v26 = vadd.f32 %v14243_v41, %v2908_v25  ;;  %v21418_v41 = vld [vmem:[#allocation30_spill] sm:$0xff]  ;;  %v1915_v4 = vadd.f32 %v16848_v29, %v1652_v9 }
 0x2ee   : > { %v14212_v17 = vpop.f32.mrf.mxu1  ;;  %v14246_v1 = vpop.f32.mrf.mxu0  ;;  %v3276_v59 = vsel %vm3212_vm11, %v3180_v11, %v3244_v30  ;;  %vm3210_vm13 = vcmp.ge.f32.partialorder %v3178_v27, 0.0  ;;  %v3242_v8 = vmul.f32 0.01, %v3178_v27  ;;  %v21419_v30 = vld [vmem:[#allocation23_spill] sm:$0xff] }
 0x2ef   : > { %v2911_v5 = vadd.f32 %v14212_v17, %v17041_v61  ;;  %v17174_v47 = vpack.c.bf16 %v3276_v59, %v3275_v37  ;;  %v3145_v46 = vmul.f32 %v17084_v21, %v3106_v26  ;;  %v1668_v61 = vadd.f32 %v16865_v39, %v21418_v41  ;;  %v21420_v39 = vld [vmem:[#allocation18_spill] sm:$0xff] }
 0x2f0   : > { %v17176_v31 = vpop.f32.mrf.mxu1  ;;  %v17178_v2 = vpop.f32.mrf.mxu0  ;;  %v3274_v0 = vsel %vm3210_vm13, %v3178_v27, %v3242_v8  ;;  %v3247_v11 = vmul.f32 0.01, %v3183_v40  ;;  %vm3215_vm14 = vcmp.ge.f32.partialorder %v3183_v40, 0.0  ;;  %v1636_v27 = vadd.f32 %v16817_v53, %v21419_v30 }
 0x2f1   : > { %21416 = vst [vmem:[#allocation26_spill] sm:$0xff] %v17174_v47  ;;  %v3109_v13 = vadd.f32 %v14246_v1, %v2911_v5  ;;  %v17181_v33 = vpack.c.bf16 %v3274_v0, %v3273_v49  ;;  %v3184_v19 = vadd.f32 %v17090_v35, %v3145_v46  ;;  %v1572_v26 = vadd.f32 %v16697_v60, %v21420_v39  ;;  %v21422_v46 = vld [vmem:[#allocation17_spill] sm:$0xff] }
 0x2f2   : > { %v14213_v7 = vpop.f32.mrf.mxu1  ;;  %v14247_v56 = vpop.f32.mrf.mxu0  ;;  %v2116_v17 = vadd.f32 %v16956_v48, %v1915_v4  ;;  %v3279_v5 = vsel %vm3215_vm14, %v3183_v40, %v3247_v11  ;;  %v1556_v60 = vadd.f32 %v16668_v12, %v21422_v46  ;;  %v1911_v48 = vadd.f32 %v16819_v20, %v1636_v27  ;;  %v21423_v20 = vld [vmem:[#allocation21_spill] sm:$0xff] }
 0x2f3   : > { %21417 = vst [vmem:[#allocation43_spill] sm:$0xff] %v17181_v33  ;;  %v3148_v52 = vmul.f32 %v17084_v21, %v3109_v13  ;;  %v2912_v22 = vadd.f32 %v14213_v7, %v17051_v63  ;;  %vm3216_vm15 = vcmp.ge.f32.partialorder %v3184_v19, 0.0  ;;  %v3248_v37 = vmul.f32 0.01, %v3184_v19  ;;  %v21425_v27 = vld [vmem:[#allocation13_spill] sm:$0xff] }
 0x2f4   : > { %v17189_v25 = vpop.f32.mrf.mxu1  ;;  %v17191_v45 = vpop.f32.mrf.mxu0  ;;  %v1919_v63 = vadd.f32 %v16867_v44, %v1668_v61  ;;  %v1895_v44 = vadd.f32 %v16699_v23, %v1572_v26  ;;  %v2317_v40 = vadd.f32 %v16958_v28, %v2116_v17  ;;  %v21426_v26 = vld [vmem:[#allocation31_spill] sm:$0xff] }
 0x2f5   : > { %v3187_v1 = vadd.f32 %v17090_v35, %v3148_v52  ;;  %v3110_v29 = vadd.f32 %v14247_v56, %v2912_v22  ;;  %v3280_v43 = vsel %vm3216_vm15, %v3184_v19, %v3248_v37  ;;  %v2112_v19 = vadd.f32 %v16943_v54, %v1911_v48  ;;  %v21424_v22 = vld [vmem:[#allocation7_spill] sm:$0xff]  ;;  %v21430_v48 = vld [vmem:[#allocation20_spill] sm:$0xff] }
 0x2f6   : > { %v14216_v59 = vpop.f32.mrf.mxu1  ;;  %v14250_v8 = vpop.f32.mrf.mxu0  ;;  %v17200_v9 = vpack.c.bf16 %v3280_v43, %v3279_v5  ;;  %v2120_v13 = vadd.f32 %v16969_v32, %v1919_v63  ;;  %v1620_v32 = vadd.f32 %v16788_v15, %v21423_v20  ;;  %v2096_v30 = vadd.f32 %v21424_v22, %v1895_v44  ;;  %v21428_v63 = vld [vmem:[#allocation14_spill] sm:$0xff] }
 0x2f7   : > { %v3149_v53 = vmul.f32 %v17084_v21, %v3110_v29  ;;  %v2915_v7 = vadd.f32 %v14216_v59, %v17054_v34  ;;  %v3251_v56 = vmul.f32 0.01, %v3187_v1  ;;  %vm3219_vm0 = vcmp.ge.f32.partialorder %v3187_v1, 0.0  ;;  %v21427_v29 = vld [vmem:[#allocation12_spill] sm:$0xff] }
 0x2f8   : > { %21421 = vst [vmem:[#allocation30_spill] sm:$0xff] %v17200_v9  ;;  %v2858_v49 = vpop.f32.mrf.mxu1  ;;  %v17203_v0 = vpop.f32.mrf.mxu0  ;;  %v2518_v34 = vadd.f32 %v17060_v57, %v2317_v40  ;;  %v2321_v37 = vadd.f32 %v21425_v27, %v2120_v13  ;;  %v1891_v17 = vadd.f32 %v21426_v26, %v1556_v60  ;;  %v2313_v5 = vadd.f32 %v21428_v63, %v2112_v19  ;;  %v21432_v40 = vld [vmem:[#allocation37_spill] sm:$0xff] }
 0x2f9   : > { %v3188_v41 = vadd.f32 %v17090_v35, %v3149_v53  ;;  %v3113_v52 = vadd.f32 %v14250_v8, %v2915_v7  ;;  %v3283_v59 = vsel %vm3219_vm0, %v3187_v1, %v3251_v56  ;;  %v1907_v13 = vadd.f32 %v21430_v48, %v1620_v32  ;;  %v21431_v7 = vld [vmem:[#allocation36_spill] sm:$0xff] }
 0x2fa   : > { %v14217_v61 = vpop.f32.mrf.mxu1  ;;  %v14251_v11 = vpop.f32.mrf.mxu0  ;;  %v2522_v43 = vadd.f32 %v17076_v38, %v2321_v37  ;;  %v2716_v44 = vadd.f32 %v21431_v7, %v2518_v34 }
 0x2fb   : > { %v2916_v12 = vadd.f32 %v14217_v61, %v17064_v10  ;;  %vm3220_vm1 = vcmp.ge.f32.partialorder %v3188_v41, 0.0  ;;  %v3252_v23 = vmul.f32 0.01, %v3188_v41  ;;  %v3152_v39 = vmul.f32 %v17084_v21, %v3113_v52  ;;  %v21435_v52 = vld [vmem:[#allocation33_spill] sm:$0xff] }
 0x2fc   : > { %v2861_v4 = vpop.f32.mrf.mxu1  ;;  %v3059_v28 = vpop.f32.mrf.mxu0  ;;  %v2524_v10 = vadd.f32 %v17070_v51, %v21427_v29  ;;  %v2514_v38 = vadd.f32 %v21435_v52, %v2313_v5  ;;  %v21440_v5 = vld [vmem:[#allocation22_spill] sm:$0xff] }
 0x2fd   : > { %v3114_v54 = vadd.f32 %v14251_v11, %v2916_v12  ;;  %v3284_v15 = vsel %vm3220_vm1, %v3188_v41, %v3252_v23  ;;  %v3191_v46 = vadd.f32 %v17090_v35, %v3152_v39  ;;  %v21433_v41 = vld [vmem:[#allocation11_spill] sm:$0xff]  ;;  %v21434_v11 = vld [vmem:[#allocation16_spill] sm:$0xff]  ;;  %v21437_v23 = vld [vmem:[#allocation38_spill] sm:$0xff]  ;;  %v2914_v34 = vadd.f32 %v2861_v4, %v2716_v44 }
 0x2fe   : > { %v14220_v8 = vpop.f32.mrf.mxu1  ;;  %v14254_v57 = vpop.f32.mrf.mxu0  ;;  %v17226_v53 = vpack.c.bf16 %v3284_v15, %v3283_v59  ;;  %v2092_v61 = vadd.f32 %v21433_v41, %v1891_v17  ;;  %v2297_v19 = vadd.f32 %v21434_v11, %v2096_v30  ;;  %v21436_v12 = vld [vmem:[#allocation39_spill] sm:$0xff]  ;;  %v2722_v22 = vadd.f32 %v21437_v23, %v2524_v10  ;;  %v21438_v39 = vld [vmem:[#allocation40_spill] sm:$0xff] }
 0x2ff   : > { %v3153_v60 = vmul.f32 %v17084_v21, %v3114_v54  ;;  %v2919_v51 = vadd.f32 %v14220_v8, %v21432_v40  ;;  %v3255_v27 = vmul.f32 0.01, %v3191_v46  ;;  %v2720_v54 = vadd.f32 %v21438_v39, %v2522_v43  ;;  %v21439_v17 = vld [vmem:[#allocation35_spill] sm:$0xff]  ;;  %v21447_v39 = vld [vmem:[#allocation28_spill] sm:$0xff] }
 0x300   : > { %21429 = vst [vmem:[#allocation23_spill] sm:$0xff] %v17226_v53  ;;  %v2874_v1 = vpop.f32.mrf.mxu1  ;;  %v3072_v56 = vpop.f32.mrf.mxu0  ;;  %vm3223_vm2 = vcmp.ge.f32.partialorder %v3191_v46, 0.0  ;;  %v2913_v15 = vadd.f32 %v2858_v49, %v21439_v17  ;;  %v2108_v48 = vadd.f32 %v21440_v5, %v1907_v13  ;;  %v3112_v43 = vadd.f32 %v3059_v28, %v2914_v34  ;;  %v21446_v34 = vld [vmem:[#allocation8_spill] sm:$0xff] }
 0x301   : > { %v2917_v20 = vadd.f32 %v2874_v1, %v21436_v12  ;;  %v3192_v32 = vadd.f32 %v17090_v35, %v3153_v60  ;;  %v3117_v26 = vadd.f32 %v14254_v57, %v2919_v51  ;;  %v3287_v44 = vsel %vm3223_vm2, %v3191_v46, %v3255_v27  ;;  %v21441_v57 = vld [vmem:[#allocation25_spill] sm:$0xff]  ;;  %v21442_v1 = vld [vmem:[#allocation34_spill] sm:$0xff] }
 0x302   : > { %v14221_v37 = vpop.f32.mrf.mxu1  ;;  %v14255_v59 = vpop.f32.mrf.mxu0  ;;  %v2498_v51 = vadd.f32 %v21441_v57, %v2297_v19  ;;  %v3111_v13 = vadd.f32 %v17203_v0, %v2913_v15  ;;  %vm3704_vm2 = vcmask 523264  }
 0x303   : > { %v3115_v29 = vadd.f32 %v3072_v56, %v2917_v20  ;;  %vm3224_vm3 = vcmp.ge.f32.partialorder %v3192_v32, 0.0  ;;  %v3256_v30 = vmul.f32 0.01, %v3192_v32  ;;  %v2920_v8 = vadd.f32 %v14221_v37, %v2722_v22  ;;  %v21444_v20 = vld [vmem:[#allocation15_spill] sm:$0xff]  ;;  %v21445_v22 = vld [vmem:[#allocation9_spill] sm:$0xff] }
 0x304   : > { %v2877_v63 = vpop.f32.mrf.mxu1  ;;  %v3156_v10 = vmul.f32 %v17084_v21, %v3117_v26  ;;  %v2712_v56 = vadd.f32 %v21442_v1, %v2514_v38  ;;  %v3075_v11 = vpop.f32.mrf.mxu0  ;;  %v2309_v23 = vadd.f32 %v21444_v20, %v2108_v48  ;;  %v2293_v19 = vadd.f32 %v21445_v22, %v2092_v61  ;;  %v21448_v26 = vld [vmem:[#allocation32_spill] sm:$0xff] }
 0x305   : > { %v3154_v7 = vmul.f32 %v17084_v21, %v3115_v29  ;;  %v2918_v4 = vadd.f32 %v2877_v63, %v2720_v54  ;;  %v3288_v60 = vsel %vm3224_vm3, %v3192_v32, %v3256_v30  ;;  %v3118_v40 = vadd.f32 %v14255_v59, %v2920_v8  ;;  %v21449_v48 = vld [vmem:[#allocation24_spill] sm:$0xff] }
 0x306   : > { %v17246_v49 = vpack.c.bf16 %v3288_v60, %v3287_v44  ;;  %v3195_v41 = vadd.f32 %v17090_v35, %v3156_v10  ;;  %v2910_v46 = vadd.f32 %v17189_v25, %v2712_v56  ;;  %v3151_v38 = vmul.f32 %v17084_v21, %v3112_v43 }
 0x307   : > { %v3157_v52 = vmul.f32 %v17084_v21, %v3118_v40  ;;  %v3116_v12 = vadd.f32 %v3075_v11, %v2918_v4  ;;  %v3193_v28 = vadd.f32 %v17090_v35, %v3154_v7  ;;  %v2696_v37 = vadd.f32 %v21446_v34, %v2498_v51  ;;  %v21451_v4 = vld [vmem:[#allocation29_spill] sm:$0xff] }
 0x308   : > { %21443 = vst [vmem:[#allocation18_spill] sm:$0xff] %v17246_v49  ;;  %v3259_v27 = vmul.f32 0.01, %v3195_v41  ;;  %v2510_v0 = vadd.f32 %v21447_v39, %v2309_v23  ;;  %vm3227_vm4 = vcmp.ge.f32.partialorder %v3195_v41, 0.0  ;;  %v2909_v29 = vadd.f32 %v17176_v31, %v21448_v26 }
 0x309   : > { %v3196_v32 = vadd.f32 %v17090_v35, %v3157_v52  ;;  %v3155_v54 = vmul.f32 %v17084_v21, %v3116_v12  ;;  %v3150_v25 = vmul.f32 %v17084_v21, %v3111_v13  ;;  %v2894_v61 = vadd.f32 %v17113_v24, %v2696_v37 }
 0x30a   : > { %v3108_v17 = vadd.f32 %v17191_v45, %v2910_v46  ;;  %v3257_v15 = vmul.f32 0.01, %v3193_v28  ;;  %v3190_v8 = vadd.f32 %v17090_v35, %v3151_v38  ;;  %vm3225_vm6 = vcmp.ge.f32.partialorder %v3193_v28, 0.0 }
 0x30b   : > { %vm3228_vm5 = vcmp.ge.f32.partialorder %v3196_v32, 0.0  ;;  %v3260_v59 = vmul.f32 0.01, %v3196_v32  ;;  %v3194_v30 = vadd.f32 %v17090_v35, %v3155_v54  ;;  %v3291_v63 = vsel %vm3227_vm4, %v3195_v41, %v3259_v27 }
 0x30c   : > { %v2494_v10 = vadd.f32 %v21449_v48, %v2293_v19  ;;  %v2708_v44 = vadd.f32 %v21451_v4, %v2510_v0  ;;  %v3107_v24 = vadd.f32 %v17178_v2, %v2909_v29  ;;  %v3189_v45 = vadd.f32 %v17090_v35, %v3150_v25  ;;  %v21453_v2 = vld [vmem:[#allocation10_spill] sm:$0xff]  ;;  %v21457_v29 = vld [vmem:[#allocation19_spill] sm:$0xff] }
 0x30d   : > { %v3292_v5 = vsel %vm3228_vm5, %v3196_v32, %v3260_v59  ;;  %vm3226_vm7 = vcmp.ge.f32.partialorder %v3194_v30, 0.0  ;;  %v3258_v31 = vmul.f32 0.01, %v3194_v30  ;;  %v3092_v60 = vadd.f32 %v17115_v62, %v2894_v61  ;;  %v21454_v62 = vld [vmem:[#allocation27_spill] sm:$0xff] }
 0x30e   : > { %v17268_v7 = vpack.c.bf16 %v3292_v5, %v3291_v63  ;;  %v3289_v43 = vsel %vm3225_vm6, %v3193_v28, %v3257_v15  ;;  %v2906_v57 = vadd.f32 %v17165_v14, %v2708_v44  ;;  %v3147_v51 = vmul.f32 %v17084_v21, %v3108_v17 }
 0x30f   : > { %v3290_v40 = vsel %vm3226_vm7, %v3194_v30, %v3258_v31  ;;  %v3254_v1 = vmul.f32 0.01, %v3190_v8  ;;  %v2692_v41 = vadd.f32 %v21453_v2, %v2494_v10  ;;  %vm3222_vm8 = vcmp.ge.f32.partialorder %v3190_v8, 0.0  ;;  %v15597_v2 = vld [vmem:[%s21339_s0 + $0x14] ss:$8 sps:$4 sm:$0xff]  }
 0x310   : > { %21450 = vst [vmem:[#allocation17_spill] sm:$0xff] %v17268_v7  ;;  %12738 = vmatprep.subr.bf16.mxu1 %v17268_v7  ;;  %12850 = vmatprep.subr.bf16.mxu0 %v17268_v7  ;;  %v17278_v56 = vpack.c.bf16 %v3290_v40, %v3289_v43  ;;  %v2905_v11 = vadd.f32 %v17153_v3, %v21454_v62  ;;  %v3253_v52 = vmul.f32 0.01, %v3189_v45  ;;  %vm3221_vm9 = vcmp.ge.f32.partialorder %v3189_v45, 0.0  ;;  %v15481_v43 = vld [vmem:[%s21270_s5 + $0x38] sm:$0xff]   ;;  %v15483_v62 = vld [vmem:[%s21270_s5 + $0x28] sm:$0xff]  }
 0x311   : > { %12739 = vmatpush3.bf16.msra.mxu1 %v17174_v47  ;;  %12851 = vmatpush3.bf16.msra.mxu0 %v17174_v47  ;;  %v3146_v13 = vmul.f32 %v17084_v21, %v3107_v24  ;;  %v2890_v14 = vadd.f32 %v17098_v18, %v2692_v41  ;;  %v3131_v12 = vmul.f32 %v17084_v21, %v3092_v60  ;;  %v15598_v41 = vld [vmem:[%s21339_s0 + $0x114] ss:$8 sps:$4 sm:$0xff]  }
 0x312   : > { %21452 = vst [vmem:[#allocation21_spill] sm:$0xff] %v17278_v56  ;;  %12740 = vmatprep.subr.bf16.mxu1 %v17278_v56  ;;  %12852 = vmatprep.subr.bf16.mxu0 %v17278_v56  ;;  %v3104_v20 = vadd.f32 %v17167_v16, %v2906_v57  ;;  %v3186_v23 = vadd.f32 %v17090_v35, %v3147_v51  ;;  %v21455_v16 = vld [vmem:[#allocation41_spill] sm:$0xff]  ;;  %v15595_v51 = vld [vmem:[%s21339_s0] ss:$8 sps:$4 sm:$0xff]  }
 0x313   : > { %v3286_v46 = vsel %vm3222_vm8, %v3190_v8, %v3254_v1  ;;  %v3130_v3 = vmul.f32 %v17084_v21, %v17111_v58  ;;  %v3103_v18 = vadd.f32 %v17155_v50, %v2905_v11  ;;  %v3185_v28 = vadd.f32 %v17090_v35, %v3146_v13  ;;  %v15482_v57 = vld [vmem:[%s21270_s5 + $0x30] sm:$0xff]   ;;  %v15596_v1 = vld [vmem:[%s21339_s0 + $0x100] ss:$8 sps:$4 sm:$0xff]  }
 0x314   : > { %v3285_v22 = vsel %vm3221_vm9, %v3189_v45, %v3253_v52  ;;  %v3088_v19 = vadd.f32 %v21455_v16, %v2890_v14  ;;  %v3170_v38 = vadd.f32 %v17090_v35, %v3131_v12  ;;  %v3143_v32 = vmul.f32 %v17084_v21, %v3104_v20  ;;  %v15484_v11 = vld [vmem:[%s21270_s5 + $0x20] sm:$0xff]   ;;  %v15599_v13 = vld [vmem:[%s21339_s0 + $0x10] ss:$8 sps:$4 sm:$0xff]  }
 0x315   : > { %12741 = vmatpush3.bf16.msra.mxu1 %v17181_v33  ;;  %12853 = vmatpush3.bf16.msra.mxu0 %v17181_v33  ;;  %v17302_v27 = vpack.c.bf16 %v3286_v46, %v3285_v22  ;;  %v3250_v34 = vmul.f32 0.01, %v3186_v23  ;;  %v3169_v58 = vadd.f32 %v17090_v35, %v3130_v3  ;;  %vm3218_vm10 = vcmp.ge.f32.partialorder %v3186_v23, 0.0  ;;  %v15600_v52 = vld [vmem:[%s21339_s0 + $0x110] ss:$8 sps:$4 sm:$0xff]  }
 0x316   : > { %12742 = vmatprep.subr.bf16.mxu1 %v17246_v49  ;;  %12854 = vmatprep.subr.bf16.mxu0 %v17246_v49  ;;  %v3142_v50 = vmul.f32 %v17084_v21, %v3103_v18  ;;  %v3249_v37 = vmul.f32 0.01, %v3185_v28  ;;  %v3127_v39 = vmul.f32 %v17084_v21, %v3088_v19  ;;  %v3234_v0 = vmul.f32 0.01, %v3170_v38  ;;  %v15601_v14 = vld [vmem:[%s21339_s0 + $0x24] ss:$8 sps:$4 sm:$0xff]  }
 0x317   : > { %21456 = vst [vmem:[#allocation7_spill] sm:$0xff] %v17302_v27  ;;  %vm3217_vm11 = vcmp.ge.f32.partialorder %v3185_v28, 0.0  ;;  %vm3202_vm12 = vcmp.ge.f32.partialorder %v3170_v38, 0.0  ;;  %v3182_v54 = vadd.f32 %v17090_v35, %v3143_v32  ;;  %v3282_v26 = vsel %vm3218_vm10, %v3186_v23, %v3250_v34  ;;  %v15602_v12 = vld [vmem:[%s21339_s0 + $0x124] ss:$8 sps:$4 sm:$0xff]  }
 0x318   : > { %v3126_v25 = vmul.f32 %v17084_v21, %v21457_v29  ;;  %v3233_v59 = vmul.f32 0.01, %v3169_v58  ;;  %vm3201_vm13 = vcmp.ge.f32.partialorder %v3169_v58, 0.0  ;;  %v3181_v61 = vadd.f32 %v17090_v35, %v3142_v50  ;;  %v15603_v20 = vld [vmem:[%s21339_s0 + $0x20] ss:$8 sps:$4 sm:$0xff]  }
 0x319   : > { %12743 = vmatpush3.bf16.msra.mxu1 %v17151_v36  ;;  %12855 = vmatpush3.bf16.msra.mxu0 %v17151_v36  ;;  %v3281_v17 = vsel %vm3217_vm11, %v3185_v28, %v3249_v37  ;;  %v3166_v15 = vadd.f32 %v17090_v35, %v3127_v39  ;;  %v3266_v30 = vsel %vm3202_vm12, %v3170_v38, %v3234_v0  ;;  %v3246_v63 = vmul.f32 0.01, %v3182_v54  ;;  %v15604_v23 = vld [vmem:[%s21339_s0 + $0x120] ss:$8 sps:$4 sm:$0xff]   ;;  %v15605_v46 = vld [vmem:[%s21339_s0 + $0x34] ss:$8 sps:$4 sm:$0xff]  }
 0x31a   : > { %12744 = vmatprep.subr.bf16.mxu1 %v17302_v27  ;;  %12856 = vmatprep.subr.bf16.mxu0 %v17302_v27  ;;  %v17321_v8 = vpack.c.bf16 %v3282_v26, %v3281_v17  ;;  %v3165_v21 = vadd.f32 %v17090_v35, %v3126_v25  ;;  %v3265_v5 = vsel %vm3201_vm13, %v3169_v58, %v3233_v59  ;;  %vm3214_vm14 = vcmp.ge.f32.partialorder %v3182_v54, 0.0  ;;  %v15606_v3 = vld [vmem:[%s21339_s0 + $0x134] ss:$8 sps:$4 sm:$0xff]   ;;  %v15607_v18 = vld [vmem:[%s21339_s0 + $0x30] ss:$8 sps:$4 sm:$0xff]  }
 0x31b   : > { %v17328_v48 = vpack.c.bf16 %v3266_v30, %v3265_v5  ;;  %v3245_v10 = vmul.f32 0.01, %v3181_v61  ;;  %v3230_v31 = vmul.f32 0.01, %v3166_v15  ;;  %vm3213_vm15 = vcmp.ge.f32.partialorder %v3181_v61, 0.0  ;;  %v15485_v58 = vld [vmem:[%s21270_s5 + $0x18] sm:$0xff]  }
 0x31c   : > { %21458 = vst [vmem:[#allocation13_spill] sm:$0xff] %v17321_v8  ;;  %vm3198_vm0 = vcmp.ge.f32.partialorder %v3166_v15, 0.0  ;;  %v3278_v4 = vsel %vm3214_vm14, %v3182_v54, %v3246_v63  ;;  %v3229_v44 = vmul.f32 0.01, %v3165_v21  ;;  %vm3197_vm1 = vcmp.ge.f32.partialorder %v3165_v21, 0.0  ;;  %v17452_v17 = vld [vmem:[%s21270_s5 + $0x58] sm:$0xff]  }
 0x31d   : > { %12745 = vmatpush3.bf16.msra.mxu1 %v17157_v55  ;;  %12857 = vmatpush3.bf16.msra.mxu0 %v17157_v55  ;;  %v3277_v35 = vsel %vm3213_vm15, %v3181_v61, %v3245_v10  ;;  %v3262_v45 = vsel %vm3198_vm0, %v3166_v15, %v3230_v31  ;;  %v15608_v28 = vld [vmem:[%s21339_s0 + $0x130] ss:$8 sps:$4 sm:$0xff]   ;;  %v15609_v22 = vld [vmem:[%s21339_s0 + $0x44] ss:$8 sps:$4 sm:$0xff]   ;;  %v15611_v19 = vld [vmem:[%s21339_s0 + $0x40] ss:$8 sps:$4 sm:$0xff]  }
 0x31e   : > { %12746 = vmatprep.subr.bf16.mxu1 %v17226_v53  ;;  %12858 = vmatprep.subr.bf16.mxu0 %v17226_v53  ;;  %v17334_v24 = vpack.c.bf16 %v3278_v4, %v3277_v35  ;;  %v3261_v60 = vsel %vm3197_vm1, %v3165_v21, %v3229_v44  ;;  %v15610_v16 = vld [vmem:[%s21339_s0 + $0x144] ss:$8 sps:$4 sm:$0xff]   ;;  %v15612_v38 = vld [vmem:[%s21339_s0 + $0x140] ss:$8 sps:$4 sm:$0xff]   ;;  %v15613_v32 = vld [vmem:[%s21339_s0 + $0x54] ss:$8 sps:$4 sm:$0xff]  }
 0x31f   : > { %v17343_v40 = vpack.c.bf16 %v3262_v45, %v3261_v60  ;;  %v15614_v34 = vld [vmem:[%s21339_s0 + $0x154] ss:$8 sps:$4 sm:$0xff]   ;;  %v15615_v50 = vld [vmem:[%s21339_s0 + $0x50] ss:$8 sps:$4 sm:$0xff]   ;;  %v15617_v39 = vld [vmem:[%s21339_s0 + $0x64] ss:$8 sps:$4 sm:$0xff]  }
 0x320   : > { %21459 = vst [vmem:[#allocation31_spill] sm:$0xff] %v17334_v24  ;;  %v15616_v37 = vld [vmem:[%s21339_s0 + $0x150] ss:$8 sps:$4 sm:$0xff]   ;;  %v15618_v0 = vld [vmem:[%s21339_s0 + $0x164] ss:$8 sps:$4 sm:$0xff]  }
 0x321   : > { %12747 = vmatpush3.bf16.msra.mxu1 %v17133_v6  ;;  %12859 = vmatpush3.bf16.msra.mxu0 %v17133_v6  ;;  %v15619_v54 = vld [vmem:[%s21339_s0 + $0x60] ss:$8 sps:$4 sm:$0xff]   ;;  %v15621_v29 = vld [vmem:[%s21339_s0 + $0x74] ss:$8 sps:$4 sm:$0xff]   ;;  %v15623_v59 = vld [vmem:[%s21339_s0 + $0x70] ss:$8 sps:$4 sm:$0xff]  }
 0x322   : > { %12748 = vmatprep.subr.bf16.mxu1 %v17321_v8  ;;  %12860 = vmatprep.subr.bf16.mxu0 %v17321_v8  ;;  %v15620_v26 = vld [vmem:[%s21339_s0 + $0x160] ss:$8 sps:$4 sm:$0xff]   ;;  %v15622_v25 = vld [vmem:[%s21339_s0 + $0x174] ss:$8 sps:$4 sm:$0xff]   ;;  %v15624_v61 = vld [vmem:[%s21339_s0 + $0x170] ss:$8 sps:$4 sm:$0xff]  }
 0x323   : > { %v15487_v15 = vld [vmem:[%s21270_s5 + $0x10] sm:$0xff]   ;;  %v15625_v30 = vld [vmem:[%s21339_s0 + $0x84] ss:$8 sps:$4 sm:$0xff]   ;;  %v15627_v21 = vld [vmem:[%s21339_s0 + $0x80] ss:$8 sps:$4 sm:$0xff]  }
 0x324   : > { %v15626_v63 = vld [vmem:[%s21339_s0 + $0x184] ss:$8 sps:$4 sm:$0xff]   ;;  %v15628_v5 = vld [vmem:[%s21339_s0 + $0x180] ss:$8 sps:$4 sm:$0xff]   ;;  %v15629_v10 = vld [vmem:[%s21339_s0 + $0x94] ss:$8 sps:$4 sm:$0xff]  }
 0x325   : > { %12749 = vmatpush3.bf16.msra.mxu1 %v17328_v48  ;;  %12861 = vmatpush3.bf16.msra.mxu0 %v17328_v48  ;;  %v15630_v31 = vld [vmem:[%s21339_s0 + $0x194] ss:$8 sps:$4 sm:$0xff]   ;;  %v15489_v4 = vld [vmem:[%s21270_s5 + $0x8] sm:$0xff]   ;;  %v15491_v44 = vld [vmem:[%s21270_s5] sm:$0xff]  }
 0x326   : > { %12750 = vmatprep.subr.bf16.mxu1 %v17200_v9  ;;  %12862 = vmatprep.subr.bf16.mxu0 %v17200_v9  ;;  %v15631_v35 = vld [vmem:[%s21339_s0 + $0x90] ss:$8 sps:$4 sm:$0xff]   ;;  %v15633_v60 = vld [vmem:[%s21339_s0 + $0xa4] ss:$8 sps:$4 sm:$0xff]  }
 0x327   : > { %v15632_v45 = vld [vmem:[%s21339_s0 + $0x190] ss:$8 sps:$4 sm:$0xff]  }
 0x329   : > { %12751 = vmatpush3.bf16.msra.mxu1 %v17118_v42  ;;  %12863 = vmatpush3.bf16.msra.mxu0 %v17118_v42 }
 0x32a   : > { %12752 = vmatprep.subr.bf16.mxu1 %v17334_v24  ;;  %12864 = vmatprep.subr.bf16.mxu0 %v17334_v24 }
 0x32d   : > { %12753 = vmatpush3.bf16.msra.mxu1 %v17343_v40  ;;  %12865 = vmatpush3.bf16.msra.mxu0 %v17343_v40 }
 0x32e   : > { %14256 = vmatprep.subr.bf16.mxu1 %v15481_v43  ;;  %14296 = vmatprep.subr.bf16.mxu0 %v15485_v58 }
 0x330   : > { %3342 = vmatmul.mubr.bf16.vlgmr.msra.gmra.mxu1 %v15595_v51  ;;  %3519 = vmatmul.mubr.bf16.vlgmr.msra.gmra.mxu0 %v15596_v1  ;;  %v15636_v51 = vld [vmem:[%s21339_s0 + $0x1a0] ss:$8 sps:$4 sm:$0xff]   ;;  %v15637_v1 = vld [vmem:[%s21339_s0 + $0xb4] ss:$8 sps:$4 sm:$0xff]  }
 0x331   : > { %3349 = vmatprep.mubr.bf16.mxu1 %v15597_v2  ;;  %3526 = vmatprep.mubr.bf16.mxu0 %v15598_v41  ;;  %v15638_v2 = vld [vmem:[%s21339_s0 + $0x1b4] ss:$8 sps:$4 sm:$0xff]   ;;  %v15639_v41 = vld [vmem:[%s21339_s0 + $0xb0] ss:$8 sps:$4 sm:$0xff]  }
 0x332   : > { %14257 = vmatpush3.bf16.msra.mxu1 %v15481_v43  ;;  %14297 = vmatpush3.bf16.msra.mxu0 %v15485_v58  ;;  %v15634_v43 = vld [vmem:[%s21339_s0 + $0x1a4] ss:$8 sps:$4 sm:$0xff]   ;;  %v15488_v58 = vld [vmem:[%s21270_s5 + $0x50] sm:$0xff]  }
 0x333   : > { %14258 = vmatprep.subr.bf16.mxu1 %v15482_v57  ;;  %14298 = vmatprep.subr.bf16.mxu0 %v15487_v15 }
 0x336   : > { %14259 = vmatpush3.bf16.msra.mxu1 %v15482_v57  ;;  %14299 = vmatpush3.bf16.msra.mxu0 %v15487_v15  ;;  %v15635_v57 = vld [vmem:[%s21339_s0 + $0xa0] ss:$8 sps:$4 sm:$0xff]  }
 0x337   : > { %14260 = vmatprep.subr.bf16.mxu1 %v15483_v62  ;;  %14300 = vmatprep.subr.bf16.mxu0 %v15489_v4 }
 0x338   : > { %3350 = vmatmul.mubr.bf16.gmra.mxu1 %v15599_v13  ;;  %3527 = vmatmul.mubr.bf16.gmra.mxu0 %v15600_v52  ;;  %v15642_v13 = vld [vmem:[%s21339_s0 + $0x1c4] ss:$8 sps:$4 sm:$0xff]   ;;  %v15643_v52 = vld [vmem:[%s21339_s0 + $0xc0] ss:$8 sps:$4 sm:$0xff]  }
 0x339   : > { %3357 = vmatprep.mubr.bf16.mxu1 %v15601_v14  ;;  %3534 = vmatprep.mubr.bf16.mxu0 %v15602_v12  ;;  %v15644_v14 = vld [vmem:[%s21339_s0 + $0x1c0] ss:$8 sps:$4 sm:$0xff]   ;;  %v15645_v12 = vld [vmem:[%s21339_s0 + $0xd4] ss:$8 sps:$4 sm:$0xff]  }
 0x33a   : > { %14261 = vmatpush3.bf16.msra.mxu1 %v15483_v62  ;;  %14301 = vmatpush3.bf16.msra.mxu0 %v15489_v4  ;;  %v15640_v62 = vld [vmem:[%s21339_s0 + $0x1b0] ss:$8 sps:$4 sm:$0xff]  }
 0x33b   : > { %14262 = vmatprep.subr.bf16.mxu1 %v15484_v11  ;;  %14302 = vmatprep.subr.bf16.mxu0 %v15491_v44 }
 0x33e   : > { %14263 = vmatpush3.bf16.msra.mxu1 %v15484_v11  ;;  %14303 = vmatpush3.bf16.msra.mxu0 %v15491_v44  ;;  %v15641_v11 = vld [vmem:[%s21339_s0 + $0xc4] ss:$8 sps:$4 sm:$0xff]  }
 0x33f   : > { %14336 = vmatprep.subr.bf16.mxu1 %v17452_v17 }
 0x340   : > { %3358 = vmatmul.mubr.bf16.gmra.mxu1 %v15603_v20  ;;  %3535 = vmatmul.mubr.bf16.gmra.mxu0 %v15604_v23  ;;  %v15646_v20 = vld [vmem:[%s21339_s0 + $0x1d4] ss:$8 sps:$4 sm:$0xff]   ;;  %v15647_v23 = vld [vmem:[%s21339_s0 + $0xd0] ss:$8 sps:$4 sm:$0xff]  }
 0x341   : > { %3365 = vmatprep.mubr.bf16.mxu1 %v15605_v46  ;;  %3542 = vmatprep.mubr.bf16.mxu0 %v15606_v3  ;;  %v15648_v46 = vld [vmem:[%s21339_s0 + $0x1d0] ss:$8 sps:$4 sm:$0xff]   ;;  %v15649_v3 = vld [vmem:[%s21339_s0 + $0xe4] ss:$8 sps:$4 sm:$0xff]  }
 0x348   : > { %3366 = vmatmul.mubr.bf16.gmra.mxu1 %v15607_v18  ;;  %3543 = vmatmul.mubr.bf16.gmra.mxu0 %v15608_v28  ;;  %v15650_v18 = vld [vmem:[%s21339_s0 + $0x1e4] ss:$8 sps:$4 sm:$0xff]   ;;  %v15651_v28 = vld [vmem:[%s21339_s0 + $0xe0] ss:$8 sps:$4 sm:$0xff]  }
 0x349   : > { %3373 = vmatprep.mubr.bf16.mxu1 %v15609_v22  ;;  %3550 = vmatprep.mubr.bf16.mxu0 %v15610_v16  ;;  %v15652_v22 = vld [vmem:[%s21339_s0 + $0x1e0] ss:$8 sps:$4 sm:$0xff]   ;;  %v15653_v16 = vld [vmem:[%s21339_s0 + $0xf4] ss:$8 sps:$4 sm:$0xff]  }
 0x350   : > { %3374 = vmatmul.mubr.bf16.gmra.mxu1 %v15611_v19  ;;  %3551 = vmatmul.mubr.bf16.gmra.mxu0 %v15612_v38  ;;  %v15654_v19 = vld [vmem:[%s21339_s0 + $0x1f4] ss:$8 sps:$4 sm:$0xff]   ;;  %v15655_v38 = vld [vmem:[%s21339_s0 + $0xf0] ss:$8 sps:$4 sm:$0xff]  }
 0x351   : > { %3381 = vmatprep.mubr.bf16.mxu1 %v15613_v32  ;;  %3558 = vmatprep.mubr.bf16.mxu0 %v15614_v34  ;;  %v15656_v32 = vld [vmem:[%s21339_s0 + $0x1f0] ss:$8 sps:$4 sm:$0xff]   ;;  %v21460_v34 = vmov 0  }
 0x358   : > { %3382 = vmatmul.mubr.bf16.gmra.mxu1 %v15615_v50  ;;  %3559 = vmatmul.mubr.bf16.gmra.mxu0 %v15616_v37  ;;  %v15490_v50 = vld [vmem:[%s21270_s5 + $0x48] sm:$0xff]   ;;  %v15492_v37 = vld [vmem:[%s21270_s5 + $0x40] sm:$0xff]  }
 0x359   : > { %3389 = vmatprep.mubr.bf16.mxu1 %v15617_v39  ;;  %3566 = vmatprep.mubr.bf16.mxu0 %v15618_v0  ;;  %v15493_v39 = vld [vmem:[%s21270_s5 + $0x78] sm:$0xff]  }
 0x35a   : > { %v15494_v0 = vld [vmem:[%s21270_s5 + $0x98] sm:$0xff]   ;;  %14376 = vmatprep.subr.bf16.mxu0 %v15493_v39 }
 0x360   : > { %3390 = vmatmul.mubr.bf16.gmra.mxu1 %v15619_v54  ;;  %3567 = vmatmul.mubr.bf16.gmra.mxu0 %v15620_v26 }
 0x361   : > { %3397 = vmatprep.mubr.bf16.mxu1 %v15621_v29  ;;  %3574 = vmatprep.mubr.bf16.mxu0 %v15622_v25 }
 0x368   : > { %3398 = vmatmul.mubr.bf16.gmra.mxu1 %v15623_v59  ;;  %3575 = vmatmul.mubr.bf16.gmra.mxu0 %v15624_v61 }
 0x369   : > { %3405 = vmatprep.mubr.bf16.mxu1 %v15625_v30  ;;  %3582 = vmatprep.mubr.bf16.mxu0 %v15626_v63 }
 0x370   : > { %3406 = vmatmul.mubr.bf16.gmra.mxu1 %v15627_v21  ;;  %3583 = vmatmul.mubr.bf16.gmra.mxu0 %v15628_v5 }
 0x371   : > { %3413 = vmatprep.mubr.bf16.mxu1 %v15629_v10  ;;  %3590 = vmatprep.mubr.bf16.mxu0 %v15630_v31 }
 0x378   : > { %3414 = vmatmul.mubr.bf16.gmra.mxu1 %v15631_v35  ;;  %3591 = vmatmul.mubr.bf16.gmra.mxu0 %v15632_v45  ;;  %v15495_v35 = vld [vmem:[%s21270_s5 + $0x70] sm:$0xff]  }
 0x379   : > { %3421 = vmatprep.mubr.bf16.mxu1 %v15633_v60  ;;  %3598 = vmatprep.mubr.bf16.mxu0 %v15634_v43  ;;  %v15496_v45 = vld [vmem:[%s21270_s5 + $0x90] sm:$0xff]  }
 0x380   : > { %3422 = vmatmul.mubr.bf16.gmra.mxu1 %v15635_v57  ;;  %3599 = vmatmul.mubr.bf16.gmra.mxu0 %v15636_v51 }
 0x381   : > { %3429 = vmatprep.mubr.bf16.mxu1 %v15637_v1  ;;  %3606 = vmatprep.mubr.bf16.mxu0 %v15638_v2  ;;  %v15497_v1 = vld [vmem:[%s21270_s5 + $0x68] sm:$0xff]  }
 0x382   : > { %v15498_v2 = vld [vmem:[%s21270_s5 + $0x88] sm:$0xff]  }
 0x388   : > { %3430 = vmatmul.mubr.bf16.gmra.mxu1 %v15639_v41  ;;  %3607 = vmatmul.mubr.bf16.gmra.mxu0 %v15640_v62 }
 0x389   : > { %3437 = vmatprep.mubr.bf16.mxu1 %v15641_v11  ;;  %3614 = vmatprep.mubr.bf16.mxu0 %v15642_v13 }
 0x390   : > { %3438 = vmatmul.mubr.bf16.gmra.mxu1 %v15643_v52  ;;  %3615 = vmatmul.mubr.bf16.gmra.mxu0 %v15644_v14 }
 0x391   : > { %3445 = vmatprep.mubr.bf16.mxu1 %v15645_v12  ;;  %3622 = vmatprep.mubr.bf16.mxu0 %v15646_v20 }
 0x398   : > { %3446 = vmatmul.mubr.bf16.gmra.mxu1 %v15647_v23  ;;  %3623 = vmatmul.mubr.bf16.gmra.mxu0 %v15648_v46 }
 0x399   : > { %3453 = vmatprep.mubr.bf16.mxu1 %v15649_v3  ;;  %3630 = vmatprep.mubr.bf16.mxu0 %v15650_v18  ;;  %v15499_v3 = vld [vmem:[%s21270_s5 + $0x60] sm:$0xff]  }
 0x39a   : > { %v15500_v18 = vld [vmem:[%s21270_s5 + $0x80] sm:$0xff]  }
 0x3a0   : > { %3454 = vmatmul.mubr.bf16.gmra.mxu1 %v15651_v28  ;;  %3631 = vmatmul.mubr.bf16.gmra.mxu0 %v15652_v22 }
 0x3a1   : > { %3461 = vmatprep.mubr.bf16.mxu1 %v15653_v16  ;;  %3638 = vmatprep.mubr.bf16.mxu0 %v15654_v19 }
 0x3a8   : > { %3462 = vmatmul.mubr.bf16.gmra.mxu1 %v15655_v38  ;;  %3639 = vmatmul.mubr.bf16.gmra.mxu0 %v15656_v32 }
 0x3a9   : > { %14264 = vmatprep.mubr.bf16.mxu1 %v21460_v34  ;;  %14304 = vmatprep.mubr.bf16.mxu0 %v21460_v34 }
 0x3b0   : > { %14265 = vmatmul.mubr.msk.bf16.vlgmr.msra.gmra.mxu1 %vm3704_vm2, %v17343_v40 }
 0x3b1   : > { %14268 = vmatprep.mubr.msk.bf16.mxu1 %vm3704_vm2, %v17118_v42  ;;  %14337 = vmatpush3.bf16.msra.mxu1 %v17452_v17 }
 0x3b2   : > { %14338 = vmatprep.subr.bf16.mxu1 %v15488_v58 }
 0x3b5   : > { %14339 = vmatpush3.bf16.msra.mxu1 %v15488_v58 }
 0x3b6   : > { %14340 = vmatprep.subr.bf16.mxu1 %v15490_v50 }
 0x3b8   : > { %14269 = vmatmul.mubr.msk.bf16.gmra.mxu1 %vm3704_vm2, %v17328_v48 }
 0x3b9   : > { %14272 = vmatprep.mubr.msk.bf16.mxu1 %vm3704_vm2, %v17133_v6  ;;  %14341 = vmatpush3.bf16.msra.mxu1 %v15490_v50 }
 0x3ba   : > { %14342 = vmatprep.subr.bf16.mxu1 %v15492_v37 }
 0x3bd   : > { %14343 = vmatpush3.bf16.msra.mxu1 %v15492_v37 }
 0x3be   : > { %14416 = vmatprep.subr.bf16.mxu1 %v15494_v0 }
 0x3c0   : > { %14273 = vmatmul.mubr.msk.bf16.gmra.mxu1 %vm3704_vm2, %v17157_v55 }
 0x3c1   : > { %14276 = vmatprep.mubr.msk.bf16.mxu1 %vm3704_vm2, %v17151_v36 }
 0x3c8   : > { %14277 = vmatmul.mubr.msk.bf16.gmra.mxu1 %vm3704_vm2, %v17181_v33 }
 0x3c9   : > { %14280 = vmatprep.mubr.msk.bf16.mxu1 %vm3704_vm2, %v17174_v47 }
 0x3d0   : > { %14281 = vmatmul.mubr.msk.bf16.gmra.mxu1 %vm3704_vm2, %v17334_v24 }
 0x3d1   : > { %14284 = vmatprep.mubr.msk.bf16.mxu1 %vm3704_vm2, %v17200_v9 }
 0x3d8   : > { %14285 = vmatmul.mubr.msk.bf16.gmra.mxu1 %vm3704_vm2, %v17321_v8 }
 0x3d9   : > { %14288 = vmatprep.mubr.msk.bf16.mxu1 %vm3704_vm2, %v17226_v53 }
 0x3e0   : > { %14289 = vmatmul.mubr.msk.bf16.gmra.mxu1 %vm3704_vm2, %v17302_v27 }
 0x3e1   : > { %14292 = vmatprep.mubr.msk.bf16.mxu1 %vm3704_vm2, %v17246_v49 }
 0x3e8   : > { %14293 = vmatmul.mubr.msk.bf16.gmra.mxu1 %vm3704_vm2, %v17278_v56 }
 0x3e9   : > { %14344 = vmatprep.mubr.bf16.mxu1 %v21460_v34 }
 0x3f0   : > { %v12754_v54 = vpop.f32.mrf.mxu1  ;;  %v12866_v26 = vpop.f32.mrf.mxu0 }
 0x3f2   : > { %v12755_v29 = vpop.f32.mrf.mxu1  ;;  %v12867_v25 = vpop.f32.mrf.mxu0 }
 0x3f3   : > { %v12756_v30 = vadd.f32 %v12755_v29, %v12754_v54  ;;  %v12868_v63 = vadd.f32 %v12867_v25, %v12866_v26 }
 0x3f4   : > { %v12757_v59 = vpop.f32.mrf.mxu1  ;;  %v12869_v61 = vpop.f32.mrf.mxu0 }
 0x3f6   : > { %v12758_v17 = vpop.f32.mrf.mxu1  ;;  %v12870_v15 = vpop.f32.mrf.mxu0 }
 0x3f7   : > { %v12759_v21 = vadd.f32 %v12758_v17, %v12757_v59  ;;  %v12871_v5 = vadd.f32 %v12870_v15, %v12869_v61 }
 0x3f8   : > { %v12760_v10 = vpop.f32.mrf.mxu1  ;;  %v12872_v31 = vpop.f32.mrf.mxu0 }
 0x3f9   : > { %v17609_v4 = vpack.c.bf16 %v12759_v21, %v12756_v30  ;;  %v17611_v44 = vpack.c.bf16 %v12871_v5, %v12868_v63 }
 0x3fa   : > { %v12761_v60 = vpop.f32.mrf.mxu1  ;;  %v12873_v43 = vpop.f32.mrf.mxu0 }
 0x3fb   : > { %14305 = vmatmul.mubr.msk.bf16.vlgmr.msra.gmra.mxu0 %vm3704_vm2, %v17609_v4  ;;  %14345 = vmatmul.mubr.msk.bf16.vlgmr.msra.gmra.mxu1 %vm3704_vm2, %v17611_v44  ;;  %v12762_v11 = vadd.f32 %v12761_v60, %v12760_v10  ;;  %v12874_v13 = vadd.f32 %v12873_v43, %v12872_v31 }
 0x3fc   : > { %v12763_v57 = vpop.f32.mrf.mxu1  ;;  %v12875_v51 = vpop.f32.mrf.mxu0  ;;  %14377 = vmatpush3.bf16.msra.mxu0 %v15493_v39  ;;  %14417 = vmatpush3.bf16.msra.mxu1 %v15494_v0 }
 0x3fd   : > { %14378 = vmatprep.subr.bf16.mxu0 %v15495_v35  ;;  %14418 = vmatprep.subr.bf16.mxu1 %v15496_v45 }
 0x3fe   : > { %v12764_v41 = vpop.f32.mrf.mxu1  ;;  %v12876_v62 = vpop.f32.mrf.mxu0 }
 0x3ff   : > { %v12765_v52 = vadd.f32 %v12764_v41, %v12763_v57  ;;  %v12877_v14 = vadd.f32 %v12876_v62, %v12875_v51  ;;  %v17662_v51 = vld [vmem:[%s21270_s5 + $0xb8] sm:$0xff]  }
 0x400   : > { %v12766_v12 = vpop.f32.mrf.mxu1  ;;  %v12878_v20 = vpop.f32.mrf.mxu0  ;;  %14379 = vmatpush3.bf16.msra.mxu0 %v15495_v35  ;;  %14419 = vmatpush3.bf16.msra.mxu1 %v15496_v45  ;;  %v17667_v41 = vld [vmem:[%s21270_s5 + $0xd8] sm:$0xff]  }
 0x401   : > { %v17629_v23 = vpack.c.bf16 %v12765_v52, %v12762_v11  ;;  %v17631_v46 = vpack.c.bf16 %v12877_v14, %v12874_v13  ;;  %14380 = vmatprep.subr.bf16.mxu0 %v15497_v1  ;;  %14420 = vmatprep.subr.bf16.mxu1 %v15498_v2 }
 0x402   : > { %v12767_v28 = vpop.f32.mrf.mxu1  ;;  %v12879_v22 = vpop.f32.mrf.mxu0 }
 0x403   : > { %14308 = vmatprep.mubr.msk.bf16.mxu0 %vm3704_vm2, %v17629_v23  ;;  %14348 = vmatprep.mubr.msk.bf16.mxu1 %vm3704_vm2, %v17631_v46  ;;  %v12768_v58 = vadd.f32 %v12767_v28, %v12766_v12  ;;  %v12880_v50 = vadd.f32 %v12879_v22, %v12878_v20 }
 0x404   : > { %v12769_v16 = vpop.f32.mrf.mxu1  ;;  %v12881_v19 = vpop.f32.mrf.mxu0  ;;  %14381 = vmatpush3.bf16.msra.mxu0 %v15497_v1  ;;  %14421 = vmatpush3.bf16.msra.mxu1 %v15498_v2 }
 0x405   : > { %14382 = vmatprep.subr.bf16.mxu0 %v15499_v3  ;;  %14422 = vmatprep.subr.bf16.mxu1 %v15500_v18 }
 0x406   : > { %v12770_v38 = vpop.f32.mrf.mxu1  ;;  %v12882_v32 = vpop.f32.mrf.mxu0 }
 0x407   : > { %v12771_v37 = vadd.f32 %v12770_v38, %v12769_v16  ;;  %v12883_v39 = vadd.f32 %v12882_v32, %v12881_v19 }
 0x408   : > { %v12772_v0 = vpop.f32.mrf.mxu1  ;;  %v12884_v54 = vpop.f32.mrf.mxu0  ;;  %14383 = vmatpush3.bf16.msra.mxu0 %v15499_v3  ;;  %14423 = vmatpush3.bf16.msra.mxu1 %v15500_v18 }
 0x409   : > { %v17643_v26 = vpack.c.bf16 %v12771_v37, %v12768_v58  ;;  %v17645_v29 = vpack.c.bf16 %v12883_v39, %v12880_v50  ;;  %14456 = vmatprep.subr.bf16.mxu0 %v17662_v51  ;;  %14496 = vmatprep.subr.bf16.mxu1 %v17667_v41 }
 0x40a   : > { %v12773_v25 = vpop.f32.mrf.mxu1  ;;  %v12885_v59 = vpop.f32.mrf.mxu0 }
 0x40b   : > { %14309 = vmatmul.mubr.msk.bf16.gmra.mxu0 %vm3704_vm2, %v17643_v26  ;;  %14349 = vmatmul.mubr.msk.bf16.gmra.mxu1 %vm3704_vm2, %v17645_v29  ;;  %v12774_v63 = vadd.f32 %v12773_v25, %v12772_v0  ;;  %v12886_v21 = vadd.f32 %v12885_v59, %v12884_v54 }
 0x40c   : > { %v12775_v61 = vpop.f32.mrf.mxu1  ;;  %v12887_v17 = vpop.f32.mrf.mxu0 }
 0x40e   : > { %v12776_v15 = vpop.f32.mrf.mxu1  ;;  %v12888_v30 = vpop.f32.mrf.mxu0 }
 0x40f   : > { %v12777_v5 = vadd.f32 %v12776_v15, %v12775_v61  ;;  %v12889_v10 = vadd.f32 %v12888_v30, %v12887_v17 }
 0x410   : > { %v12778_v31 = vpop.f32.mrf.mxu1  ;;  %v12890_v35 = vpop.f32.mrf.mxu0 }
 0x411   : > { %v17651_v45 = vpack.c.bf16 %v12777_v5, %v12774_v63  ;;  %v17653_v60 = vpack.c.bf16 %v12889_v10, %v12886_v21 }
 0x412   : > { %v12779_v43 = vpop.f32.mrf.mxu1  ;;  %v12891_v57 = vpop.f32.mrf.mxu0 }
 0x413   : > { %14312 = vmatprep.mubr.msk.bf16.mxu0 %vm3704_vm2, %v17651_v45  ;;  %14352 = vmatprep.mubr.msk.bf16.mxu1 %vm3704_vm2, %v17653_v60  ;;  %v12780_v13 = vadd.f32 %v12779_v43, %v12778_v31  ;;  %v12892_v52 = vadd.f32 %v12891_v57, %v12890_v35 }
 0x414   : > { %v12781_v1 = vpop.f32.mrf.mxu1  ;;  %v12893_v2 = vpop.f32.mrf.mxu0 }
 0x416   : > { %v12782_v62 = vpop.f32.mrf.mxu1  ;;  %v12894_v11 = vpop.f32.mrf.mxu0 }
 0x417   : > { %v12783_v14 = vadd.f32 %v12782_v62, %v12781_v1  ;;  %v12895_v12 = vadd.f32 %v12894_v11, %v12893_v2 }
 0x418   : > { %v12784_v20 = vpop.f32.mrf.mxu1  ;;  %v12896_v3 = vpop.f32.mrf.mxu0 }
 0x419   : > { %v17671_v18 = vpack.c.bf16 %v12783_v14, %v12780_v13  ;;  %v17673_v28 = vpack.c.bf16 %v12895_v12, %v12892_v52 }
 0x41a   : > { %v12785_v22 = vpop.f32.mrf.mxu1  ;;  %v12897_v16 = vpop.f32.mrf.mxu0 }
 0x41b   : > { %14313 = vmatmul.mubr.msk.bf16.gmra.mxu0 %vm3704_vm2, %v17671_v18  ;;  %14353 = vmatmul.mubr.msk.bf16.gmra.mxu1 %vm3704_vm2, %v17673_v28  ;;  %v12786_v50 = vadd.f32 %v12785_v22, %v12784_v20  ;;  %v12898_v37 = vadd.f32 %v12897_v16, %v12896_v3 }
 0x41c   : > { %v12787_v19 = vpop.f32.mrf.mxu1  ;;  %v12899_v38 = vpop.f32.mrf.mxu0 }
 0x41e   : > { %v12788_v32 = vpop.f32.mrf.mxu1  ;;  %v12900_v58 = vpop.f32.mrf.mxu0 }
 0x41f   : > { %v12789_v39 = vadd.f32 %v12788_v32, %v12787_v19  ;;  %v12901_v0 = vadd.f32 %v12900_v58, %v12899_v38 }
 0x420   : > { %v12790_v54 = vpop.f32.mrf.mxu1  ;;  %v12902_v25 = vpop.f32.mrf.mxu0 }
 0x421   : > { %v17679_v59 = vpack.c.bf16 %v12789_v39, %v12786_v50  ;;  %v17681_v61 = vpack.c.bf16 %v12901_v0, %v12898_v37 }
 0x422   : > { %v12791_v17 = vpop.f32.mrf.mxu1  ;;  %v12903_v15 = vpop.f32.mrf.mxu0 }
 0x423   : > { %14316 = vmatprep.mubr.msk.bf16.mxu0 %vm3704_vm2, %v17679_v59  ;;  %14356 = vmatprep.mubr.msk.bf16.mxu1 %vm3704_vm2, %v17681_v61  ;;  %v12792_v10 = vadd.f32 %v12791_v17, %v12790_v54  ;;  %v12904_v31 = vadd.f32 %v12903_v15, %v12902_v25 }
 0x424   : > { %v12793_v30 = vpop.f32.mrf.mxu1  ;;  %v12905_v63 = vpop.f32.mrf.mxu0 }
 0x426   : > { %v12794_v21 = vpop.f32.mrf.mxu1  ;;  %v12906_v5 = vpop.f32.mrf.mxu0 }
 0x427   : > { %v12795_v35 = vadd.f32 %v12794_v21, %v12793_v30  ;;  %v12907_v43 = vadd.f32 %v12906_v5, %v12905_v63 }
 0x428   : > { %v12796_v57 = vpop.f32.mrf.mxu1  ;;  %v12908_v1 = vpop.f32.mrf.mxu0 }
 0x429   : > { %v17687_v2 = vpack.c.bf16 %v12795_v35, %v12792_v10  ;;  %v17689_v62 = vpack.c.bf16 %v12907_v43, %v12904_v31 }
 0x42a   : > { %v12797_v11 = vpop.f32.mrf.mxu1  ;;  %v12909_v13 = vpop.f32.mrf.mxu0 }
 0x42b   : > { %14317 = vmatmul.mubr.msk.bf16.gmra.mxu0 %vm3704_vm2, %v17687_v2  ;;  %14357 = vmatmul.mubr.msk.bf16.gmra.mxu1 %vm3704_vm2, %v17689_v62  ;;  %v12798_v3 = vadd.f32 %v12797_v11, %v12796_v57  ;;  %v12910_v22 = vadd.f32 %v12909_v13, %v12908_v1 }
 0x42c   : > { %v12799_v52 = vpop.f32.mrf.mxu1  ;;  %v12911_v14 = vpop.f32.mrf.mxu0 }
 0x42e   : > { %v12800_v12 = vpop.f32.mrf.mxu1  ;;  %v12912_v20 = vpop.f32.mrf.mxu0 }
 0x42f   : > { %v12801_v16 = vadd.f32 %v12800_v12, %v12799_v52  ;;  %v12913_v19 = vadd.f32 %v12912_v20, %v12911_v14 }
 0x430   : > { %v12802_v38 = vpop.f32.mrf.mxu1  ;;  %v12914_v32 = vpop.f32.mrf.mxu0 }
 0x431   : > { %v17695_v58 = vpack.c.bf16 %v12801_v16, %v12798_v3  ;;  %v17697_v50 = vpack.c.bf16 %v12913_v19, %v12910_v22 }
 0x432   : > { %v12803_v37 = vpop.f32.mrf.mxu1  ;;  %v12915_v39 = vpop.f32.mrf.mxu0 }
 0x433   : > { %14320 = vmatprep.mubr.msk.bf16.mxu0 %vm3704_vm2, %v17695_v58  ;;  %14360 = vmatprep.mubr.msk.bf16.mxu1 %vm3704_vm2, %v17697_v50  ;;  %v12804_v15 = vadd.f32 %v12803_v37, %v12802_v38  ;;  %v12916_v30 = vadd.f32 %v12915_v39, %v12914_v32 }
 0x434   : > { %v12805_v0 = vpop.f32.mrf.mxu1  ;;  %v12917_v54 = vpop.f32.mrf.mxu0 }
 0x436   : > { %v12806_v25 = vpop.f32.mrf.mxu1  ;;  %v12918_v17 = vpop.f32.mrf.mxu0 }
 0x437   : > { %v12807_v63 = vadd.f32 %v12806_v25, %v12805_v0  ;;  %v12919_v21 = vadd.f32 %v12918_v17, %v12917_v54 }
 0x438   : > { %v12808_v5 = vpop.f32.mrf.mxu1  ;;  %v12920_v10 = vpop.f32.mrf.mxu0 }
 0x439   : > { %v17703_v31 = vpack.c.bf16 %v12807_v63, %v12804_v15  ;;  %v17705_v35 = vpack.c.bf16 %v12919_v21, %v12916_v30 }
 0x43a   : > { %v12809_v43 = vpop.f32.mrf.mxu1  ;;  %v12921_v57 = vpop.f32.mrf.mxu0 }
 0x43b   : > { %14321 = vmatmul.mubr.msk.bf16.gmra.mxu0 %vm3704_vm2, %v17703_v31  ;;  %14361 = vmatmul.mubr.msk.bf16.gmra.mxu1 %vm3704_vm2, %v17705_v35  ;;  %v12810_v14 = vadd.f32 %v12809_v43, %v12808_v5  ;;  %v12922_v12 = vadd.f32 %v12921_v57, %v12920_v10 }
 0x43c   : > { %v12811_v1 = vpop.f32.mrf.mxu1  ;;  %v12923_v11 = vpop.f32.mrf.mxu0 }
 0x43e   : > { %v12812_v13 = vpop.f32.mrf.mxu1  ;;  %v12924_v52 = vpop.f32.mrf.mxu0 }
 0x43f   : > { %v12813_v20 = vadd.f32 %v12812_v13, %v12811_v1  ;;  %v12925_v3 = vadd.f32 %v12924_v52, %v12923_v11 }
 0x440   : > { %v12814_v22 = vpop.f32.mrf.mxu1  ;;  %v12926_v16 = vpop.f32.mrf.mxu0 }
 0x441   : > { %v17711_v19 = vpack.c.bf16 %v12813_v20, %v12810_v14  ;;  %v17713_v38 = vpack.c.bf16 %v12925_v3, %v12922_v12 }
 0x442   : > { %v12815_v32 = vpop.f32.mrf.mxu1  ;;  %v12927_v37 = vpop.f32.mrf.mxu0 }
 0x443   : > { %14324 = vmatprep.mubr.msk.bf16.mxu0 %vm3704_vm2, %v17711_v19  ;;  %14364 = vmatprep.mubr.msk.bf16.mxu1 %vm3704_vm2, %v17713_v38  ;;  %v12816_v17 = vadd.f32 %v12815_v32, %v12814_v22  ;;  %v12928_v15 = vadd.f32 %v12927_v37, %v12926_v16 }
 0x444   : > { %v12817_v39 = vpop.f32.mrf.mxu1  ;;  %v12929_v0 = vpop.f32.mrf.mxu0 }
 0x446   : > { %v12818_v54 = vpop.f32.mrf.mxu1  ;;  %v12930_v25 = vpop.f32.mrf.mxu0 }
 0x447   : > { %v12819_v30 = vadd.f32 %v12818_v54, %v12817_v39  ;;  %v12931_v63 = vadd.f32 %v12930_v25, %v12929_v0 }
 0x448   : > { %v12820_v21 = vpop.f32.mrf.mxu1  ;;  %v12932_v5 = vpop.f32.mrf.mxu0 }
 0x449   : > { %v17719_v10 = vpack.c.bf16 %v12819_v30, %v12816_v17  ;;  %v17721_v43 = vpack.c.bf16 %v12931_v63, %v12928_v15 }
 0x44a   : > { %v12821_v57 = vpop.f32.mrf.mxu1  ;;  %v12933_v1 = vpop.f32.mrf.mxu0 }
 0x44b   : > { %14325 = vmatmul.mubr.msk.bf16.gmra.mxu0 %vm3704_vm2, %v17719_v10  ;;  %14365 = vmatmul.mubr.msk.bf16.gmra.mxu1 %vm3704_vm2, %v17721_v43  ;;  %v12822_v12 = vadd.f32 %v12821_v57, %v12820_v21  ;;  %v12934_v20 = vadd.f32 %v12933_v1, %v12932_v5 }
 0x44c   : > { %v12823_v11 = vpop.f32.mrf.mxu1  ;;  %v12935_v13 = vpop.f32.mrf.mxu0 }
 0x44e   : > { %v12824_v52 = vpop.f32.mrf.mxu1  ;;  %v12936_v14 = vpop.f32.mrf.mxu0 }
 0x44f   : > { %v12825_v3 = vadd.f32 %v12824_v52, %v12823_v11  ;;  %v12937_v22 = vadd.f32 %v12936_v14, %v12935_v13 }
 0x450   : > { %v12826_v16 = vpop.f32.mrf.mxu1  ;;  %v12938_v32 = vpop.f32.mrf.mxu0 }
 0x451   : > { %v17727_v37 = vpack.c.bf16 %v12825_v3, %v12822_v12  ;;  %v17729_v39 = vpack.c.bf16 %v12937_v22, %v12934_v20 }
 0x452   : > { %v12827_v0 = vpop.f32.mrf.mxu1  ;;  %v12939_v54 = vpop.f32.mrf.mxu0 }
 0x453   : > { %14328 = vmatprep.mubr.msk.bf16.mxu0 %vm3704_vm2, %v17727_v37  ;;  %14368 = vmatprep.mubr.msk.bf16.mxu1 %vm3704_vm2, %v17729_v39  ;;  %v12828_v63 = vadd.f32 %v12827_v0, %v12826_v16  ;;  %v12940_v21 = vadd.f32 %v12939_v54, %v12938_v32 }
 0x454   : > { %v12829_v25 = vpop.f32.mrf.mxu1  ;;  %v12941_v17 = vpop.f32.mrf.mxu0 }
 0x456   : > { %v12830_v15 = vpop.f32.mrf.mxu1  ;;  %v12942_v30 = vpop.f32.mrf.mxu0 }
 0x457   : > { %v12831_v5 = vadd.f32 %v12830_v15, %v12829_v25  ;;  %v12943_v57 = vadd.f32 %v12942_v30, %v12941_v17 }
 0x458   : > { %v12832_v1 = vpop.f32.mrf.mxu1  ;;  %v12944_v11 = vpop.f32.mrf.mxu0 }
 0x459   : > { %v17735_v13 = vpack.c.bf16 %v12831_v5, %v12828_v63  ;;  %v17737_v52 = vpack.c.bf16 %v12943_v57, %v12940_v21 }
 0x45a   : > { %v12833_v14 = vpop.f32.mrf.mxu1  ;;  %v12945_v12 = vpop.f32.mrf.mxu0 }
 0x45b   : > { %14329 = vmatmul.mubr.msk.bf16.gmra.mxu0 %vm3704_vm2, %v17735_v13  ;;  %14369 = vmatmul.mubr.msk.bf16.gmra.mxu1 %vm3704_vm2, %v17737_v52  ;;  %v12834_v32 = vadd.f32 %v12833_v14, %v12832_v1  ;;  %v12946_v0 = vadd.f32 %v12945_v12, %v12944_v11 }
 0x45c   : > { %v12835_v20 = vpop.f32.mrf.mxu1  ;;  %v12947_v3 = vpop.f32.mrf.mxu0 }
 0x45e   : > { %v12836_v22 = vpop.f32.mrf.mxu1  ;;  %v12948_v16 = vpop.f32.mrf.mxu0 }
 0x45f   : > { %v12837_v54 = vadd.f32 %v12836_v22, %v12835_v20  ;;  %v12949_v25 = vadd.f32 %v12948_v16, %v12947_v3 }
 0x460   : > { %v12838_v17 = vpop.f32.mrf.mxu1  ;;  %v12950_v15 = vpop.f32.mrf.mxu0 }
 0x461   : > { %v17743_v30 = vpack.c.bf16 %v12837_v54, %v12834_v32  ;;  %v17745_v63 = vpack.c.bf16 %v12949_v25, %v12946_v0 }
 0x462   : > { %v12839_v21 = vpop.f32.mrf.mxu1  ;;  %v12951_v5 = vpop.f32.mrf.mxu0 }
 0x463   : > { %14332 = vmatprep.mubr.msk.bf16.mxu0 %vm3704_vm2, %v17743_v30  ;;  %14372 = vmatprep.mubr.msk.bf16.mxu1 %vm3704_vm2, %v17745_v63  ;;  %v12840_v14 = vadd.f32 %v12839_v21, %v12838_v17  ;;  %v12952_v12 = vadd.f32 %v12951_v5, %v12950_v15  ;;  %v15503_v15 = vld [vmem:[%s21270_s5 + $0xb0] sm:$0xff]   ;;  %v15505_v5 = vld [vmem:[%s21270_s5 + $0xa8] sm:$0xff]  }
 0x464   : > { %v12841_v57 = vpop.f32.mrf.mxu1  ;;  %v12953_v34 = vpop.f32.mrf.mxu0  ;;  %v15504_v21 = vld [vmem:[%s21270_s5 + $0xd0] sm:$0xff]  }
 0x466   : > { %v12842_v1 = vpop.f32.mrf.mxu1  ;;  %v12954_v11 = vpop.f32.mrf.mxu0 }
 0x467   : > { %v12843_v20 = vadd.f32 %v12842_v1, %v12841_v57  ;;  %v12955_v3 = vadd.f32 %v12954_v11, %v12953_v34  ;;  %v15506_v57 = vld [vmem:[%s21270_s5 + $0xc8] sm:$0xff]  }
 0x468   : > { %v17751_v22 = vpop.f32.mrf.mxu1 }
 0x469   : > { %v17753_v16 = vpack.c.bf16 %v12843_v20, %v12840_v14  ;;  %v17755_v32 = vpack.c.bf16 %v12955_v3, %v12952_v12  ;;  %v17826_v20 = vld [vmem:[%s21270_s5 + $0xf8] sm:$0xff]  }
 0x46a   : > { %v17757_v0 = vpop.f32.mrf.mxu1  ;;  %v17831_v3 = vld [vmem:[%s21270_s5 + $0x118] sm:$0xff]  }
 0x46b   : > { %14333 = vmatmul.mubr.msk.bf16.gmra.mxu0 %vm3704_vm2, %v17753_v16  ;;  %14373 = vmatmul.mubr.msk.bf16.gmra.mxu1 %vm3704_vm2, %v17755_v32 }
 0x46c   : > { %v17763_v54 = vpop.f32.mrf.mxu1  ;;  %14384 = vmatprep.mubr.msk.bf16.mxu0 %vm3704_vm2, %v17609_v4  ;;  %14424 = vmatprep.mubr.msk.bf16.mxu1 %vm3704_vm2, %v17343_v40 }
 0x46e   : > { %v17769_v34 = vpop.f32.mrf.mxu1 }
 0x470   : > { %v17771_v25 = vpop.f32.mrf.mxu1 }
 0x472   : > { %v17773_v17 = vpop.f32.mrf.mxu1 }
 0x473   : > { %14385 = vmatmul.mubr.msk.bf16.vlgmr.msra.gmra.mxu0 %vm3704_vm2, %v17629_v23  ;;  %14425 = vmatmul.mubr.msk.bf16.vlgmr.msra.gmra.mxu1 %vm3704_vm2, %v17118_v42 }
 0x474   : > { %v17785_v40 = vpop.f32.mrf.mxu1  ;;  %14388 = vmatprep.mubr.msk.bf16.mxu0 %vm3704_vm2, %v17643_v26  ;;  %14428 = vmatprep.mubr.msk.bf16.mxu1 %vm3704_vm2, %v17328_v48 }
 0x475   : > { %14457 = vmatpush3.bf16.msra.mxu0 %v17662_v51  ;;  %14497 = vmatpush3.bf16.msra.mxu1 %v17667_v41  ;;  %v15507_v51 = vld [vmem:[%s21270_s5 + $0xa0] sm:$0xff]  }
 0x476   : > { %v17793_v4 = vpop.f32.mrf.mxu1  ;;  %14458 = vmatprep.subr.bf16.mxu0 %v15503_v15  ;;  %14498 = vmatprep.subr.bf16.mxu1 %v15504_v21  ;;  %v15508_v41 = vld [vmem:[%s21270_s5 + $0xc0] sm:$0xff]  }
 0x477   : > { %21461 = vst [vmem:[#allocation12_spill] sm:$0xff] %v17793_v4 }
 0x478   : > { %v17801_v1 = vpop.f32.mrf.mxu1 }
 0x479   : > { %14459 = vmatpush3.bf16.msra.mxu0 %v15503_v15  ;;  %14499 = vmatpush3.bf16.msra.mxu1 %v15504_v21 }
 0x47a   : > { %v17803_v11 = vpop.f32.mrf.mxu1  ;;  %14460 = vmatprep.subr.bf16.mxu0 %v15505_v5  ;;  %14500 = vmatprep.subr.bf16.mxu1 %v15506_v57 }
 0x47b   : > { %14389 = vmatmul.mubr.msk.bf16.gmra.mxu0 %vm3704_vm2, %v17651_v45  ;;  %14429 = vmatmul.mubr.msk.bf16.gmra.mxu1 %vm3704_vm2, %v17133_v6 }
 0x47c   : > { %v17815_v14 = vpop.f32.mrf.mxu1  ;;  %14392 = vmatprep.mubr.msk.bf16.mxu0 %vm3704_vm2, %v17671_v18  ;;  %14432 = vmatprep.mubr.msk.bf16.mxu1 %vm3704_vm2, %v17157_v55 }
 0x47d   : > { %14461 = vmatpush3.bf16.msra.mxu0 %v15505_v5  ;;  %14501 = vmatpush3.bf16.msra.mxu1 %v15506_v57 }
 0x47e   : > { %v17821_v12 = vpop.f32.mrf.mxu1  ;;  %14462 = vmatprep.subr.bf16.mxu0 %v15507_v51  ;;  %14502 = vmatprep.subr.bf16.mxu1 %v15508_v41 }
 0x47f   : > { %21462 = vst [vmem:[#allocation14_spill] sm:$0xff] %v17821_v12 }
 0x480   : > { %v17833_v15 = vpop.f32.mrf.mxu1 }
 0x481   : > { %14463 = vmatpush3.bf16.msra.mxu0 %v15507_v51  ;;  %14503 = vmatpush3.bf16.msra.mxu1 %v15508_v41 }
 0x482   : > { %v17835_v21 = vpop.f32.mrf.mxu1  ;;  %14536 = vmatprep.subr.bf16.mxu0 %v17826_v20  ;;  %14576 = vmatprep.subr.bf16.mxu1 %v17831_v3 }
 0x483   : > { %14393 = vmatmul.mubr.msk.bf16.gmra.mxu0 %vm3704_vm2, %v17679_v59  ;;  %14433 = vmatmul.mubr.msk.bf16.gmra.mxu1 %vm3704_vm2, %v17151_v36 }
 0x484   : > { %v17843_v5 = vpop.f32.mrf.mxu1  ;;  %14396 = vmatprep.mubr.msk.bf16.mxu0 %vm3704_vm2, %v17687_v2  ;;  %14436 = vmatprep.mubr.msk.bf16.mxu1 %vm3704_vm2, %v17181_v33 }
 0x486   : > { %v17849_v57 = vpop.f32.mrf.mxu1 }
 0x487   : > { %21463 = vst [vmem:[#allocation20_spill] sm:$0xff] %v17849_v57 }
 0x488   : > { %v17851_v51 = vpop.f32.mrf.mxu1 }
 0x48a   : > { %v17853_v41 = vpop.f32.mrf.mxu1 }
 0x48b   : > { %14397 = vmatmul.mubr.msk.bf16.gmra.mxu0 %vm3704_vm2, %v17695_v58  ;;  %14437 = vmatmul.mubr.msk.bf16.gmra.mxu1 %vm3704_vm2, %v17174_v47 }
 0x48c   : > { %v17859_v4 = vpop.f32.mrf.mxu1  ;;  %14400 = vmatprep.mubr.msk.bf16.mxu0 %vm3704_vm2, %v17703_v31  ;;  %14440 = vmatprep.mubr.msk.bf16.mxu1 %vm3704_vm2, %v17334_v24 }
 0x48e   : > { %v17865_v12 = vpop.f32.mrf.mxu1 }
 0x490   : > { %v17867_v57 = vpop.f32.mrf.mxu1 }
 0x491   : > { %21464 = vst [vmem:[#allocation36_spill] sm:$0xff] %v17867_v57 }
 0x492   : > { %v17869_v33 = vpop.f32.mrf.mxu1 }
 0x493   : > { %14401 = vmatmul.mubr.msk.bf16.gmra.mxu0 %vm3704_vm2, %v17711_v19  ;;  %14441 = vmatmul.mubr.msk.bf16.gmra.mxu1 %vm3704_vm2, %v17200_v9 }
 0x494   : > { %v17875_v47 = vpop.f32.mrf.mxu1  ;;  %14404 = vmatprep.mubr.msk.bf16.mxu0 %vm3704_vm2, %v17719_v10  ;;  %14444 = vmatprep.mubr.msk.bf16.mxu1 %vm3704_vm2, %v17321_v8 }
 0x496   : > { %v17881_v24 = vpop.f32.mrf.mxu1 }
 0x497   : > { %21465 = vst [vmem:[#allocation37_spill] sm:$0xff] %v17881_v24 }
 0x498   : > { %v17883_v36 = vpop.f32.mrf.mxu1 }
 0x499   : > { %21466 = vst [vmem:[#allocation11_spill] sm:$0xff] %v17883_v36 }
 0x49a   : > { %v17885_v57 = vpop.f32.mrf.mxu1 }
 0x49b   : > { %14405 = vmatmul.mubr.msk.bf16.gmra.mxu0 %vm3704_vm2, %v17727_v37  ;;  %14445 = vmatmul.mubr.msk.bf16.gmra.mxu1 %vm3704_vm2, %v17226_v53 }
 0x49c   : > { %v17891_v9 = vpop.f32.mrf.mxu1  ;;  %14408 = vmatprep.mubr.msk.bf16.mxu0 %vm3704_vm2, %v17735_v13  ;;  %14448 = vmatprep.mubr.msk.bf16.mxu1 %vm3704_vm2, %v17302_v27  ;;  %v12846_v27 = vadd.f32 %v17757_v0, %v17751_v22  ;;  %v15511_v0 = vld [vmem:[%s21270_s5 + $0xf0] sm:$0xff]  }
 0x49e   : > { %v17897_v8 = vpop.f32.mrf.mxu1 }
 0x49f   : > { %21467 = vst [vmem:[#allocation16_spill] sm:$0xff] %v17897_v8  ;;  %v12849_v8 = vadd.f32 %v17769_v34, %v17763_v54  ;;  %v15512_v54 = vld [vmem:[%s21270_s5 + $0x110] sm:$0xff]   ;;  %v15514_v34 = vld [vmem:[%s21270_s5 + $0x108] sm:$0xff]  }
 0x4a0   : > { %v17899_v24 = vpop.f32.mrf.mxu1 }
 0x4a1   : > { %21468 = vst [vmem:[#allocation33_spill] sm:$0xff] %v17899_v24 }
 0x4a2   : > { %v17901_v36 = vpop.f32.mrf.mxu1 }
 0x4a3   : > { %21469 = vst [vmem:[#allocation39_spill] sm:$0xff] %v17901_v36  ;;  %14409 = vmatmul.mubr.msk.bf16.gmra.mxu0 %vm3704_vm2, %v17743_v30  ;;  %14449 = vmatmul.mubr.msk.bf16.gmra.mxu1 %vm3704_vm2, %v17246_v49  ;;  %v17917_v36 = vpack.c.bf16 %v12849_v8, %v12846_v27  ;;  %v17925_v49 = vpop.f32.mrf.mxu0 }
 0x4a4   : > { %14412 = vmatprep.mubr.msk.bf16.mxu0 %vm3704_vm2, %v17753_v16  ;;  %14452 = vmatprep.mubr.msk.bf16.mxu1 %vm3704_vm2, %v17278_v56  ;;  %v17915_v24 = vpop.f32.mrf.mxu1 }
 0x4a5   : > { %21470 = vst [vmem:[#allocation38_spill] sm:$0xff] %v17915_v24  ;;  %v17933_v27 = vpop.f32.mrf.mxu0 }
 0x4a6   : > { %v17919_v53 = vpop.f32.mrf.mxu1 }
 0x4a7   : > { %21471 = vst [vmem:[#allocation40_spill] sm:$0xff] %v17919_v53 }
 0x4a8   : > { %v17931_v22 = vpop.f32.mrf.mxu1 }
 0x4a9   : > { %21472 = vst [vmem:[#allocation35_spill] sm:$0xff] %v17931_v22 }
 0x4aa   : > { %v17935_v8 = vpop.f32.mrf.mxu1 }
 0x4ab   : > { %14413 = vmatmul.mubr.msk.bf16.gmra.mxu0 %vm3704_vm2, %v17917_v36  ;;  %14453 = vmatmul.mubr.msk.bf16.gmra.mxu1 %vm3704_vm2, %v17268_v7  ;;  %21473 = vst [vmem:[#allocation22_spill] sm:$0xff] %v17935_v8 }
 0x4ac   : > { %14464 = vmatprep.mubr.msk.bf16.mxu0 %vm3704_vm2, %v17611_v44  ;;  %14504 = vmatprep.mubr.msk.bf16.mxu1 %vm3704_vm2, %v17629_v23  ;;  %v17947_v44 = vpop.f32.mrf.mxu0  ;;  %v17953_v23 = vpop.f32.mrf.mxu1 }
 0x4ad   : > { %21474 = vst [vmem:[#allocation25_spill] sm:$0xff] %v17953_v23 }
 0x4ae   : > { %v17963_v53 = vpop.f32.mrf.mxu0  ;;  %v17965_v8 = vpop.f32.mrf.mxu1 }
 0x4af   : > { %21475 = vst [vmem:[#allocation34_spill] sm:$0xff] %v17965_v8 }
 0x4b3   : > { %14465 = vmatmul.mubr.msk.bf16.vlgmr.msra.gmra.mxu0 %vm3704_vm2, %v17631_v46  ;;  %14505 = vmatmul.mubr.msk.bf16.vlgmr.msra.gmra.mxu1 %vm3704_vm2, %v17643_v26  ;;  %v15513_v26 = vld [vmem:[%s21270_s5 + $0xe8] sm:$0xff]  }
 0x4b4   : > { %14468 = vmatprep.mubr.msk.bf16.mxu0 %vm3704_vm2, %v17645_v29  ;;  %14508 = vmatprep.mubr.msk.bf16.mxu1 %vm3704_vm2, %v17651_v45  ;;  %v15515_v45 = vld [vmem:[%s21270_s5 + $0xe0] sm:$0xff]  }
 0x4b5   : > { %14537 = vmatpush3.bf16.msra.mxu0 %v17826_v20  ;;  %14577 = vmatpush3.bf16.msra.mxu1 %v17831_v3  ;;  %v15516_v20 = vld [vmem:[%s21270_s5 + $0x100] sm:$0xff]  }
 0x4b6   : > { %14538 = vmatprep.subr.bf16.mxu0 %v15511_v0  ;;  %14578 = vmatprep.subr.bf16.mxu1 %v15512_v54 }
 0x4b9   : > { %14539 = vmatpush3.bf16.msra.mxu0 %v15511_v0  ;;  %14579 = vmatpush3.bf16.msra.mxu1 %v15512_v54 }
 0x4ba   : > { %14540 = vmatprep.subr.bf16.mxu0 %v15513_v26  ;;  %14580 = vmatprep.subr.bf16.mxu1 %v15514_v34 }
 0x4bb   : > { %v14306_v3 = vpop.f32.mrf.mxu0  ;;  %v14346_v23 = vpop.f32.mrf.mxu1  ;;  %14469 = vmatmul.mubr.msk.bf16.gmra.mxu0 %vm3704_vm2, %v17653_v60  ;;  %14509 = vmatmul.mubr.msk.bf16.gmra.mxu1 %vm3704_vm2, %v17671_v18 }
 0x4bc   : > { %v4025_v0 = vadd.f32 %v14306_v3, %v17771_v25  ;;  %14472 = vmatprep.mubr.msk.bf16.mxu0 %vm3704_vm2, %v17673_v28  ;;  %14512 = vmatprep.mubr.msk.bf16.mxu1 %vm3704_vm2, %v17679_v59 }
 0x4bd   : > { %v4016_v54 = vpop.f32.mrf.mxu0  ;;  %v4255_v8 = vpop.f32.mrf.mxu1  ;;  %14541 = vmatpush3.bf16.msra.mxu0 %v15513_v26  ;;  %14581 = vmatpush3.bf16.msra.mxu1 %v15514_v34 }
 0x4be   : > { %v17982_v22 = vadd.f32 %v14346_v23, %v4025_v0  ;;  %v4017_v7 = vadd.f32 %v4016_v54, %v17773_v17  ;;  %14542 = vmatprep.subr.bf16.mxu0 %v15515_v45  ;;  %14582 = vmatprep.subr.bf16.mxu1 %v15516_v20 }
 0x4bf   : > { %v14307_v56 = vpop.f32.mrf.mxu0  ;;  %v14347_v3 = vpop.f32.mrf.mxu1 }
 0x4c0   : > { %v17985_v18 = vadd.f32 %v4255_v8, %v4017_v7  ;;  %v4028_v25 = vadd.f32 %v14307_v56, %v17785_v40 }
 0x4c1   : > { %14543 = vmatpush3.bf16.msra.mxu0 %v15515_v45  ;;  %14583 = vmatpush3.bf16.msra.mxu1 %v15516_v20  ;;  %v17998_v7 = vpop.f32.mrf.mxu0  ;;  %v18000_v56 = vpop.f32.mrf.mxu1 }
 0x4c2   : > { %v17988_v24 = vadd.f32 %v14347_v3, %v4028_v25  ;;  %21476 = vst [vmem:[#allocation15_spill] sm:$0xff] %v18000_v56 }
 0x4c3   : > { %14473 = vmatmul.mubr.msk.bf16.gmra.mxu0 %vm3704_vm2, %v17681_v61  ;;  %14513 = vmatmul.mubr.msk.bf16.gmra.mxu1 %vm3704_vm2, %v17687_v2 }
 0x4c4   : > { %14476 = vmatprep.mubr.msk.bf16.mxu0 %vm3704_vm2, %v17689_v62  ;;  %14516 = vmatprep.mubr.msk.bf16.mxu1 %vm3704_vm2, %v17695_v58 }
 0x4cb   : > { %v14310_v59 = vpop.f32.mrf.mxu0  ;;  %v14350_v17 = vpop.f32.mrf.mxu1  ;;  %14477 = vmatmul.mubr.msk.bf16.gmra.mxu0 %vm3704_vm2, %v17697_v50  ;;  %14517 = vmatmul.mubr.msk.bf16.gmra.mxu1 %vm3704_vm2, %v17703_v31 }
 0x4cc   : > { %v4041_v2 = vadd.f32 %v14310_v59, %v17801_v1  ;;  %14480 = vmatprep.mubr.msk.bf16.mxu0 %vm3704_vm2, %v17705_v35  ;;  %14520 = vmatprep.mubr.msk.bf16.mxu1 %vm3704_vm2, %v17711_v19 }
 0x4cd   : > { %v4032_v58 = vpop.f32.mrf.mxu0  ;;  %v4271_v40 = vpop.f32.mrf.mxu1 }
 0x4ce   : > { %v18011_v8 = vadd.f32 %v14350_v17, %v4041_v2  ;;  %v4033_v23 = vadd.f32 %v4032_v58, %v17803_v11 }
 0x4cf   : > { %v14311_v26 = vpop.f32.mrf.mxu0  ;;  %v14351_v31 = vpop.f32.mrf.mxu1 }
 0x4d0   : > { %v18014_v34 = vadd.f32 %v4271_v40, %v4033_v23  ;;  %v4044_v45 = vadd.f32 %v14311_v26, %v17815_v14  ;;  %v21477_v23 = vmov 0  }
 0x4d1   : > { %v18027_v19 = vpop.f32.mrf.mxu0  ;;  %v18029_v1 = vpop.f32.mrf.mxu1 }
 0x4d2   : > { %v18017_v20 = vadd.f32 %v14351_v31, %v4044_v45 }
 0x4d3   : > { %14481 = vmatmul.mubr.msk.bf16.gmra.mxu0 %vm3704_vm2, %v17713_v38  ;;  %14521 = vmatmul.mubr.msk.bf16.gmra.mxu1 %vm3704_vm2, %v17719_v10 }
 0x4d4   : > { %14484 = vmatprep.mubr.msk.bf16.mxu0 %vm3704_vm2, %v17721_v43  ;;  %14524 = vmatprep.mubr.msk.bf16.mxu1 %vm3704_vm2, %v17727_v37 }
 0x4db   : > { %v14314_v11 = vpop.f32.mrf.mxu0  ;;  %v14354_v14 = vpop.f32.mrf.mxu1  ;;  %14485 = vmatmul.mubr.msk.bf16.gmra.mxu0 %vm3704_vm2, %v17729_v39  ;;  %14525 = vmatmul.mubr.msk.bf16.gmra.mxu1 %vm3704_vm2, %v17735_v13 }
 0x4dc   : > { %v4057_v10 = vadd.f32 %v14314_v11, %v17833_v15  ;;  %14488 = vmatprep.mubr.msk.bf16.mxu0 %vm3704_vm2, %v17737_v52  ;;  %14528 = vmatprep.mubr.msk.bf16.mxu1 %vm3704_vm2, %v17743_v30  ;;  %v12958_v30 = vadd.f32 %v17933_v27, %v17925_v49  ;;  %v12961_v15 = vadd.f32 %v17963_v53, %v17947_v44 }
 0x4dd   : > { %v4048_v37 = vpop.f32.mrf.mxu0  ;;  %v4287_v0 = vpop.f32.mrf.mxu1 }
 0x4de   : > { %v18040_v54 = vadd.f32 %v14354_v14, %v4057_v10  ;;  %v4049_v25 = vadd.f32 %v4048_v37, %v17835_v21  ;;  %v18060_v21 = vpack.c.bf16 %v12961_v15, %v12958_v30  ;;  %v21479_v37 = vld [vmem:[#allocation42_spill] sm:$0xff] }
 0x4df   : > { %v14315_v3 = vpop.f32.mrf.mxu0  ;;  %v14355_v13 = vpop.f32.mrf.mxu1 }
 0x4e0   : > { %v18043_v59 = vadd.f32 %v4287_v0, %v4049_v25  ;;  %v4060_v17 = vadd.f32 %v14315_v3, %v17843_v5 }
 0x4e1   : > { %v18062_v5 = vpop.f32.mrf.mxu0  ;;  %v18064_v58 = vpop.f32.mrf.mxu1 }
 0x4e2   : > { %v18046_v2 = vadd.f32 %v14355_v13, %v4060_v17  ;;  %v21480_v13 = vld [vmem:[#allocation43_spill] sm:$0xff] }
 0x4e3   : > { %14489 = vmatmul.mubr.msk.bf16.gmra.mxu0 %vm3704_vm2, %v17745_v63  ;;  %14529 = vmatmul.mubr.msk.bf16.gmra.mxu1 %vm3704_vm2, %v17753_v16 }
 0x4e4   : > { %14492 = vmatprep.mubr.msk.bf16.mxu0 %vm3704_vm2, %v17755_v32  ;;  %14532 = vmatprep.mubr.msk.bf16.mxu1 %vm3704_vm2, %v17917_v36 }
 0x4eb   : > { %v14318_v40 = vpop.f32.mrf.mxu0  ;;  %v14358_v16 = vpop.f32.mrf.mxu1  ;;  %14493 = vmatmul.mubr.msk.bf16.gmra.mxu0 %vm3704_vm2, %v18060_v21  ;;  %14533 = vmatmul.mubr.bf16.gmra.mxu1 %v21477_v23 }
 0x4ec   : > { %v4073_v36 = vadd.f32 %v14318_v40, %v17851_v51  ;;  %14544 = vmatprep.mubr.msk.bf16.mxu0 %vm3704_vm2, %v17118_v42  ;;  %14584 = vmatprep.mubr.msk.bf16.mxu1 %vm3704_vm2, %v17631_v46  ;;  %v21483_v40 = vld [vmem:[#allocation31_spill] sm:$0xff] }
 0x4ed   : > { %v4064_v53 = vpop.f32.mrf.mxu0  ;;  %v4303_v49 = vpop.f32.mrf.mxu1 }
 0x4ee   : > { %v18074_v27 = vadd.f32 %v14358_v16, %v4073_v36  ;;  %v4065_v44 = vadd.f32 %v4064_v53, %v17853_v41  ;;  %v21484_v16 = vld [vmem:[#allocation11_spill] sm:$0xff]  ;;  %v21485_v36 = vld [vmem:[#allocation30_spill] sm:$0xff] }
 0x4ef   : > { %v14319_v26 = vpop.f32.mrf.mxu0  ;;  %v14359_v45 = vpop.f32.mrf.mxu1 }
 0x4f0   : > { %v18077_v31 = vadd.f32 %v4303_v49, %v4065_v44  ;;  %v4076_v11 = vadd.f32 %v14319_v26, %v17859_v4 }
 0x4f1   : > { %v4067_v14 = vpop.f32.mrf.mxu0  ;;  %v4306_v10 = vpop.f32.mrf.mxu1 }
 0x4f2   : > { %v18080_v51 = vadd.f32 %v14359_v45, %v4076_v11  ;;  %v4068_v42 = vadd.f32 %v4067_v14, %v17865_v12 }
 0x4f3   : > { %14545 = vmatmul.mubr.msk.bf16.vlgmr.msra.gmra.mxu0 %vm3704_vm2, %v17328_v48  ;;  %14585 = vmatmul.mubr.msk.bf16.vlgmr.msra.gmra.mxu1 %vm3704_vm2, %v17645_v29  ;;  %v21478_v48 = vld [vmem:[#allocation36_spill] sm:$0xff] }
 0x4f4   : > { %v18087_v46 = vadd.f32 %v4306_v10, %v4068_v42  ;;  %14548 = vmatprep.mubr.msk.bf16.mxu0 %vm3704_vm2, %v17133_v6  ;;  %14588 = vmatprep.mubr.msk.bf16.mxu1 %vm3704_vm2, %v17653_v60  ;;  %v21486_v42 = vld [vmem:[#allocation13_spill] sm:$0xff] }
 0x4fb   : > { %v14322_v4 = vpop.f32.mrf.mxu0  ;;  %v14362_v41 = vpop.f32.mrf.mxu1  ;;  %14549 = vmatmul.mubr.msk.bf16.gmra.mxu0 %vm3704_vm2, %v17157_v55  ;;  %14589 = vmatmul.mubr.msk.bf16.gmra.mxu1 %vm3704_vm2, %v17673_v28 }
 0x4fc   : > { %v4089_v12 = vadd.f32 %v14322_v4, %v21478_v48  ;;  %14552 = vmatprep.mubr.msk.bf16.mxu0 %vm3704_vm2, %v21479_v37  ;;  %14592 = vmatprep.mubr.msk.bf16.mxu1 %vm3704_vm2, %v17681_v61  ;;  %v21481_v61 = vld [vmem:[#allocation26_spill] sm:$0xff]  ;;  %v21489_v48 = vld [vmem:[#allocation33_spill] sm:$0xff] }
 0x4fd   : > { %v4080_v6 = vpop.f32.mrf.mxu0  ;;  %v4319_v29 = vpop.f32.mrf.mxu1 }
 0x4fe   : > { %v18102_v0 = vadd.f32 %v14362_v41, %v4089_v12  ;;  %v4081_v60 = vadd.f32 %v4080_v6, %v17869_v33  ;;  %v21488_v41 = vld [vmem:[#allocation7_spill] sm:$0xff]  ;;  %v21490_v12 = vld [vmem:[#allocation18_spill] sm:$0xff] }
 0x4ff   : > { %v14323_v25 = vpop.f32.mrf.mxu0  ;;  %v14363_v28 = vpop.f32.mrf.mxu1 }
 0x500   : > { %v18105_v3 = vadd.f32 %v4319_v29, %v4081_v60  ;;  %v4092_v55 = vadd.f32 %v14323_v25, %v17875_v47  ;;  %v21491_v29 = vld [vmem:[#allocation39_spill] sm:$0xff] }
 0x501   : > { %v18118_v33 = vpop.f32.mrf.mxu0  ;;  %v18120_v30 = vpop.f32.mrf.mxu1 }
 0x502   : > { %v18108_v17 = vadd.f32 %v14363_v28, %v4092_v55  ;;  %21482 = vst [vmem:[#allocation9_spill] sm:$0xff] %v18120_v30  ;;  %v21492_v28 = vld [vmem:[#allocation38_spill] sm:$0xff] }
 0x503   : > { %14553 = vmatmul.mubr.msk.bf16.gmra.mxu0 %vm3704_vm2, %v21480_v13  ;;  %14593 = vmatmul.mubr.msk.bf16.gmra.mxu1 %vm3704_vm2, %v17689_v62 }
 0x504   : > { %14556 = vmatprep.mubr.msk.bf16.mxu0 %vm3704_vm2, %v21481_v61  ;;  %14596 = vmatprep.mubr.msk.bf16.mxu1 %vm3704_vm2, %v17697_v50 }
 0x50b   : > { %v14326_v47 = vpop.f32.mrf.mxu0  ;;  %v14366_v15 = vpop.f32.mrf.mxu1  ;;  %14557 = vmatmul.mubr.msk.bf16.gmra.mxu0 %vm3704_vm2, %v21483_v40  ;;  %14597 = vmatmul.mubr.msk.bf16.gmra.mxu1 %vm3704_vm2, %v17705_v35 }
 0x50c   : > { %v4105_v62 = vadd.f32 %v14326_v47, %v21484_v16  ;;  %14560 = vmatprep.mubr.msk.bf16.mxu0 %vm3704_vm2, %v21485_v36  ;;  %14600 = vmatprep.mubr.msk.bf16.mxu1 %vm3704_vm2, %v17713_v38  ;;  %v21487_v38 = vld [vmem:[#allocation23_spill] sm:$0xff]  ;;  %v21493_v47 = vld [vmem:[#allocation21_spill] sm:$0xff] }
 0x50d   : > { %v4096_v50 = vpop.f32.mrf.mxu0  ;;  %v4335_v53 = vpop.f32.mrf.mxu1  ;;  %v21495_v36 = vld [vmem:[#allocation35_spill] sm:$0xff] }
 0x50e   : > { %v18131_v49 = vadd.f32 %v14366_v15, %v4105_v62  ;;  %v4097_v44 = vadd.f32 %v4096_v50, %v17885_v57 }
 0x50f   : > { %v14327_v26 = vpop.f32.mrf.mxu0  ;;  %v14367_v35 = vpop.f32.mrf.mxu1 }
 0x510   : > { %v18134_v45 = vadd.f32 %v4335_v53, %v4097_v44  ;;  %v4108_v11 = vadd.f32 %v14327_v26, %v17891_v9 }
 0x511   : > { %v18147_v57 = vpop.f32.mrf.mxu0  ;;  %v18149_v10 = vpop.f32.mrf.mxu1 }
 0x512   : > { %v18137_v14 = vadd.f32 %v14367_v35, %v4108_v11  ;;  %v21496_v11 = vld [vmem:[#allocation22_spill] sm:$0xff] }
 0x513   : > { %14561 = vmatmul.mubr.msk.bf16.gmra.mxu0 %vm3704_vm2, %v21486_v42  ;;  %14601 = vmatmul.mubr.msk.bf16.gmra.mxu1 %vm3704_vm2, %v17721_v43 }
 0x514   : > { %14564 = vmatprep.mubr.msk.bf16.mxu0 %vm3704_vm2, %v21487_v38  ;;  %14604 = vmatprep.mubr.msk.bf16.mxu1 %vm3704_vm2, %v17729_v39 }
 0x51b   : > { %v14330_v9 = vpop.f32.mrf.mxu0  ;;  %v14370_v4 = vpop.f32.mrf.mxu1  ;;  %14565 = vmatmul.mubr.msk.bf16.gmra.mxu0 %vm3704_vm2, %v21488_v41  ;;  %14605 = vmatmul.mubr.msk.bf16.gmra.mxu1 %vm3704_vm2, %v17737_v52 }
 0x51c   : > { %v4121_v43 = vadd.f32 %v14330_v9, %v21489_v48  ;;  %14568 = vmatprep.mubr.msk.bf16.mxu0 %vm3704_vm2, %v21490_v12  ;;  %14608 = vmatprep.mubr.msk.bf16.mxu1 %vm3704_vm2, %v17745_v63  ;;  %v21494_v63 = vld [vmem:[#allocation17_spill] sm:$0xff] }
 0x51d   : > { %v4112_v39 = vpop.f32.mrf.mxu0  ;;  %v4351_v37 = vpop.f32.mrf.mxu1 }
 0x51e   : > { %v18160_v6 = vadd.f32 %v14370_v4, %v4121_v43  ;;  %v4113_v60 = vadd.f32 %v4112_v39, %v21491_v29  ;;  %v21497_v4 = vld [vmem:[#allocation25_spill] sm:$0xff] }
 0x51f   : > { %v14331_v25 = vpop.f32.mrf.mxu0  ;;  %v14371_v52 = vpop.f32.mrf.mxu1 }
 0x520   : > { %v18163_v55 = vadd.f32 %v4351_v37, %v4113_v60  ;;  %v4124_v13 = vadd.f32 %v14331_v25, %v21492_v28 }
 0x521   : > { %v18176_v15 = vpop.f32.mrf.mxu0  ;;  %v18178_v40 = vpop.f32.mrf.mxu1 }
 0x522   : > { %v18166_v61 = vadd.f32 %v14371_v52, %v4124_v13 }
 0x523   : > { %14569 = vmatmul.mubr.msk.bf16.gmra.mxu0 %vm3704_vm2, %v21493_v47  ;;  %14609 = vmatmul.mubr.msk.bf16.gmra.mxu1 %vm3704_vm2, %v17755_v32  ;;  %v15657_v32 = vld [vmem:[%s21339_s0 + $0x4] ss:$8 sps:$4 sm:$0xff]  }
 0x524   : > { %14572 = vmatprep.mubr.msk.bf16.mxu0 %vm3704_vm2, %v21494_v63  ;;  %14612 = vmatprep.mubr.msk.bf16.mxu1 %vm3704_vm2, %v18060_v21  ;;  %v15658_v21 = vld [vmem:[%s21339_s0 + $0x104] ss:$8 sps:$4 sm:$0xff]  }
 0x52b   : > { %v14334_v16 = vpop.f32.mrf.mxu0  ;;  %v14374_v62 = vpop.f32.mrf.mxu1  ;;  %14573 = vmatmul.mubr.bf16.gmra.mxu0 %v21477_v23  ;;  %14613 = vmatmul.mubr.bf16.gmra.mxu1 %v21477_v23 }
 0x52c   : > { %v4137_v50 = vadd.f32 %v14334_v16, %v21495_v36  ;;  %6001 = vmatprep.mubr.bf16.mxu0 %v15657_v32  ;;  %6178 = vmatprep.mubr.bf16.mxu1 %v15658_v21 }
 0x52d   : > { %v4128_v53 = vpop.f32.mrf.mxu0  ;;  %v4367_v44 = vpop.f32.mrf.mxu1 }
 0x52e   : > { %v18189_v26 = vadd.f32 %v14374_v62, %v4137_v50  ;;  %v4129_v35 = vadd.f32 %v4128_v53, %v21496_v11 }
 0x52f   : > { %v14335_v42 = vpop.f32.mrf.mxu0  ;;  %v14375_v38 = vpop.f32.mrf.mxu1 }
 0x530   : > { %v18192_v9 = vadd.f32 %v4367_v44, %v4129_v35  ;;  %v4140_v41 = vadd.f32 %v14335_v42, %v21497_v4 }
 0x531   : > { %v18195_v48 = vpop.f32.mrf.mxu0  ;;  %v18197_v43 = vpop.f32.mrf.mxu1 }
 0x532   : > { %v18199_v12 = vadd.f32 %v14375_v38, %v4140_v41 }
 0x533   : > { %v14386_v39 = vpop.f32.mrf.mxu0  ;;  %v14426_v37 = vpop.f32.mrf.mxu1 }
 0x534   : > { %v4613_v29 = vadd.f32 %v14386_v39, %v17982_v22 }
 0x535   : > { %v4484_v60 = vpop.f32.mrf.mxu0  ;;  %v4713_v25 = vpop.f32.mrf.mxu1 }
 0x536   : > { %v18202_v28 = vadd.f32 %v14426_v37, %v4613_v29  ;;  %v4611_v13 = vadd.f32 %v4484_v60, %v17985_v18 }
 0x537   : > { %v14387_v52 = vpop.f32.mrf.mxu0  ;;  %v14427_v47 = vpop.f32.mrf.mxu1 }
 0x538   : > { %v18205_v63 = vadd.f32 %v4713_v25, %v4611_v13  ;;  %v4614_v16 = vadd.f32 %v14387_v52, %v17988_v24 }
 0x539   : > { %v18208_v62 = vpop.f32.mrf.mxu0  ;;  %v18210_v36 = vpop.f32.mrf.mxu1 }
 0x53a   : > { %21498 = vst [vmem:[#allocation8_spill] sm:$0xff] %v18208_v62  ;;  %21499 = vst [vmem:[#allocation28_spill] sm:$0xff] %v18210_v36  ;;  %v18212_v50 = vadd.f32 %v14427_v47, %v4614_v16 }
 0x53b   : > { %v14390_v32 = vpop.f32.mrf.mxu0  ;;  %v14430_v22 = vpop.f32.mrf.mxu1 }
 0x53c   : > { %v4617_v21 = vadd.f32 %v14390_v32, %v18011_v8 }
 0x53d   : > { %v4500_v53 = vpop.f32.mrf.mxu0  ;;  %v4729_v44 = vpop.f32.mrf.mxu1 }
 0x53e   : > { %v18215_v11 = vadd.f32 %v14430_v22, %v4617_v21  ;;  %v4615_v18 = vadd.f32 %v4500_v53, %v18014_v34 }
 0x53f   : > { %v14391_v35 = vpop.f32.mrf.mxu0  ;;  %v14431_v42 = vpop.f32.mrf.mxu1 }
 0x540   : > { %v18218_v38 = vadd.f32 %v4729_v44, %v4615_v18  ;;  %v4618_v24 = vadd.f32 %v14391_v35, %v18017_v20 }
 0x541   : > { %v18221_v4 = vpop.f32.mrf.mxu0  ;;  %v18223_v41 = vpop.f32.mrf.mxu1 }
 0x542   : > { %21500 = vst [vmem:[#allocation32_spill] sm:$0xff] %v18221_v4  ;;  %21501 = vst [vmem:[#allocation24_spill] sm:$0xff] %v18223_v41  ;;  %v18225_v39 = vadd.f32 %v14431_v42, %v4618_v24 }
 0x543   : > { %v14394_v37 = vpop.f32.mrf.mxu0  ;;  %v14434_v8 = vpop.f32.mrf.mxu1 }
 0x544   : > { %v4621_v29 = vadd.f32 %v14394_v37, %v18040_v54 }
 0x545   : > { %v4516_v60 = vpop.f32.mrf.mxu0  ;;  %v4745_v25 = vpop.f32.mrf.mxu1 }
 0x546   : > { %v18228_v13 = vadd.f32 %v14434_v8, %v4621_v29  ;;  %v4619_v34 = vadd.f32 %v4516_v60, %v18043_v59 }
 0x547   : > { %v14395_v52 = vpop.f32.mrf.mxu0  ;;  %v14435_v47 = vpop.f32.mrf.mxu1 }
 0x548   : > { %v18231_v16 = vadd.f32 %v4745_v25, %v4619_v34  ;;  %v4622_v20 = vadd.f32 %v14395_v52, %v18046_v2 }
 0x549   : > { %v18234_v32 = vpop.f32.mrf.mxu0  ;;  %v18236_v22 = vpop.f32.mrf.mxu1 }
 0x54a   : > { %v18238_v21 = vadd.f32 %v14435_v47, %v4622_v20 }
 0x54b   : > { %v14398_v53 = vpop.f32.mrf.mxu0  ;;  %v14438_v54 = vpop.f32.mrf.mxu1 }
 0x54c   : > { %v4625_v44 = vadd.f32 %v14398_v53, %v18074_v27 }
 0x54d   : > { %v4532_v18 = vpop.f32.mrf.mxu0  ;;  %v4761_v35 = vpop.f32.mrf.mxu1 }
 0x54e   : > { %v18241_v42 = vadd.f32 %v14438_v54, %v4625_v44  ;;  %v4623_v59 = vadd.f32 %v4532_v18, %v18077_v31 }
 0x54f   : > { %v14399_v24 = vpop.f32.mrf.mxu0  ;;  %v14439_v37 = vpop.f32.mrf.mxu1 }
 0x550   : > { %v18244_v8 = vadd.f32 %v4761_v35, %v4623_v59  ;;  %v4626_v2 = vadd.f32 %v14399_v24, %v18080_v51 }
 0x551   : > { %v18247_v29 = vpop.f32.mrf.mxu0  ;;  %v18249_v60 = vpop.f32.mrf.mxu1 }
 0x552   : > { %v18251_v25 = vadd.f32 %v14439_v37, %v4626_v2 }
 0x553   : > { %v14402_v34 = vpop.f32.mrf.mxu0  ;;  %v14442_v27 = vpop.f32.mrf.mxu1 }
 0x554   : > { %v4629_v52 = vadd.f32 %v14402_v34, %v18102_v0 }
 0x555   : > { %v4548_v47 = vpop.f32.mrf.mxu0  ;;  %v4777_v20 = vpop.f32.mrf.mxu1 }
 0x556   : > { %v18254_v53 = vadd.f32 %v14442_v27, %v4629_v52  ;;  %v4627_v31 = vadd.f32 %v4548_v47, %v18105_v3 }
 0x557   : > { %v14403_v54 = vpop.f32.mrf.mxu0  ;;  %v14443_v44 = vpop.f32.mrf.mxu1 }
 0x558   : > { %v18257_v18 = vadd.f32 %v4777_v20, %v4627_v31  ;;  %v4630_v51 = vadd.f32 %v14403_v54, %v18108_v17 }
 0x559   : > { %v18260_v35 = vpop.f32.mrf.mxu0  ;;  %v18262_v59 = vpop.f32.mrf.mxu1 }
 0x55a   : > { %21502 = vst [vmem:[#allocation29_spill] sm:$0xff] %v18260_v35  ;;  %21503 = vst [vmem:[#allocation10_spill] sm:$0xff] %v18262_v59  ;;  %v18264_v24 = vadd.f32 %v14443_v44, %v4630_v51 }
 0x55b   : > { %v14406_v37 = vpop.f32.mrf.mxu0  ;;  %v14446_v0 = vpop.f32.mrf.mxu1 }
 0x55c   : > { %v4633_v2 = vadd.f32 %v14406_v37, %v18131_v49 }
 0x55d   : > { %v4564_v34 = vpop.f32.mrf.mxu0  ;;  %v4793_v27 = vpop.f32.mrf.mxu1 }
 0x55e   : > { %v18267_v52 = vadd.f32 %v14446_v0, %v4633_v2  ;;  %v4631_v3 = vadd.f32 %v4564_v34, %v18134_v45 }
 0x55f   : > { %v14407_v47 = vpop.f32.mrf.mxu0  ;;  %v14447_v20 = vpop.f32.mrf.mxu1 }
 0x560   : > { %v18270_v31 = vadd.f32 %v4793_v27, %v4631_v3  ;;  %v4634_v17 = vadd.f32 %v14407_v47, %v18137_v14 }
 0x561   : > { %v18273_v54 = vpop.f32.mrf.mxu0  ;;  %v18275_v44 = vpop.f32.mrf.mxu1 }
 0x562   : > { %21504 = vst [vmem:[#allocation27_spill] sm:$0xff] %v18275_v44  ;;  %v18277_v51 = vadd.f32 %v14447_v20, %v4634_v17 }
 0x563   : > { %v14410_v23 = vpop.f32.mrf.mxu0  ;;  %v14450_v49 = vpop.f32.mrf.mxu1 }
 0x564   : > { %v4637_v37 = vadd.f32 %v14410_v23, %v18160_v6 }
 0x565   : > { %v4580_v0 = vpop.f32.mrf.mxu0  ;;  %v4809_v2 = vpop.f32.mrf.mxu1 }
 0x566   : > { %v18280_v36 = vadd.f32 %v14450_v49, %v4637_v37  ;;  %v4635_v45 = vadd.f32 %v4580_v0, %v18163_v55 }
 0x567   : > { %v14411_v34 = vpop.f32.mrf.mxu0  ;;  %v14451_v27 = vpop.f32.mrf.mxu1 }
 0x568   : > { %v18283_v3 = vadd.f32 %v4809_v2, %v4635_v45  ;;  %v4638_v14 = vadd.f32 %v14411_v34, %v18166_v61 }
 0x569   : > { %v18286_v47 = vpop.f32.mrf.mxu0  ;;  %v18288_v20 = vpop.f32.mrf.mxu1 }
 0x56a   : > { %v18290_v17 = vadd.f32 %v14451_v27, %v4638_v14 }
 0x56b   : > { %v14414_v59 = vpop.f32.mrf.mxu0  ;;  %v14454_v23 = vpop.f32.mrf.mxu1 }
 0x56c   : > { %v4641_v6 = vadd.f32 %v14414_v59, %v18189_v26 }
 0x56d   : > { %v4596_v49 = vpop.f32.mrf.mxu0  ;;  %v4825_v37 = vpop.f32.mrf.mxu1 }
 0x56e   : > { %v18293_v35 = vadd.f32 %v14454_v23, %v4641_v6  ;;  %v4639_v55 = vadd.f32 %v4596_v49, %v18192_v9 }
 0x56f   : > { %v14415_v0 = vpop.f32.mrf.mxu0  ;;  %v14455_v2 = vpop.f32.mrf.mxu1 }
 0x570   : > { %v18296_v45 = vadd.f32 %v4825_v37, %v4639_v55  ;;  %v4642_v61 = vadd.f32 %v14415_v0, %v18199_v12 }
 0x571   : > { %v18299_v34 = vpop.f32.mrf.mxu0  ;;  %v18301_v27 = vpop.f32.mrf.mxu1 }
 0x572   : > { %21505 = vst [vmem:[#allocation41_spill] sm:$0xff] %v18301_v27  ;;  %v18303_v14 = vadd.f32 %v14455_v2, %v4642_v61 }
 0x573   : > { %v14466_v41 = vpop.f32.mrf.mxu0  ;;  %v14506_v26 = vpop.f32.mrf.mxu1 }
 0x574   : > { %21506 = vst [vmem:[#allocation19_spill] sm:$0xff] %v18303_v14  ;;  %v5071_v59 = vadd.f32 %v14466_v41, %v18202_v28 }
 0x575   : > { %v4942_v23 = vpop.f32.mrf.mxu0  ;;  %v5168_v6 = vpop.f32.mrf.mxu1 }
 0x576   : > { %v18306_v62 = vadd.f32 %v14506_v26, %v5071_v59  ;;  %v5069_v9 = vadd.f32 %v4942_v23, %v18205_v63 }
 0x577   : > { %v14467_v49 = vpop.f32.mrf.mxu0  ;;  %v14507_v37 = vpop.f32.mrf.mxu1 }
 0x578   : > { %v18309_v55 = vadd.f32 %v5168_v6, %v5069_v9  ;;  %v5072_v12 = vadd.f32 %v14467_v49, %v18212_v50 }
 0x579   : > { %v18312_v0 = vpop.f32.mrf.mxu0  ;;  %v18314_v2 = vpop.f32.mrf.mxu1 }
 0x57a   : > { %21507 = vst [vmem:[#allocation36_spill] sm:$0xff] %v18312_v0  ;;  %21508 = vst [vmem:[#allocation42_spill] sm:$0xff] %v18314_v2  ;;  %v18316_v61 = vadd.f32 %v14507_v37, %v5072_v12 }
 0x57b   : > { %v14470_v30 = vpop.f32.mrf.mxu0  ;;  %v14510_v28 = vpop.f32.mrf.mxu1 }
 0x57c   : > { %v5075_v41 = vadd.f32 %v14470_v30, %v18215_v11 }
 0x57d   : > { %v4958_v26 = vpop.f32.mrf.mxu0  ;;  %v5184_v59 = vpop.f32.mrf.mxu1 }
 0x57e   : > { %v18319_v44 = vadd.f32 %v14510_v28, %v5075_v41  ;;  %v5073_v63 = vadd.f32 %v4958_v26, %v18218_v38 }
 0x57f   : > { %v14471_v23 = vpop.f32.mrf.mxu0  ;;  %v14511_v6 = vpop.f32.mrf.mxu1 }
 0x580   : > { %v18322_v9 = vadd.f32 %v5184_v59, %v5073_v63  ;;  %v5076_v50 = vadd.f32 %v14471_v23, %v18225_v39 }
 0x581   : > { %v18325_v49 = vpop.f32.mrf.mxu0  ;;  %v18327_v37 = vpop.f32.mrf.mxu1 }
 0x582   : > { %21509 = vst [vmem:[#allocation43_spill] sm:$0xff] %v18325_v49  ;;  %21510 = vst [vmem:[#allocation26_spill] sm:$0xff] %v18327_v37  ;;  %v18329_v12 = vadd.f32 %v14511_v6, %v5076_v50 }
 0x583   : > { %v14474_v2 = vpop.f32.mrf.mxu0  ;;  %v14514_v30 = vpop.f32.mrf.mxu1 }
 0x584   : > { %v5079_v11 = vadd.f32 %v14474_v2, %v18228_v13 }
 0x585   : > { %v4974_v28 = vpop.f32.mrf.mxu0  ;;  %v5200_v41 = vpop.f32.mrf.mxu1 }
 0x586   : > { %v18332_v0 = vadd.f32 %v14514_v30, %v5079_v11  ;;  %v5077_v38 = vadd.f32 %v4974_v28, %v18231_v16 }
 0x587   : > { %v14475_v26 = vpop.f32.mrf.mxu0  ;;  %v14515_v59 = vpop.f32.mrf.mxu1 }
 0x588   : > { %v18335_v63 = vadd.f32 %v5200_v41, %v5077_v38  ;;  %v5080_v39 = vadd.f32 %v14475_v26, %v18238_v21 }
 0x589   : > { %v18338_v23 = vpop.f32.mrf.mxu0  ;;  %v18340_v6 = vpop.f32.mrf.mxu1 }
 0x58a   : > { %v18342_v50 = vadd.f32 %v14515_v59, %v5080_v39 }
 0x58b   : > { %v14478_v37 = vpop.f32.mrf.mxu0  ;;  %v14518_v13 = vpop.f32.mrf.mxu1 }
 0x58c   : > { %v5083_v2 = vadd.f32 %v14478_v37, %v18241_v42 }
 0x58d   : > { %v4990_v30 = vpop.f32.mrf.mxu0  ;;  %v5216_v11 = vpop.f32.mrf.mxu1 }
 0x58e   : > { %v18345_v49 = vadd.f32 %v14518_v13, %v5083_v2  ;;  %v5081_v16 = vadd.f32 %v4990_v30, %v18244_v8 }
 0x58f   : > { %v14479_v28 = vpop.f32.mrf.mxu0  ;;  %v14519_v41 = vpop.f32.mrf.mxu1 }
 0x590   : > { %v18348_v38 = vadd.f32 %v5216_v11, %v5081_v16  ;;  %v5084_v21 = vadd.f32 %v14479_v28, %v18251_v25 }
 0x591   : > { %v18351_v26 = vpop.f32.mrf.mxu0  ;;  %v18353_v59 = vpop.f32.mrf.mxu1 }
 0x592   : > { %v18355_v39 = vadd.f32 %v14519_v41, %v5084_v21 }
 0x593   : > { %v14482_v14 = vpop.f32.mrf.mxu0  ;;  %v14522_v42 = vpop.f32.mrf.mxu1 }
 0x594   : > { %v5087_v37 = vadd.f32 %v14482_v14, %v18254_v53 }
 0x595   : > { %v5006_v13 = vpop.f32.mrf.mxu0  ;;  %v5232_v2 = vpop.f32.mrf.mxu1 }
 0x596   : > { %v18358_v56 = vadd.f32 %v14522_v42, %v5087_v37  ;;  %v5085_v8 = vadd.f32 %v5006_v13, %v18257_v18 }
 0x597   : > { %v14483_v30 = vpop.f32.mrf.mxu0  ;;  %v14523_v11 = vpop.f32.mrf.mxu1 }
 0x598   : > { %v18361_v16 = vadd.f32 %v5232_v2, %v5085_v8  ;;  %v5088_v25 = vadd.f32 %v14483_v30, %v18264_v24 }
 0x599   : > { %v18364_v28 = vpop.f32.mrf.mxu0  ;;  %v18366_v41 = vpop.f32.mrf.mxu1 }
 0x59a   : > { %21511 = vst [vmem:[#allocation31_spill] sm:$0xff] %v18361_v16  ;;  %21512 = vst [vmem:[#allocation11_spill] sm:$0xff] %v18364_v28  ;;  %v18368_v21 = vadd.f32 %v14523_v11, %v5088_v25 }
 0x59b   : > { %21513 = vst [vmem:[#allocation30_spill] sm:$0xff] %v18366_v41  ;;  %v14486_v27 = vpop.f32.mrf.mxu0  ;;  %v14526_v53 = vpop.f32.mrf.mxu1 }
 0x59c   : > { %v5091_v14 = vadd.f32 %v14486_v27, %v18267_v52 }
 0x59d   : > { %v5022_v42 = vpop.f32.mrf.mxu0  ;;  %v5248_v37 = vpop.f32.mrf.mxu1 }
 0x59e   : > { %v18371_v4 = vadd.f32 %v14526_v53, %v5091_v14  ;;  %v5089_v18 = vadd.f32 %v5022_v42, %v18270_v31 }
 0x59f   : > { %v14487_v13 = vpop.f32.mrf.mxu0  ;;  %v14527_v2 = vpop.f32.mrf.mxu1 }
 0x5a0   : > { %v18374_v8 = vadd.f32 %v5248_v37, %v5089_v18  ;;  %v5092_v24 = vadd.f32 %v14487_v13, %v18277_v51 }
 0x5a1   : > { %v18377_v30 = vpop.f32.mrf.mxu0  ;;  %v18379_v11 = vpop.f32.mrf.mxu1 }
 0x5a2   : > { %21514 = vst [vmem:[#allocation13_spill] sm:$0xff] %v18374_v8  ;;  %21515 = vst [vmem:[#allocation23_spill] sm:$0xff] %v18377_v30  ;;  %v18381_v25 = vadd.f32 %v14527_v2, %v5092_v24 }
 0x5a3   : > { %21516 = vst [vmem:[#allocation7_spill] sm:$0xff] %v18379_v11  ;;  %v14490_v16 = vpop.f32.mrf.mxu0  ;;  %v14530_v52 = vpop.f32.mrf.mxu1 }
 0x5a4   : > { %v5095_v27 = vadd.f32 %v14490_v16, %v18280_v36 }
 0x5a5   : > { %v5038_v53 = vpop.f32.mrf.mxu0  ;;  %v5264_v14 = vpop.f32.mrf.mxu1 }
 0x5a6   : > { %v18384_v41 = vadd.f32 %v14530_v52, %v5095_v27  ;;  %v5093_v31 = vadd.f32 %v5038_v53, %v18283_v3 }
 0x5a7   : > { %v14491_v42 = vpop.f32.mrf.mxu0  ;;  %v14531_v37 = vpop.f32.mrf.mxu1 }
 0x5a8   : > { %v18387_v18 = vadd.f32 %v5264_v14, %v5093_v31  ;;  %v5096_v51 = vadd.f32 %v14491_v42, %v18290_v17 }
 0x5a9   : > { %v18390_v13 = vpop.f32.mrf.mxu0  ;;  %v18392_v2 = vpop.f32.mrf.mxu1 }
 0x5aa   : > { %21517 = vst [vmem:[#allocation33_spill] sm:$0xff] %v18387_v18  ;;  %21518 = vst [vmem:[#allocation18_spill] sm:$0xff] %v18392_v2  ;;  %v18394_v24 = vadd.f32 %v14531_v37, %v5096_v51  ;;  %v21523_v18 = vld [vmem:[#allocation20_spill] sm:$0xff] }
 0x5ab   : > { %v14494_v8 = vpop.f32.mrf.mxu0  ;;  %v14534_v36 = vpop.f32.mrf.mxu1 }
 0x5ac   : > { %v5099_v16 = vadd.f32 %v14494_v8, %v18293_v35  ;;  %v18414_v8 = vld [vmem:[%s21271_s6] ss:$0 sm:$0xff] }
 0x5ad   : > { %v5054_v52 = vpop.f32.mrf.mxu0  ;;  %v5280_v27 = vpop.f32.mrf.mxu1 }
 0x5ae   : > { %v18397_v28 = vadd.f32 %v14534_v36, %v5099_v16  ;;  %v5097_v3 = vadd.f32 %v5054_v52, %v18296_v45 }
 0x5af   : > { %v18400_v53 = vpop.f32.mrf.mxu0  ;;  %v18402_v14 = vpop.f32.mrf.mxu1 }
 0x5b0   : > { %21519 = vst [vmem:[#allocation39_spill] sm:$0xff] %v18397_v28  ;;  %21520 = vst [vmem:[#allocation38_spill] sm:$0xff] %v18402_v14  ;;  %v18404_v17 = vadd.f32 %v5280_v27, %v5097_v3  ;;  %v18420_v27 = vld [vmem:[%s21272_s7] ss:$0 sm:$0xff] }
 0x5b1   : > { %v18406_v31 = vpop.f32.mrf.mxu0  ;;  %v18408_v42 = vpop.f32.mrf.mxu1 }
 0x5b2   : > { %21521 = vst [vmem:[#allocation21_spill] sm:$0xff] %v18404_v17  ;;  %21522 = vst [vmem:[#allocation17_spill] sm:$0xff] %v18408_v42 }
 0x5b3   : > { %v14546_v37 = vpop.f32.mrf.mxu0  ;;  %v14586_v51 = vpop.f32.mrf.mxu1 }
 0x5b4   : > { %v5523_v35 = vadd.f32 %v14546_v37, %v18306_v62  ;;  %v4052_v62 = vadd.f32 %v18062_v5, %v21523_v18 }
 0x5b5   : > { %v5394_v45 = vpop.f32.mrf.mxu0  ;;  %v5620_v36 = vpop.f32.mrf.mxu1 }
 0x5b6   : > { %v5749_v16 = vadd.f32 %v14586_v51, %v5523_v35  ;;  %v5521_v52 = vadd.f32 %v5394_v45, %v18309_v55  ;;  %v4391_v28 = vadd.f32 %v18064_v58, %v4052_v62 }
 0x5b7   : > { %v14547_v3 = vpop.f32.mrf.mxu0  ;;  %v14587_v11 = vpop.f32.mrf.mxu1 }
 0x5b8   : > { %v5788_v37 = vmul.f32 %v18414_v8, %v5749_v16  ;;  %v18425_v42 = vadd.f32 %v5620_v36, %v5521_v52  ;;  %v5524_v14 = vadd.f32 %v14547_v3, %v18316_v61  ;;  %v4620_v16 = vadd.f32 %v18234_v32, %v4391_v28 }
 0x5b9   : > { %v18428_v17 = vpop.f32.mrf.mxu0  ;;  %v18430_v51 = vpop.f32.mrf.mxu1 }
 0x5ba   : > { %21524 = vst [vmem:[#allocation35_spill] sm:$0xff] %v18425_v42  ;;  %21525 = vst [vmem:[#allocation22_spill] sm:$0xff] %v18430_v51  ;;  %v5827_v55 = vadd.f32 %v18420_v27, %v5788_v37  ;;  %v5750_v35 = vadd.f32 %v14587_v11, %v5524_v14  ;;  %v4849_v28 = vadd.f32 %v18236_v22, %v4620_v16 }
 0x5bb   : > { %v14550_v45 = vpop.f32.mrf.mxu0  ;;  %v14590_v30 = vpop.f32.mrf.mxu1 }
 0x5bc   : > { %v5789_v2 = vmul.f32 %v18414_v8, %v5750_v35  ;;  %v5527_v5 = vadd.f32 %v14550_v45, %v18319_v44  ;;  %v5891_v61 = vmul.f32 0.01, %v5827_v55  ;;  %vm5859_vm3 = vcmp.ge.f32.partialorder %v5827_v55, 0.0 }
 0x5bd   : > { %v5410_v18 = vpop.f32.mrf.mxu0  ;;  %v5636_v36 = vpop.f32.mrf.mxu1 }
 0x5be   : > { %v5828_v52 = vadd.f32 %v18420_v27, %v5789_v2  ;;  %v5753_v3 = vadd.f32 %v14590_v30, %v5527_v5  ;;  %v5525_v37 = vadd.f32 %v5410_v18, %v18322_v9  ;;  %v5923_v2 = vsel %vm5859_vm3, %v5827_v55, %v5891_v61 }
 0x5bf   : > { %v14551_v11 = vpop.f32.mrf.mxu0  ;;  %v14591_v14 = vpop.f32.mrf.mxu1 }
 0x5c0   : > { %vm5860_vm4 = vcmp.ge.f32.partialorder %v5828_v52, 0.0  ;;  %v5892_v42 = vmul.f32 0.01, %v5828_v52  ;;  %v5528_v58 = vadd.f32 %v14551_v11, %v18329_v12  ;;  %v5792_v62 = vmul.f32 %v18414_v8, %v5753_v3 }
 0x5c1   : > { %v18441_v44 = vadd.f32 %v5636_v36, %v5525_v37  ;;  %v18443_v35 = vpop.f32.mrf.mxu0  ;;  %v18445_v32 = vpop.f32.mrf.mxu1  ;;  %v5078_v12 = vadd.f32 %v18338_v23, %v4849_v28  ;;  %v4624_v37 = vadd.f32 %v18247_v29, %v18087_v46 }
 0x5c2   : > { %v5924_v30 = vsel %vm5860_vm4, %v5828_v52, %v5892_v42  ;;  %v5754_v45 = vadd.f32 %v14591_v14, %v5528_v58  ;;  %v5831_v5 = vadd.f32 %v18420_v27, %v5792_v62 }
 0x5c3   : > { %v18448_v9 = vpack.c.bf16 %v5924_v30, %v5923_v2  ;;  %v14554_v18 = vpop.f32.mrf.mxu0  ;;  %v14594_v51 = vpop.f32.mrf.mxu1  ;;  %v5304_v23 = vadd.f32 %v18340_v6, %v5078_v12 }
 0x5c4   : > { %v5793_v36 = vmul.f32 %v18414_v8, %v5754_v45  ;;  %v5531_v3 = vadd.f32 %v14554_v18, %v18332_v0  ;;  %v5895_v55 = vmul.f32 0.01, %v5831_v5  ;;  %vm5863_vm5 = vcmp.ge.f32.partialorder %v5831_v5, 0.0 }
 0x5c5   : > { %v5426_v11 = vpop.f32.mrf.mxu0  ;;  %v5652_v22 = vpop.f32.mrf.mxu1  ;;  %v4853_v0 = vadd.f32 %v18249_v60, %v4624_v37 }
 0x5c6   : > { %v5832_v42 = vadd.f32 %v18420_v27, %v5793_v36  ;;  %v5757_v16 = vadd.f32 %v14594_v51, %v5531_v3  ;;  %v5529_v61 = vadd.f32 %v5426_v11, %v18335_v63  ;;  %v5927_v30 = vsel %vm5863_vm5, %v5831_v5, %v5895_v55 }
 0x5c7   : > { %v14555_v52 = vpop.f32.mrf.mxu0  ;;  %v14595_v14 = vpop.f32.mrf.mxu1  ;;  %v5082_v63 = vadd.f32 %v18351_v26, %v4853_v0 }
 0x5c8   : > { %vm5864_vm6 = vcmp.ge.f32.partialorder %v5832_v42, 0.0  ;;  %v5896_v58 = vmul.f32 0.01, %v5832_v42  ;;  %v5796_v62 = vmul.f32 %v18414_v8, %v5757_v16  ;;  %v5755_v46 = vadd.f32 %v5652_v22, %v5529_v61 }
 0x5c9   : > { %v5532_v29 = vadd.f32 %v14555_v52, %v18342_v50  ;;  %v5429_v28 = vpop.f32.mrf.mxu0  ;;  %v5655_v2 = vpop.f32.mrf.mxu1 }
 0x5ca   : > { %v5928_v51 = vsel %vm5864_vm6, %v5832_v42, %v5896_v58  ;;  %v5530_v45 = vadd.f32 %v5429_v28, %v5304_v23  ;;  %v5835_v6 = vadd.f32 %v18420_v27, %v5796_v62  ;;  %v5794_v60 = vmul.f32 %v18414_v8, %v5755_v46 }
 0x5cb   : > { %v18463_v18 = vpack.c.bf16 %v5928_v51, %v5927_v30  ;;  %v14558_v12 = vpop.f32.mrf.mxu0  ;;  %v14598_v36 = vpop.f32.mrf.mxu1  ;;  %v5758_v3 = vadd.f32 %v14595_v14, %v5532_v29  ;;  %v5308_v42 = vadd.f32 %v18353_v59, %v5082_v63 }
 0x5cc   : > { %v5756_v37 = vadd.f32 %v5655_v2, %v5530_v45  ;;  %v5535_v11 = vadd.f32 %v14558_v12, %v18345_v49  ;;  %v5833_v5 = vadd.f32 %v18420_v27, %v5794_v60  ;;  %vm5867_vm7 = vcmp.ge.f32.partialorder %v5835_v6, 0.0 }
 0x5cd   : > { %v5442_v50 = vpop.f32.mrf.mxu0  ;;  %v5668_v22 = vpop.f32.mrf.mxu1  ;;  %v5797_v55 = vmul.f32 %v18414_v8, %v5758_v3  ;;  %v5899_v14 = vmul.f32 0.01, %v5835_v6 }
 0x5ce   : > { %v5795_v26 = vmul.f32 %v18414_v8, %v5756_v37  ;;  %v5761_v16 = vadd.f32 %v14598_v36, %v5535_v11  ;;  %v5533_v61 = vadd.f32 %v5442_v50, %v18348_v38  ;;  %v5897_v0 = vmul.f32 0.01, %v5833_v5 }
 0x5cf   : > { %v14559_v52 = vpop.f32.mrf.mxu0  ;;  %v14599_v23 = vpop.f32.mrf.mxu1  ;;  %v5836_v58 = vadd.f32 %v18420_v27, %v5797_v55  ;;  %vm5865_vm8 = vcmp.ge.f32.partialorder %v5833_v5, 0.0  ;;  %v5931_v36 = vsel %vm5867_vm7, %v5835_v6, %v5899_v14 }
 0x5d0   : > { %v5834_v49 = vadd.f32 %v18420_v27, %v5795_v26  ;;  %v5800_v62 = vmul.f32 %v18414_v8, %v5761_v16  ;;  %v5759_v46 = vadd.f32 %v5668_v22, %v5533_v61  ;;  %v5536_v29 = vadd.f32 %v14559_v52, %v18355_v39 }
 0x5d1   : > { %v5445_v28 = vpop.f32.mrf.mxu0  ;;  %v5671_v2 = vpop.f32.mrf.mxu1  ;;  %vm5868_vm9 = vcmp.ge.f32.partialorder %v5836_v58, 0.0  ;;  %v5900_v59 = vmul.f32 0.01, %v5836_v58  ;;  %v5929_v37 = vsel %vm5865_vm8, %v5833_v5, %v5897_v0 }
 0x5d2   : > { %vm5866_vm10 = vcmp.ge.f32.partialorder %v5834_v49, 0.0  ;;  %v5898_v38 = vmul.f32 0.01, %v5834_v49  ;;  %v5839_v30 = vadd.f32 %v18420_v27, %v5800_v62  ;;  %v5798_v51 = vmul.f32 %v18414_v8, %v5759_v46 }
 0x5d3   : > { %v5762_v45 = vadd.f32 %v14599_v23, %v5536_v29  ;;  %v14562_v63 = vpop.f32.mrf.mxu0  ;;  %v14602_v12 = vpop.f32.mrf.mxu1  ;;  %v5932_v60 = vsel %vm5868_vm9, %v5836_v58, %v5900_v59  ;;  %v5534_v3 = vadd.f32 %v5445_v28, %v5308_v42 }
 0x5d4   : > { %v5539_v39 = vadd.f32 %v14562_v63, %v18358_v56  ;;  %v18481_v11 = vpack.c.bf16 %v5932_v60, %v5931_v36  ;;  %v5930_v50 = vsel %vm5866_vm10, %v5834_v49, %v5898_v38  ;;  %v5837_v16 = vadd.f32 %v18420_v27, %v5798_v51  ;;  %v21527_v36 = vld [vmem:[#allocation40_spill] sm:$0xff] }
 0x5d5   : > { %v18483_v22 = vpop.f32.mrf.mxu0  ;;  %v18485_v55 = vpop.f32.mrf.mxu1  ;;  %v18487_v26 = vpack.c.bf16 %v5930_v50, %v5929_v37  ;;  %v5801_v61 = vmul.f32 %v18414_v8, %v5762_v45  ;;  %v5760_v52 = vadd.f32 %v5671_v2, %v5534_v3  ;;  %v5903_v6 = vmul.f32 0.01, %v5839_v30 }
 0x5d6   : > { %21526 = vst [vmem:[#allocation25_spill] sm:$0xff] %v18481_v11  ;;  %v5765_v23 = vadd.f32 %v14602_v12, %v5539_v39  ;;  %vm5871_vm11 = vcmp.ge.f32.partialorder %v5839_v30, 0.0  ;;  %v5901_v46 = vmul.f32 0.01, %v5837_v16  ;;  %vm5869_vm13 = vcmp.ge.f32.partialorder %v5837_v16, 0.0 }
 0x5d7   : > { %v14563_v42 = vpop.f32.mrf.mxu0  ;;  %v14603_v14 = vpop.f32.mrf.mxu1  ;;  %v5840_v56 = vadd.f32 %v18420_v27, %v5801_v61  ;;  %v5799_v5 = vmul.f32 %v18414_v8, %v5760_v52  ;;  %v5935_v2 = vsel %vm5871_vm11, %v5839_v30, %v5903_v6  ;;  %v4116_v60 = vadd.f32 %v18176_v15, %v21527_v36 }
 0x5d8   : > { %v5804_v58 = vmul.f32 %v18414_v8, %v5765_v23  ;;  %v5540_v49 = vadd.f32 %v14563_v42, %v18368_v21  ;;  %v5933_v30 = vsel %vm5869_vm13, %v5837_v16, %v5901_v46 }
 0x5d9   : > { %v18495_v0 = vpop.f32.mrf.mxu0  ;;  %v18497_v62 = vpop.f32.mrf.mxu1  ;;  %vm5872_vm12 = vcmp.ge.f32.partialorder %v5840_v56, 0.0  ;;  %v5904_v29 = vmul.f32 0.01, %v5840_v56  ;;  %v5838_v28 = vadd.f32 %v18420_v27, %v5799_v5 }
 0x5da   : > { %v5843_v59 = vadd.f32 %v18420_v27, %v5804_v58  ;;  %v5766_v38 = vadd.f32 %v14603_v14, %v5540_v49  ;;  %v21530_v14 = vld [vmem:[#allocation34_spill] sm:$0xff]  ;;  %v4407_v58 = vadd.f32 %v18178_v40, %v4116_v60 }
 0x5db   : > { %v14566_v51 = vpop.f32.mrf.mxu0  ;;  %v14606_v45 = vpop.f32.mrf.mxu1  ;;  %v5936_v63 = vsel %vm5872_vm12, %v5840_v56, %v5904_v29  ;;  %vm5870_vm14 = vcmp.ge.f32.partialorder %v5838_v28, 0.0  ;;  %v5902_v12 = vmul.f32 0.01, %v5838_v28  ;;  %v21531_v29 = vld [vmem:[#allocation16_spill] sm:$0xff] }
 0x5dc   : > { %v5543_v21 = vadd.f32 %v14566_v51, %v18371_v4  ;;  %v18504_v3 = vpack.c.bf16 %v5936_v63, %v5935_v2  ;;  %v5805_v61 = vmul.f32 %v18414_v8, %v5766_v38  ;;  %v4132_v4 = vadd.f32 %v18195_v48, %v21530_v14  ;;  %v21532_v48 = vld [vmem:[#allocation14_spill] sm:$0xff] }
 0x5dd   : > { %v18506_v39 = vpop.f32.mrf.mxu0  ;;  %v18508_v37 = vpop.f32.mrf.mxu1  ;;  %v5934_v50 = vsel %vm5870_vm14, %v5838_v28, %v5902_v12  ;;  %v5907_v56 = vmul.f32 0.01, %v5843_v59  ;;  %vm5875_vm15 = vcmp.ge.f32.partialorder %v5843_v59, 0.0  ;;  %v4100_v28 = vadd.f32 %v18147_v57, %v21531_v29 }
 0x5de   : > { %21528 = vst [vmem:[#allocation20_spill] sm:$0xff] %v18504_v3  ;;  %v5769_v52 = vadd.f32 %v14606_v45, %v5543_v21  ;;  %v18511_v6 = vpack.c.bf16 %v5934_v50, %v5933_v30  ;;  %v5844_v15 = vadd.f32 %v18420_v27, %v5805_v61  ;;  %v4036_v38 = vadd.f32 %v18027_v19, %v21532_v48  ;;  %v21534_v61 = vld [vmem:[#allocation12_spill] sm:$0xff] }
 0x5df   : > { %v14567_v23 = vpop.f32.mrf.mxu0  ;;  %v14607_v42 = vpop.f32.mrf.mxu1  ;;  %v4636_v51 = vadd.f32 %v18286_v47, %v4407_v58  ;;  %v5939_v21 = vsel %vm5875_vm15, %v5843_v59, %v5907_v56  ;;  %v4020_v19 = vadd.f32 %v17998_v7, %v21534_v61  ;;  %v4403_v47 = vadd.f32 %v18149_v10, %v4100_v28  ;;  %v21535_v10 = vld [vmem:[#allocation37_spill] sm:$0xff] }
 0x5e0   : > { %21529 = vst [vmem:[#allocation40_spill] sm:$0xff] %v18511_v6  ;;  %v5808_v5 = vmul.f32 %v18414_v8, %v5769_v52  ;;  %v5544_v16 = vadd.f32 %v14567_v23, %v18381_v25  ;;  %vm5876_vm0 = vcmp.ge.f32.partialorder %v5844_v15, 0.0  ;;  %v5908_v2 = vmul.f32 0.01, %v5844_v15  ;;  %v21537_v28 = vld [vmem:[#allocation41_spill] sm:$0xff] }
 0x5e1   : > { %v18519_v49 = vpop.f32.mrf.mxu0  ;;  %v18521_v46 = vpop.f32.mrf.mxu1  ;;  %v4411_v25 = vadd.f32 %v18197_v43, %v4132_v4  ;;  %v4387_v43 = vadd.f32 %v18029_v1, %v4036_v38  ;;  %v4865_v59 = vadd.f32 %v18288_v20, %v4636_v51  ;;  %v21538_v38 = vld [vmem:[#allocation15_spill] sm:$0xff] }
 0x5e2   : > { %v5847_v45 = vadd.f32 %v18420_v27, %v5808_v5  ;;  %v5770_v40 = vadd.f32 %v14607_v42, %v5544_v16  ;;  %v5940_v36 = vsel %vm5876_vm0, %v5844_v15, %v5908_v2  ;;  %v4632_v15 = vadd.f32 %v18273_v54, %v4403_v47  ;;  %v21536_v16 = vld [vmem:[#allocation32_spill] sm:$0xff]  ;;  %v21542_v47 = vld [vmem:[#allocation9_spill] sm:$0xff] }
 0x5e3   : > { %v14570_v63 = vpop.f32.mrf.mxu0  ;;  %v14610_v12 = vpop.f32.mrf.mxu1  ;;  %v18530_v60 = vpack.c.bf16 %v5940_v36, %v5939_v21  ;;  %v4640_v52 = vadd.f32 %v18299_v34, %v4411_v25  ;;  %v4084_v34 = vadd.f32 %v18118_v33, %v21535_v10  ;;  %v4616_v29 = vadd.f32 %v21536_v16, %v4387_v43  ;;  %v21540_v25 = vld [vmem:[#allocation27_spill] sm:$0xff] }
 0x5e4   : > { %v5809_v57 = vmul.f32 %v18414_v8, %v5770_v40  ;;  %v5547_v23 = vadd.f32 %v14570_v63, %v18384_v41  ;;  %v5911_v42 = vmul.f32 0.01, %v5847_v45  ;;  %vm5879_vm1 = vcmp.ge.f32.partialorder %v5847_v45, 0.0  ;;  %v21539_v40 = vld [vmem:[#allocation19_spill] sm:$0xff] }
 0x5e5   : > { %21533 = vst [vmem:[#allocation34_spill] sm:$0xff] %v18530_v60  ;;  %v5490_v30 = vpop.f32.mrf.mxu0  ;;  %v18533_v50 = vpop.f32.mrf.mxu1  ;;  %v5094_v41 = vadd.f32 %v18390_v13, %v4865_v59  ;;  %v4869_v2 = vadd.f32 %v21537_v28, %v4640_v52  ;;  %v4383_v51 = vadd.f32 %v21538_v38, %v4020_v19  ;;  %v4861_v21 = vadd.f32 %v21540_v25, %v4632_v15  ;;  %v21544_v59 = vld [vmem:[#allocation39_spill] sm:$0xff] }
 0x5e6   : > { %v5848_v14 = vadd.f32 %v18420_v27, %v5809_v57  ;;  %v5773_v5 = vadd.f32 %v14610_v12, %v5547_v23  ;;  %v5943_v63 = vsel %vm5879_vm1, %v5847_v45, %v5911_v42  ;;  %v4399_v52 = vadd.f32 %v21542_v47, %v4084_v34  ;;  %v21543_v23 = vld [vmem:[#allocation18_spill] sm:$0xff] }
 0x5e7   : > { %v14571_v4 = vpop.f32.mrf.mxu0  ;;  %v14611_v56 = vpop.f32.mrf.mxu1  ;;  %v5098_v36 = vadd.f32 %v18406_v31, %v4869_v2  ;;  %v5320_v43 = vadd.f32 %v21543_v23, %v5094_v41 }
 0x5e8   : > { %v5548_v7 = vadd.f32 %v14571_v4, %v18394_v24  ;;  %vm5880_vm3 = vcmp.ge.f32.partialorder %v5848_v14, 0.0  ;;  %v5912_v1 = vmul.f32 0.01, %v5848_v14  ;;  %v5812_v48 = vmul.f32 %v18414_v8, %v5773_v5  ;;  %v21547_v5 = vld [vmem:[#allocation23_spill] sm:$0xff] }
 0x5e9   : > { %v5493_v58 = vpop.f32.mrf.mxu0  ;;  %v5719_v20 = vpop.f32.mrf.mxu1  ;;  %v5100_v24 = vadd.f32 %v18400_v53, %v21539_v40  ;;  %v5090_v31 = vadd.f32 %v21547_v5, %v4861_v21  ;;  %v21552_v21 = vld [vmem:[#allocation29_spill] sm:$0xff] }
 0x5ea   : > { %v5774_v54 = vadd.f32 %v14611_v56, %v5548_v7  ;;  %v5944_v33 = vsel %vm5880_vm3, %v5848_v14, %v5912_v1  ;;  %v5851_v61 = vadd.f32 %v18420_v27, %v5812_v48  ;;  %v21545_v14 = vld [vmem:[#allocation8_spill] sm:$0xff]  ;;  %v21548_v7 = vld [vmem:[#allocation21_spill] sm:$0xff]  ;;  %v21549_v1 = vld [vmem:[#allocation38_spill] sm:$0xff]  ;;  %v5546_v41 = vadd.f32 %v5493_v58, %v5320_v43 }
 0x5eb   : > { %v14574_v12 = vpop.f32.mrf.mxu0  ;;  %v14614_v13 = vpop.f32.mrf.mxu1  ;;  %v18556_v57 = vpack.c.bf16 %v5944_v33, %v5943_v63  ;;  %v4612_v4 = vadd.f32 %v21545_v14, %v4383_v51  ;;  %v21546_v56 = vld [vmem:[#allocation24_spill] sm:$0xff]  ;;  %v5326_v16 = vadd.f32 %v21549_v1, %v5100_v24  ;;  %v21550_v48 = vld [vmem:[#allocation17_spill] sm:$0xff]  ;;  %v4628_v47 = vadd.f32 %v21552_v21, %v4399_v52 }
 0x5ec   : > { %v5813_v19 = vmul.f32 %v18414_v8, %v5774_v54  ;;  %v5551_v53 = vadd.f32 %v14574_v12, %v21544_v59  ;;  %v4845_v15 = vadd.f32 %v21546_v56, %v4616_v29  ;;  %v5915_v28 = vmul.f32 0.01, %v5851_v61  ;;  %v21551_v51 = vld [vmem:[#allocation33_spill] sm:$0xff] }
 0x5ed   : > { %21541 = vst [vmem:[#allocation16_spill] sm:$0xff] %v18556_v57  ;;  %v5506_v45 = vpop.f32.mrf.mxu0  ;;  %v5732_v42 = vpop.f32.mrf.mxu1  ;;  %v5324_v54 = vadd.f32 %v21550_v48, %v5098_v36  ;;  %vm5883_vm4 = vcmp.ge.f32.partialorder %v5851_v61, 0.0  ;;  %v5545_v33 = vadd.f32 %v5490_v30, %v21551_v51  ;;  %v5772_v36 = vadd.f32 %v5719_v20, %v5546_v41  ;;  %v21558_v41 = vld [vmem:[#allocation26_spill] sm:$0xff]  ;;  %v21559_v48 = vld [vmem:[#allocation11_spill] sm:$0xff] }
 0x5ee   : > { %v5549_v10 = vadd.f32 %v5506_v45, %v21548_v7  ;;  %v5852_v34 = vadd.f32 %v18420_v27, %v5813_v19  ;;  %v5777_v38 = vadd.f32 %v14614_v13, %v5551_v53  ;;  %v5947_v43 = vsel %vm5883_vm4, %v5851_v61, %v5915_v28  ;;  %v21553_v13 = vld [vmem:[#allocation43_spill] sm:$0xff] }
 0x5ef   : > { %v14575_v2 = vpop.f32.mrf.mxu0  ;;  %v14615_v63 = vpop.f32.mrf.mxu1  ;;  %v5074_v53 = vadd.f32 %v21553_v13, %v4845_v15  ;;  %v21554_v45 = vld [vmem:[#allocation7_spill] sm:$0xff]  ;;  %v5771_v52 = vadd.f32 %v18533_v50, %v5545_v33 }
 0x5f0   : > { %v5775_v40 = vadd.f32 %v5732_v42, %v5549_v10  ;;  %vm5884_vm5 = vcmp.ge.f32.partialorder %v5852_v34, 0.0  ;;  %v5916_v29 = vmul.f32 0.01, %v5852_v34  ;;  %v5552_v12 = vadd.f32 %v14575_v2, %v5326_v16  ;;  %v21556_v10 = vld [vmem:[#allocation10_spill] sm:$0xff]  ;;  %v21557_v16 = vld [vmem:[#allocation28_spill] sm:$0xff] }
 0x5f1   : > { %v5509_v25 = vpop.f32.mrf.mxu0  ;;  %v5816_v24 = vmul.f32 %v18414_v8, %v5777_v38  ;;  %v5316_v42 = vadd.f32 %v21554_v45, %v5090_v31  ;;  %v5735_v56 = vpop.f32.mrf.mxu1  ;;  %v4857_v1 = vadd.f32 %v21556_v10, %v4628_v47  ;;  %v4841_v15 = vadd.f32 %v21557_v16, %v4612_v4  ;;  %v21560_v38 = vld [vmem:[#allocation13_spill] sm:$0xff]  ;;  %v21561_v47 = vld [vmem:[#allocation36_spill] sm:$0xff] }
 0x5f2   : > { %v5814_v23 = vmul.f32 %v18414_v8, %v5775_v40  ;;  %v5550_v58 = vadd.f32 %v5509_v25, %v5324_v54  ;;  %v5948_v19 = vsel %vm5884_vm5, %v5852_v34, %v5916_v29  ;;  %v5778_v59 = vadd.f32 %v14615_v63, %v5552_v12 }
 0x5f3   : > { %v18576_v30 = vpack.c.bf16 %v5948_v19, %v5947_v43  ;;  %v5855_v14 = vadd.f32 %v18420_v27, %v5816_v24  ;;  %v5542_v61 = vadd.f32 %v18519_v49, %v5316_v42  ;;  %v5811_v31 = vmul.f32 %v18414_v8, %v5772_v36 }
 0x5f4   : > { %v5817_v5 = vmul.f32 %v18414_v8, %v5778_v59  ;;  %v5776_v7 = vadd.f32 %v5735_v56, %v5550_v58  ;;  %v5853_v20 = vadd.f32 %v18420_v27, %v5814_v23  ;;  %v5300_v2 = vadd.f32 %v21558_v41, %v5074_v53  ;;  %v21563_v58 = vld [vmem:[#allocation30_spill] sm:$0xff] }
 0x5f5   : > { %21555 = vst [vmem:[#allocation14_spill] sm:$0xff] %v18576_v30  ;;  %v5919_v28 = vmul.f32 0.01, %v5855_v14  ;;  %v5086_v50 = vadd.f32 %v21559_v48, %v4857_v1  ;;  %vm5887_vm6 = vcmp.ge.f32.partialorder %v5855_v14, 0.0  ;;  %v5541_v40 = vadd.f32 %v18506_v39, %v21560_v38 }
 0x5f6   : > { %v5856_v34 = vadd.f32 %v18420_v27, %v5817_v5  ;;  %v5815_v54 = vmul.f32 %v18414_v8, %v5776_v7  ;;  %v5810_v49 = vmul.f32 %v18414_v8, %v5771_v52  ;;  %v5526_v4 = vadd.f32 %v18443_v35, %v5300_v2 }
 0x5f7   : > { %v5768_v51 = vadd.f32 %v18521_v46, %v5542_v61  ;;  %v5917_v33 = vmul.f32 0.01, %v5853_v20  ;;  %v5850_v12 = vadd.f32 %v18420_v27, %v5811_v31  ;;  %vm5885_vm8 = vcmp.ge.f32.partialorder %v5853_v20, 0.0 }
 0x5f8   : > { %vm5888_vm7 = vcmp.ge.f32.partialorder %v5856_v34, 0.0  ;;  %v5920_v63 = vmul.f32 0.01, %v5856_v34  ;;  %v5854_v29 = vadd.f32 %v18420_v27, %v5815_v54  ;;  %v5951_v25 = vsel %vm5887_vm6, %v5855_v14, %v5919_v28 }
 0x5f9   : > { %v5070_v24 = vadd.f32 %v21561_v47, %v4841_v15  ;;  %v5312_v43 = vadd.f32 %v21563_v58, %v5086_v50  ;;  %v5767_v35 = vadd.f32 %v18508_v37, %v5541_v40  ;;  %v5849_v46 = vadd.f32 %v18420_v27, %v5810_v49  ;;  %v21565_v37 = vld [vmem:[#allocation42_spill] sm:$0xff]  ;;  %v21569_v40 = vld [vmem:[#allocation35_spill] sm:$0xff] }
 0x5fa   : > { %v5952_v21 = vsel %vm5888_vm7, %v5856_v34, %v5920_v63  ;;  %vm5886_vm9 = vcmp.ge.f32.partialorder %v5854_v29, 0.0  ;;  %v5918_v39 = vmul.f32 0.01, %v5854_v29  ;;  %v5752_v19 = vadd.f32 %v18445_v32, %v5526_v4  ;;  %v21566_v32 = vld [vmem:[#allocation31_spill] sm:$0xff] }
 0x5fb   : > { %v18598_v23 = vpack.c.bf16 %v5952_v21, %v5951_v25  ;;  %v5949_v36 = vsel %vm5885_vm8, %v5853_v20, %v5917_v33  ;;  %v5538_v13 = vadd.f32 %v18495_v0, %v5312_v43  ;;  %v5807_v53 = vmul.f32 %v18414_v8, %v5768_v51 }
 0x5fc   : > { %v5950_v59 = vsel %vm5886_vm9, %v5854_v29, %v5918_v39  ;;  %v5914_v45 = vmul.f32 0.01, %v5850_v12  ;;  %v5296_v14 = vadd.f32 %v21565_v37, %v5070_v24  ;;  %vm5882_vm10 = vcmp.ge.f32.partialorder %v5850_v12, 0.0  ;;  %v15661_v37 = vld [vmem:[%s21339_s0 + $0x14] ss:$8 sps:$4 sm:$0xff]  }
 0x5fd   : > { %21562 = vst [vmem:[#allocation12_spill] sm:$0xff] %v18598_v23  ;;  %13142 = vmatprep.subr.bf16.mxu0 %v18598_v23  ;;  %13254 = vmatprep.subr.bf16.mxu1 %v18598_v23  ;;  %v18608_v42 = vpack.c.bf16 %v5950_v59, %v5949_v36  ;;  %v5537_v56 = vadd.f32 %v18483_v22, %v21566_v32  ;;  %v5913_v5 = vmul.f32 0.01, %v5849_v46  ;;  %vm5881_vm11 = vcmp.ge.f32.partialorder %v5849_v46, 0.0  ;;  %v15517_v36 = vld [vmem:[%s21273_s8 + $0x38] sm:$0xff]   ;;  %v15519_v32 = vld [vmem:[%s21273_s8 + $0x28] sm:$0xff]  }
 0x5fe   : > { %13143 = vmatpush3.bf16.msra.mxu0 %v18504_v3  ;;  %13255 = vmatpush3.bf16.msra.mxu1 %v18504_v3  ;;  %v5806_v52 = vmul.f32 %v18414_v8, %v5767_v35  ;;  %v5522_v0 = vadd.f32 %v18428_v17, %v5296_v14  ;;  %v5791_v7 = vmul.f32 %v18414_v8, %v5752_v19  ;;  %v15662_v14 = vld [vmem:[%s21339_s0 + $0x114] ss:$8 sps:$4 sm:$0xff]  }
 0x5ff   : > { %21564 = vst [vmem:[#allocation37_spill] sm:$0xff] %v18608_v42  ;;  %13144 = vmatprep.subr.bf16.mxu0 %v18608_v42  ;;  %13256 = vmatprep.subr.bf16.mxu1 %v18608_v42  ;;  %v5764_v10 = vadd.f32 %v18497_v62, %v5538_v13  ;;  %v5846_v1 = vadd.f32 %v18420_v27, %v5807_v53  ;;  %v21567_v62 = vld [vmem:[#allocation22_spill] sm:$0xff]  ;;  %v15518_v13 = vld [vmem:[%s21273_s8 + $0x30] sm:$0xff]  }
 0x600   : > { %v5946_v61 = vsel %vm5882_vm10, %v5850_v12, %v5914_v45  ;;  %v5790_v22 = vmul.f32 %v18414_v8, %v18441_v44  ;;  %v5763_v17 = vadd.f32 %v18485_v55, %v5537_v56  ;;  %v5845_v20 = vadd.f32 %v18420_v27, %v5806_v52  ;;  %v15659_v53 = vld [vmem:[%s21339_s0] ss:$8 sps:$4 sm:$0xff]   ;;  %v15663_v52 = vld [vmem:[%s21339_s0 + $0x10] ss:$8 sps:$4 sm:$0xff]  }
 0x601   : > { %v5945_v16 = vsel %vm5881_vm11, %v5849_v46, %v5913_v5  ;;  %v5748_v15 = vadd.f32 %v21567_v62, %v5522_v0  ;;  %v5830_v31 = vadd.f32 %v18420_v27, %v5791_v7  ;;  %v5803_v34 = vmul.f32 %v18414_v8, %v5764_v10  ;;  %v15660_v45 = vld [vmem:[%s21339_s0 + $0x100] ss:$8 sps:$4 sm:$0xff]   ;;  %v15664_v5 = vld [vmem:[%s21339_s0 + $0x110] ss:$8 sps:$4 sm:$0xff]   ;;  %v15665_v0 = vld [vmem:[%s21339_s0 + $0x24] ss:$8 sps:$4 sm:$0xff]  }
 0x602   : > { %13145 = vmatpush3.bf16.msra.mxu0 %v18511_v6  ;;  %13257 = vmatpush3.bf16.msra.mxu1 %v18511_v6  ;;  %v18632_v28 = vpack.c.bf16 %v5946_v61, %v5945_v16  ;;  %v5910_v41 = vmul.f32 0.01, %v5846_v1  ;;  %v5829_v44 = vadd.f32 %v18420_v27, %v5790_v22  ;;  %vm5878_vm12 = vcmp.ge.f32.partialorder %v5846_v1, 0.0  ;;  %v15520_v56 = vld [vmem:[%s21273_s8 + $0x20] sm:$0xff]   ;;  %v15669_v61 = vld [vmem:[%s21339_s0 + $0x34] ss:$8 sps:$4 sm:$0xff]  }
 0x603   : > { %13146 = vmatprep.subr.bf16.mxu0 %v18576_v30  ;;  %13258 = vmatprep.subr.bf16.mxu1 %v18576_v30  ;;  %v5802_v55 = vmul.f32 %v18414_v8, %v5763_v17  ;;  %v5909_v2 = vmul.f32 0.01, %v5845_v20  ;;  %v5787_v48 = vmul.f32 %v18414_v8, %v5748_v15  ;;  %v5894_v50 = vmul.f32 0.01, %v5830_v31  ;;  %v15666_v7 = vld [vmem:[%s21339_s0 + $0x124] ss:$8 sps:$4 sm:$0xff]  }
 0x604   : > { %21568 = vst [vmem:[#allocation32_spill] sm:$0xff] %v18632_v28  ;;  %vm5877_vm13 = vcmp.ge.f32.partialorder %v5845_v20, 0.0  ;;  %vm5862_vm14 = vcmp.ge.f32.partialorder %v5830_v31, 0.0  ;;  %v5842_v54 = vadd.f32 %v18420_v27, %v5803_v34  ;;  %v5942_v38 = vsel %vm5878_vm12, %v5846_v1, %v5910_v41  ;;  %v15667_v10 = vld [vmem:[%s21339_s0 + $0x20] ss:$8 sps:$4 sm:$0xff]  }
 0x605   : > { %v5786_v49 = vmul.f32 %v18414_v8, %v21569_v40  ;;  %v5893_v63 = vmul.f32 0.01, %v5829_v44  ;;  %vm5861_vm15 = vcmp.ge.f32.partialorder %v5829_v44, 0.0  ;;  %v5841_v4 = vadd.f32 %v18420_v27, %v5802_v55  ;;  %v15668_v1 = vld [vmem:[%s21339_s0 + $0x120] ss:$8 sps:$4 sm:$0xff]  }
 0x606   : > { %13147 = vmatpush3.bf16.msra.mxu0 %v18481_v11  ;;  %13259 = vmatpush3.bf16.msra.mxu1 %v18481_v11  ;;  %v5941_v51 = vsel %vm5877_vm13, %v5845_v20, %v5909_v2  ;;  %v5826_v33 = vadd.f32 %v18420_v27, %v5787_v48  ;;  %v5926_v29 = vsel %vm5862_vm14, %v5830_v31, %v5894_v50  ;;  %v5906_v25 = vmul.f32 0.01, %v5842_v54  ;;  %v15670_v22 = vld [vmem:[%s21339_s0 + $0x134] ss:$8 sps:$4 sm:$0xff]   ;;  %v15671_v17 = vld [vmem:[%s21339_s0 + $0x30] ss:$8 sps:$4 sm:$0xff]  }
 0x607   : > { %13148 = vmatprep.subr.bf16.mxu0 %v18632_v28  ;;  %13260 = vmatprep.subr.bf16.mxu1 %v18632_v28  ;;  %v18651_v12 = vpack.c.bf16 %v5942_v38, %v5941_v51  ;;  %v5825_v8 = vadd.f32 %v18420_v27, %v5786_v49  ;;  %v5925_v21 = vsel %vm5861_vm15, %v5829_v44, %v5893_v63  ;;  %vm5874_vm0 = vcmp.ge.f32.partialorder %v5842_v54, 0.0  ;;  %v15672_v20 = vld [vmem:[%s21339_s0 + $0x130] ss:$8 sps:$4 sm:$0xff]   ;;  %v15673_v16 = vld [vmem:[%s21339_s0 + $0x44] ss:$8 sps:$4 sm:$0xff]  }
 0x608   : > { %v18658_v47 = vpack.c.bf16 %v5926_v29, %v5925_v21  ;;  %v5905_v24 = vmul.f32 0.01, %v5841_v4  ;;  %v5890_v39 = vmul.f32 0.01, %v5826_v33  ;;  %vm5873_vm1 = vcmp.ge.f32.partialorder %v5841_v4, 0.0  ;;  %v15521_v44 = vld [vmem:[%s21273_s8 + $0x18] sm:$0xff]  }
 0x609   : > { %21570 = vst [vmem:[#allocation41_spill] sm:$0xff] %v18651_v12  ;;  %vm5858_vm3 = vcmp.ge.f32.partialorder %v5826_v33, 0.0  ;;  %v5938_v58 = vsel %vm5874_vm0, %v5842_v54, %v5906_v25  ;;  %v5889_v43 = vmul.f32 0.01, %v5825_v8  ;;  %vm5857_vm4 = vcmp.ge.f32.partialorder %v5825_v8, 0.0  ;;  %v18782_v51 = vld [vmem:[%s21273_s8 + $0x58] sm:$0xff]  }
 0x60a   : > { %13149 = vmatpush3.bf16.msra.mxu0 %v18487_v26  ;;  %13261 = vmatpush3.bf16.msra.mxu1 %v18487_v26  ;;  %v5937_v27 = vsel %vm5873_vm1, %v5841_v4, %v5905_v24  ;;  %v5922_v46 = vsel %vm5858_vm3, %v5826_v33, %v5890_v39  ;;  %v15674_v62 = vld [vmem:[%s21339_s0 + $0x144] ss:$8 sps:$4 sm:$0xff]   ;;  %v15675_v15 = vld [vmem:[%s21339_s0 + $0x40] ss:$8 sps:$4 sm:$0xff]   ;;  %v15677_v34 = vld [vmem:[%s21339_s0 + $0x54] ss:$8 sps:$4 sm:$0xff]  }
 0x60b   : > { %13150 = vmatprep.subr.bf16.mxu0 %v18556_v57  ;;  %13262 = vmatprep.subr.bf16.mxu1 %v18556_v57  ;;  %v18664_v35 = vpack.c.bf16 %v5938_v58, %v5937_v27  ;;  %v5921_v19 = vsel %vm5857_vm4, %v5825_v8, %v5889_v43  ;;  %v15676_v31 = vld [vmem:[%s21339_s0 + $0x140] ss:$8 sps:$4 sm:$0xff]   ;;  %v15678_v41 = vld [vmem:[%s21339_s0 + $0x154] ss:$8 sps:$4 sm:$0xff]   ;;  %v15679_v55 = vld [vmem:[%s21339_s0 + $0x50] ss:$8 sps:$4 sm:$0xff]  }
 0x60c   : > { %v18673_v59 = vpack.c.bf16 %v5922_v46, %v5921_v19  ;;  %v15680_v2 = vld [vmem:[%s21339_s0 + $0x150] ss:$8 sps:$4 sm:$0xff]   ;;  %v15681_v48 = vld [vmem:[%s21339_s0 + $0x64] ss:$8 sps:$4 sm:$0xff]   ;;  %v15683_v54 = vld [vmem:[%s21339_s0 + $0x60] ss:$8 sps:$4 sm:$0xff]  }
 0x60d   : > { %21571 = vst [vmem:[#allocation15_spill] sm:$0xff] %v18664_v35  ;;  %v15682_v50 = vld [vmem:[%s21339_s0 + $0x164] ss:$8 sps:$4 sm:$0xff]   ;;  %v15684_v38 = vld [vmem:[%s21339_s0 + $0x160] ss:$8 sps:$4 sm:$0xff]   ;;  %v15523_v33 = vld [vmem:[%s21273_s8 + $0x10] sm:$0xff]  }
 0x60e   : > { %13151 = vmatpush3.bf16.msra.mxu0 %v18463_v18  ;;  %13263 = vmatpush3.bf16.msra.mxu1 %v18463_v18  ;;  %v15685_v40 = vld [vmem:[%s21339_s0 + $0x74] ss:$8 sps:$4 sm:$0xff]   ;;  %v15687_v63 = vld [vmem:[%s21339_s0 + $0x70] ss:$8 sps:$4 sm:$0xff]   ;;  %v15689_v29 = vld [vmem:[%s21339_s0 + $0x84] ss:$8 sps:$4 sm:$0xff]  }
 0x60f   : > { %13152 = vmatprep.subr.bf16.mxu0 %v18651_v12  ;;  %13264 = vmatprep.subr.bf16.mxu1 %v18651_v12  ;;  %v15686_v49 = vld [vmem:[%s21339_s0 + $0x174] ss:$8 sps:$4 sm:$0xff]   ;;  %v15688_v4 = vld [vmem:[%s21339_s0 + $0x170] ss:$8 sps:$4 sm:$0xff]   ;;  %v15690_v25 = vld [vmem:[%s21339_s0 + $0x184] ss:$8 sps:$4 sm:$0xff]  }
 0x610   : > { %v15691_v8 = vld [vmem:[%s21339_s0 + $0x80] ss:$8 sps:$4 sm:$0xff]   ;;  %v15693_v24 = vld [vmem:[%s21339_s0 + $0x94] ss:$8 sps:$4 sm:$0xff]   ;;  %v15695_v27 = vld [vmem:[%s21339_s0 + $0x90] ss:$8 sps:$4 sm:$0xff]  }
 0x611   : > { %v15692_v21 = vld [vmem:[%s21339_s0 + $0x180] ss:$8 sps:$4 sm:$0xff]   ;;  %v15694_v39 = vld [vmem:[%s21339_s0 + $0x194] ss:$8 sps:$4 sm:$0xff]   ;;  %v15696_v46 = vld [vmem:[%s21339_s0 + $0x190] ss:$8 sps:$4 sm:$0xff]  }
 0x612   : > { %13153 = vmatpush3.bf16.msra.mxu0 %v18658_v47  ;;  %13265 = vmatpush3.bf16.msra.mxu1 %v18658_v47  ;;  %v15525_v58 = vld [vmem:[%s21273_s8 + $0x8] sm:$0xff]   ;;  %v15527_v43 = vld [vmem:[%s21273_s8] sm:$0xff]  }
 0x613   : > { %13154 = vmatprep.subr.bf16.mxu0 %v18530_v60  ;;  %13266 = vmatprep.subr.bf16.mxu1 %v18530_v60  ;;  %v15697_v19 = vld [vmem:[%s21339_s0 + $0xa4] ss:$8 sps:$4 sm:$0xff]  }
 0x616   : > { %13155 = vmatpush3.bf16.msra.mxu0 %v18448_v9  ;;  %13267 = vmatpush3.bf16.msra.mxu1 %v18448_v9 }
 0x617   : > { %13156 = vmatprep.subr.bf16.mxu0 %v18664_v35  ;;  %13268 = vmatprep.subr.bf16.mxu1 %v18664_v35 }
 0x61a   : > { %13157 = vmatpush3.bf16.msra.mxu0 %v18673_v59  ;;  %13269 = vmatpush3.bf16.msra.mxu1 %v18673_v59 }
 0x61b   : > { %14616 = vmatprep.subr.bf16.mxu0 %v15517_v36  ;;  %14656 = vmatprep.subr.bf16.mxu1 %v15521_v44 }
 0x61d   : > { %6002 = vmatmul.mubr.bf16.vlgmr.msra.gmra.mxu0 %v15659_v53  ;;  %6179 = vmatmul.mubr.bf16.vlgmr.msra.gmra.mxu1 %v15660_v45  ;;  %v15700_v53 = vld [vmem:[%s21339_s0 + $0x1a0] ss:$8 sps:$4 sm:$0xff]   ;;  %v15701_v45 = vld [vmem:[%s21339_s0 + $0xb4] ss:$8 sps:$4 sm:$0xff]  }
 0x61e   : > { %6009 = vmatprep.mubr.bf16.mxu0 %v15661_v37  ;;  %6186 = vmatprep.mubr.bf16.mxu1 %v15662_v14  ;;  %v15702_v37 = vld [vmem:[%s21339_s0 + $0x1b4] ss:$8 sps:$4 sm:$0xff]   ;;  %v15703_v14 = vld [vmem:[%s21339_s0 + $0xb0] ss:$8 sps:$4 sm:$0xff]  }
 0x61f   : > { %14617 = vmatpush3.bf16.msra.mxu0 %v15517_v36  ;;  %14657 = vmatpush3.bf16.msra.mxu1 %v15521_v44  ;;  %v15698_v36 = vld [vmem:[%s21339_s0 + $0x1a4] ss:$8 sps:$4 sm:$0xff]   ;;  %v15524_v44 = vld [vmem:[%s21273_s8 + $0x50] sm:$0xff]  }
 0x620   : > { %14618 = vmatprep.subr.bf16.mxu0 %v15518_v13  ;;  %14658 = vmatprep.subr.bf16.mxu1 %v15523_v33 }
 0x623   : > { %14619 = vmatpush3.bf16.msra.mxu0 %v15518_v13  ;;  %14659 = vmatpush3.bf16.msra.mxu1 %v15523_v33  ;;  %v15699_v13 = vld [vmem:[%s21339_s0 + $0xa0] ss:$8 sps:$4 sm:$0xff]  }
 0x624   : > { %14620 = vmatprep.subr.bf16.mxu0 %v15519_v32  ;;  %14660 = vmatprep.subr.bf16.mxu1 %v15525_v58 }
 0x625   : > { %6010 = vmatmul.mubr.bf16.gmra.mxu0 %v15663_v52  ;;  %6187 = vmatmul.mubr.bf16.gmra.mxu1 %v15664_v5  ;;  %v15706_v52 = vld [vmem:[%s21339_s0 + $0x1c4] ss:$8 sps:$4 sm:$0xff]   ;;  %v15707_v5 = vld [vmem:[%s21339_s0 + $0xc0] ss:$8 sps:$4 sm:$0xff]  }
 0x626   : > { %6017 = vmatprep.mubr.bf16.mxu0 %v15665_v0  ;;  %6194 = vmatprep.mubr.bf16.mxu1 %v15666_v7  ;;  %v15708_v0 = vld [vmem:[%s21339_s0 + $0x1c0] ss:$8 sps:$4 sm:$0xff]   ;;  %v15709_v7 = vld [vmem:[%s21339_s0 + $0xd4] ss:$8 sps:$4 sm:$0xff]  }
 0x627   : > { %14621 = vmatpush3.bf16.msra.mxu0 %v15519_v32  ;;  %14661 = vmatpush3.bf16.msra.mxu1 %v15525_v58  ;;  %v15704_v32 = vld [vmem:[%s21339_s0 + $0x1b0] ss:$8 sps:$4 sm:$0xff]  }
 0x628   : > { %14622 = vmatprep.subr.bf16.mxu0 %v15520_v56  ;;  %14662 = vmatprep.subr.bf16.mxu1 %v15527_v43 }
 0x62b   : > { %14623 = vmatpush3.bf16.msra.mxu0 %v15520_v56  ;;  %14663 = vmatpush3.bf16.msra.mxu1 %v15527_v43  ;;  %v15705_v56 = vld [vmem:[%s21339_s0 + $0xc4] ss:$8 sps:$4 sm:$0xff]  }
 0x62c   : > { %14696 = vmatprep.subr.bf16.mxu0 %v18782_v51 }
 0x62d   : > { %6018 = vmatmul.mubr.bf16.gmra.mxu0 %v15667_v10  ;;  %6195 = vmatmul.mubr.bf16.gmra.mxu1 %v15668_v1  ;;  %v15710_v10 = vld [vmem:[%s21339_s0 + $0x1d4] ss:$8 sps:$4 sm:$0xff]   ;;  %v15711_v1 = vld [vmem:[%s21339_s0 + $0xd0] ss:$8 sps:$4 sm:$0xff]  }
 0x62e   : > { %6025 = vmatprep.mubr.bf16.mxu0 %v15669_v61  ;;  %6202 = vmatprep.mubr.bf16.mxu1 %v15670_v22  ;;  %v15712_v61 = vld [vmem:[%s21339_s0 + $0x1d0] ss:$8 sps:$4 sm:$0xff]   ;;  %v15713_v22 = vld [vmem:[%s21339_s0 + $0xe4] ss:$8 sps:$4 sm:$0xff]  }
 0x635   : > { %6026 = vmatmul.mubr.bf16.gmra.mxu0 %v15671_v17  ;;  %6203 = vmatmul.mubr.bf16.gmra.mxu1 %v15672_v20  ;;  %v15714_v17 = vld [vmem:[%s21339_s0 + $0x1e4] ss:$8 sps:$4 sm:$0xff]   ;;  %v15715_v20 = vld [vmem:[%s21339_s0 + $0xe0] ss:$8 sps:$4 sm:$0xff]  }
 0x636   : > { %6033 = vmatprep.mubr.bf16.mxu0 %v15673_v16  ;;  %6210 = vmatprep.mubr.bf16.mxu1 %v15674_v62  ;;  %v15716_v16 = vld [vmem:[%s21339_s0 + $0x1e0] ss:$8 sps:$4 sm:$0xff]   ;;  %v15717_v62 = vld [vmem:[%s21339_s0 + $0xf4] ss:$8 sps:$4 sm:$0xff]  }
 0x63d   : > { %6034 = vmatmul.mubr.bf16.gmra.mxu0 %v15675_v15  ;;  %6211 = vmatmul.mubr.bf16.gmra.mxu1 %v15676_v31  ;;  %v15718_v15 = vld [vmem:[%s21339_s0 + $0x1f4] ss:$8 sps:$4 sm:$0xff]   ;;  %v15719_v31 = vld [vmem:[%s21339_s0 + $0xf0] ss:$8 sps:$4 sm:$0xff]  }
 0x63e   : > { %6041 = vmatprep.mubr.bf16.mxu0 %v15677_v34  ;;  %6218 = vmatprep.mubr.bf16.mxu1 %v15678_v41  ;;  %v15720_v34 = vld [vmem:[%s21339_s0 + $0x1f0] ss:$8 sps:$4 sm:$0xff]   ;;  %v21572_v41 = vmov 0  }
 0x645   : > { %6042 = vmatmul.mubr.bf16.gmra.mxu0 %v15679_v55  ;;  %6219 = vmatmul.mubr.bf16.gmra.mxu1 %v15680_v2  ;;  %v15526_v55 = vld [vmem:[%s21273_s8 + $0x48] sm:$0xff]   ;;  %v15528_v2 = vld [vmem:[%s21273_s8 + $0x40] sm:$0xff]  }
 0x646   : > { %6049 = vmatprep.mubr.bf16.mxu0 %v15681_v48  ;;  %6226 = vmatprep.mubr.bf16.mxu1 %v15682_v50  ;;  %v15529_v48 = vld [vmem:[%s21273_s8 + $0x78] sm:$0xff]  }
 0x647   : > { %v15530_v50 = vld [vmem:[%s21273_s8 + $0x98] sm:$0xff]   ;;  %14736 = vmatprep.subr.bf16.mxu1 %v15529_v48 }
 0x64d   : > { %6050 = vmatmul.mubr.bf16.gmra.mxu0 %v15683_v54  ;;  %6227 = vmatmul.mubr.bf16.gmra.mxu1 %v15684_v38 }
 0x64e   : > { %6057 = vmatprep.mubr.bf16.mxu0 %v15685_v40  ;;  %6234 = vmatprep.mubr.bf16.mxu1 %v15686_v49 }
 0x655   : > { %6058 = vmatmul.mubr.bf16.gmra.mxu0 %v15687_v63  ;;  %6235 = vmatmul.mubr.bf16.gmra.mxu1 %v15688_v4 }
 0x656   : > { %6065 = vmatprep.mubr.bf16.mxu0 %v15689_v29  ;;  %6242 = vmatprep.mubr.bf16.mxu1 %v15690_v25 }
 0x65d   : > { %6066 = vmatmul.mubr.bf16.gmra.mxu0 %v15691_v8  ;;  %6243 = vmatmul.mubr.bf16.gmra.mxu1 %v15692_v21 }
 0x65e   : > { %6073 = vmatprep.mubr.bf16.mxu0 %v15693_v24  ;;  %6250 = vmatprep.mubr.bf16.mxu1 %v15694_v39 }
 0x665   : > { %6074 = vmatmul.mubr.bf16.gmra.mxu0 %v15695_v27  ;;  %6251 = vmatmul.mubr.bf16.gmra.mxu1 %v15696_v46  ;;  %v15531_v27 = vld [vmem:[%s21273_s8 + $0x70] sm:$0xff]  }
 0x666   : > { %6081 = vmatprep.mubr.bf16.mxu0 %v15697_v19  ;;  %6258 = vmatprep.mubr.bf16.mxu1 %v15698_v36  ;;  %v15532_v46 = vld [vmem:[%s21273_s8 + $0x90] sm:$0xff]  }
 0x66d   : > { %6082 = vmatmul.mubr.bf16.gmra.mxu0 %v15699_v13  ;;  %6259 = vmatmul.mubr.bf16.gmra.mxu1 %v15700_v53 }
 0x66e   : > { %6089 = vmatprep.mubr.bf16.mxu0 %v15701_v45  ;;  %6266 = vmatprep.mubr.bf16.mxu1 %v15702_v37  ;;  %v15533_v45 = vld [vmem:[%s21273_s8 + $0x68] sm:$0xff]  }
 0x66f   : > { %v15534_v37 = vld [vmem:[%s21273_s8 + $0x88] sm:$0xff]  }
 0x675   : > { %6090 = vmatmul.mubr.bf16.gmra.mxu0 %v15703_v14  ;;  %6267 = vmatmul.mubr.bf16.gmra.mxu1 %v15704_v32 }
 0x676   : > { %6097 = vmatprep.mubr.bf16.mxu0 %v15705_v56  ;;  %6274 = vmatprep.mubr.bf16.mxu1 %v15706_v52 }
 0x67d   : > { %6098 = vmatmul.mubr.bf16.gmra.mxu0 %v15707_v5  ;;  %6275 = vmatmul.mubr.bf16.gmra.mxu1 %v15708_v0 }
 0x67e   : > { %6105 = vmatprep.mubr.bf16.mxu0 %v15709_v7  ;;  %6282 = vmatprep.mubr.bf16.mxu1 %v15710_v10 }
 0x685   : > { %6106 = vmatmul.mubr.bf16.gmra.mxu0 %v15711_v1  ;;  %6283 = vmatmul.mubr.bf16.gmra.mxu1 %v15712_v61 }
 0x686   : > { %6113 = vmatprep.mubr.bf16.mxu0 %v15713_v22  ;;  %6290 = vmatprep.mubr.bf16.mxu1 %v15714_v17  ;;  %v15535_v22 = vld [vmem:[%s21273_s8 + $0x60] sm:$0xff]  }
 0x687   : > { %v15536_v17 = vld [vmem:[%s21273_s8 + $0x80] sm:$0xff]  }
 0x68d   : > { %6114 = vmatmul.mubr.bf16.gmra.mxu0 %v15715_v20  ;;  %6291 = vmatmul.mubr.bf16.gmra.mxu1 %v15716_v16 }
 0x68e   : > { %6121 = vmatprep.mubr.bf16.mxu0 %v15717_v62  ;;  %6298 = vmatprep.mubr.bf16.mxu1 %v15718_v15 }
 0x695   : > { %6122 = vmatmul.mubr.bf16.gmra.mxu0 %v15719_v31  ;;  %6299 = vmatmul.mubr.bf16.gmra.mxu1 %v15720_v34 }
 0x696   : > { %14624 = vmatprep.mubr.bf16.mxu0 %v21572_v41  ;;  %14664 = vmatprep.mubr.bf16.mxu1 %v21572_v41 }
 0x69d   : > { %14625 = vmatmul.mubr.msk.bf16.vlgmr.msra.gmra.mxu0 %vm3704_vm2, %v18673_v59 }
 0x69e   : > { %14628 = vmatprep.mubr.msk.bf16.mxu0 %vm3704_vm2, %v18448_v9  ;;  %14697 = vmatpush3.bf16.msra.mxu0 %v18782_v51 }
 0x69f   : > { %14698 = vmatprep.subr.bf16.mxu0 %v15524_v44 }
 0x6a2   : > { %14699 = vmatpush3.bf16.msra.mxu0 %v15524_v44 }
 0x6a3   : > { %14700 = vmatprep.subr.bf16.mxu0 %v15526_v55 }
 0x6a5   : > { %14629 = vmatmul.mubr.msk.bf16.gmra.mxu0 %vm3704_vm2, %v18658_v47 }
 0x6a6   : > { %14632 = vmatprep.mubr.msk.bf16.mxu0 %vm3704_vm2, %v18463_v18  ;;  %14701 = vmatpush3.bf16.msra.mxu0 %v15526_v55 }
 0x6a7   : > { %14702 = vmatprep.subr.bf16.mxu0 %v15528_v2 }
 0x6aa   : > { %14703 = vmatpush3.bf16.msra.mxu0 %v15528_v2 }
 0x6ab   : > { %14776 = vmatprep.subr.bf16.mxu0 %v15530_v50 }
 0x6ad   : > { %14633 = vmatmul.mubr.msk.bf16.gmra.mxu0 %vm3704_vm2, %v18487_v26 }
 0x6ae   : > { %14636 = vmatprep.mubr.msk.bf16.mxu0 %vm3704_vm2, %v18481_v11 }
 0x6b5   : > { %14637 = vmatmul.mubr.msk.bf16.gmra.mxu0 %vm3704_vm2, %v18511_v6 }
 0x6b6   : > { %14640 = vmatprep.mubr.msk.bf16.mxu0 %vm3704_vm2, %v18504_v3 }
 0x6bd   : > { %14641 = vmatmul.mubr.msk.bf16.gmra.mxu0 %vm3704_vm2, %v18664_v35 }
 0x6be   : > { %14644 = vmatprep.mubr.msk.bf16.mxu0 %vm3704_vm2, %v18530_v60 }
 0x6c5   : > { %14645 = vmatmul.mubr.msk.bf16.gmra.mxu0 %vm3704_vm2, %v18651_v12 }
 0x6c6   : > { %14648 = vmatprep.mubr.msk.bf16.mxu0 %vm3704_vm2, %v18556_v57 }
 0x6cd   : > { %14649 = vmatmul.mubr.msk.bf16.gmra.mxu0 %vm3704_vm2, %v18632_v28 }
 0x6ce   : > { %14652 = vmatprep.mubr.msk.bf16.mxu0 %vm3704_vm2, %v18576_v30 }
 0x6d5   : > { %14653 = vmatmul.mubr.msk.bf16.gmra.mxu0 %vm3704_vm2, %v18608_v42 }
 0x6d6   : > { %14704 = vmatprep.mubr.bf16.mxu0 %v21572_v41 }
 0x6dd   : > { %v13158_v54 = vpop.f32.mrf.mxu0  ;;  %v13270_v38 = vpop.f32.mrf.mxu1 }
 0x6df   : > { %v13159_v40 = vpop.f32.mrf.mxu0  ;;  %v13271_v49 = vpop.f32.mrf.mxu1 }
 0x6e0   : > { %v13160_v29 = vadd.f32 %v13159_v40, %v13158_v54  ;;  %v13272_v25 = vadd.f32 %v13271_v49, %v13270_v38 }
 0x6e1   : > { %v13161_v63 = vpop.f32.mrf.mxu0  ;;  %v13273_v4 = vpop.f32.mrf.mxu1 }
 0x6e3   : > { %v13162_v51 = vpop.f32.mrf.mxu0  ;;  %v13274_v33 = vpop.f32.mrf.mxu1 }
 0x6e4   : > { %v13163_v8 = vadd.f32 %v13162_v51, %v13161_v63  ;;  %v13275_v21 = vadd.f32 %v13274_v33, %v13273_v4 }
 0x6e5   : > { %v13164_v24 = vpop.f32.mrf.mxu0  ;;  %v13276_v39 = vpop.f32.mrf.mxu1 }
 0x6e6   : > { %v18939_v58 = vpack.c.bf16 %v13163_v8, %v13160_v29  ;;  %v18941_v43 = vpack.c.bf16 %v13275_v21, %v13272_v25 }
 0x6e7   : > { %v13165_v19 = vpop.f32.mrf.mxu0  ;;  %v13277_v36 = vpop.f32.mrf.mxu1 }
 0x6e8   : > { %14665 = vmatmul.mubr.msk.bf16.vlgmr.msra.gmra.mxu1 %vm3704_vm2, %v18939_v58  ;;  %14705 = vmatmul.mubr.msk.bf16.vlgmr.msra.gmra.mxu0 %vm3704_vm2, %v18941_v43  ;;  %v13166_v56 = vadd.f32 %v13165_v19, %v13164_v24  ;;  %v13278_v52 = vadd.f32 %v13277_v36, %v13276_v39 }
 0x6e9   : > { %v13167_v13 = vpop.f32.mrf.mxu0  ;;  %v13279_v53 = vpop.f32.mrf.mxu1  ;;  %14737 = vmatpush3.bf16.msra.mxu1 %v15529_v48  ;;  %14777 = vmatpush3.bf16.msra.mxu0 %v15530_v50 }
 0x6ea   : > { %14738 = vmatprep.subr.bf16.mxu1 %v15531_v27  ;;  %14778 = vmatprep.subr.bf16.mxu0 %v15532_v46 }
 0x6eb   : > { %v13168_v14 = vpop.f32.mrf.mxu0  ;;  %v13280_v32 = vpop.f32.mrf.mxu1 }
 0x6ec   : > { %v13169_v5 = vadd.f32 %v13168_v14, %v13167_v13  ;;  %v13281_v0 = vadd.f32 %v13280_v32, %v13279_v53  ;;  %v18992_v53 = vld [vmem:[%s21273_s8 + $0xb8] sm:$0xff]  }
 0x6ed   : > { %v13170_v7 = vpop.f32.mrf.mxu0  ;;  %v13282_v10 = vpop.f32.mrf.mxu1  ;;  %14739 = vmatpush3.bf16.msra.mxu1 %v15531_v27  ;;  %14779 = vmatpush3.bf16.msra.mxu0 %v15532_v46  ;;  %v18997_v14 = vld [vmem:[%s21273_s8 + $0xd8] sm:$0xff]  }
 0x6ee   : > { %v18959_v1 = vpack.c.bf16 %v13169_v5, %v13166_v56  ;;  %v18961_v61 = vpack.c.bf16 %v13281_v0, %v13278_v52  ;;  %14740 = vmatprep.subr.bf16.mxu1 %v15533_v45  ;;  %14780 = vmatprep.subr.bf16.mxu0 %v15534_v37 }
 0x6ef   : > { %v13171_v20 = vpop.f32.mrf.mxu0  ;;  %v13283_v16 = vpop.f32.mrf.mxu1 }
 0x6f0   : > { %14668 = vmatprep.mubr.msk.bf16.mxu1 %vm3704_vm2, %v18959_v1  ;;  %14708 = vmatprep.mubr.msk.bf16.mxu0 %vm3704_vm2, %v18961_v61  ;;  %v13172_v44 = vadd.f32 %v13171_v20, %v13170_v7  ;;  %v13284_v55 = vadd.f32 %v13283_v16, %v13282_v10 }
 0x6f1   : > { %v13173_v62 = vpop.f32.mrf.mxu0  ;;  %v13285_v15 = vpop.f32.mrf.mxu1  ;;  %14741 = vmatpush3.bf16.msra.mxu1 %v15533_v45  ;;  %14781 = vmatpush3.bf16.msra.mxu0 %v15534_v37 }
 0x6f2   : > { %14742 = vmatprep.subr.bf16.mxu1 %v15535_v22  ;;  %14782 = vmatprep.subr.bf16.mxu0 %v15536_v17 }
 0x6f3   : > { %v13174_v31 = vpop.f32.mrf.mxu0  ;;  %v13286_v34 = vpop.f32.mrf.mxu1 }
 0x6f4   : > { %v13175_v2 = vadd.f32 %v13174_v31, %v13173_v62  ;;  %v13287_v48 = vadd.f32 %v13286_v34, %v13285_v15 }
 0x6f5   : > { %v13176_v50 = vpop.f32.mrf.mxu0  ;;  %v13288_v54 = vpop.f32.mrf.mxu1  ;;  %14743 = vmatpush3.bf16.msra.mxu1 %v15535_v22  ;;  %14783 = vmatpush3.bf16.msra.mxu0 %v15536_v17 }
 0x6f6   : > { %v18973_v38 = vpack.c.bf16 %v13175_v2, %v13172_v44  ;;  %v18975_v40 = vpack.c.bf16 %v13287_v48, %v13284_v55  ;;  %14816 = vmatprep.subr.bf16.mxu1 %v18992_v53  ;;  %14856 = vmatprep.subr.bf16.mxu0 %v18997_v14 }
 0x6f7   : > { %v13177_v49 = vpop.f32.mrf.mxu0  ;;  %v13289_v63 = vpop.f32.mrf.mxu1 }
 0x6f8   : > { %14669 = vmatmul.mubr.msk.bf16.gmra.mxu1 %vm3704_vm2, %v18973_v38  ;;  %14709 = vmatmul.mubr.msk.bf16.gmra.mxu0 %vm3704_vm2, %v18975_v40  ;;  %v13178_v25 = vadd.f32 %v13177_v49, %v13176_v50  ;;  %v13290_v8 = vadd.f32 %v13289_v63, %v13288_v54 }
 0x6f9   : > { %v13179_v4 = vpop.f32.mrf.mxu0  ;;  %v13291_v51 = vpop.f32.mrf.mxu1 }
 0x6fb   : > { %v13180_v33 = vpop.f32.mrf.mxu0  ;;  %v13292_v29 = vpop.f32.mrf.mxu1 }
 0x6fc   : > { %v13181_v21 = vadd.f32 %v13180_v33, %v13179_v4  ;;  %v13293_v24 = vadd.f32 %v13292_v29, %v13291_v51 }
 0x6fd   : > { %v13182_v39 = vpop.f32.mrf.mxu0  ;;  %v13294_v27 = vpop.f32.mrf.mxu1 }
 0x6fe   : > { %v18981_v46 = vpack.c.bf16 %v13181_v21, %v13178_v25  ;;  %v18983_v19 = vpack.c.bf16 %v13293_v24, %v13290_v8 }
 0x6ff   : > { %v13183_v36 = vpop.f32.mrf.mxu0  ;;  %v13295_v13 = vpop.f32.mrf.mxu1 }
 0x700   : > { %14672 = vmatprep.mubr.msk.bf16.mxu1 %vm3704_vm2, %v18981_v46  ;;  %14712 = vmatprep.mubr.msk.bf16.mxu0 %vm3704_vm2, %v18983_v19  ;;  %v13184_v52 = vadd.f32 %v13183_v36, %v13182_v39  ;;  %v13296_v5 = vadd.f32 %v13295_v13, %v13294_v27 }
 0x701   : > { %v13185_v45 = vpop.f32.mrf.mxu0  ;;  %v13297_v37 = vpop.f32.mrf.mxu1 }
 0x703   : > { %v13186_v32 = vpop.f32.mrf.mxu0  ;;  %v13298_v56 = vpop.f32.mrf.mxu1 }
 0x704   : > { %v13187_v0 = vadd.f32 %v13186_v32, %v13185_v45  ;;  %v13299_v7 = vadd.f32 %v13298_v56, %v13297_v37 }
 0x705   : > { %v13188_v10 = vpop.f32.mrf.mxu0  ;;  %v13300_v22 = vpop.f32.mrf.mxu1 }
 0x706   : > { %v19001_v17 = vpack.c.bf16 %v13187_v0, %v13184_v52  ;;  %v19003_v20 = vpack.c.bf16 %v13299_v7, %v13296_v5 }
 0x707   : > { %v13189_v16 = vpop.f32.mrf.mxu0  ;;  %v13301_v62 = vpop.f32.mrf.mxu1 }
 0x708   : > { %14673 = vmatmul.mubr.msk.bf16.gmra.mxu1 %vm3704_vm2, %v19001_v17  ;;  %14713 = vmatmul.mubr.msk.bf16.gmra.mxu0 %vm3704_vm2, %v19003_v20  ;;  %v13190_v55 = vadd.f32 %v13189_v16, %v13188_v10  ;;  %v13302_v2 = vadd.f32 %v13301_v62, %v13300_v22 }
 0x709   : > { %v13191_v15 = vpop.f32.mrf.mxu0  ;;  %v13303_v31 = vpop.f32.mrf.mxu1 }
 0x70b   : > { %v13192_v34 = vpop.f32.mrf.mxu0  ;;  %v13304_v44 = vpop.f32.mrf.mxu1 }
 0x70c   : > { %v13193_v48 = vadd.f32 %v13192_v34, %v13191_v15  ;;  %v13305_v50 = vadd.f32 %v13304_v44, %v13303_v31 }
 0x70d   : > { %v13194_v54 = vpop.f32.mrf.mxu0  ;;  %v13306_v49 = vpop.f32.mrf.mxu1 }
 0x70e   : > { %v19009_v63 = vpack.c.bf16 %v13193_v48, %v13190_v55  ;;  %v19011_v4 = vpack.c.bf16 %v13305_v50, %v13302_v2 }
 0x70f   : > { %v13195_v51 = vpop.f32.mrf.mxu0  ;;  %v13307_v33 = vpop.f32.mrf.mxu1 }
 0x710   : > { %14676 = vmatprep.mubr.msk.bf16.mxu1 %vm3704_vm2, %v19009_v63  ;;  %14716 = vmatprep.mubr.msk.bf16.mxu0 %vm3704_vm2, %v19011_v4  ;;  %v13196_v24 = vadd.f32 %v13195_v51, %v13194_v54  ;;  %v13308_v39 = vadd.f32 %v13307_v33, %v13306_v49 }
 0x711   : > { %v13197_v29 = vpop.f32.mrf.mxu0  ;;  %v13309_v25 = vpop.f32.mrf.mxu1 }
 0x713   : > { %v13198_v8 = vpop.f32.mrf.mxu0  ;;  %v13310_v21 = vpop.f32.mrf.mxu1 }
 0x714   : > { %v13199_v27 = vadd.f32 %v13198_v8, %v13197_v29  ;;  %v13311_v36 = vadd.f32 %v13310_v21, %v13309_v25 }
 0x715   : > { %v13200_v13 = vpop.f32.mrf.mxu0  ;;  %v13312_v45 = vpop.f32.mrf.mxu1 }
 0x716   : > { %v19017_v37 = vpack.c.bf16 %v13199_v27, %v13196_v24  ;;  %v19019_v32 = vpack.c.bf16 %v13311_v36, %v13308_v39 }
 0x717   : > { %v13201_v56 = vpop.f32.mrf.mxu0  ;;  %v13313_v52 = vpop.f32.mrf.mxu1 }
 0x718   : > { %14677 = vmatmul.mubr.msk.bf16.gmra.mxu1 %vm3704_vm2, %v19017_v37  ;;  %14717 = vmatmul.mubr.msk.bf16.gmra.mxu0 %vm3704_vm2, %v19019_v32  ;;  %v13202_v22 = vadd.f32 %v13201_v56, %v13200_v13  ;;  %v13314_v16 = vadd.f32 %v13313_v52, %v13312_v45 }
 0x719   : > { %v13203_v5 = vpop.f32.mrf.mxu0  ;;  %v13315_v0 = vpop.f32.mrf.mxu1 }
 0x71b   : > { %v13204_v7 = vpop.f32.mrf.mxu0  ;;  %v13316_v10 = vpop.f32.mrf.mxu1 }
 0x71c   : > { %v13205_v62 = vadd.f32 %v13204_v7, %v13203_v5  ;;  %v13317_v15 = vadd.f32 %v13316_v10, %v13315_v0 }
 0x71d   : > { %v13206_v31 = vpop.f32.mrf.mxu0  ;;  %v13318_v34 = vpop.f32.mrf.mxu1 }
 0x71e   : > { %v19025_v44 = vpack.c.bf16 %v13205_v62, %v13202_v22  ;;  %v19027_v55 = vpack.c.bf16 %v13317_v15, %v13314_v16 }
 0x71f   : > { %v13207_v2 = vpop.f32.mrf.mxu0  ;;  %v13319_v48 = vpop.f32.mrf.mxu1 }
 0x720   : > { %14680 = vmatprep.mubr.msk.bf16.mxu1 %vm3704_vm2, %v19025_v44  ;;  %14720 = vmatprep.mubr.msk.bf16.mxu0 %vm3704_vm2, %v19027_v55  ;;  %v13208_v33 = vadd.f32 %v13207_v2, %v13206_v31  ;;  %v13320_v29 = vadd.f32 %v13319_v48, %v13318_v34 }
 0x721   : > { %v13209_v50 = vpop.f32.mrf.mxu0  ;;  %v13321_v54 = vpop.f32.mrf.mxu1 }
 0x723   : > { %v13210_v49 = vpop.f32.mrf.mxu0  ;;  %v13322_v51 = vpop.f32.mrf.mxu1 }
 0x724   : > { %v13211_v25 = vadd.f32 %v13210_v49, %v13209_v50  ;;  %v13323_v8 = vadd.f32 %v13322_v51, %v13321_v54 }
 0x725   : > { %v13212_v21 = vpop.f32.mrf.mxu0  ;;  %v13324_v24 = vpop.f32.mrf.mxu1 }
 0x726   : > { %v19033_v39 = vpack.c.bf16 %v13211_v25, %v13208_v33  ;;  %v19035_v27 = vpack.c.bf16 %v13323_v8, %v13320_v29 }
 0x727   : > { %v13213_v36 = vpop.f32.mrf.mxu0  ;;  %v13325_v13 = vpop.f32.mrf.mxu1 }
 0x728   : > { %14681 = vmatmul.mubr.msk.bf16.gmra.mxu1 %vm3704_vm2, %v19033_v39  ;;  %14721 = vmatmul.mubr.msk.bf16.gmra.mxu0 %vm3704_vm2, %v19035_v27  ;;  %v13214_v0 = vadd.f32 %v13213_v36, %v13212_v21  ;;  %v13326_v7 = vadd.f32 %v13325_v13, %v13324_v24 }
 0x729   : > { %v13215_v45 = vpop.f32.mrf.mxu0  ;;  %v13327_v56 = vpop.f32.mrf.mxu1 }
 0x72b   : > { %v13216_v52 = vpop.f32.mrf.mxu0  ;;  %v13328_v5 = vpop.f32.mrf.mxu1 }
 0x72c   : > { %v13217_v10 = vadd.f32 %v13216_v52, %v13215_v45  ;;  %v13329_v22 = vadd.f32 %v13328_v5, %v13327_v56 }
 0x72d   : > { %v13218_v16 = vpop.f32.mrf.mxu0  ;;  %v13330_v62 = vpop.f32.mrf.mxu1 }
 0x72e   : > { %v19041_v15 = vpack.c.bf16 %v13217_v10, %v13214_v0  ;;  %v19043_v31 = vpack.c.bf16 %v13329_v22, %v13326_v7 }
 0x72f   : > { %v13219_v34 = vpop.f32.mrf.mxu0  ;;  %v13331_v2 = vpop.f32.mrf.mxu1 }
 0x730   : > { %14684 = vmatprep.mubr.msk.bf16.mxu1 %vm3704_vm2, %v19041_v15  ;;  %14724 = vmatprep.mubr.msk.bf16.mxu0 %vm3704_vm2, %v19043_v31  ;;  %v13220_v51 = vadd.f32 %v13219_v34, %v13218_v16  ;;  %v13332_v33 = vadd.f32 %v13331_v2, %v13330_v62 }
 0x731   : > { %v13221_v48 = vpop.f32.mrf.mxu0  ;;  %v13333_v50 = vpop.f32.mrf.mxu1 }
 0x733   : > { %v13222_v54 = vpop.f32.mrf.mxu0  ;;  %v13334_v49 = vpop.f32.mrf.mxu1 }
 0x734   : > { %v13223_v29 = vadd.f32 %v13222_v54, %v13221_v48  ;;  %v13335_v25 = vadd.f32 %v13334_v49, %v13333_v50 }
 0x735   : > { %v13224_v8 = vpop.f32.mrf.mxu0  ;;  %v13336_v21 = vpop.f32.mrf.mxu1 }
 0x736   : > { %v19049_v24 = vpack.c.bf16 %v13223_v29, %v13220_v51  ;;  %v19051_v36 = vpack.c.bf16 %v13335_v25, %v13332_v33 }
 0x737   : > { %v13225_v13 = vpop.f32.mrf.mxu0  ;;  %v13337_v45 = vpop.f32.mrf.mxu1 }
 0x738   : > { %14685 = vmatmul.mubr.msk.bf16.gmra.mxu1 %vm3704_vm2, %v19049_v24  ;;  %14725 = vmatmul.mubr.msk.bf16.gmra.mxu0 %vm3704_vm2, %v19051_v36  ;;  %v13226_v7 = vadd.f32 %v13225_v13, %v13224_v8  ;;  %v13338_v10 = vadd.f32 %v13337_v45, %v13336_v21 }
 0x739   : > { %v13227_v56 = vpop.f32.mrf.mxu0  ;;  %v13339_v52 = vpop.f32.mrf.mxu1 }
 0x73b   : > { %v13228_v5 = vpop.f32.mrf.mxu0  ;;  %v13340_v0 = vpop.f32.mrf.mxu1 }
 0x73c   : > { %v13229_v22 = vadd.f32 %v13228_v5, %v13227_v56  ;;  %v13341_v16 = vadd.f32 %v13340_v0, %v13339_v52 }
 0x73d   : > { %v13230_v62 = vpop.f32.mrf.mxu0  ;;  %v13342_v34 = vpop.f32.mrf.mxu1 }
 0x73e   : > { %v19057_v2 = vpack.c.bf16 %v13229_v22, %v13226_v7  ;;  %v19059_v48 = vpack.c.bf16 %v13341_v16, %v13338_v10 }
 0x73f   : > { %v13231_v50 = vpop.f32.mrf.mxu0  ;;  %v13343_v54 = vpop.f32.mrf.mxu1 }
 0x740   : > { %14688 = vmatprep.mubr.msk.bf16.mxu1 %vm3704_vm2, %v19057_v2  ;;  %14728 = vmatprep.mubr.msk.bf16.mxu0 %vm3704_vm2, %v19059_v48  ;;  %v13232_v25 = vadd.f32 %v13231_v50, %v13230_v62  ;;  %v13344_v8 = vadd.f32 %v13343_v54, %v13342_v34 }
 0x741   : > { %v13233_v49 = vpop.f32.mrf.mxu0  ;;  %v13345_v51 = vpop.f32.mrf.mxu1 }
 0x743   : > { %v13234_v33 = vpop.f32.mrf.mxu0  ;;  %v13346_v29 = vpop.f32.mrf.mxu1 }
 0x744   : > { %v13235_v21 = vadd.f32 %v13234_v33, %v13233_v49  ;;  %v13347_v13 = vadd.f32 %v13346_v29, %v13345_v51 }
 0x745   : > { %v13236_v45 = vpop.f32.mrf.mxu0  ;;  %v13348_v56 = vpop.f32.mrf.mxu1 }
 0x746   : > { %v19065_v52 = vpack.c.bf16 %v13235_v21, %v13232_v25  ;;  %v19067_v5 = vpack.c.bf16 %v13347_v13, %v13344_v8 }
 0x747   : > { %v13237_v0 = vpop.f32.mrf.mxu0  ;;  %v13349_v7 = vpop.f32.mrf.mxu1 }
 0x748   : > { %14689 = vmatmul.mubr.msk.bf16.gmra.mxu1 %vm3704_vm2, %v19065_v52  ;;  %14729 = vmatmul.mubr.msk.bf16.gmra.mxu0 %vm3704_vm2, %v19067_v5  ;;  %v13238_v34 = vadd.f32 %v13237_v0, %v13236_v45  ;;  %v13350_v50 = vadd.f32 %v13349_v7, %v13348_v56 }
 0x749   : > { %v13239_v10 = vpop.f32.mrf.mxu0  ;;  %v13351_v22 = vpop.f32.mrf.mxu1 }
 0x74b   : > { %v13240_v16 = vpop.f32.mrf.mxu0  ;;  %v13352_v62 = vpop.f32.mrf.mxu1 }
 0x74c   : > { %v13241_v54 = vadd.f32 %v13240_v16, %v13239_v10  ;;  %v13353_v49 = vadd.f32 %v13352_v62, %v13351_v22 }
 0x74d   : > { %v13242_v51 = vpop.f32.mrf.mxu0  ;;  %v13354_v33 = vpop.f32.mrf.mxu1 }
 0x74e   : > { %v19073_v29 = vpack.c.bf16 %v13241_v54, %v13238_v34  ;;  %v19075_v25 = vpack.c.bf16 %v13353_v49, %v13350_v50 }
 0x74f   : > { %v13243_v8 = vpop.f32.mrf.mxu0  ;;  %v13355_v21 = vpop.f32.mrf.mxu1 }
 0x750   : > { %14692 = vmatprep.mubr.msk.bf16.mxu1 %vm3704_vm2, %v19073_v29  ;;  %14732 = vmatprep.mubr.msk.bf16.mxu0 %vm3704_vm2, %v19075_v25  ;;  %v13244_v0 = vadd.f32 %v13243_v8, %v13242_v51  ;;  %v13356_v7 = vadd.f32 %v13355_v21, %v13354_v33  ;;  %v15539_v33 = vld [vmem:[%s21273_s8 + $0xb0] sm:$0xff]   ;;  %v15541_v21 = vld [vmem:[%s21273_s8 + $0xa8] sm:$0xff]  }
 0x751   : > { %v13245_v13 = vpop.f32.mrf.mxu0  ;;  %v13357_v41 = vpop.f32.mrf.mxu1  ;;  %v15540_v8 = vld [vmem:[%s21273_s8 + $0xd0] sm:$0xff]  }
 0x753   : > { %v13246_v45 = vpop.f32.mrf.mxu0  ;;  %v13358_v56 = vpop.f32.mrf.mxu1 }
 0x754   : > { %v13247_v10 = vadd.f32 %v13246_v45, %v13245_v13  ;;  %v13359_v22 = vadd.f32 %v13358_v56, %v13357_v41  ;;  %v15542_v13 = vld [vmem:[%s21273_s8 + $0xc8] sm:$0xff]  }
 0x755   : > { %v19081_v16 = vpop.f32.mrf.mxu0 }
 0x756   : > { %v19083_v62 = vpack.c.bf16 %v13247_v10, %v13244_v0  ;;  %v19085_v34 = vpack.c.bf16 %v13359_v22, %v13356_v7  ;;  %v19156_v10 = vld [vmem:[%s21273_s8 + $0xf8] sm:$0xff]  }
 0x757   : > { %v19087_v50 = vpop.f32.mrf.mxu0  ;;  %v19161_v22 = vld [vmem:[%s21273_s8 + $0x118] sm:$0xff]  }
 0x758   : > { %14693 = vmatmul.mubr.msk.bf16.gmra.mxu1 %vm3704_vm2, %v19083_v62  ;;  %14733 = vmatmul.mubr.msk.bf16.gmra.mxu0 %vm3704_vm2, %v19085_v34 }
 0x759   : > { %v19093_v54 = vpop.f32.mrf.mxu0  ;;  %14744 = vmatprep.mubr.msk.bf16.mxu1 %vm3704_vm2, %v18939_v58  ;;  %14784 = vmatprep.mubr.msk.bf16.mxu0 %vm3704_vm2, %v18673_v59 }
 0x75b   : > { %v19099_v41 = vpop.f32.mrf.mxu0 }
 0x75d   : > { %v19101_v49 = vpop.f32.mrf.mxu0 }
 0x75f   : > { %v19103_v51 = vpop.f32.mrf.mxu0 }
 0x760   : > { %14745 = vmatmul.mubr.msk.bf16.vlgmr.msra.gmra.mxu1 %vm3704_vm2, %v18959_v1  ;;  %14785 = vmatmul.mubr.msk.bf16.vlgmr.msra.gmra.mxu0 %vm3704_vm2, %v18448_v9 }
 0x761   : > { %v19115_v59 = vpop.f32.mrf.mxu0  ;;  %14748 = vmatprep.mubr.msk.bf16.mxu1 %vm3704_vm2, %v18973_v38  ;;  %14788 = vmatprep.mubr.msk.bf16.mxu0 %vm3704_vm2, %v18658_v47 }
 0x762   : > { %14817 = vmatpush3.bf16.msra.mxu1 %v18992_v53  ;;  %14857 = vmatpush3.bf16.msra.mxu0 %v18997_v14  ;;  %v15543_v53 = vld [vmem:[%s21273_s8 + $0xa0] sm:$0xff]  }
 0x763   : > { %v19123_v58 = vpop.f32.mrf.mxu0  ;;  %14818 = vmatprep.subr.bf16.mxu1 %v15539_v33  ;;  %14858 = vmatprep.subr.bf16.mxu0 %v15540_v8  ;;  %v15544_v14 = vld [vmem:[%s21273_s8 + $0xc0] sm:$0xff]  }
 0x764   : > { %21573 = vst [vmem:[#allocation19_spill] sm:$0xff] %v19123_v58 }
 0x765   : > { %v19131_v45 = vpop.f32.mrf.mxu0 }
 0x766   : > { %14819 = vmatpush3.bf16.msra.mxu1 %v15539_v33  ;;  %14859 = vmatpush3.bf16.msra.mxu0 %v15540_v8 }
 0x767   : > { %v19133_v56 = vpop.f32.mrf.mxu0  ;;  %14820 = vmatprep.subr.bf16.mxu1 %v15541_v21  ;;  %14860 = vmatprep.subr.bf16.mxu0 %v15542_v13 }
 0x768   : > { %14749 = vmatmul.mubr.msk.bf16.gmra.mxu1 %vm3704_vm2, %v18981_v46  ;;  %14789 = vmatmul.mubr.msk.bf16.gmra.mxu0 %vm3704_vm2, %v18463_v18 }
 0x769   : > { %v19145_v0 = vpop.f32.mrf.mxu0  ;;  %14752 = vmatprep.mubr.msk.bf16.mxu1 %vm3704_vm2, %v19001_v17  ;;  %14792 = vmatprep.mubr.msk.bf16.mxu0 %vm3704_vm2, %v18487_v26 }
 0x76a   : > { %14821 = vmatpush3.bf16.msra.mxu1 %v15541_v21  ;;  %14861 = vmatpush3.bf16.msra.mxu0 %v15542_v13 }
 0x76b   : > { %v19151_v7 = vpop.f32.mrf.mxu0  ;;  %14822 = vmatprep.subr.bf16.mxu1 %v15543_v53  ;;  %14862 = vmatprep.subr.bf16.mxu0 %v15544_v14 }
 0x76c   : > { %21574 = vst [vmem:[#allocation27_spill] sm:$0xff] %v19151_v7 }
 0x76d   : > { %v19163_v33 = vpop.f32.mrf.mxu0 }
 0x76e   : > { %14823 = vmatpush3.bf16.msra.mxu1 %v15543_v53  ;;  %14863 = vmatpush3.bf16.msra.mxu0 %v15544_v14 }
 0x76f   : > { %v19165_v8 = vpop.f32.mrf.mxu0  ;;  %14896 = vmatprep.subr.bf16.mxu1 %v19156_v10  ;;  %14936 = vmatprep.subr.bf16.mxu0 %v19161_v22 }
 0x770   : > { %14753 = vmatmul.mubr.msk.bf16.gmra.mxu1 %vm3704_vm2, %v19009_v63  ;;  %14793 = vmatmul.mubr.msk.bf16.gmra.mxu0 %vm3704_vm2, %v18481_v11 }
 0x771   : > { %v19173_v21 = vpop.f32.mrf.mxu0  ;;  %14756 = vmatprep.mubr.msk.bf16.mxu1 %vm3704_vm2, %v19017_v37  ;;  %14796 = vmatprep.mubr.msk.bf16.mxu0 %vm3704_vm2, %v18511_v6 }
 0x773   : > { %v19179_v13 = vpop.f32.mrf.mxu0 }
 0x774   : > { %21575 = vst [vmem:[#allocation9_spill] sm:$0xff] %v19179_v13 }
 0x775   : > { %v19181_v53 = vpop.f32.mrf.mxu0 }
 0x777   : > { %v19183_v14 = vpop.f32.mrf.mxu0 }
 0x778   : > { %14757 = vmatmul.mubr.msk.bf16.gmra.mxu1 %vm3704_vm2, %v19025_v44  ;;  %14797 = vmatmul.mubr.msk.bf16.gmra.mxu0 %vm3704_vm2, %v18504_v3 }
 0x779   : > { %v19189_v58 = vpop.f32.mrf.mxu0  ;;  %14760 = vmatprep.mubr.msk.bf16.mxu1 %vm3704_vm2, %v19033_v39  ;;  %14800 = vmatprep.mubr.msk.bf16.mxu0 %vm3704_vm2, %v18664_v35 }
 0x77b   : > { %v19195_v7 = vpop.f32.mrf.mxu0 }
 0x77d   : > { %v19197_v13 = vpop.f32.mrf.mxu0 }
 0x77e   : > { %21576 = vst [vmem:[#allocation18_spill] sm:$0xff] %v19197_v13 }
 0x77f   : > { %v19199_v6 = vpop.f32.mrf.mxu0 }
 0x780   : > { %14761 = vmatmul.mubr.msk.bf16.gmra.mxu1 %vm3704_vm2, %v19041_v15  ;;  %14801 = vmatmul.mubr.msk.bf16.gmra.mxu0 %vm3704_vm2, %v18530_v60 }
 0x781   : > { %v19205_v3 = vpop.f32.mrf.mxu0  ;;  %14764 = vmatprep.mubr.msk.bf16.mxu1 %vm3704_vm2, %v19049_v24  ;;  %14804 = vmatprep.mubr.msk.bf16.mxu0 %vm3704_vm2, %v18651_v12 }
 0x783   : > { %v19211_v35 = vpop.f32.mrf.mxu0 }
 0x784   : > { %21577 = vst [vmem:[#allocation39_spill] sm:$0xff] %v19211_v35 }
 0x785   : > { %v19213_v11 = vpop.f32.mrf.mxu0 }
 0x786   : > { %21578 = vst [vmem:[#allocation8_spill] sm:$0xff] %v19213_v11 }
 0x787   : > { %v19215_v13 = vpop.f32.mrf.mxu0 }
 0x788   : > { %14765 = vmatmul.mubr.msk.bf16.gmra.mxu1 %vm3704_vm2, %v19057_v2  ;;  %14805 = vmatmul.mubr.msk.bf16.gmra.mxu0 %vm3704_vm2, %v18556_v57 }
 0x789   : > { %v19221_v60 = vpop.f32.mrf.mxu0  ;;  %14768 = vmatprep.mubr.msk.bf16.mxu1 %vm3704_vm2, %v19065_v52  ;;  %14808 = vmatprep.mubr.msk.bf16.mxu0 %vm3704_vm2, %v18632_v28  ;;  %v13250_v28 = vadd.f32 %v19087_v50, %v19081_v16  ;;  %v15547_v50 = vld [vmem:[%s21273_s8 + $0xf0] sm:$0xff]  }
 0x78b   : > { %v19227_v12 = vpop.f32.mrf.mxu0 }
 0x78c   : > { %21579 = vst [vmem:[#allocation24_spill] sm:$0xff] %v19227_v12  ;;  %v13253_v12 = vadd.f32 %v19099_v41, %v19093_v54  ;;  %v15548_v54 = vld [vmem:[%s21273_s8 + $0x110] sm:$0xff]   ;;  %v15550_v41 = vld [vmem:[%s21273_s8 + $0x108] sm:$0xff]  }
 0x78d   : > { %v19229_v35 = vpop.f32.mrf.mxu0 }
 0x78e   : > { %21580 = vst [vmem:[#allocation23_spill] sm:$0xff] %v19229_v35 }
 0x78f   : > { %v19231_v11 = vpop.f32.mrf.mxu0 }
 0x790   : > { %21581 = vst [vmem:[#allocation21_spill] sm:$0xff] %v19231_v11  ;;  %14769 = vmatmul.mubr.msk.bf16.gmra.mxu1 %vm3704_vm2, %v19073_v29  ;;  %14809 = vmatmul.mubr.msk.bf16.gmra.mxu0 %vm3704_vm2, %v18576_v30  ;;  %v19247_v11 = vpack.c.bf16 %v13253_v12, %v13250_v28  ;;  %v19255_v30 = vpop.f32.mrf.mxu1 }
 0x791   : > { %14772 = vmatprep.mubr.msk.bf16.mxu1 %vm3704_vm2, %v19083_v62  ;;  %14812 = vmatprep.mubr.msk.bf16.mxu0 %vm3704_vm2, %v18608_v42  ;;  %v19245_v35 = vpop.f32.mrf.mxu0 }
 0x792   : > { %21582 = vst [vmem:[#allocation38_spill] sm:$0xff] %v19245_v35  ;;  %v19263_v28 = vpop.f32.mrf.mxu1 }
 0x793   : > { %v19249_v57 = vpop.f32.mrf.mxu0 }
 0x794   : > { %21583 = vst [vmem:[#allocation17_spill] sm:$0xff] %v19249_v57 }
 0x795   : > { %v19261_v16 = vpop.f32.mrf.mxu0 }
 0x796   : > { %21584 = vst [vmem:[#allocation33_spill] sm:$0xff] %v19261_v16 }
 0x797   : > { %v19265_v12 = vpop.f32.mrf.mxu0 }
 0x798   : > { %14773 = vmatmul.mubr.msk.bf16.gmra.mxu1 %vm3704_vm2, %v19247_v11  ;;  %14813 = vmatmul.mubr.msk.bf16.gmra.mxu0 %vm3704_vm2, %v18598_v23  ;;  %21585 = vst [vmem:[#allocation29_spill] sm:$0xff] %v19265_v12 }
 0x799   : > { %14824 = vmatprep.mubr.msk.bf16.mxu1 %vm3704_vm2, %v18941_v43  ;;  %14864 = vmatprep.mubr.msk.bf16.mxu0 %vm3704_vm2, %v18959_v1  ;;  %v19277_v43 = vpop.f32.mrf.mxu1  ;;  %v19283_v1 = vpop.f32.mrf.mxu0 }
 0x79a   : > { %21586 = vst [vmem:[#allocation43_spill] sm:$0xff] %v19283_v1 }
 0x79b   : > { %v19293_v57 = vpop.f32.mrf.mxu1  ;;  %v19295_v12 = vpop.f32.mrf.mxu0 }
 0x79c   : > { %21587 = vst [vmem:[#allocation7_spill] sm:$0xff] %v19295_v12 }
 0x7a0   : > { %14825 = vmatmul.mubr.msk.bf16.vlgmr.msra.gmra.mxu1 %vm3704_vm2, %v18961_v61  ;;  %14865 = vmatmul.mubr.msk.bf16.vlgmr.msra.gmra.mxu0 %vm3704_vm2, %v18973_v38  ;;  %v15549_v38 = vld [vmem:[%s21273_s8 + $0xe8] sm:$0xff]  }
 0x7a1   : > { %14828 = vmatprep.mubr.msk.bf16.mxu1 %vm3704_vm2, %v18975_v40  ;;  %14868 = vmatprep.mubr.msk.bf16.mxu0 %vm3704_vm2, %v18981_v46  ;;  %v15551_v46 = vld [vmem:[%s21273_s8 + $0xe0] sm:$0xff]  }
 0x7a2   : > { %14897 = vmatpush3.bf16.msra.mxu1 %v19156_v10  ;;  %14937 = vmatpush3.bf16.msra.mxu0 %v19161_v22  ;;  %v15552_v10 = vld [vmem:[%s21273_s8 + $0x100] sm:$0xff]  }
 0x7a3   : > { %14898 = vmatprep.subr.bf16.mxu1 %v15547_v50  ;;  %14938 = vmatprep.subr.bf16.mxu0 %v15548_v54 }
 0x7a6   : > { %14899 = vmatpush3.bf16.msra.mxu1 %v15547_v50  ;;  %14939 = vmatpush3.bf16.msra.mxu0 %v15548_v54 }
 0x7a7   : > { %14900 = vmatprep.subr.bf16.mxu1 %v15549_v38  ;;  %14940 = vmatprep.subr.bf16.mxu0 %v15550_v41 }
 0x7a8   : > { %v14666_v22 = vpop.f32.mrf.mxu1  ;;  %v14706_v1 = vpop.f32.mrf.mxu0  ;;  %14829 = vmatmul.mubr.msk.bf16.gmra.mxu1 %vm3704_vm2, %v18983_v19  ;;  %14869 = vmatmul.mubr.msk.bf16.gmra.mxu0 %vm3704_vm2, %v19001_v17 }
 0x7a9   : > { %v6682_v50 = vadd.f32 %v14666_v22, %v19101_v49  ;;  %14832 = vmatprep.mubr.msk.bf16.mxu1 %vm3704_vm2, %v19003_v20  ;;  %14872 = vmatprep.mubr.msk.bf16.mxu0 %vm3704_vm2, %v19009_v63 }
 0x7aa   : > { %v6673_v54 = vpop.f32.mrf.mxu1  ;;  %v6912_v12 = vpop.f32.mrf.mxu0  ;;  %14901 = vmatpush3.bf16.msra.mxu1 %v15549_v38  ;;  %14941 = vmatpush3.bf16.msra.mxu0 %v15550_v41 }
 0x7ab   : > { %v19312_v16 = vadd.f32 %v14706_v1, %v6682_v50  ;;  %v6674_v23 = vadd.f32 %v6673_v54, %v19103_v51  ;;  %14902 = vmatprep.subr.bf16.mxu1 %v15551_v46  ;;  %14942 = vmatprep.subr.bf16.mxu0 %v15552_v10 }
 0x7ac   : > { %v14667_v42 = vpop.f32.mrf.mxu1  ;;  %v14707_v22 = vpop.f32.mrf.mxu0 }
 0x7ad   : > { %v19315_v17 = vadd.f32 %v6912_v12, %v6674_v23  ;;  %v6685_v49 = vadd.f32 %v14667_v42, %v19115_v59 }
 0x7ae   : > { %14903 = vmatpush3.bf16.msra.mxu1 %v15551_v46  ;;  %14943 = vmatpush3.bf16.msra.mxu0 %v15552_v10  ;;  %v19328_v23 = vpop.f32.mrf.mxu1  ;;  %v19330_v42 = vpop.f32.mrf.mxu0 }
 0x7af   : > { %v19318_v35 = vadd.f32 %v14707_v22, %v6685_v49  ;;  %21588 = vst [vmem:[#allocation10_spill] sm:$0xff] %v19330_v42 }
 0x7b0   : > { %14833 = vmatmul.mubr.msk.bf16.gmra.mxu1 %vm3704_vm2, %v19011_v4  ;;  %14873 = vmatmul.mubr.msk.bf16.gmra.mxu0 %vm3704_vm2, %v19017_v37 }
 0x7b1   : > { %14836 = vmatprep.mubr.msk.bf16.mxu1 %vm3704_vm2, %v19019_v32  ;;  %14876 = vmatprep.mubr.msk.bf16.mxu0 %vm3704_vm2, %v19025_v44 }
 0x7b8   : > { %v14670_v63 = vpop.f32.mrf.mxu1  ;;  %v14710_v51 = vpop.f32.mrf.mxu0  ;;  %14837 = vmatmul.mubr.msk.bf16.gmra.mxu1 %vm3704_vm2, %v19027_v55  ;;  %14877 = vmatmul.mubr.msk.bf16.gmra.mxu0 %vm3704_vm2, %v19033_v39 }
 0x7b9   : > { %v6698_v37 = vadd.f32 %v14670_v63, %v19131_v45  ;;  %14840 = vmatprep.mubr.msk.bf16.mxu1 %vm3704_vm2, %v19035_v27  ;;  %14880 = vmatprep.mubr.msk.bf16.mxu0 %vm3704_vm2, %v19041_v15 }
 0x7ba   : > { %v6689_v44 = vpop.f32.mrf.mxu1  ;;  %v6928_v59 = vpop.f32.mrf.mxu0 }
 0x7bb   : > { %v19341_v12 = vadd.f32 %v14710_v51, %v6698_v37  ;;  %v6690_v1 = vadd.f32 %v6689_v44, %v19133_v56 }
 0x7bc   : > { %v14671_v38 = vpop.f32.mrf.mxu1  ;;  %v14711_v39 = vpop.f32.mrf.mxu0 }
 0x7bd   : > { %v19344_v41 = vadd.f32 %v6928_v59, %v6690_v1  ;;  %v6701_v46 = vadd.f32 %v14671_v38, %v19145_v0  ;;  %v21589_v1 = vmov 0  }
 0x7be   : > { %v19357_v15 = vpop.f32.mrf.mxu1  ;;  %v19359_v45 = vpop.f32.mrf.mxu0 }
 0x7bf   : > { %v19347_v10 = vadd.f32 %v14711_v39, %v6701_v46 }
 0x7c0   : > { %14841 = vmatmul.mubr.msk.bf16.gmra.mxu1 %vm3704_vm2, %v19043_v31  ;;  %14881 = vmatmul.mubr.msk.bf16.gmra.mxu0 %vm3704_vm2, %v19049_v24 }
 0x7c1   : > { %14844 = vmatprep.mubr.msk.bf16.mxu1 %vm3704_vm2, %v19051_v36  ;;  %14884 = vmatprep.mubr.msk.bf16.mxu0 %vm3704_vm2, %v19057_v2 }
 0x7c8   : > { %v14674_v56 = vpop.f32.mrf.mxu1  ;;  %v14714_v0 = vpop.f32.mrf.mxu0  ;;  %14845 = vmatmul.mubr.msk.bf16.gmra.mxu1 %vm3704_vm2, %v19059_v48  ;;  %14885 = vmatmul.mubr.msk.bf16.gmra.mxu0 %vm3704_vm2, %v19065_v52 }
 0x7c9   : > { %v6714_v24 = vadd.f32 %v14674_v56, %v19163_v33  ;;  %14848 = vmatprep.mubr.msk.bf16.mxu1 %vm3704_vm2, %v19067_v5  ;;  %14888 = vmatprep.mubr.msk.bf16.mxu0 %vm3704_vm2, %v19073_v29  ;;  %v13362_v29 = vadd.f32 %v19263_v28, %v19255_v30  ;;  %v13365_v33 = vadd.f32 %v19293_v57, %v19277_v43 }
 0x7ca   : > { %v6705_v2 = vpop.f32.mrf.mxu1  ;;  %v6944_v50 = vpop.f32.mrf.mxu0 }
 0x7cb   : > { %v19370_v54 = vadd.f32 %v14714_v0, %v6714_v24  ;;  %v6706_v49 = vadd.f32 %v6705_v2, %v19165_v8  ;;  %v19390_v8 = vpack.c.bf16 %v13365_v33, %v13362_v29  ;;  %v21591_v2 = vld [vmem:[#allocation25_spill] sm:$0xff] }
 0x7cc   : > { %v14675_v22 = vpop.f32.mrf.mxu1  ;;  %v14715_v52 = vpop.f32.mrf.mxu0 }
 0x7cd   : > { %v19373_v63 = vadd.f32 %v6944_v50, %v6706_v49  ;;  %v6717_v51 = vadd.f32 %v14675_v22, %v19173_v21 }
 0x7ce   : > { %v19392_v21 = vpop.f32.mrf.mxu1  ;;  %v19394_v44 = vpop.f32.mrf.mxu0 }
 0x7cf   : > { %v19376_v37 = vadd.f32 %v14715_v52, %v6717_v51  ;;  %v21592_v52 = vld [vmem:[#allocation40_spill] sm:$0xff] }
 0x7d0   : > { %14849 = vmatmul.mubr.msk.bf16.gmra.mxu1 %vm3704_vm2, %v19075_v25  ;;  %14889 = vmatmul.mubr.msk.bf16.gmra.mxu0 %vm3704_vm2, %v19083_v62 }
 0x7d1   : > { %14852 = vmatprep.mubr.msk.bf16.mxu1 %vm3704_vm2, %v19085_v34  ;;  %14892 = vmatprep.mubr.msk.bf16.mxu0 %vm3704_vm2, %v19247_v11 }
 0x7d8   : > { %v14678_v59 = vpop.f32.mrf.mxu1  ;;  %v14718_v62 = vpop.f32.mrf.mxu0  ;;  %14853 = vmatmul.mubr.msk.bf16.gmra.mxu1 %vm3704_vm2, %v19390_v8  ;;  %14893 = vmatmul.mubr.bf16.gmra.mxu0 %v21589_v1 }
 0x7d9   : > { %v6730_v11 = vadd.f32 %v14678_v59, %v19181_v53  ;;  %14904 = vmatprep.mubr.msk.bf16.mxu1 %vm3704_vm2, %v18448_v9  ;;  %14944 = vmatprep.mubr.msk.bf16.mxu0 %vm3704_vm2, %v18961_v61  ;;  %v21595_v59 = vld [vmem:[#allocation15_spill] sm:$0xff] }
 0x7da   : > { %v6721_v57 = vpop.f32.mrf.mxu1  ;;  %v6960_v30 = vpop.f32.mrf.mxu0 }
 0x7db   : > { %v19404_v28 = vadd.f32 %v14718_v62, %v6730_v11  ;;  %v6722_v43 = vadd.f32 %v6721_v57, %v19183_v14  ;;  %v21596_v62 = vld [vmem:[#allocation8_spill] sm:$0xff]  ;;  %v21597_v11 = vld [vmem:[#allocation34_spill] sm:$0xff] }
 0x7dc   : > { %v14679_v38 = vpop.f32.mrf.mxu1  ;;  %v14719_v46 = vpop.f32.mrf.mxu0 }
 0x7dd   : > { %v19407_v39 = vadd.f32 %v6960_v30, %v6722_v43  ;;  %v6733_v56 = vadd.f32 %v14679_v38, %v19189_v58 }
 0x7de   : > { %v6724_v0 = vpop.f32.mrf.mxu1  ;;  %v6963_v24 = vpop.f32.mrf.mxu0 }
 0x7df   : > { %v19410_v53 = vadd.f32 %v14719_v46, %v6733_v56  ;;  %v6725_v9 = vadd.f32 %v6724_v0, %v19195_v7 }
 0x7e0   : > { %14905 = vmatmul.mubr.msk.bf16.vlgmr.msra.gmra.mxu1 %vm3704_vm2, %v18658_v47  ;;  %14945 = vmatmul.mubr.msk.bf16.vlgmr.msra.gmra.mxu0 %vm3704_vm2, %v18975_v40  ;;  %v21590_v47 = vld [vmem:[#allocation18_spill] sm:$0xff] }
 0x7e1   : > { %v19417_v61 = vadd.f32 %v6963_v24, %v6725_v9  ;;  %14908 = vmatprep.mubr.msk.bf16.mxu1 %vm3704_vm2, %v18463_v18  ;;  %14948 = vmatprep.mubr.msk.bf16.mxu0 %vm3704_vm2, %v18983_v19  ;;  %v21598_v9 = vld [vmem:[#allocation41_spill] sm:$0xff] }
 0x7e8   : > { %v14682_v58 = vpop.f32.mrf.mxu1  ;;  %v14722_v14 = vpop.f32.mrf.mxu0  ;;  %14909 = vmatmul.mubr.msk.bf16.gmra.mxu1 %vm3704_vm2, %v18487_v26  ;;  %14949 = vmatmul.mubr.msk.bf16.gmra.mxu0 %vm3704_vm2, %v19003_v20 }
 0x7e9   : > { %v6746_v7 = vadd.f32 %v14682_v58, %v21590_v47  ;;  %14912 = vmatprep.mubr.msk.bf16.mxu1 %vm3704_vm2, %v21591_v2  ;;  %14952 = vmatprep.mubr.msk.bf16.mxu0 %vm3704_vm2, %v19011_v4  ;;  %v21593_v4 = vld [vmem:[#allocation20_spill] sm:$0xff]  ;;  %v21601_v47 = vld [vmem:[#allocation23_spill] sm:$0xff] }
 0x7ea   : > { %v6737_v18 = vpop.f32.mrf.mxu1  ;;  %v6976_v40 = vpop.f32.mrf.mxu0 }
 0x7eb   : > { %v19432_v50 = vadd.f32 %v14722_v14, %v6746_v7  ;;  %v6738_v19 = vadd.f32 %v6737_v18, %v19199_v6  ;;  %v21600_v14 = vld [vmem:[#allocation32_spill] sm:$0xff]  ;;  %v21602_v7 = vld [vmem:[#allocation14_spill] sm:$0xff] }
 0x7ec   : > { %v14683_v49 = vpop.f32.mrf.mxu1  ;;  %v14723_v20 = vpop.f32.mrf.mxu0 }
 0x7ed   : > { %v19435_v22 = vadd.f32 %v6976_v40, %v6738_v19  ;;  %v6749_v26 = vadd.f32 %v14683_v49, %v19205_v3  ;;  %v21603_v40 = vld [vmem:[#allocation21_spill] sm:$0xff] }
 0x7ee   : > { %v19448_v6 = vpop.f32.mrf.mxu1  ;;  %v19450_v29 = vpop.f32.mrf.mxu0 }
 0x7ef   : > { %v19438_v51 = vadd.f32 %v14723_v20, %v6749_v26  ;;  %21594 = vst [vmem:[#allocation28_spill] sm:$0xff] %v19450_v29  ;;  %v21604_v20 = vld [vmem:[#allocation38_spill] sm:$0xff] }
 0x7f0   : > { %14913 = vmatmul.mubr.msk.bf16.gmra.mxu1 %vm3704_vm2, %v21592_v52  ;;  %14953 = vmatmul.mubr.msk.bf16.gmra.mxu0 %vm3704_vm2, %v19019_v32 }
 0x7f1   : > { %14916 = vmatprep.mubr.msk.bf16.mxu1 %vm3704_vm2, %v21593_v4  ;;  %14956 = vmatprep.mubr.msk.bf16.mxu0 %vm3704_vm2, %v19027_v55 }
 0x7f8   : > { %v14686_v3 = vpop.f32.mrf.mxu1  ;;  %v14726_v33 = vpop.f32.mrf.mxu0  ;;  %14917 = vmatmul.mubr.msk.bf16.gmra.mxu1 %vm3704_vm2, %v21595_v59  ;;  %14957 = vmatmul.mubr.msk.bf16.gmra.mxu0 %vm3704_vm2, %v19035_v27 }
 0x7f9   : > { %v6762_v32 = vadd.f32 %v14686_v3, %v21596_v62  ;;  %14920 = vmatprep.mubr.msk.bf16.mxu1 %vm3704_vm2, %v21597_v11  ;;  %14960 = vmatprep.mubr.msk.bf16.mxu0 %vm3704_vm2, %v19043_v31  ;;  %v21599_v31 = vld [vmem:[#allocation16_spill] sm:$0xff]  ;;  %v21605_v3 = vld [vmem:[#allocation37_spill] sm:$0xff] }
 0x7fa   : > { %v6753_v55 = vpop.f32.mrf.mxu1  ;;  %v6992_v57 = vpop.f32.mrf.mxu0  ;;  %v21607_v11 = vld [vmem:[#allocation33_spill] sm:$0xff] }
 0x7fb   : > { %v19461_v30 = vadd.f32 %v14726_v33, %v6762_v32  ;;  %v6754_v43 = vadd.f32 %v6753_v55, %v19215_v13 }
 0x7fc   : > { %v14687_v38 = vpop.f32.mrf.mxu1  ;;  %v14727_v27 = vpop.f32.mrf.mxu0 }
 0x7fd   : > { %v19464_v46 = vadd.f32 %v6992_v57, %v6754_v43  ;;  %v6765_v56 = vadd.f32 %v14687_v38, %v19221_v60 }
 0x7fe   : > { %v19477_v13 = vpop.f32.mrf.mxu1  ;;  %v19479_v24 = vpop.f32.mrf.mxu0 }
 0x7ff   : > { %v19467_v0 = vadd.f32 %v14727_v27, %v6765_v56  ;;  %v21608_v56 = vld [vmem:[#allocation29_spill] sm:$0xff] }
 0x800   : > { %14921 = vmatmul.mubr.msk.bf16.gmra.mxu1 %vm3704_vm2, %v21598_v9  ;;  %14961 = vmatmul.mubr.msk.bf16.gmra.mxu0 %vm3704_vm2, %v19051_v36 }
 0x801   : > { %14924 = vmatprep.mubr.msk.bf16.mxu1 %vm3704_vm2, %v21599_v31  ;;  %14964 = vmatprep.mubr.msk.bf16.mxu0 %vm3704_vm2, %v19059_v48 }
 0x808   : > { %v14690_v60 = vpop.f32.mrf.mxu1  ;;  %v14730_v58 = vpop.f32.mrf.mxu0  ;;  %14925 = vmatmul.mubr.msk.bf16.gmra.mxu1 %vm3704_vm2, %v21600_v14  ;;  %14965 = vmatmul.mubr.msk.bf16.gmra.mxu0 %vm3704_vm2, %v19067_v5 }
 0x809   : > { %v6778_v36 = vadd.f32 %v14690_v60, %v21601_v47  ;;  %14928 = vmatprep.mubr.msk.bf16.mxu1 %vm3704_vm2, %v21602_v7  ;;  %14968 = vmatprep.mubr.msk.bf16.mxu0 %vm3704_vm2, %v19075_v25  ;;  %v21606_v25 = vld [vmem:[#allocation12_spill] sm:$0xff] }
 0x80a   : > { %v6769_v48 = vpop.f32.mrf.mxu1  ;;  %v7008_v2 = vpop.f32.mrf.mxu0 }
 0x80b   : > { %v19490_v18 = vadd.f32 %v14730_v58, %v6778_v36  ;;  %v6770_v19 = vadd.f32 %v6769_v48, %v21603_v40  ;;  %v21609_v58 = vld [vmem:[#allocation43_spill] sm:$0xff] }
 0x80c   : > { %v14691_v49 = vpop.f32.mrf.mxu1  ;;  %v14731_v5 = vpop.f32.mrf.mxu0 }
 0x80d   : > { %v19493_v26 = vadd.f32 %v7008_v2, %v6770_v19  ;;  %v6781_v52 = vadd.f32 %v14691_v49, %v21604_v20 }
 0x80e   : > { %v19506_v33 = vpop.f32.mrf.mxu1  ;;  %v19508_v59 = vpop.f32.mrf.mxu0 }
 0x80f   : > { %v19496_v4 = vadd.f32 %v14731_v5, %v6781_v52 }
 0x810   : > { %14929 = vmatmul.mubr.msk.bf16.gmra.mxu1 %vm3704_vm2, %v21605_v3  ;;  %14969 = vmatmul.mubr.msk.bf16.gmra.mxu0 %vm3704_vm2, %v19085_v34  ;;  %v15721_v34 = vld [vmem:[%s21339_s0 + $0x4] ss:$8 sps:$4 sm:$0xff]  }
 0x811   : > { %14932 = vmatprep.mubr.msk.bf16.mxu1 %vm3704_vm2, %v21606_v25  ;;  %14972 = vmatprep.mubr.msk.bf16.mxu0 %vm3704_vm2, %v19390_v8  ;;  %v15722_v8 = vld [vmem:[%s21339_s0 + $0x104] ss:$8 sps:$4 sm:$0xff]  }
 0x818   : > { %v14694_v62 = vpop.f32.mrf.mxu1  ;;  %v14734_v32 = vpop.f32.mrf.mxu0  ;;  %14933 = vmatmul.mubr.bf16.gmra.mxu1 %v21589_v1  ;;  %14973 = vmatmul.mubr.bf16.gmra.mxu0 %v21589_v1 }
 0x819   : > { %v6794_v55 = vadd.f32 %v14694_v62, %v21607_v11  ;;  %8658 = vmatprep.mubr.bf16.mxu1 %v15721_v34  ;;  %8835 = vmatprep.mubr.bf16.mxu0 %v15722_v8 }
 0x81a   : > { %v6785_v57 = vpop.f32.mrf.mxu1  ;;  %v7024_v43 = vpop.f32.mrf.mxu0 }
 0x81b   : > { %v19519_v38 = vadd.f32 %v14734_v32, %v6794_v55  ;;  %v6786_v27 = vadd.f32 %v6785_v57, %v21608_v56 }
 0x81c   : > { %v14695_v9 = vpop.f32.mrf.mxu1  ;;  %v14735_v31 = vpop.f32.mrf.mxu0 }
 0x81d   : > { %v19522_v60 = vadd.f32 %v7024_v43, %v6786_v27  ;;  %v6797_v14 = vadd.f32 %v14695_v9, %v21609_v58 }
 0x81e   : > { %v19525_v47 = vpop.f32.mrf.mxu1  ;;  %v19527_v36 = vpop.f32.mrf.mxu0 }
 0x81f   : > { %v19529_v7 = vadd.f32 %v14735_v31, %v6797_v14 }
 0x820   : > { %v14746_v48 = vpop.f32.mrf.mxu1  ;;  %v14786_v2 = vpop.f32.mrf.mxu0 }
 0x821   : > { %v7270_v40 = vadd.f32 %v14746_v48, %v19312_v16 }
 0x822   : > { %v7141_v19 = vpop.f32.mrf.mxu1  ;;  %v7370_v49 = vpop.f32.mrf.mxu0 }
 0x823   : > { %v19532_v20 = vadd.f32 %v14786_v2, %v7270_v40  ;;  %v7268_v52 = vadd.f32 %v7141_v19, %v19315_v17 }
 0x824   : > { %v14747_v5 = vpop.f32.mrf.mxu1  ;;  %v14787_v3 = vpop.f32.mrf.mxu0 }
 0x825   : > { %v19535_v25 = vadd.f32 %v7370_v49, %v7268_v52  ;;  %v7271_v62 = vadd.f32 %v14747_v5, %v19318_v35 }
 0x826   : > { %v19538_v32 = vpop.f32.mrf.mxu1  ;;  %v19540_v11 = vpop.f32.mrf.mxu0 }
 0x827   : > { %21610 = vst [vmem:[#allocation26_spill] sm:$0xff] %v19538_v32  ;;  %21611 = vst [vmem:[#allocation11_spill] sm:$0xff] %v19540_v11  ;;  %v19542_v55 = vadd.f32 %v14787_v3, %v7271_v62 }
 0x828   : > { %v14750_v34 = vpop.f32.mrf.mxu1  ;;  %v14790_v16 = vpop.f32.mrf.mxu0 }
 0x829   : > { %v7274_v8 = vadd.f32 %v14750_v34, %v19341_v12 }
 0x82a   : > { %v7157_v57 = vpop.f32.mrf.mxu1  ;;  %v7386_v43 = vpop.f32.mrf.mxu0 }
 0x82b   : > { %v19545_v56 = vadd.f32 %v14790_v16, %v7274_v8  ;;  %v7272_v17 = vadd.f32 %v7157_v57, %v19344_v41 }
 0x82c   : > { %v14751_v27 = vpop.f32.mrf.mxu1  ;;  %v14791_v9 = vpop.f32.mrf.mxu0 }
 0x82d   : > { %v19548_v31 = vadd.f32 %v7386_v43, %v7272_v17  ;;  %v7275_v35 = vadd.f32 %v14751_v27, %v19347_v10 }
 0x82e   : > { %v19551_v58 = vpop.f32.mrf.mxu1  ;;  %v19553_v14 = vpop.f32.mrf.mxu0 }
 0x82f   : > { %21612 = vst [vmem:[#allocation13_spill] sm:$0xff] %v19551_v58  ;;  %21613 = vst [vmem:[#allocation36_spill] sm:$0xff] %v19553_v14  ;;  %v19555_v48 = vadd.f32 %v14791_v9, %v7275_v35 }
 0x830   : > { %v14754_v2 = vpop.f32.mrf.mxu1  ;;  %v14794_v12 = vpop.f32.mrf.mxu0 }
 0x831   : > { %v7278_v40 = vadd.f32 %v14754_v2, %v19370_v54 }
 0x832   : > { %v7173_v19 = vpop.f32.mrf.mxu1  ;;  %v7402_v49 = vpop.f32.mrf.mxu0 }
 0x833   : > { %v19558_v52 = vadd.f32 %v14794_v12, %v7278_v40  ;;  %v7276_v41 = vadd.f32 %v7173_v19, %v19373_v63 }
 0x834   : > { %v14755_v5 = vpop.f32.mrf.mxu1  ;;  %v14795_v3 = vpop.f32.mrf.mxu0 }
 0x835   : > { %v19561_v62 = vadd.f32 %v7402_v49, %v7276_v41  ;;  %v7279_v10 = vadd.f32 %v14755_v5, %v19376_v37 }
 0x836   : > { %v19564_v34 = vpop.f32.mrf.mxu1  ;;  %v19566_v16 = vpop.f32.mrf.mxu0 }
 0x837   : > { %v19568_v8 = vadd.f32 %v14795_v3, %v7279_v10 }
 0x838   : > { %v14758_v57 = vpop.f32.mrf.mxu1  ;;  %v14798_v54 = vpop.f32.mrf.mxu0 }
 0x839   : > { %v7282_v43 = vadd.f32 %v14758_v57, %v19404_v28 }
 0x83a   : > { %v7189_v17 = vpop.f32.mrf.mxu1  ;;  %v7418_v27 = vpop.f32.mrf.mxu0 }
 0x83b   : > { %v19571_v9 = vadd.f32 %v14798_v54, %v7282_v43  ;;  %v7280_v63 = vadd.f32 %v7189_v17, %v19407_v39 }
 0x83c   : > { %v14759_v35 = vpop.f32.mrf.mxu1  ;;  %v14799_v2 = vpop.f32.mrf.mxu0 }
 0x83d   : > { %v19574_v12 = vadd.f32 %v7418_v27, %v7280_v63  ;;  %v7283_v37 = vadd.f32 %v14759_v35, %v19410_v53 }
 0x83e   : > { %v19577_v40 = vpop.f32.mrf.mxu1  ;;  %v19579_v19 = vpop.f32.mrf.mxu0 }
 0x83f   : > { %v19581_v49 = vadd.f32 %v14799_v2, %v7283_v37 }
 0x840   : > { %v14762_v41 = vpop.f32.mrf.mxu1  ;;  %v14802_v28 = vpop.f32.mrf.mxu0 }
 0x841   : > { %v7286_v5 = vadd.f32 %v14762_v41, %v19432_v50 }
 0x842   : > { %v7205_v3 = vpop.f32.mrf.mxu1  ;;  %v7434_v10 = vpop.f32.mrf.mxu0 }
 0x843   : > { %v19584_v57 = vadd.f32 %v14802_v28, %v7286_v5  ;;  %v7284_v39 = vadd.f32 %v7205_v3, %v19435_v22 }
 0x844   : > { %v14763_v54 = vpop.f32.mrf.mxu1  ;;  %v14803_v43 = vpop.f32.mrf.mxu0 }
 0x845   : > { %v19587_v17 = vadd.f32 %v7434_v10, %v7284_v39  ;;  %v7287_v53 = vadd.f32 %v14763_v54, %v19438_v51 }
 0x846   : > { %v19590_v27 = vpop.f32.mrf.mxu1  ;;  %v19592_v63 = vpop.f32.mrf.mxu0 }
 0x847   : > { %21614 = vst [vmem:[#allocation30_spill] sm:$0xff] %v19590_v27  ;;  %21615 = vst [vmem:[#allocation42_spill] sm:$0xff] %v19592_v63  ;;  %v19594_v35 = vadd.f32 %v14803_v43, %v7287_v53 }
 0x848   : > { %v14766_v2 = vpop.f32.mrf.mxu1  ;;  %v14806_v50 = vpop.f32.mrf.mxu0 }
 0x849   : > { %v7290_v37 = vadd.f32 %v14766_v2, %v19461_v30 }
 0x84a   : > { %v7221_v41 = vpop.f32.mrf.mxu1  ;;  %v7450_v28 = vpop.f32.mrf.mxu0 }
 0x84b   : > { %v19597_v5 = vadd.f32 %v14806_v50, %v7290_v37  ;;  %v7288_v22 = vadd.f32 %v7221_v41, %v19464_v46 }
 0x84c   : > { %v14767_v3 = vpop.f32.mrf.mxu1  ;;  %v14807_v10 = vpop.f32.mrf.mxu0 }
 0x84d   : > { %v19600_v39 = vadd.f32 %v7450_v28, %v7288_v22  ;;  %v7291_v51 = vadd.f32 %v14767_v3, %v19467_v0 }
 0x84e   : > { %v19603_v54 = vpop.f32.mrf.mxu1  ;;  %v19605_v43 = vpop.f32.mrf.mxu0 }
 0x84f   : > { %21616 = vst [vmem:[#allocation31_spill] sm:$0xff] %v19605_v43  ;;  %v19607_v53 = vadd.f32 %v14807_v10, %v7291_v51 }
 0x850   : > { %v14770_v1 = vpop.f32.mrf.mxu1  ;;  %v14810_v30 = vpop.f32.mrf.mxu0 }
 0x851   : > { %v7294_v2 = vadd.f32 %v14770_v1, %v19490_v18 }
 0x852   : > { %v7237_v50 = vpop.f32.mrf.mxu1  ;;  %v7466_v37 = vpop.f32.mrf.mxu0 }
 0x853   : > { %v19610_v11 = vadd.f32 %v14810_v30, %v7294_v2  ;;  %v7292_v46 = vadd.f32 %v7237_v50, %v19493_v26 }
 0x854   : > { %v14771_v41 = vpop.f32.mrf.mxu1  ;;  %v14811_v28 = vpop.f32.mrf.mxu0 }
 0x855   : > { %v19613_v22 = vadd.f32 %v7466_v37, %v7292_v46  ;;  %v7295_v0 = vadd.f32 %v14771_v41, %v19496_v4 }
 0x856   : > { %v19616_v3 = vpop.f32.mrf.mxu1  ;;  %v19618_v10 = vpop.f32.mrf.mxu0 }
 0x857   : > { %v19620_v51 = vadd.f32 %v14811_v28, %v7295_v0 }
 0x858   : > { %v14774_v63 = vpop.f32.mrf.mxu1  ;;  %v14814_v1 = vpop.f32.mrf.mxu0 }
 0x859   : > { %v7298_v18 = vadd.f32 %v14774_v63, %v19519_v38 }
 0x85a   : > { %v7253_v30 = vpop.f32.mrf.mxu1  ;;  %v7482_v2 = vpop.f32.mrf.mxu0 }
 0x85b   : > { %v19623_v27 = vadd.f32 %v14814_v1, %v7298_v18  ;;  %v7296_v26 = vadd.f32 %v7253_v30, %v19522_v60 }
 0x85c   : > { %v14775_v50 = vpop.f32.mrf.mxu1  ;;  %v14815_v37 = vpop.f32.mrf.mxu0 }
 0x85d   : > { %v19626_v46 = vadd.f32 %v7482_v2, %v7296_v26  ;;  %v7299_v4 = vadd.f32 %v14775_v50, %v19529_v7 }
 0x85e   : > { %v19629_v41 = vpop.f32.mrf.mxu1  ;;  %v19631_v28 = vpop.f32.mrf.mxu0 }
 0x85f   : > { %21617 = vst [vmem:[#allocation22_spill] sm:$0xff] %v19631_v28  ;;  %v19633_v0 = vadd.f32 %v14815_v37, %v7299_v4 }
 0x860   : > { %v14826_v14 = vpop.f32.mrf.mxu1  ;;  %v14866_v38 = vpop.f32.mrf.mxu0 }
 0x861   : > { %21618 = vst [vmem:[#allocation35_spill] sm:$0xff] %v19633_v0  ;;  %v7728_v63 = vadd.f32 %v14826_v14, %v19532_v20 }
 0x862   : > { %v7599_v1 = vpop.f32.mrf.mxu1  ;;  %v7825_v18 = vpop.f32.mrf.mxu0 }
 0x863   : > { %v19636_v32 = vadd.f32 %v14866_v38, %v7728_v63  ;;  %v7726_v60 = vadd.f32 %v7599_v1, %v19535_v25 }
 0x864   : > { %v14827_v30 = vpop.f32.mrf.mxu1  ;;  %v14867_v2 = vpop.f32.mrf.mxu0 }
 0x865   : > { %v19639_v26 = vadd.f32 %v7825_v18, %v7726_v60  ;;  %v7729_v7 = vadd.f32 %v14827_v30, %v19542_v55 }
 0x866   : > { %v19642_v50 = vpop.f32.mrf.mxu1  ;;  %v19644_v37 = vpop.f32.mrf.mxu0 }
 0x867   : > { %21619 = vst [vmem:[#allocation18_spill] sm:$0xff] %v19642_v50  ;;  %21620 = vst [vmem:[#allocation25_spill] sm:$0xff] %v19644_v37  ;;  %v19646_v4 = vadd.f32 %v14867_v2, %v7729_v7 }
 0x868   : > { %v14830_v29 = vpop.f32.mrf.mxu1  ;;  %v14870_v20 = vpop.f32.mrf.mxu0 }
 0x869   : > { %v7732_v14 = vadd.f32 %v14830_v29, %v19545_v56 }
 0x86a   : > { %v7615_v38 = vpop.f32.mrf.mxu1  ;;  %v7841_v63 = vpop.f32.mrf.mxu0 }
 0x86b   : > { %v19649_v43 = vadd.f32 %v14870_v20, %v7732_v14  ;;  %v7730_v25 = vadd.f32 %v7615_v38, %v19548_v31 }
 0x86c   : > { %v14831_v1 = vpop.f32.mrf.mxu1  ;;  %v14871_v18 = vpop.f32.mrf.mxu0 }
 0x86d   : > { %v19652_v60 = vadd.f32 %v7841_v63, %v7730_v25  ;;  %v7733_v55 = vadd.f32 %v14831_v1, %v19555_v48 }
 0x86e   : > { %v19655_v30 = vpop.f32.mrf.mxu1  ;;  %v19657_v2 = vpop.f32.mrf.mxu0 }
 0x86f   : > { %21621 = vst [vmem:[#allocation40_spill] sm:$0xff] %v19655_v30  ;;  %21622 = vst [vmem:[#allocation20_spill] sm:$0xff] %v19657_v2  ;;  %v19659_v7 = vadd.f32 %v14871_v18, %v7733_v55 }
 0x870   : > { %v14834_v37 = vpop.f32.mrf.mxu1  ;;  %v14874_v29 = vpop.f32.mrf.mxu0 }
 0x871   : > { %v7736_v56 = vadd.f32 %v14834_v37, %v19558_v52 }
 0x872   : > { %v7631_v20 = vpop.f32.mrf.mxu1  ;;  %v7857_v14 = vpop.f32.mrf.mxu0 }
 0x873   : > { %v19662_v50 = vadd.f32 %v14874_v29, %v7736_v56  ;;  %v7734_v31 = vadd.f32 %v7631_v20, %v19561_v62 }
 0x874   : > { %v14835_v38 = vpop.f32.mrf.mxu1  ;;  %v14875_v63 = vpop.f32.mrf.mxu0 }
 0x875   : > { %v19665_v25 = vadd.f32 %v7857_v14, %v7734_v31  ;;  %v7737_v48 = vadd.f32 %v14835_v38, %v19568_v8 }
 0x876   : > { %v19668_v1 = vpop.f32.mrf.mxu1  ;;  %v19670_v18 = vpop.f32.mrf.mxu0 }
 0x877   : > { %v19672_v55 = vadd.f32 %v14875_v63, %v7737_v48 }
 0x878   : > { %v14838_v2 = vpop.f32.mrf.mxu1  ;;  %v14878_v52 = vpop.f32.mrf.mxu0 }
 0x879   : > { %v7740_v37 = vadd.f32 %v14838_v2, %v19571_v9 }
 0x87a   : > { %v7647_v29 = vpop.f32.mrf.mxu1  ;;  %v7873_v56 = vpop.f32.mrf.mxu0 }
 0x87b   : > { %v19675_v30 = vadd.f32 %v14878_v52, %v7740_v37  ;;  %v7738_v62 = vadd.f32 %v7647_v29, %v19574_v12 }
 0x87c   : > { %v14839_v20 = vpop.f32.mrf.mxu1  ;;  %v14879_v14 = vpop.f32.mrf.mxu0 }
 0x87d   : > { %v19678_v31 = vadd.f32 %v7873_v56, %v7738_v62  ;;  %v7741_v8 = vadd.f32 %v14839_v20, %v19581_v49 }
 0x87e   : > { %v19681_v38 = vpop.f32.mrf.mxu1  ;;  %v19683_v63 = vpop.f32.mrf.mxu0 }
 0x87f   : > { %v19685_v48 = vadd.f32 %v14879_v14, %v7741_v8 }
 0x880   : > { %v14842_v0 = vpop.f32.mrf.mxu1  ;;  %v14882_v9 = vpop.f32.mrf.mxu0 }
 0x881   : > { %v7744_v2 = vadd.f32 %v14842_v0, %v19584_v57 }
 0x882   : > { %v7663_v52 = vpop.f32.mrf.mxu1  ;;  %v7889_v37 = vpop.f32.mrf.mxu0 }
 0x883   : > { %v19688_v42 = vadd.f32 %v14882_v9, %v7744_v2  ;;  %v7742_v12 = vadd.f32 %v7663_v52, %v19587_v17 }
 0x884   : > { %v14843_v29 = vpop.f32.mrf.mxu1  ;;  %v14883_v56 = vpop.f32.mrf.mxu0 }
 0x885   : > { %v19691_v62 = vadd.f32 %v7889_v37, %v7742_v12  ;;  %v7745_v49 = vadd.f32 %v14843_v29, %v19594_v35 }
 0x886   : > { %v19694_v20 = vpop.f32.mrf.mxu1  ;;  %v19696_v14 = vpop.f32.mrf.mxu0 }
 0x887   : > { %21623 = vst [vmem:[#allocation15_spill] sm:$0xff] %v19691_v62  ;;  %21624 = vst [vmem:[#allocation8_spill] sm:$0xff] %v19694_v20  ;;  %v19698_v8 = vadd.f32 %v14883_v56, %v7745_v49 }
 0x888   : > { %21625 = vst [vmem:[#allocation34_spill] sm:$0xff] %v19696_v14  ;;  %v14846_v28 = vpop.f32.mrf.mxu1  ;;  %v14886_v57 = vpop.f32.mrf.mxu0 }
 0x889   : > { %v7748_v0 = vadd.f32 %v14846_v28, %v19597_v5 }
 0x88a   : > { %v7679_v9 = vpop.f32.mrf.mxu1  ;;  %v7905_v2 = vpop.f32.mrf.mxu0 }
 0x88b   : > { %v19701_v58 = vadd.f32 %v14886_v57, %v7748_v0  ;;  %v7746_v17 = vadd.f32 %v7679_v9, %v19600_v39 }
 0x88c   : > { %v14847_v52 = vpop.f32.mrf.mxu1  ;;  %v14887_v37 = vpop.f32.mrf.mxu0 }
 0x88d   : > { %v19704_v12 = vadd.f32 %v7905_v2, %v7746_v17  ;;  %v7749_v35 = vadd.f32 %v14847_v52, %v19607_v53 }
 0x88e   : > { %v19707_v29 = vpop.f32.mrf.mxu1  ;;  %v19709_v56 = vpop.f32.mrf.mxu0 }
 0x88f   : > { %21626 = vst [vmem:[#allocation41_spill] sm:$0xff] %v19704_v12  ;;  %21627 = vst [vmem:[#allocation16_spill] sm:$0xff] %v19707_v29  ;;  %v19711_v49 = vadd.f32 %v14887_v37, %v7749_v35 }
 0x890   : > { %21628 = vst [vmem:[#allocation32_spill] sm:$0xff] %v19709_v56  ;;  %v14850_v62 = vpop.f32.mrf.mxu1  ;;  %v14890_v5 = vpop.f32.mrf.mxu0 }
 0x891   : > { %v7752_v28 = vadd.f32 %v14850_v62, %v19610_v11 }
 0x892   : > { %v7695_v57 = vpop.f32.mrf.mxu1  ;;  %v7921_v0 = vpop.f32.mrf.mxu0 }
 0x893   : > { %v19714_v14 = vadd.f32 %v14890_v5, %v7752_v28  ;;  %v7750_v39 = vadd.f32 %v7695_v57, %v19613_v22 }
 0x894   : > { %v14851_v9 = vpop.f32.mrf.mxu1  ;;  %v14891_v2 = vpop.f32.mrf.mxu0 }
 0x895   : > { %v19717_v17 = vadd.f32 %v7921_v0, %v7750_v39  ;;  %v7753_v53 = vadd.f32 %v14851_v9, %v19620_v51 }
 0x896   : > { %v19720_v52 = vpop.f32.mrf.mxu1  ;;  %v19722_v37 = vpop.f32.mrf.mxu0 }
 0x897   : > { %21629 = vst [vmem:[#allocation23_spill] sm:$0xff] %v19717_v17  ;;  %21630 = vst [vmem:[#allocation14_spill] sm:$0xff] %v19722_v37  ;;  %v19724_v35 = vadd.f32 %v14891_v2, %v7753_v53  ;;  %v21635_v17 = vld [vmem:[#allocation9_spill] sm:$0xff] }
 0x898   : > { %v14854_v12 = vpop.f32.mrf.mxu1  ;;  %v14894_v11 = vpop.f32.mrf.mxu0 }
 0x899   : > { %v7756_v62 = vadd.f32 %v14854_v12, %v19623_v27  ;;  %v19744_v12 = vld [vmem:[%s21274_s9] ss:$0 sm:$0xff] }
 0x89a   : > { %v7711_v5 = vpop.f32.mrf.mxu1  ;;  %v7937_v28 = vpop.f32.mrf.mxu0 }
 0x89b   : > { %v19727_v20 = vadd.f32 %v14894_v11, %v7756_v62  ;;  %v7754_v22 = vadd.f32 %v7711_v5, %v19626_v46 }
 0x89c   : > { %v19730_v57 = vpop.f32.mrf.mxu1  ;;  %v19732_v0 = vpop.f32.mrf.mxu0 }
 0x89d   : > { %21631 = vst [vmem:[#allocation21_spill] sm:$0xff] %v19727_v20  ;;  %21632 = vst [vmem:[#allocation38_spill] sm:$0xff] %v19732_v0  ;;  %v19734_v51 = vadd.f32 %v7937_v28, %v7754_v22  ;;  %v19750_v28 = vld [vmem:[%s21275_s10] ss:$0 sm:$0xff] }
 0x89e   : > { %v19736_v39 = vpop.f32.mrf.mxu1  ;;  %v19738_v9 = vpop.f32.mrf.mxu0 }
 0x89f   : > { %21633 = vst [vmem:[#allocation37_spill] sm:$0xff] %v19734_v51  ;;  %21634 = vst [vmem:[#allocation12_spill] sm:$0xff] %v19738_v9 }
 0x8a0   : > { %v14906_v2 = vpop.f32.mrf.mxu1  ;;  %v14946_v53 = vpop.f32.mrf.mxu0 }
 0x8a1   : > { %v8180_v27 = vadd.f32 %v14906_v2, %v19636_v32  ;;  %v6709_v32 = vadd.f32 %v19392_v21, %v21635_v17 }
 0x8a2   : > { %v8051_v46 = vpop.f32.mrf.mxu1  ;;  %v8277_v11 = vpop.f32.mrf.mxu0 }
 0x8a3   : > { %v8406_v62 = vadd.f32 %v14946_v53, %v8180_v27  ;;  %v8178_v5 = vadd.f32 %v8051_v46, %v19639_v26  ;;  %v7048_v20 = vadd.f32 %v19394_v44, %v6709_v32 }
 0x8a4   : > { %v14907_v22 = vpop.f32.mrf.mxu1  ;;  %v14947_v56 = vpop.f32.mrf.mxu0 }
 0x8a5   : > { %v8445_v2 = vmul.f32 %v19744_v12, %v8406_v62  ;;  %v19755_v9 = vadd.f32 %v8277_v11, %v8178_v5  ;;  %v8181_v0 = vadd.f32 %v14907_v22, %v19646_v4  ;;  %v7277_v62 = vadd.f32 %v19564_v34, %v7048_v20 }
 0x8a6   : > { %v19758_v51 = vpop.f32.mrf.mxu1  ;;  %v19760_v53 = vpop.f32.mrf.mxu0 }
 0x8a7   : > { %21636 = vst [vmem:[#allocation33_spill] sm:$0xff] %v19755_v9  ;;  %21637 = vst [vmem:[#allocation29_spill] sm:$0xff] %v19760_v53  ;;  %v8484_v26 = vadd.f32 %v19750_v28, %v8445_v2  ;;  %v8407_v27 = vadd.f32 %v14947_v56, %v8181_v0  ;;  %v7506_v20 = vadd.f32 %v19566_v16, %v7277_v62 }
 0x8a8   : > { %v14910_v46 = vpop.f32.mrf.mxu1  ;;  %v14950_v29 = vpop.f32.mrf.mxu0 }
 0x8a9   : > { %v8446_v37 = vmul.f32 %v19744_v12, %v8407_v27  ;;  %v8184_v21 = vadd.f32 %v14910_v46, %v19649_v43  ;;  %v8548_v4 = vmul.f32 0.01, %v8484_v26  ;;  %vm8516_vm5 = vcmp.ge.f32.partialorder %v8484_v26, 0.0 }
 0x8aa   : > { %v8067_v17 = vpop.f32.mrf.mxu1  ;;  %v8293_v11 = vpop.f32.mrf.mxu0 }
 0x8ab   : > { %v8485_v5 = vadd.f32 %v19750_v28, %v8446_v37  ;;  %v8410_v22 = vadd.f32 %v14950_v29, %v8184_v21  ;;  %v8182_v2 = vadd.f32 %v8067_v17, %v19652_v60  ;;  %v8580_v37 = vsel %vm8516_vm5, %v8484_v26, %v8548_v4 }
 0x8ac   : > { %v14911_v56 = vpop.f32.mrf.mxu1  ;;  %v14951_v0 = vpop.f32.mrf.mxu0 }
 0x8ad   : > { %vm8517_vm6 = vcmp.ge.f32.partialorder %v8485_v5, 0.0  ;;  %v8549_v9 = vmul.f32 0.01, %v8485_v5  ;;  %v8185_v44 = vadd.f32 %v14911_v56, %v19659_v7  ;;  %v8449_v32 = vmul.f32 %v19744_v12, %v8410_v22 }
 0x8ae   : > { %v19771_v43 = vadd.f32 %v8293_v11, %v8182_v2  ;;  %v19773_v27 = vpop.f32.mrf.mxu1  ;;  %v19775_v34 = vpop.f32.mrf.mxu0  ;;  %v7735_v7 = vadd.f32 %v19668_v1, %v7506_v20  ;;  %v7281_v2 = vadd.f32 %v19577_v40, %v19417_v61 }
 0x8af   : > { %v8581_v29 = vsel %vm8517_vm6, %v8485_v5, %v8549_v9  ;;  %v8411_v46 = vadd.f32 %v14951_v0, %v8185_v44  ;;  %v8488_v21 = vadd.f32 %v19750_v28, %v8449_v32 }
 0x8b0   : > { %v19778_v60 = vpack.c.bf16 %v8581_v29, %v8580_v37  ;;  %v14914_v17 = vpop.f32.mrf.mxu1  ;;  %v14954_v53 = vpop.f32.mrf.mxu0  ;;  %v7961_v1 = vadd.f32 %v19670_v18, %v7735_v7 }
 0x8b1   : > { %v8450_v11 = vmul.f32 %v19744_v12, %v8411_v46  ;;  %v8188_v22 = vadd.f32 %v14914_v17, %v19662_v50  ;;  %v8552_v26 = vmul.f32 0.01, %v8488_v21  ;;  %vm8520_vm7 = vcmp.ge.f32.partialorder %v8488_v21, 0.0 }
 0x8b2   : > { %v8083_v56 = vpop.f32.mrf.mxu1  ;;  %v8309_v16 = vpop.f32.mrf.mxu0  ;;  %v7510_v50 = vadd.f32 %v19579_v19, %v7281_v2 }
 0x8b3   : > { %v8489_v9 = vadd.f32 %v19750_v28, %v8450_v11  ;;  %v8414_v62 = vadd.f32 %v14954_v53, %v8188_v22  ;;  %v8186_v4 = vadd.f32 %v8083_v56, %v19665_v25  ;;  %v8584_v29 = vsel %vm8520_vm7, %v8488_v21, %v8552_v26 }
 0x8b4   : > { %v14915_v5 = vpop.f32.mrf.mxu1  ;;  %v14955_v0 = vpop.f32.mrf.mxu0  ;;  %v7739_v25 = vadd.f32 %v19681_v38, %v7510_v50 }
 0x8b5   : > { %vm8521_vm8 = vcmp.ge.f32.partialorder %v8489_v9, 0.0  ;;  %v8553_v44 = vmul.f32 0.01, %v8489_v9  ;;  %v8453_v32 = vmul.f32 %v19744_v12, %v8414_v62  ;;  %v8412_v61 = vadd.f32 %v8309_v16, %v8186_v4 }
 0x8b6   : > { %v8189_v40 = vadd.f32 %v14915_v5, %v19672_v55  ;;  %v8086_v20 = vpop.f32.mrf.mxu1  ;;  %v8312_v37 = vpop.f32.mrf.mxu0 }
 0x8b7   : > { %v8585_v53 = vsel %vm8521_vm8, %v8489_v9, %v8553_v44  ;;  %v8187_v46 = vadd.f32 %v8086_v20, %v7961_v1  ;;  %v8492_v18 = vadd.f32 %v19750_v28, %v8453_v32  ;;  %v8451_v19 = vmul.f32 %v19744_v12, %v8412_v61 }
 0x8b8   : > { %v19793_v17 = vpack.c.bf16 %v8585_v53, %v8584_v29  ;;  %v14918_v7 = vpop.f32.mrf.mxu1  ;;  %v14958_v11 = vpop.f32.mrf.mxu0  ;;  %v8415_v22 = vadd.f32 %v14955_v0, %v8189_v40  ;;  %v7965_v9 = vadd.f32 %v19683_v63, %v7739_v25 }
 0x8b9   : > { %v8413_v2 = vadd.f32 %v8312_v37, %v8187_v46  ;;  %v8192_v56 = vadd.f32 %v14918_v7, %v19675_v30  ;;  %v8490_v21 = vadd.f32 %v19750_v28, %v8451_v19  ;;  %vm8524_vm9 = vcmp.ge.f32.partialorder %v8492_v18, 0.0 }
 0x8ba   : > { %v8099_v55 = vpop.f32.mrf.mxu1  ;;  %v8325_v16 = vpop.f32.mrf.mxu0  ;;  %v8454_v26 = vmul.f32 %v19744_v12, %v8415_v22  ;;  %v8556_v0 = vmul.f32 0.01, %v8492_v18 }
 0x8bb   : > { %v8452_v38 = vmul.f32 %v19744_v12, %v8413_v2  ;;  %v8418_v62 = vadd.f32 %v14958_v11, %v8192_v56  ;;  %v8190_v4 = vadd.f32 %v8099_v55, %v19678_v31  ;;  %v8554_v50 = vmul.f32 0.01, %v8490_v21 }
 0x8bc   : > { %v14919_v5 = vpop.f32.mrf.mxu1  ;;  %v14959_v1 = vpop.f32.mrf.mxu0  ;;  %v8493_v44 = vadd.f32 %v19750_v28, %v8454_v26  ;;  %vm8522_vm10 = vcmp.ge.f32.partialorder %v8490_v21, 0.0  ;;  %v8588_v11 = vsel %vm8524_vm9, %v8492_v18, %v8556_v0 }
 0x8bd   : > { %v8491_v30 = vadd.f32 %v19750_v28, %v8452_v38  ;;  %v8457_v32 = vmul.f32 %v19744_v12, %v8418_v62  ;;  %v8416_v61 = vadd.f32 %v8325_v16, %v8190_v4  ;;  %v8193_v40 = vadd.f32 %v14919_v5, %v19685_v48 }
 0x8be   : > { %v8102_v20 = vpop.f32.mrf.mxu1  ;;  %v8328_v37 = vpop.f32.mrf.mxu0  ;;  %vm8525_vm11 = vcmp.ge.f32.partialorder %v8493_v44, 0.0  ;;  %v8557_v63 = vmul.f32 0.01, %v8493_v44  ;;  %v8586_v2 = vsel %vm8522_vm10, %v8490_v21, %v8554_v50 }
 0x8bf   : > { %vm8523_vm12 = vcmp.ge.f32.partialorder %v8491_v30, 0.0  ;;  %v8555_v31 = vmul.f32 0.01, %v8491_v30  ;;  %v8496_v29 = vadd.f32 %v19750_v28, %v8457_v32  ;;  %v8455_v53 = vmul.f32 %v19744_v12, %v8416_v61 }
 0x8c0   : > { %v8419_v46 = vadd.f32 %v14959_v1, %v8193_v40  ;;  %v14922_v25 = vpop.f32.mrf.mxu1  ;;  %v14962_v7 = vpop.f32.mrf.mxu0  ;;  %v8589_v19 = vsel %vm8525_vm11, %v8493_v44, %v8557_v63  ;;  %v8191_v22 = vadd.f32 %v8102_v20, %v7965_v9 }
 0x8c1   : > { %v8196_v48 = vadd.f32 %v14922_v25, %v19688_v42  ;;  %v19811_v56 = vpack.c.bf16 %v8589_v19, %v8588_v11  ;;  %v8587_v55 = vsel %vm8523_vm12, %v8491_v30, %v8555_v31  ;;  %v8494_v62 = vadd.f32 %v19750_v28, %v8455_v53  ;;  %v21639_v11 = vld [vmem:[#allocation17_spill] sm:$0xff] }
 0x8c2   : > { %v19813_v16 = vpop.f32.mrf.mxu1  ;;  %v19815_v26 = vpop.f32.mrf.mxu0  ;;  %v19817_v38 = vpack.c.bf16 %v8587_v55, %v8586_v2  ;;  %v8458_v4 = vmul.f32 %v19744_v12, %v8419_v46  ;;  %v8417_v5 = vadd.f32 %v8328_v37, %v8191_v22  ;;  %v8560_v18 = vmul.f32 0.01, %v8496_v29 }
 0x8c3   : > { %21638 = vst [vmem:[#allocation43_spill] sm:$0xff] %v19811_v56  ;;  %v8422_v1 = vadd.f32 %v14962_v7, %v8196_v48  ;;  %vm8528_vm13 = vcmp.ge.f32.partialorder %v8496_v29, 0.0  ;;  %v8558_v61 = vmul.f32 0.01, %v8494_v62  ;;  %vm8526_vm15 = vcmp.ge.f32.partialorder %v8494_v62, 0.0 }
 0x8c4   : > { %v14923_v9 = vpop.f32.mrf.mxu1  ;;  %v14963_v0 = vpop.f32.mrf.mxu0  ;;  %v8497_v42 = vadd.f32 %v19750_v28, %v8458_v4  ;;  %v8456_v21 = vmul.f32 %v19744_v12, %v8417_v5  ;;  %v8592_v37 = vsel %vm8528_vm13, %v8496_v29, %v8560_v18  ;;  %v6773_v19 = vadd.f32 %v19506_v33, %v21639_v11 }
 0x8c5   : > { %v8461_v44 = vmul.f32 %v19744_v12, %v8422_v1  ;;  %v8197_v30 = vadd.f32 %v14923_v9, %v19698_v8  ;;  %v8590_v29 = vsel %vm8526_vm15, %v8494_v62, %v8558_v61 }
 0x8c6   : > { %v19825_v50 = vpop.f32.mrf.mxu1  ;;  %v19827_v32 = vpop.f32.mrf.mxu0  ;;  %vm8529_vm14 = vcmp.ge.f32.partialorder %v8497_v42, 0.0  ;;  %v8561_v40 = vmul.f32 0.01, %v8497_v42  ;;  %v8495_v20 = vadd.f32 %v19750_v28, %v8456_v21 }
 0x8c7   : > { %v8500_v63 = vadd.f32 %v19750_v28, %v8461_v44  ;;  %v8423_v31 = vadd.f32 %v14963_v0, %v8197_v30  ;;  %v21642_v0 = vld [vmem:[#allocation7_spill] sm:$0xff]  ;;  %v7064_v44 = vadd.f32 %v19508_v59, %v6773_v19 }
 0x8c8   : > { %v14926_v53 = vpop.f32.mrf.mxu1  ;;  %v14966_v46 = vpop.f32.mrf.mxu0  ;;  %v8593_v25 = vsel %vm8529_vm14, %v8497_v42, %v8561_v40  ;;  %vm8527_vm0 = vcmp.ge.f32.partialorder %v8495_v20, 0.0  ;;  %v8559_v7 = vmul.f32 0.01, %v8495_v20  ;;  %v21643_v40 = vld [vmem:[#allocation24_spill] sm:$0xff] }
 0x8c9   : > { %v8200_v8 = vadd.f32 %v14926_v53, %v19701_v58  ;;  %v19834_v22 = vpack.c.bf16 %v8593_v25, %v8592_v37  ;;  %v8462_v4 = vmul.f32 %v19744_v12, %v8423_v31  ;;  %v6789_v58 = vadd.f32 %v19525_v47, %v21642_v0  ;;  %v21644_v47 = vld [vmem:[#allocation27_spill] sm:$0xff] }
 0x8ca   : > { %v19836_v48 = vpop.f32.mrf.mxu1  ;;  %v19838_v2 = vpop.f32.mrf.mxu0  ;;  %v8591_v55 = vsel %vm8527_vm0, %v8495_v20, %v8559_v7  ;;  %v8564_v42 = vmul.f32 0.01, %v8500_v63  ;;  %vm8532_vm1 = vcmp.ge.f32.partialorder %v8500_v63, 0.0  ;;  %v6757_v20 = vadd.f32 %v19477_v13, %v21643_v40 }
 0x8cb   : > { %21640 = vst [vmem:[#allocation9_spill] sm:$0xff] %v19834_v22  ;;  %v8426_v5 = vadd.f32 %v14966_v46, %v8200_v8  ;;  %v19841_v18 = vpack.c.bf16 %v8591_v55, %v8590_v29  ;;  %v8501_v33 = vadd.f32 %v19750_v28, %v8462_v4  ;;  %v6693_v31 = vadd.f32 %v19357_v15, %v21644_v47  ;;  %v21646_v4 = vld [vmem:[#allocation19_spill] sm:$0xff] }
 0x8cc   : > { %v14927_v1 = vpop.f32.mrf.mxu1  ;;  %v14967_v9 = vpop.f32.mrf.mxu0  ;;  %v7293_v53 = vadd.f32 %v19616_v3, %v7064_v44  ;;  %v8596_v8 = vsel %vm8532_vm1, %v8500_v63, %v8564_v42  ;;  %v6677_v15 = vadd.f32 %v19328_v23, %v21646_v4  ;;  %v7060_v3 = vadd.f32 %v19479_v24, %v6757_v20  ;;  %v21647_v24 = vld [vmem:[#allocation39_spill] sm:$0xff]  ;;  %v21649_v20 = vld [vmem:[#allocation22_spill] sm:$0xff] }
 0x8cd   : > { %21641 = vst [vmem:[#allocation17_spill] sm:$0xff] %v19841_v18  ;;  %v8465_v21 = vmul.f32 %v19744_v12, %v8426_v5  ;;  %v8201_v62 = vadd.f32 %v14927_v1, %v19711_v49  ;;  %vm8533_vm3 = vcmp.ge.f32.partialorder %v8501_v33, 0.0  ;;  %v8565_v37 = vmul.f32 0.01, %v8501_v33 }
 0x8ce   : > { %v19849_v30 = vpop.f32.mrf.mxu1  ;;  %v19851_v61 = vpop.f32.mrf.mxu0  ;;  %v7068_v49 = vadd.f32 %v19527_v36, %v6789_v58  ;;  %v7044_v36 = vadd.f32 %v19359_v45, %v6693_v31  ;;  %v7522_v63 = vadd.f32 %v19618_v10, %v7293_v53  ;;  %v21650_v31 = vld [vmem:[#allocation10_spill] sm:$0xff] }
 0x8cf   : > { %v8504_v46 = vadd.f32 %v19750_v28, %v8465_v21  ;;  %v8427_v59 = vadd.f32 %v14967_v9, %v8201_v62  ;;  %v8597_v11 = vsel %vm8533_vm3, %v8501_v33, %v8565_v37  ;;  %v7289_v33 = vadd.f32 %v19603_v54, %v7060_v3  ;;  %v21648_v62 = vld [vmem:[#allocation13_spill] sm:$0xff]  ;;  %v21654_v3 = vld [vmem:[#allocation28_spill] sm:$0xff] }
 0x8d0   : > { %v14930_v25 = vpop.f32.mrf.mxu1  ;;  %v14970_v7 = vpop.f32.mrf.mxu0  ;;  %v19860_v19 = vpack.c.bf16 %v8597_v11, %v8596_v8  ;;  %v7297_v5 = vadd.f32 %v19629_v41, %v7068_v49  ;;  %v6741_v41 = vadd.f32 %v19448_v6, %v21647_v24  ;;  %v7273_v40 = vadd.f32 %v21648_v62, %v7044_v36  ;;  %v21652_v49 = vld [vmem:[#allocation31_spill] sm:$0xff] }
 0x8d1   : > { %v8466_v13 = vmul.f32 %v19744_v12, %v8427_v59  ;;  %v8204_v1 = vadd.f32 %v14930_v25, %v19714_v14  ;;  %v8568_v9 = vmul.f32 0.01, %v8504_v46  ;;  %vm8536_vm4 = vcmp.ge.f32.partialorder %v8504_v46, 0.0  ;;  %v21651_v59 = vld [vmem:[#allocation35_spill] sm:$0xff] }
 0x8d2   : > { %21645 = vst [vmem:[#allocation7_spill] sm:$0xff] %v19860_v19  ;;  %v8147_v29 = vpop.f32.mrf.mxu1  ;;  %v19863_v55 = vpop.f32.mrf.mxu0  ;;  %v7751_v14 = vadd.f32 %v19720_v52, %v7522_v63  ;;  %v7526_v37 = vadd.f32 %v21649_v20, %v7297_v5  ;;  %v7040_v53 = vadd.f32 %v21650_v31, %v6677_v15  ;;  %v7518_v8 = vadd.f32 %v21652_v49, %v7289_v33  ;;  %v21656_v63 = vld [vmem:[#allocation21_spill] sm:$0xff] }
 0x8d3   : > { %v8505_v0 = vadd.f32 %v19750_v28, %v8466_v13  ;;  %v8430_v21 = vadd.f32 %v14970_v7, %v8204_v1  ;;  %v8600_v25 = vsel %vm8536_vm4, %v8504_v46, %v8568_v9  ;;  %v7056_v5 = vadd.f32 %v21654_v3, %v6741_v41  ;;  %v21655_v1 = vld [vmem:[#allocation14_spill] sm:$0xff] }
 0x8d4   : > { %v14931_v58 = vpop.f32.mrf.mxu1  ;;  %v14971_v42 = vpop.f32.mrf.mxu0  ;;  %v7755_v11 = vadd.f32 %v19736_v39, %v7526_v37  ;;  %v7977_v36 = vadd.f32 %v21655_v1, %v7751_v14 }
 0x8d5   : > { %v8205_v23 = vadd.f32 %v14931_v58, %v19724_v35  ;;  %vm8537_vm5 = vcmp.ge.f32.partialorder %v8505_v0, 0.0  ;;  %v8569_v45 = vmul.f32 0.01, %v8505_v0  ;;  %v8469_v47 = vmul.f32 %v19744_v12, %v8430_v21  ;;  %v21659_v21 = vld [vmem:[#allocation16_spill] sm:$0xff] }
 0x8d6   : > { %v8150_v44 = vpop.f32.mrf.mxu1  ;;  %v8376_v10 = vpop.f32.mrf.mxu0  ;;  %v7757_v35 = vadd.f32 %v19730_v57, %v21651_v59  ;;  %v7747_v39 = vadd.f32 %v21659_v21, %v7518_v8  ;;  %v21664_v8 = vld [vmem:[#allocation30_spill] sm:$0xff] }
 0x8d7   : > { %v8431_v54 = vadd.f32 %v14971_v42, %v8205_v23  ;;  %v8601_v6 = vsel %vm8537_vm5, %v8505_v0, %v8569_v45  ;;  %v8508_v4 = vadd.f32 %v19750_v28, %v8469_v47  ;;  %v21657_v0 = vld [vmem:[#allocation26_spill] sm:$0xff]  ;;  %v21658_v42 = vld [vmem:[#allocation36_spill] sm:$0xff]  ;;  %v21660_v23 = vld [vmem:[#allocation37_spill] sm:$0xff]  ;;  %v8203_v14 = vadd.f32 %v8150_v44, %v7977_v36 }
 0x8d8   : > { %v14934_v7 = vpop.f32.mrf.mxu1  ;;  %v14974_v52 = vpop.f32.mrf.mxu0  ;;  %v19886_v13 = vpack.c.bf16 %v8601_v6, %v8600_v25  ;;  %v7269_v58 = vadd.f32 %v21657_v0, %v7040_v53  ;;  %v7502_v33 = vadd.f32 %v21658_v42, %v7273_v40  ;;  %v21661_v45 = vld [vmem:[#allocation38_spill] sm:$0xff]  ;;  %v21662_v47 = vld [vmem:[#allocation12_spill] sm:$0xff]  ;;  %v21663_v53 = vld [vmem:[#allocation23_spill] sm:$0xff]  ;;  %v7285_v3 = vadd.f32 %v21664_v8, %v7056_v5 }
 0x8d9   : > { %v8470_v15 = vmul.f32 %v19744_v12, %v8431_v54  ;;  %v8208_v57 = vadd.f32 %v14934_v7, %v21656_v63  ;;  %v7983_v62 = vadd.f32 %v21661_v45, %v7757_v35  ;;  %v8572_v20 = vmul.f32 0.01, %v8508_v4 }
 0x8da   : > { %21653 = vst [vmem:[#allocation24_spill] sm:$0xff] %v19886_v13  ;;  %v8163_v46 = vpop.f32.mrf.mxu1  ;;  %v8389_v9 = vpop.f32.mrf.mxu0  ;;  %v7981_v54 = vadd.f32 %v21662_v47, %v7755_v11  ;;  %vm8540_vm6 = vcmp.ge.f32.partialorder %v8508_v4, 0.0  ;;  %v8202_v6 = vadd.f32 %v8147_v29, %v21663_v53  ;;  %v8429_v11 = vadd.f32 %v8376_v10, %v8203_v14  ;;  %v21670_v14 = vld [vmem:[#allocation20_spill] sm:$0xff] }
 0x8db   : > { %v8206_v24 = vadd.f32 %v8163_v46, %v21660_v23  ;;  %v8509_v41 = vadd.f32 %v19750_v28, %v8470_v15  ;;  %v8434_v31 = vadd.f32 %v14974_v52, %v8208_v57  ;;  %v8604_v36 = vsel %vm8540_vm6, %v8508_v4, %v8572_v20  ;;  %v21665_v52 = vld [vmem:[#allocation40_spill] sm:$0xff] }
 0x8dc   : > { %v14935_v37 = vpop.f32.mrf.mxu1  ;;  %v14975_v25 = vpop.f32.mrf.mxu0  ;;  %v7731_v57 = vadd.f32 %v21665_v52, %v7502_v33  ;;  %v21666_v46 = vld [vmem:[#allocation32_spill] sm:$0xff]  ;;  %v8428_v5 = vadd.f32 %v19863_v55, %v8202_v6 }
 0x8dd   : > { %v8432_v59 = vadd.f32 %v8389_v9, %v8206_v24  ;;  %vm8541_vm7 = vcmp.ge.f32.partialorder %v8509_v41, 0.0  ;;  %v8573_v40 = vmul.f32 0.01, %v8509_v41  ;;  %v8209_v7 = vadd.f32 %v14935_v37, %v7983_v62  ;;  %v21668_v24 = vld [vmem:[#allocation42_spill] sm:$0xff]  ;;  %v21669_v62 = vld [vmem:[#allocation11_spill] sm:$0xff]  ;;  %v21671_v47 = vld [vmem:[#allocation8_spill] sm:$0xff] }
 0x8de   : > { %v8166_v49 = vpop.f32.mrf.mxu1  ;;  %v8473_v35 = vmul.f32 %v19744_v12, %v8434_v31  ;;  %v7973_v9 = vadd.f32 %v21666_v46, %v7747_v39  ;;  %v8392_v42 = vpop.f32.mrf.mxu0  ;;  %v7514_v45 = vadd.f32 %v21668_v24, %v7285_v3  ;;  %v7498_v33 = vadd.f32 %v21669_v62, %v7269_v58  ;;  %v21672_v31 = vld [vmem:[#allocation41_spill] sm:$0xff]  ;;  %v21673_v3 = vld [vmem:[#allocation18_spill] sm:$0xff] }
 0x8df   : > { %v8471_v1 = vmul.f32 %v19744_v12, %v8432_v59  ;;  %v8207_v44 = vadd.f32 %v8166_v49, %v7981_v54  ;;  %v8605_v15 = vsel %vm8541_vm7, %v8509_v41, %v8573_v40  ;;  %v8435_v63 = vadd.f32 %v14975_v25, %v8209_v7 }
 0x8e0   : > { %v19906_v29 = vpack.c.bf16 %v8605_v15, %v8604_v36  ;;  %v8512_v0 = vadd.f32 %v19750_v28, %v8473_v35  ;;  %v8199_v4 = vadd.f32 %v19849_v30, %v7973_v9  ;;  %v8468_v39 = vmul.f32 %v19744_v12, %v8429_v11 }
 0x8e1   : > { %v8474_v21 = vmul.f32 %v19744_v12, %v8435_v63  ;;  %v8433_v23 = vadd.f32 %v8392_v42, %v8207_v44  ;;  %v8510_v10 = vadd.f32 %v19750_v28, %v8471_v1  ;;  %v7957_v37 = vadd.f32 %v21670_v14, %v7731_v57  ;;  %v21675_v44 = vld [vmem:[#allocation34_spill] sm:$0xff] }
 0x8e2   : > { %21667 = vst [vmem:[#allocation27_spill] sm:$0xff] %v19906_v29  ;;  %v8576_v20 = vmul.f32 0.01, %v8512_v0  ;;  %v7743_v55 = vadd.f32 %v21671_v47, %v7514_v45  ;;  %vm8544_vm8 = vcmp.ge.f32.partialorder %v8512_v0, 0.0  ;;  %v8198_v59 = vadd.f32 %v19836_v48, %v21672_v31 }
 0x8e3   : > { %v8513_v41 = vadd.f32 %v19750_v28, %v8474_v21  ;;  %v8472_v54 = vmul.f32 %v19744_v12, %v8433_v23  ;;  %v8467_v30 = vmul.f32 %v19744_v12, %v8428_v5  ;;  %v8183_v58 = vadd.f32 %v19773_v27, %v7957_v37 }
 0x8e4   : > { %v8425_v53 = vadd.f32 %v19851_v61, %v8199_v4  ;;  %v8574_v6 = vmul.f32 0.01, %v8510_v10  ;;  %v8507_v7 = vadd.f32 %v19750_v28, %v8468_v39  ;;  %vm8542_vm10 = vcmp.ge.f32.partialorder %v8510_v10, 0.0 }
 0x8e5   : > { %vm8545_vm9 = vcmp.ge.f32.partialorder %v8513_v41, 0.0  ;;  %v8577_v25 = vmul.f32 0.01, %v8513_v41  ;;  %v8511_v40 = vadd.f32 %v19750_v28, %v8472_v54  ;;  %v8608_v49 = vsel %vm8544_vm8, %v8512_v0, %v8576_v20 }
 0x8e6   : > { %v7727_v35 = vadd.f32 %v21673_v3, %v7498_v33  ;;  %v7969_v36 = vadd.f32 %v21675_v44, %v7743_v55  ;;  %v8424_v27 = vadd.f32 %v19838_v2, %v8198_v59  ;;  %v8506_v61 = vadd.f32 %v19750_v28, %v8467_v30  ;;  %v21677_v2 = vld [vmem:[#allocation25_spill] sm:$0xff] }
 0x8e7   : > { %v8609_v8 = vsel %vm8545_vm9, %v8513_v41, %v8577_v25  ;;  %vm8543_vm11 = vcmp.ge.f32.partialorder %v8511_v40, 0.0  ;;  %v8575_v48 = vmul.f32 0.01, %v8511_v40  ;;  %v8409_v15 = vadd.f32 %v19775_v34, %v8183_v58  ;;  %v21678_v34 = vld [vmem:[#allocation15_spill] sm:$0xff]  ;;  %v21681_v59 = vld [vmem:[#allocation33_spill] sm:$0xff] }
 0x8e8   : > { %v19928_v1 = vpack.c.bf16 %v8609_v8, %v8608_v49  ;;  %v8606_v11 = vsel %vm8542_vm10, %v8510_v10, %v8574_v6  ;;  %v8195_v52 = vadd.f32 %v19825_v50, %v7969_v36  ;;  %v8464_v57 = vmul.f32 %v19744_v12, %v8425_v53 }
 0x8e9   : > { %v8607_v63 = vsel %vm8543_vm11, %v8511_v40, %v8575_v48  ;;  %v8571_v46 = vmul.f32 0.01, %v8507_v7  ;;  %v7953_v0 = vadd.f32 %v21677_v2, %v7727_v35  ;;  %vm8539_vm12 = vcmp.ge.f32.partialorder %v8507_v7, 0.0  ;;  %v15725_v2 = vld [vmem:[%s21339_s0 + $0x14] ss:$8 sps:$4 sm:$0xff]  }
 0x8ea   : > { %21674 = vst [vmem:[#allocation19_spill] sm:$0xff] %v19928_v1  ;;  %13546 = vmatprep.subr.bf16.mxu1 %v19928_v1  ;;  %13658 = vmatprep.subr.bf16.mxu0 %v19928_v1  ;;  %v19938_v9 = vpack.c.bf16 %v8607_v63, %v8606_v11  ;;  %v8194_v42 = vadd.f32 %v19813_v16, %v21678_v34  ;;  %v8570_v21 = vmul.f32 0.01, %v8506_v61  ;;  %vm8538_vm13 = vcmp.ge.f32.partialorder %v8506_v61, 0.0  ;;  %v15553_v11 = vld [vmem:[%s21276_s11 + $0x38] sm:$0xff]   ;;  %v15555_v34 = vld [vmem:[%s21276_s11 + $0x28] sm:$0xff]  }
 0x8eb   : > { %13547 = vmatpush3.bf16.msra.mxu1 %v19834_v22  ;;  %13659 = vmatpush3.bf16.msra.mxu0 %v19834_v22  ;;  %v8463_v5 = vmul.f32 %v19744_v12, %v8424_v27  ;;  %v8179_v50 = vadd.f32 %v19758_v51, %v7953_v0  ;;  %v8448_v23 = vmul.f32 %v19744_v12, %v8409_v15  ;;  %v15726_v0 = vld [vmem:[%s21339_s0 + $0x114] ss:$8 sps:$4 sm:$0xff]  }
 0x8ec   : > { %21676 = vst [vmem:[#allocation39_spill] sm:$0xff] %v19938_v9  ;;  %13548 = vmatprep.subr.bf16.mxu1 %v19938_v9  ;;  %13660 = vmatprep.subr.bf16.mxu0 %v19938_v9  ;;  %v8421_v24 = vadd.f32 %v19827_v32, %v8195_v52  ;;  %v8503_v45 = vadd.f32 %v19750_v28, %v8464_v57  ;;  %v21679_v32 = vld [vmem:[#allocation29_spill] sm:$0xff]  ;;  %v15723_v57 = vld [vmem:[%s21339_s0] ss:$8 sps:$4 sm:$0xff]  }
 0x8ed   : > { %v8603_v4 = vsel %vm8539_vm12, %v8507_v7, %v8571_v46  ;;  %v8447_v16 = vmul.f32 %v19744_v12, %v19771_v43  ;;  %v8420_v51 = vadd.f32 %v19815_v26, %v8194_v42  ;;  %v8502_v10 = vadd.f32 %v19750_v28, %v8463_v5  ;;  %v15554_v52 = vld [vmem:[%s21276_s11 + $0x30] sm:$0xff]   ;;  %v15724_v46 = vld [vmem:[%s21339_s0 + $0x100] ss:$8 sps:$4 sm:$0xff]  }
 0x8ee   : > { %v8602_v62 = vsel %vm8538_vm13, %v8506_v61, %v8570_v21  ;;  %v8405_v33 = vadd.f32 %v21679_v32, %v8179_v50  ;;  %v8487_v39 = vadd.f32 %v19750_v28, %v8448_v23  ;;  %v8460_v41 = vmul.f32 %v19744_v12, %v8421_v24  ;;  %v15556_v42 = vld [vmem:[%s21276_s11 + $0x20] sm:$0xff]   ;;  %v15727_v5 = vld [vmem:[%s21339_s0 + $0x10] ss:$8 sps:$4 sm:$0xff]  }
 0x8ef   : > { %13549 = vmatpush3.bf16.msra.mxu1 %v19841_v18  ;;  %13661 = vmatpush3.bf16.msra.mxu0 %v19841_v18  ;;  %v19962_v20 = vpack.c.bf16 %v8603_v4, %v8602_v62  ;;  %v8567_v14 = vmul.f32 0.01, %v8503_v45  ;;  %v8486_v43 = vadd.f32 %v19750_v28, %v8447_v16  ;;  %vm8535_vm14 = vcmp.ge.f32.partialorder %v8503_v45, 0.0  ;;  %v15728_v21 = vld [vmem:[%s21339_s0 + $0x110] ss:$8 sps:$4 sm:$0xff]  }
 0x8f0   : > { %13550 = vmatprep.subr.bf16.mxu1 %v19906_v29  ;;  %13662 = vmatprep.subr.bf16.mxu0 %v19906_v29  ;;  %v8459_v26 = vmul.f32 %v19744_v12, %v8420_v51  ;;  %v8566_v37 = vmul.f32 0.01, %v8502_v10  ;;  %v8444_v47 = vmul.f32 %v19744_v12, %v8405_v33  ;;  %v8551_v55 = vmul.f32 0.01, %v8487_v39  ;;  %v15729_v50 = vld [vmem:[%s21339_s0 + $0x24] ss:$8 sps:$4 sm:$0xff]  }
 0x8f1   : > { %21680 = vst [vmem:[#allocation13_spill] sm:$0xff] %v19962_v20  ;;  %vm8534_vm15 = vcmp.ge.f32.partialorder %v8502_v10, 0.0  ;;  %vm8519_vm0 = vcmp.ge.f32.partialorder %v8487_v39, 0.0  ;;  %v8499_v54 = vadd.f32 %v19750_v28, %v8460_v41  ;;  %v8599_v31 = vsel %vm8535_vm14, %v8503_v45, %v8567_v14  ;;  %v15730_v23 = vld [vmem:[%s21339_s0 + $0x124] ss:$8 sps:$4 sm:$0xff]  }
 0x8f2   : > { %v8443_v30 = vmul.f32 %v19744_v12, %v21681_v59  ;;  %v8550_v25 = vmul.f32 0.01, %v8486_v43  ;;  %vm8518_vm1 = vcmp.ge.f32.partialorder %v8486_v43, 0.0  ;;  %v8498_v58 = vadd.f32 %v19750_v28, %v8459_v26  ;;  %v15731_v24 = vld [vmem:[%s21339_s0 + $0x20] ss:$8 sps:$4 sm:$0xff]  }
 0x8f3   : > { %13551 = vmatpush3.bf16.msra.mxu1 %v19811_v56  ;;  %13663 = vmatpush3.bf16.msra.mxu0 %v19811_v56  ;;  %v8598_v53 = vsel %vm8534_vm15, %v8502_v10, %v8566_v37  ;;  %v8483_v6 = vadd.f32 %v19750_v28, %v8444_v47  ;;  %v8583_v40 = vsel %vm8519_vm0, %v8487_v39, %v8551_v55  ;;  %v8563_v49 = vmul.f32 0.01, %v8499_v54  ;;  %v15732_v45 = vld [vmem:[%s21339_s0 + $0x120] ss:$8 sps:$4 sm:$0xff]   ;;  %v15733_v4 = vld [vmem:[%s21339_s0 + $0x34] ss:$8 sps:$4 sm:$0xff]  }
 0x8f4   : > { %13552 = vmatprep.subr.bf16.mxu1 %v19962_v20  ;;  %13664 = vmatprep.subr.bf16.mxu0 %v19962_v20  ;;  %v19981_v7 = vpack.c.bf16 %v8599_v31, %v8598_v53  ;;  %v8482_v12 = vadd.f32 %v19750_v28, %v8443_v30  ;;  %v8582_v8 = vsel %vm8518_vm1, %v8486_v43, %v8550_v25  ;;  %vm8531_vm3 = vcmp.ge.f32.partialorder %v8499_v54, 0.0  ;;  %v15734_v16 = vld [vmem:[%s21339_s0 + $0x134] ss:$8 sps:$4 sm:$0xff]   ;;  %v15735_v51 = vld [vmem:[%s21339_s0 + $0x30] ss:$8 sps:$4 sm:$0xff]  }
 0x8f5   : > { %v19988_v3 = vpack.c.bf16 %v8583_v40, %v8582_v8  ;;  %v8562_v35 = vmul.f32 0.01, %v8498_v58  ;;  %v8547_v48 = vmul.f32 0.01, %v8483_v6  ;;  %vm8530_vm4 = vcmp.ge.f32.partialorder %v8498_v58, 0.0  ;;  %v15557_v43 = vld [vmem:[%s21276_s11 + $0x18] sm:$0xff]  }
 0x8f6   : > { %21682 = vst [vmem:[#allocation22_spill] sm:$0xff] %v19981_v7  ;;  %vm8515_vm5 = vcmp.ge.f32.partialorder %v8483_v6, 0.0  ;;  %v8595_v44 = vsel %vm8531_vm3, %v8499_v54, %v8563_v49  ;;  %v8546_v36 = vmul.f32 0.01, %v8482_v12  ;;  %vm8514_vm6 = vcmp.ge.f32.partialorder %v8482_v12, 0.0  ;;  %v20112_v53 = vld [vmem:[%s21276_s11 + $0x58] sm:$0xff]  }
 0x8f7   : > { %13553 = vmatpush3.bf16.msra.mxu1 %v19817_v38  ;;  %13665 = vmatpush3.bf16.msra.mxu0 %v19817_v38  ;;  %v8594_v28 = vsel %vm8530_vm4, %v8498_v58, %v8562_v35  ;;  %v8579_v61 = vsel %vm8515_vm5, %v8483_v6, %v8547_v48  ;;  %v15736_v10 = vld [vmem:[%s21339_s0 + $0x130] ss:$8 sps:$4 sm:$0xff]   ;;  %v15737_v62 = vld [vmem:[%s21339_s0 + $0x44] ss:$8 sps:$4 sm:$0xff]   ;;  %v15739_v33 = vld [vmem:[%s21339_s0 + $0x40] ss:$8 sps:$4 sm:$0xff]  }
 0x8f8   : > { %13554 = vmatprep.subr.bf16.mxu1 %v19886_v13  ;;  %13666 = vmatprep.subr.bf16.mxu0 %v19886_v13  ;;  %v19994_v27 = vpack.c.bf16 %v8595_v44, %v8594_v28  ;;  %v8578_v15 = vsel %vm8514_vm6, %v8482_v12, %v8546_v36  ;;  %v15738_v32 = vld [vmem:[%s21339_s0 + $0x144] ss:$8 sps:$4 sm:$0xff]   ;;  %v15740_v39 = vld [vmem:[%s21339_s0 + $0x140] ss:$8 sps:$4 sm:$0xff]   ;;  %v15741_v41 = vld [vmem:[%s21339_s0 + $0x54] ss:$8 sps:$4 sm:$0xff]  }
 0x8f9   : > { %v20003_v63 = vpack.c.bf16 %v8579_v61, %v8578_v15  ;;  %v15742_v14 = vld [vmem:[%s21339_s0 + $0x154] ss:$8 sps:$4 sm:$0xff]   ;;  %v15743_v26 = vld [vmem:[%s21339_s0 + $0x50] ss:$8 sps:$4 sm:$0xff]   ;;  %v15745_v47 = vld [vmem:[%s21339_s0 + $0x64] ss:$8 sps:$4 sm:$0xff]  }
 0x8fa   : > { %21683 = vst [vmem:[#allocation10_spill] sm:$0xff] %v19994_v27  ;;  %v15744_v37 = vld [vmem:[%s21339_s0 + $0x150] ss:$8 sps:$4 sm:$0xff]   ;;  %v15746_v55 = vld [vmem:[%s21339_s0 + $0x164] ss:$8 sps:$4 sm:$0xff]  }
 0x8fb   : > { %13555 = vmatpush3.bf16.msra.mxu1 %v19793_v17  ;;  %13667 = vmatpush3.bf16.msra.mxu0 %v19793_v17  ;;  %v15747_v54 = vld [vmem:[%s21339_s0 + $0x60] ss:$8 sps:$4 sm:$0xff]   ;;  %v15749_v59 = vld [vmem:[%s21339_s0 + $0x74] ss:$8 sps:$4 sm:$0xff]   ;;  %v15751_v25 = vld [vmem:[%s21339_s0 + $0x70] ss:$8 sps:$4 sm:$0xff]  }
 0x8fc   : > { %13556 = vmatprep.subr.bf16.mxu1 %v19981_v7  ;;  %13668 = vmatprep.subr.bf16.mxu0 %v19981_v7  ;;  %v15748_v31 = vld [vmem:[%s21339_s0 + $0x160] ss:$8 sps:$4 sm:$0xff]   ;;  %v15750_v30 = vld [vmem:[%s21339_s0 + $0x174] ss:$8 sps:$4 sm:$0xff]   ;;  %v15752_v58 = vld [vmem:[%s21339_s0 + $0x170] ss:$8 sps:$4 sm:$0xff]  }
 0x8fd   : > { %v15559_v6 = vld [vmem:[%s21276_s11 + $0x10] sm:$0xff]   ;;  %v15753_v40 = vld [vmem:[%s21339_s0 + $0x84] ss:$8 sps:$4 sm:$0xff]   ;;  %v15755_v12 = vld [vmem:[%s21339_s0 + $0x80] ss:$8 sps:$4 sm:$0xff]  }
 0x8fe   : > { %v15754_v49 = vld [vmem:[%s21339_s0 + $0x184] ss:$8 sps:$4 sm:$0xff]   ;;  %v15756_v8 = vld [vmem:[%s21339_s0 + $0x180] ss:$8 sps:$4 sm:$0xff]   ;;  %v15757_v35 = vld [vmem:[%s21339_s0 + $0x94] ss:$8 sps:$4 sm:$0xff]  }
 0x8ff   : > { %13557 = vmatpush3.bf16.msra.mxu1 %v19988_v3  ;;  %13669 = vmatpush3.bf16.msra.mxu0 %v19988_v3  ;;  %v15758_v48 = vld [vmem:[%s21339_s0 + $0x194] ss:$8 sps:$4 sm:$0xff]   ;;  %v15561_v44 = vld [vmem:[%s21276_s11 + $0x8] sm:$0xff]   ;;  %v15563_v36 = vld [vmem:[%s21276_s11] sm:$0xff]  }
 0x900   : > { %13558 = vmatprep.subr.bf16.mxu1 %v19860_v19  ;;  %13670 = vmatprep.subr.bf16.mxu0 %v19860_v19  ;;  %v15759_v28 = vld [vmem:[%s21339_s0 + $0x90] ss:$8 sps:$4 sm:$0xff]   ;;  %v15761_v15 = vld [vmem:[%s21339_s0 + $0xa4] ss:$8 sps:$4 sm:$0xff]  }
 0x901   : > { %v15760_v61 = vld [vmem:[%s21339_s0 + $0x190] ss:$8 sps:$4 sm:$0xff]  }
 0x903   : > { %13559 = vmatpush3.bf16.msra.mxu1 %v19778_v60  ;;  %13671 = vmatpush3.bf16.msra.mxu0 %v19778_v60 }
 0x904   : > { %13560 = vmatprep.subr.bf16.mxu1 %v19994_v27  ;;  %13672 = vmatprep.subr.bf16.mxu0 %v19994_v27 }
 0x907   : > { %13561 = vmatpush3.bf16.msra.mxu1 %v20003_v63  ;;  %13673 = vmatpush3.bf16.msra.mxu0 %v20003_v63 }
 0x908   : > { %14976 = vmatprep.subr.bf16.mxu1 %v15553_v11  ;;  %15016 = vmatprep.subr.bf16.mxu0 %v15557_v43 }
 0x90a   : > { %8659 = vmatmul.mubr.bf16.vlgmr.msra.gmra.mxu1 %v15723_v57  ;;  %8836 = vmatmul.mubr.bf16.vlgmr.msra.gmra.mxu0 %v15724_v46  ;;  %v15764_v57 = vld [vmem:[%s21339_s0 + $0x1a0] ss:$8 sps:$4 sm:$0xff]   ;;  %v15765_v46 = vld [vmem:[%s21339_s0 + $0xb4] ss:$8 sps:$4 sm:$0xff]  }
 0x90b   : > { %8666 = vmatprep.mubr.bf16.mxu1 %v15725_v2  ;;  %8843 = vmatprep.mubr.bf16.mxu0 %v15726_v0  ;;  %v15766_v2 = vld [vmem:[%s21339_s0 + $0x1b4] ss:$8 sps:$4 sm:$0xff]   ;;  %v15767_v0 = vld [vmem:[%s21339_s0 + $0xb0] ss:$8 sps:$4 sm:$0xff]  }
 0x90c   : > { %14977 = vmatpush3.bf16.msra.mxu1 %v15553_v11  ;;  %15017 = vmatpush3.bf16.msra.mxu0 %v15557_v43  ;;  %v15762_v11 = vld [vmem:[%s21339_s0 + $0x1a4] ss:$8 sps:$4 sm:$0xff]   ;;  %v15560_v43 = vld [vmem:[%s21276_s11 + $0x50] sm:$0xff]  }
 0x90d   : > { %14978 = vmatprep.subr.bf16.mxu1 %v15554_v52  ;;  %15018 = vmatprep.subr.bf16.mxu0 %v15559_v6 }
 0x910   : > { %14979 = vmatpush3.bf16.msra.mxu1 %v15554_v52  ;;  %15019 = vmatpush3.bf16.msra.mxu0 %v15559_v6  ;;  %v15763_v52 = vld [vmem:[%s21339_s0 + $0xa0] ss:$8 sps:$4 sm:$0xff]  }
 0x911   : > { %14980 = vmatprep.subr.bf16.mxu1 %v15555_v34  ;;  %15020 = vmatprep.subr.bf16.mxu0 %v15561_v44 }
 0x912   : > { %8667 = vmatmul.mubr.bf16.gmra.mxu1 %v15727_v5  ;;  %8844 = vmatmul.mubr.bf16.gmra.mxu0 %v15728_v21  ;;  %v15770_v5 = vld [vmem:[%s21339_s0 + $0x1c4] ss:$8 sps:$4 sm:$0xff]   ;;  %v15771_v21 = vld [vmem:[%s21339_s0 + $0xc0] ss:$8 sps:$4 sm:$0xff]  }
 0x913   : > { %8674 = vmatprep.mubr.bf16.mxu1 %v15729_v50  ;;  %8851 = vmatprep.mubr.bf16.mxu0 %v15730_v23  ;;  %v15772_v50 = vld [vmem:[%s21339_s0 + $0x1c0] ss:$8 sps:$4 sm:$0xff]   ;;  %v15773_v23 = vld [vmem:[%s21339_s0 + $0xd4] ss:$8 sps:$4 sm:$0xff]  }
 0x914   : > { %14981 = vmatpush3.bf16.msra.mxu1 %v15555_v34  ;;  %15021 = vmatpush3.bf16.msra.mxu0 %v15561_v44  ;;  %v15768_v34 = vld [vmem:[%s21339_s0 + $0x1b0] ss:$8 sps:$4 sm:$0xff]  }
 0x915   : > { %14982 = vmatprep.subr.bf16.mxu1 %v15556_v42  ;;  %15022 = vmatprep.subr.bf16.mxu0 %v15563_v36 }
 0x918   : > { %14983 = vmatpush3.bf16.msra.mxu1 %v15556_v42  ;;  %15023 = vmatpush3.bf16.msra.mxu0 %v15563_v36  ;;  %v15769_v42 = vld [vmem:[%s21339_s0 + $0xc4] ss:$8 sps:$4 sm:$0xff]  }
 0x919   : > { %15056 = vmatprep.subr.bf16.mxu1 %v20112_v53 }
 0x91a   : > { %8675 = vmatmul.mubr.bf16.gmra.mxu1 %v15731_v24  ;;  %8852 = vmatmul.mubr.bf16.gmra.mxu0 %v15732_v45  ;;  %v15774_v24 = vld [vmem:[%s21339_s0 + $0x1d4] ss:$8 sps:$4 sm:$0xff]   ;;  %v15775_v45 = vld [vmem:[%s21339_s0 + $0xd0] ss:$8 sps:$4 sm:$0xff]  }
 0x91b   : > { %8682 = vmatprep.mubr.bf16.mxu1 %v15733_v4  ;;  %8859 = vmatprep.mubr.bf16.mxu0 %v15734_v16  ;;  %v15776_v4 = vld [vmem:[%s21339_s0 + $0x1d0] ss:$8 sps:$4 sm:$0xff]   ;;  %v15777_v16 = vld [vmem:[%s21339_s0 + $0xe4] ss:$8 sps:$4 sm:$0xff]  }
 0x922   : > { %8683 = vmatmul.mubr.bf16.gmra.mxu1 %v15735_v51  ;;  %8860 = vmatmul.mubr.bf16.gmra.mxu0 %v15736_v10  ;;  %v15778_v51 = vld [vmem:[%s21339_s0 + $0x1e4] ss:$8 sps:$4 sm:$0xff]   ;;  %v15779_v10 = vld [vmem:[%s21339_s0 + $0xe0] ss:$8 sps:$4 sm:$0xff]  }
 0x923   : > { %8690 = vmatprep.mubr.bf16.mxu1 %v15737_v62  ;;  %8867 = vmatprep.mubr.bf16.mxu0 %v15738_v32  ;;  %v15780_v62 = vld [vmem:[%s21339_s0 + $0x1e0] ss:$8 sps:$4 sm:$0xff]   ;;  %v15781_v32 = vld [vmem:[%s21339_s0 + $0xf4] ss:$8 sps:$4 sm:$0xff]  }
 0x92a   : > { %8691 = vmatmul.mubr.bf16.gmra.mxu1 %v15739_v33  ;;  %8868 = vmatmul.mubr.bf16.gmra.mxu0 %v15740_v39  ;;  %v15782_v33 = vld [vmem:[%s21339_s0 + $0x1f4] ss:$8 sps:$4 sm:$0xff]   ;;  %v15783_v39 = vld [vmem:[%s21339_s0 + $0xf0] ss:$8 sps:$4 sm:$0xff]  }
 0x92b   : > { %8698 = vmatprep.mubr.bf16.mxu1 %v15741_v41  ;;  %8875 = vmatprep.mubr.bf16.mxu0 %v15742_v14  ;;  %v15784_v41 = vld [vmem:[%s21339_s0 + $0x1f0] ss:$8 sps:$4 sm:$0xff]   ;;  %v21684_v14 = vmov 0   ;;  %s15789_s0 = sshll.u32 %s15848_s20, 4  ;;  %s15790_s0 = int_to_ptr.vmem [resolvable:$false] %s15789_s0 }
 0x92c   : > { %s15791_s17 = scalar_lea.vmem %s15790_s0, 32  ;;  %p15792_p0 = scmp.lt.s32.totalorder %s11333_s26, %s15790_s0 }
 0x92d   : > { %p15793_p1 = scmp.lt.s32.totalorder %s15791_s17, %s15785_s18 }
 0x92f   : > { %p15794_p2 = por %p15793_p1, %p15792_p0 }
 0x931   : > { %p15795_p3 = pnand %p15794_p2, %p15788_p13 }
 0x932   : > { %8699 = vmatmul.mubr.bf16.gmra.mxu1 %v15743_v26  ;;  %8876 = vmatmul.mubr.bf16.gmra.mxu0 %v15744_v37  ;;  %v15562_v26 = vld [vmem:[%s21276_s11 + $0x48] sm:$0xff]   ;;  %v15564_v37 = vld [vmem:[%s21276_s11 + $0x40] sm:$0xff]  }
 0x933   : > { %8706 = vmatprep.mubr.bf16.mxu1 %v15745_v47  ;;  %8883 = vmatprep.mubr.bf16.mxu0 %v15746_v55  ;;  %v15565_v47 = vld [vmem:[%s21276_s11 + $0x78] sm:$0xff]  }
 0x934   : > { %v15566_v55 = vld [vmem:[%s21276_s11 + $0x98] sm:$0xff]   ;;  %15096 = vmatprep.subr.bf16.mxu0 %v15565_v47 }
 0x93a   : > { %8707 = vmatmul.mubr.bf16.gmra.mxu1 %v15747_v54  ;;  %8884 = vmatmul.mubr.bf16.gmra.mxu0 %v15748_v31 }
 0x93b   : > { %8714 = vmatprep.mubr.bf16.mxu1 %v15749_v59  ;;  %8891 = vmatprep.mubr.bf16.mxu0 %v15750_v30 }
 0x942   : > { %8715 = vmatmul.mubr.bf16.gmra.mxu1 %v15751_v25  ;;  %8892 = vmatmul.mubr.bf16.gmra.mxu0 %v15752_v58 }
 0x943   : > { %8722 = vmatprep.mubr.bf16.mxu1 %v15753_v40  ;;  %8899 = vmatprep.mubr.bf16.mxu0 %v15754_v49 }
 0x94a   : > { %8723 = vmatmul.mubr.bf16.gmra.mxu1 %v15755_v12  ;;  %8900 = vmatmul.mubr.bf16.gmra.mxu0 %v15756_v8 }
 0x94b   : > { %8730 = vmatprep.mubr.bf16.mxu1 %v15757_v35  ;;  %8907 = vmatprep.mubr.bf16.mxu0 %v15758_v48 }
 0x952   : > { %8731 = vmatmul.mubr.bf16.gmra.mxu1 %v15759_v28  ;;  %8908 = vmatmul.mubr.bf16.gmra.mxu0 %v15760_v61  ;;  %v15567_v28 = vld [vmem:[%s21276_s11 + $0x70] sm:$0xff]  }
 0x953   : > { %8738 = vmatprep.mubr.bf16.mxu1 %v15761_v15  ;;  %8915 = vmatprep.mubr.bf16.mxu0 %v15762_v11  ;;  %v15568_v61 = vld [vmem:[%s21276_s11 + $0x90] sm:$0xff]  }
 0x95a   : > { %8739 = vmatmul.mubr.bf16.gmra.mxu1 %v15763_v52  ;;  %8916 = vmatmul.mubr.bf16.gmra.mxu0 %v15764_v57 }
 0x95b   : > { %8746 = vmatprep.mubr.bf16.mxu1 %v15765_v46  ;;  %8923 = vmatprep.mubr.bf16.mxu0 %v15766_v2  ;;  %v15569_v46 = vld [vmem:[%s21276_s11 + $0x68] sm:$0xff]  }
 0x95c   : > { %v15570_v2 = vld [vmem:[%s21276_s11 + $0x88] sm:$0xff]  }
 0x962   : > { %8747 = vmatmul.mubr.bf16.gmra.mxu1 %v15767_v0  ;;  %8924 = vmatmul.mubr.bf16.gmra.mxu0 %v15768_v34 }
 0x963   : > { %8754 = vmatprep.mubr.bf16.mxu1 %v15769_v42  ;;  %8931 = vmatprep.mubr.bf16.mxu0 %v15770_v5 }
 0x96a   : > { %8755 = vmatmul.mubr.bf16.gmra.mxu1 %v15771_v21  ;;  %8932 = vmatmul.mubr.bf16.gmra.mxu0 %v15772_v50 }
 0x96b   : > { %8762 = vmatprep.mubr.bf16.mxu1 %v15773_v23  ;;  %8939 = vmatprep.mubr.bf16.mxu0 %v15774_v24 }
 0x972   : > { %8763 = vmatmul.mubr.bf16.gmra.mxu1 %v15775_v45  ;;  %8940 = vmatmul.mubr.bf16.gmra.mxu0 %v15776_v4 }
 0x973   : > { %8770 = vmatprep.mubr.bf16.mxu1 %v15777_v16  ;;  %8947 = vmatprep.mubr.bf16.mxu0 %v15778_v51  ;;  %v15571_v16 = vld [vmem:[%s21276_s11 + $0x60] sm:$0xff]  }
 0x974   : > { %v15572_v51 = vld [vmem:[%s21276_s11 + $0x80] sm:$0xff]  }
 0x97a   : > { %8771 = vmatmul.mubr.bf16.gmra.mxu1 %v15779_v10  ;;  %8948 = vmatmul.mubr.bf16.gmra.mxu0 %v15780_v62 }
 0x97b   : > { %8778 = vmatprep.mubr.bf16.mxu1 %v15781_v32  ;;  %8955 = vmatprep.mubr.bf16.mxu0 %v15782_v33 }
 0x982   : > { %8779 = vmatmul.mubr.bf16.gmra.mxu1 %v15783_v39  ;;  %8956 = vmatmul.mubr.bf16.gmra.mxu0 %v15784_v41 }
 0x983   : > { %14984 = vmatprep.mubr.bf16.mxu1 %v21684_v14  ;;  %15024 = vmatprep.mubr.bf16.mxu0 %v21684_v14 }
 0x98a   : > { %14985 = vmatmul.mubr.msk.bf16.vlgmr.msra.gmra.mxu1 %vm3704_vm2, %v20003_v63 }
 0x98b   : > { %14988 = vmatprep.mubr.msk.bf16.mxu1 %vm3704_vm2, %v19778_v60  ;;  %15057 = vmatpush3.bf16.msra.mxu1 %v20112_v53 }
 0x98c   : > { %15058 = vmatprep.subr.bf16.mxu1 %v15560_v43 }
 0x98f   : > { %15059 = vmatpush3.bf16.msra.mxu1 %v15560_v43 }
 0x990   : > { %15060 = vmatprep.subr.bf16.mxu1 %v15562_v26 }
 0x992   : > { %14989 = vmatmul.mubr.msk.bf16.gmra.mxu1 %vm3704_vm2, %v19988_v3 }
 0x993   : > { %14992 = vmatprep.mubr.msk.bf16.mxu1 %vm3704_vm2, %v19793_v17  ;;  %15061 = vmatpush3.bf16.msra.mxu1 %v15562_v26 }
 0x994   : > { %15062 = vmatprep.subr.bf16.mxu1 %v15564_v37 }
 0x997   : > { %15063 = vmatpush3.bf16.msra.mxu1 %v15564_v37 }
 0x998   : > { %15136 = vmatprep.subr.bf16.mxu1 %v15566_v55 }
 0x99a   : > { %14993 = vmatmul.mubr.msk.bf16.gmra.mxu1 %vm3704_vm2, %v19817_v38 }
 0x99b   : > { %14996 = vmatprep.mubr.msk.bf16.mxu1 %vm3704_vm2, %v19811_v56 }
 0x9a2   : > { %14997 = vmatmul.mubr.msk.bf16.gmra.mxu1 %vm3704_vm2, %v19841_v18 }
 0x9a3   : > { %15000 = vmatprep.mubr.msk.bf16.mxu1 %vm3704_vm2, %v19834_v22 }
 0x9aa   : > { %15001 = vmatmul.mubr.msk.bf16.gmra.mxu1 %vm3704_vm2, %v19994_v27 }
 0x9ab   : > { %15004 = vmatprep.mubr.msk.bf16.mxu1 %vm3704_vm2, %v19860_v19 }
 0x9b2   : > { %15005 = vmatmul.mubr.msk.bf16.gmra.mxu1 %vm3704_vm2, %v19981_v7 }
 0x9b3   : > { %15008 = vmatprep.mubr.msk.bf16.mxu1 %vm3704_vm2, %v19886_v13 }
 0x9ba   : > { %15009 = vmatmul.mubr.msk.bf16.gmra.mxu1 %vm3704_vm2, %v19962_v20 }
 0x9bb   : > { %15012 = vmatprep.mubr.msk.bf16.mxu1 %vm3704_vm2, %v19906_v29 }
 0x9c2   : > { %15013 = vmatmul.mubr.msk.bf16.gmra.mxu1 %vm3704_vm2, %v19938_v9 }
 0x9c3   : > { %15064 = vmatprep.mubr.bf16.mxu1 %v21684_v14 }
 0x9ca   : > { %v13562_v54 = vpop.f32.mrf.mxu1  ;;  %v13674_v31 = vpop.f32.mrf.mxu0 }
 0x9cc   : > { %v13563_v59 = vpop.f32.mrf.mxu1  ;;  %v13675_v30 = vpop.f32.mrf.mxu0 }
 0x9cd   : > { %v13564_v40 = vadd.f32 %v13563_v59, %v13562_v54  ;;  %v13676_v49 = vadd.f32 %v13675_v30, %v13674_v31 }
 0x9ce   : > { %v13565_v25 = vpop.f32.mrf.mxu1  ;;  %v13677_v58 = vpop.f32.mrf.mxu0 }
 0x9d0   : > { %v13566_v53 = vpop.f32.mrf.mxu1  ;;  %v13678_v6 = vpop.f32.mrf.mxu0 }
 0x9d1   : > { %v13567_v12 = vadd.f32 %v13566_v53, %v13565_v25  ;;  %v13679_v8 = vadd.f32 %v13678_v6, %v13677_v58 }
 0x9d2   : > { %v13568_v35 = vpop.f32.mrf.mxu1  ;;  %v13680_v48 = vpop.f32.mrf.mxu0 }
 0x9d3   : > { %v20269_v44 = vpack.c.bf16 %v13567_v12, %v13564_v40  ;;  %v20271_v36 = vpack.c.bf16 %v13679_v8, %v13676_v49 }
 0x9d4   : > { %v13569_v15 = vpop.f32.mrf.mxu1  ;;  %v13681_v11 = vpop.f32.mrf.mxu0 }
 0x9d5   : > { %15025 = vmatmul.mubr.msk.bf16.vlgmr.msra.gmra.mxu0 %vm3704_vm2, %v20269_v44  ;;  %15065 = vmatmul.mubr.msk.bf16.vlgmr.msra.gmra.mxu1 %vm3704_vm2, %v20271_v36  ;;  %v13570_v42 = vadd.f32 %v13569_v15, %v13568_v35  ;;  %v13682_v5 = vadd.f32 %v13681_v11, %v13680_v48 }
 0x9d6   : > { %v13571_v52 = vpop.f32.mrf.mxu1  ;;  %v13683_v57 = vpop.f32.mrf.mxu0  ;;  %15097 = vmatpush3.bf16.msra.mxu0 %v15565_v47  ;;  %15137 = vmatpush3.bf16.msra.mxu1 %v15566_v55 }
 0x9d7   : > { %15098 = vmatprep.subr.bf16.mxu0 %v15567_v28  ;;  %15138 = vmatprep.subr.bf16.mxu1 %v15568_v61 }
 0x9d8   : > { %v13572_v0 = vpop.f32.mrf.mxu1  ;;  %v13684_v34 = vpop.f32.mrf.mxu0 }
 0x9d9   : > { %v13573_v21 = vadd.f32 %v13572_v0, %v13571_v52  ;;  %v13685_v50 = vadd.f32 %v13684_v34, %v13683_v57  ;;  %v20322_v57 = vld [vmem:[%s21276_s11 + $0xb8] sm:$0xff]  }
 0x9da   : > { %v13574_v23 = vpop.f32.mrf.mxu1  ;;  %v13686_v24 = vpop.f32.mrf.mxu0  ;;  %15099 = vmatpush3.bf16.msra.mxu0 %v15567_v28  ;;  %15139 = vmatpush3.bf16.msra.mxu1 %v15568_v61  ;;  %v20327_v0 = vld [vmem:[%s21276_s11 + $0xd8] sm:$0xff]  }
 0x9db   : > { %v20289_v45 = vpack.c.bf16 %v13573_v21, %v13570_v42  ;;  %v20291_v4 = vpack.c.bf16 %v13685_v50, %v13682_v5  ;;  %15100 = vmatprep.subr.bf16.mxu0 %v15569_v46  ;;  %15140 = vmatprep.subr.bf16.mxu1 %v15570_v2 }
 0x9dc   : > { %v13575_v10 = vpop.f32.mrf.mxu1  ;;  %v13687_v62 = vpop.f32.mrf.mxu0 }
 0x9dd   : > { %15028 = vmatprep.mubr.msk.bf16.mxu0 %vm3704_vm2, %v20289_v45  ;;  %15068 = vmatprep.mubr.msk.bf16.mxu1 %vm3704_vm2, %v20291_v4  ;;  %v13576_v43 = vadd.f32 %v13575_v10, %v13574_v23  ;;  %v13688_v26 = vadd.f32 %v13687_v62, %v13686_v24 }
 0x9de   : > { %v13577_v32 = vpop.f32.mrf.mxu1  ;;  %v13689_v33 = vpop.f32.mrf.mxu0  ;;  %15101 = vmatpush3.bf16.msra.mxu0 %v15569_v46  ;;  %15141 = vmatpush3.bf16.msra.mxu1 %v15570_v2 }
 0x9df   : > { %15102 = vmatprep.subr.bf16.mxu0 %v15571_v16  ;;  %15142 = vmatprep.subr.bf16.mxu1 %v15572_v51 }
 0x9e0   : > { %v13578_v39 = vpop.f32.mrf.mxu1  ;;  %v13690_v41 = vpop.f32.mrf.mxu0 }
 0x9e1   : > { %v13579_v37 = vadd.f32 %v13578_v39, %v13577_v32  ;;  %v13691_v47 = vadd.f32 %v13690_v41, %v13689_v33 }
 0x9e2   : > { %v13580_v55 = vpop.f32.mrf.mxu1  ;;  %v13692_v54 = vpop.f32.mrf.mxu0  ;;  %15103 = vmatpush3.bf16.msra.mxu0 %v15571_v16  ;;  %15143 = vmatpush3.bf16.msra.mxu1 %v15572_v51 }
 0x9e3   : > { %v20303_v31 = vpack.c.bf16 %v13579_v37, %v13576_v43  ;;  %v20305_v59 = vpack.c.bf16 %v13691_v47, %v13688_v26  ;;  %15176 = vmatprep.subr.bf16.mxu0 %v20322_v57  ;;  %15216 = vmatprep.subr.bf16.mxu1 %v20327_v0 }
 0x9e4   : > { %v13581_v30 = vpop.f32.mrf.mxu1  ;;  %v13693_v25 = vpop.f32.mrf.mxu0 }
 0x9e5   : > { %15029 = vmatmul.mubr.msk.bf16.gmra.mxu0 %vm3704_vm2, %v20303_v31  ;;  %15069 = vmatmul.mubr.msk.bf16.gmra.mxu1 %vm3704_vm2, %v20305_v59  ;;  %v13582_v49 = vadd.f32 %v13581_v30, %v13580_v55  ;;  %v13694_v12 = vadd.f32 %v13693_v25, %v13692_v54 }
 0x9e6   : > { %v13583_v58 = vpop.f32.mrf.mxu1  ;;  %v13695_v53 = vpop.f32.mrf.mxu0 }
 0x9e8   : > { %v13584_v6 = vpop.f32.mrf.mxu1  ;;  %v13696_v40 = vpop.f32.mrf.mxu0 }
 0x9e9   : > { %v13585_v8 = vadd.f32 %v13584_v6, %v13583_v58  ;;  %v13697_v35 = vadd.f32 %v13696_v40, %v13695_v53 }
 0x9ea   : > { %v13586_v48 = vpop.f32.mrf.mxu1  ;;  %v13698_v28 = vpop.f32.mrf.mxu0 }
 0x9eb   : > { %v20311_v61 = vpack.c.bf16 %v13585_v8, %v13582_v49  ;;  %v20313_v15 = vpack.c.bf16 %v13697_v35, %v13694_v12 }
 0x9ec   : > { %v13587_v11 = vpop.f32.mrf.mxu1  ;;  %v13699_v52 = vpop.f32.mrf.mxu0 }
 0x9ed   : > { %15032 = vmatprep.mubr.msk.bf16.mxu0 %vm3704_vm2, %v20311_v61  ;;  %15072 = vmatprep.mubr.msk.bf16.mxu1 %vm3704_vm2, %v20313_v15  ;;  %v13588_v5 = vadd.f32 %v13587_v11, %v13586_v48  ;;  %v13700_v21 = vadd.f32 %v13699_v52, %v13698_v28 }
 0x9ee   : > { %v13589_v46 = vpop.f32.mrf.mxu1  ;;  %v13701_v2 = vpop.f32.mrf.mxu0 }
 0x9f0   : > { %v13590_v34 = vpop.f32.mrf.mxu1  ;;  %v13702_v42 = vpop.f32.mrf.mxu0 }
 0x9f1   : > { %v13591_v50 = vadd.f32 %v13590_v34, %v13589_v46  ;;  %v13703_v23 = vadd.f32 %v13702_v42, %v13701_v2 }
 0x9f2   : > { %v13592_v24 = vpop.f32.mrf.mxu1  ;;  %v13704_v16 = vpop.f32.mrf.mxu0 }
 0x9f3   : > { %v20331_v51 = vpack.c.bf16 %v13591_v50, %v13588_v5  ;;  %v20333_v10 = vpack.c.bf16 %v13703_v23, %v13700_v21 }
 0x9f4   : > { %v13593_v62 = vpop.f32.mrf.mxu1  ;;  %v13705_v32 = vpop.f32.mrf.mxu0 }
 0x9f5   : > { %15033 = vmatmul.mubr.msk.bf16.gmra.mxu0 %vm3704_vm2, %v20331_v51  ;;  %15073 = vmatmul.mubr.msk.bf16.gmra.mxu1 %vm3704_vm2, %v20333_v10  ;;  %v13594_v26 = vadd.f32 %v13593_v62, %v13592_v24  ;;  %v13706_v37 = vadd.f32 %v13705_v32, %v13704_v16 }
 0x9f6   : > { %v13595_v33 = vpop.f32.mrf.mxu1  ;;  %v13707_v39 = vpop.f32.mrf.mxu0 }
 0x9f8   : > { %v13596_v41 = vpop.f32.mrf.mxu1  ;;  %v13708_v43 = vpop.f32.mrf.mxu0 }
 0x9f9   : > { %v13597_v47 = vadd.f32 %v13596_v41, %v13595_v33  ;;  %v13709_v55 = vadd.f32 %v13708_v43, %v13707_v39 }
 0x9fa   : > { %v13598_v54 = vpop.f32.mrf.mxu1  ;;  %v13710_v30 = vpop.f32.mrf.mxu0 }
 0x9fb   : > { %v20339_v25 = vpack.c.bf16 %v13597_v47, %v13594_v26  ;;  %v20341_v58 = vpack.c.bf16 %v13709_v55, %v13706_v37 }
 0x9fc   : > { %v13599_v53 = vpop.f32.mrf.mxu1  ;;  %v13711_v6 = vpop.f32.mrf.mxu0 }
 0x9fd   : > { %15036 = vmatprep.mubr.msk.bf16.mxu0 %vm3704_vm2, %v20339_v25  ;;  %15076 = vmatprep.mubr.msk.bf16.mxu1 %vm3704_vm2, %v20341_v58  ;;  %v13600_v35 = vadd.f32 %v13599_v53, %v13598_v54  ;;  %v13712_v48 = vadd.f32 %v13711_v6, %v13710_v30 }
 0x9fe   : > { %v13601_v40 = vpop.f32.mrf.mxu1  ;;  %v13713_v49 = vpop.f32.mrf.mxu0 }
 0xa00   : > { %v13602_v12 = vpop.f32.mrf.mxu1  ;;  %v13714_v8 = vpop.f32.mrf.mxu0 }
 0xa01   : > { %v13603_v28 = vadd.f32 %v13602_v12, %v13601_v40  ;;  %v13715_v11 = vadd.f32 %v13714_v8, %v13713_v49 }
 0xa02   : > { %v13604_v52 = vpop.f32.mrf.mxu1  ;;  %v13716_v46 = vpop.f32.mrf.mxu0 }
 0xa03   : > { %v20347_v2 = vpack.c.bf16 %v13603_v28, %v13600_v35  ;;  %v20349_v34 = vpack.c.bf16 %v13715_v11, %v13712_v48 }
 0xa04   : > { %v13605_v42 = vpop.f32.mrf.mxu1  ;;  %v13717_v5 = vpop.f32.mrf.mxu0 }
 0xa05   : > { %15037 = vmatmul.mubr.msk.bf16.gmra.mxu0 %vm3704_vm2, %v20347_v2  ;;  %15077 = vmatmul.mubr.msk.bf16.gmra.mxu1 %vm3704_vm2, %v20349_v34  ;;  %v13606_v16 = vadd.f32 %v13605_v42, %v13604_v52  ;;  %v13718_v62 = vadd.f32 %v13717_v5, %v13716_v46 }
 0xa06   : > { %v13607_v21 = vpop.f32.mrf.mxu1  ;;  %v13719_v50 = vpop.f32.mrf.mxu0 }
 0xa08   : > { %v13608_v23 = vpop.f32.mrf.mxu1  ;;  %v13720_v24 = vpop.f32.mrf.mxu0 }
 0xa09   : > { %v13609_v32 = vadd.f32 %v13608_v23, %v13607_v21  ;;  %v13721_v33 = vadd.f32 %v13720_v24, %v13719_v50 }
 0xa0a   : > { %v13610_v39 = vpop.f32.mrf.mxu1  ;;  %v13722_v41 = vpop.f32.mrf.mxu0 }
 0xa0b   : > { %v20355_v43 = vpack.c.bf16 %v13609_v32, %v13606_v16  ;;  %v20357_v26 = vpack.c.bf16 %v13721_v33, %v13718_v62 }
 0xa0c   : > { %v13611_v37 = vpop.f32.mrf.mxu1  ;;  %v13723_v47 = vpop.f32.mrf.mxu0 }
 0xa0d   : > { %15040 = vmatprep.mubr.msk.bf16.mxu0 %vm3704_vm2, %v20355_v43  ;;  %15080 = vmatprep.mubr.msk.bf16.mxu1 %vm3704_vm2, %v20357_v26  ;;  %v13612_v6 = vadd.f32 %v13611_v37, %v13610_v39  ;;  %v13724_v40 = vadd.f32 %v13723_v47, %v13722_v41 }
 0xa0e   : > { %v13613_v55 = vpop.f32.mrf.mxu1  ;;  %v13725_v54 = vpop.f32.mrf.mxu0 }
 0xa10   : > { %v13614_v30 = vpop.f32.mrf.mxu1  ;;  %v13726_v53 = vpop.f32.mrf.mxu0 }
 0xa11   : > { %v13615_v49 = vadd.f32 %v13614_v30, %v13613_v55  ;;  %v13727_v12 = vadd.f32 %v13726_v53, %v13725_v54 }
 0xa12   : > { %v13616_v8 = vpop.f32.mrf.mxu1  ;;  %v13728_v35 = vpop.f32.mrf.mxu0 }
 0xa13   : > { %v20363_v48 = vpack.c.bf16 %v13615_v49, %v13612_v6  ;;  %v20365_v28 = vpack.c.bf16 %v13727_v12, %v13724_v40 }
 0xa14   : > { %v13617_v11 = vpop.f32.mrf.mxu1  ;;  %v13729_v52 = vpop.f32.mrf.mxu0 }
 0xa15   : > { %15041 = vmatmul.mubr.msk.bf16.gmra.mxu0 %vm3704_vm2, %v20363_v48  ;;  %15081 = vmatmul.mubr.msk.bf16.gmra.mxu1 %vm3704_vm2, %v20365_v28  ;;  %v13618_v50 = vadd.f32 %v13617_v11, %v13616_v8  ;;  %v13730_v23 = vadd.f32 %v13729_v52, %v13728_v35 }
 0xa16   : > { %v13619_v46 = vpop.f32.mrf.mxu1  ;;  %v13731_v42 = vpop.f32.mrf.mxu0 }
 0xa18   : > { %v13620_v5 = vpop.f32.mrf.mxu1  ;;  %v13732_v21 = vpop.f32.mrf.mxu0 }
 0xa19   : > { %v13621_v24 = vadd.f32 %v13620_v5, %v13619_v46  ;;  %v13733_v16 = vadd.f32 %v13732_v21, %v13731_v42 }
 0xa1a   : > { %v13622_v62 = vpop.f32.mrf.mxu1  ;;  %v13734_v32 = vpop.f32.mrf.mxu0 }
 0xa1b   : > { %v20371_v33 = vpack.c.bf16 %v13621_v24, %v13618_v50  ;;  %v20373_v39 = vpack.c.bf16 %v13733_v16, %v13730_v23 }
 0xa1c   : > { %v13623_v41 = vpop.f32.mrf.mxu1  ;;  %v13735_v37 = vpop.f32.mrf.mxu0 }
 0xa1d   : > { %15044 = vmatprep.mubr.msk.bf16.mxu0 %vm3704_vm2, %v20371_v33  ;;  %15084 = vmatprep.mubr.msk.bf16.mxu1 %vm3704_vm2, %v20373_v39  ;;  %v13624_v53 = vadd.f32 %v13623_v41, %v13622_v62  ;;  %v13736_v6 = vadd.f32 %v13735_v37, %v13734_v32 }
 0xa1e   : > { %v13625_v47 = vpop.f32.mrf.mxu1  ;;  %v13737_v55 = vpop.f32.mrf.mxu0 }
 0xa20   : > { %v13626_v54 = vpop.f32.mrf.mxu1  ;;  %v13738_v30 = vpop.f32.mrf.mxu0 }
 0xa21   : > { %v13627_v40 = vadd.f32 %v13626_v54, %v13625_v47  ;;  %v13739_v49 = vadd.f32 %v13738_v30, %v13737_v55 }
 0xa22   : > { %v13628_v12 = vpop.f32.mrf.mxu1  ;;  %v13740_v8 = vpop.f32.mrf.mxu0 }
 0xa23   : > { %v20379_v35 = vpack.c.bf16 %v13627_v40, %v13624_v53  ;;  %v20381_v11 = vpack.c.bf16 %v13739_v49, %v13736_v6 }
 0xa24   : > { %v13629_v52 = vpop.f32.mrf.mxu1  ;;  %v13741_v46 = vpop.f32.mrf.mxu0 }
 0xa25   : > { %15045 = vmatmul.mubr.msk.bf16.gmra.mxu0 %vm3704_vm2, %v20379_v35  ;;  %15085 = vmatmul.mubr.msk.bf16.gmra.mxu1 %vm3704_vm2, %v20381_v11  ;;  %v13630_v23 = vadd.f32 %v13629_v52, %v13628_v12  ;;  %v13742_v24 = vadd.f32 %v13741_v46, %v13740_v8 }
 0xa26   : > { %v13631_v42 = vpop.f32.mrf.mxu1  ;;  %v13743_v5 = vpop.f32.mrf.mxu0 }
 0xa28   : > { %v13632_v21 = vpop.f32.mrf.mxu1  ;;  %v13744_v50 = vpop.f32.mrf.mxu0 }
 0xa29   : > { %v13633_v16 = vadd.f32 %v13632_v21, %v13631_v42  ;;  %v13745_v62 = vadd.f32 %v13744_v50, %v13743_v5 }
 0xa2a   : > { %v13634_v32 = vpop.f32.mrf.mxu1  ;;  %v13746_v41 = vpop.f32.mrf.mxu0 }
 0xa2b   : > { %v20387_v37 = vpack.c.bf16 %v13633_v16, %v13630_v23  ;;  %v20389_v47 = vpack.c.bf16 %v13745_v62, %v13742_v24 }
 0xa2c   : > { %v13635_v55 = vpop.f32.mrf.mxu1  ;;  %v13747_v54 = vpop.f32.mrf.mxu0 }
 0xa2d   : > { %15048 = vmatprep.mubr.msk.bf16.mxu0 %vm3704_vm2, %v20387_v37  ;;  %15088 = vmatprep.mubr.msk.bf16.mxu1 %vm3704_vm2, %v20389_v47  ;;  %v13636_v49 = vadd.f32 %v13635_v55, %v13634_v32  ;;  %v13748_v12 = vadd.f32 %v13747_v54, %v13746_v41 }
 0xa2e   : > { %v13637_v30 = vpop.f32.mrf.mxu1  ;;  %v13749_v53 = vpop.f32.mrf.mxu0 }
 0xa30   : > { %v13638_v6 = vpop.f32.mrf.mxu1  ;;  %v13750_v40 = vpop.f32.mrf.mxu0 }
 0xa31   : > { %v13639_v8 = vadd.f32 %v13638_v6, %v13637_v30  ;;  %v13751_v52 = vadd.f32 %v13750_v40, %v13749_v53 }
 0xa32   : > { %v13640_v46 = vpop.f32.mrf.mxu1  ;;  %v13752_v42 = vpop.f32.mrf.mxu0 }
 0xa33   : > { %v20395_v5 = vpack.c.bf16 %v13639_v8, %v13636_v49  ;;  %v20397_v21 = vpack.c.bf16 %v13751_v52, %v13748_v12 }
 0xa34   : > { %v13641_v50 = vpop.f32.mrf.mxu1  ;;  %v13753_v23 = vpop.f32.mrf.mxu0 }
 0xa35   : > { %15049 = vmatmul.mubr.msk.bf16.gmra.mxu0 %vm3704_vm2, %v20395_v5  ;;  %15089 = vmatmul.mubr.msk.bf16.gmra.mxu1 %vm3704_vm2, %v20397_v21  ;;  %v13642_v41 = vadd.f32 %v13641_v50, %v13640_v46  ;;  %v13754_v55 = vadd.f32 %v13753_v23, %v13752_v42 }
 0xa36   : > { %v13643_v24 = vpop.f32.mrf.mxu1  ;;  %v13755_v16 = vpop.f32.mrf.mxu0 }
 0xa38   : > { %v13644_v62 = vpop.f32.mrf.mxu1  ;;  %v13756_v32 = vpop.f32.mrf.mxu0 }
 0xa39   : > { %v13645_v54 = vadd.f32 %v13644_v62, %v13643_v24  ;;  %v13757_v30 = vadd.f32 %v13756_v32, %v13755_v16 }
 0xa3a   : > { %v13646_v53 = vpop.f32.mrf.mxu1  ;;  %v13758_v6 = vpop.f32.mrf.mxu0 }
 0xa3b   : > { %v20403_v40 = vpack.c.bf16 %v13645_v54, %v13642_v41  ;;  %v20405_v49 = vpack.c.bf16 %v13757_v30, %v13754_v55 }
 0xa3c   : > { %v13647_v12 = vpop.f32.mrf.mxu1  ;;  %v13759_v8 = vpop.f32.mrf.mxu0 }
 0xa3d   : > { %15052 = vmatprep.mubr.msk.bf16.mxu0 %vm3704_vm2, %v20403_v40  ;;  %15092 = vmatprep.mubr.msk.bf16.mxu1 %vm3704_vm2, %v20405_v49  ;;  %v13648_v50 = vadd.f32 %v13647_v12, %v13646_v53  ;;  %v13760_v23 = vadd.f32 %v13759_v8, %v13758_v6  ;;  %v15575_v6 = vld [vmem:[%s21276_s11 + $0xb0] sm:$0xff]   ;;  %v15577_v8 = vld [vmem:[%s21276_s11 + $0xa8] sm:$0xff]  }
 0xa3e   : > { %v13649_v52 = vpop.f32.mrf.mxu1  ;;  %v13761_v14 = vpop.f32.mrf.mxu0  ;;  %v15576_v12 = vld [vmem:[%s21276_s11 + $0xd0] sm:$0xff]  }
 0xa40   : > { %v13650_v46 = vpop.f32.mrf.mxu1  ;;  %v13762_v42 = vpop.f32.mrf.mxu0 }
 0xa41   : > { %v13651_v24 = vadd.f32 %v13650_v46, %v13649_v52  ;;  %v13763_v16 = vadd.f32 %v13762_v42, %v13761_v14  ;;  %v15578_v52 = vld [vmem:[%s21276_s11 + $0xc8] sm:$0xff]  }
 0xa42   : > { %v20411_v62 = vpop.f32.mrf.mxu1 }
 0xa43   : > { %v20413_v32 = vpack.c.bf16 %v13651_v24, %v13648_v50  ;;  %v20415_v41 = vpack.c.bf16 %v13763_v16, %v13760_v23  ;;  %v20486_v24 = vld [vmem:[%s21276_s11 + $0xf8] sm:$0xff]  }
 0xa44   : > { %v20417_v55 = vpop.f32.mrf.mxu1  ;;  %v20491_v16 = vld [vmem:[%s21276_s11 + $0x118] sm:$0xff]  }
 0xa45   : > { %15053 = vmatmul.mubr.msk.bf16.gmra.mxu0 %vm3704_vm2, %v20413_v32  ;;  %15093 = vmatmul.mubr.msk.bf16.gmra.mxu1 %vm3704_vm2, %v20415_v41 }
 0xa46   : > { %v20423_v54 = vpop.f32.mrf.mxu1  ;;  %15104 = vmatprep.mubr.msk.bf16.mxu0 %vm3704_vm2, %v20269_v44  ;;  %15144 = vmatprep.mubr.msk.bf16.mxu1 %vm3704_vm2, %v20003_v63 }
 0xa48   : > { %v20429_v14 = vpop.f32.mrf.mxu1 }
 0xa4a   : > { %v20431_v30 = vpop.f32.mrf.mxu1 }
 0xa4c   : > { %v20433_v53 = vpop.f32.mrf.mxu1 }
 0xa4d   : > { %15105 = vmatmul.mubr.msk.bf16.vlgmr.msra.gmra.mxu0 %vm3704_vm2, %v20289_v45  ;;  %15145 = vmatmul.mubr.msk.bf16.vlgmr.msra.gmra.mxu1 %vm3704_vm2, %v19778_v60 }
 0xa4e   : > { %v20445_v63 = vpop.f32.mrf.mxu1  ;;  %15108 = vmatprep.mubr.msk.bf16.mxu0 %vm3704_vm2, %v20303_v31  ;;  %15148 = vmatprep.mubr.msk.bf16.mxu1 %vm3704_vm2, %v19988_v3 }
 0xa4f   : > { %15177 = vmatpush3.bf16.msra.mxu0 %v20322_v57  ;;  %15217 = vmatpush3.bf16.msra.mxu1 %v20327_v0  ;;  %v15579_v57 = vld [vmem:[%s21276_s11 + $0xa0] sm:$0xff]  }
 0xa50   : > { %v20453_v44 = vpop.f32.mrf.mxu1  ;;  %15178 = vmatprep.subr.bf16.mxu0 %v15575_v6  ;;  %15218 = vmatprep.subr.bf16.mxu1 %v15576_v12  ;;  %v15580_v0 = vld [vmem:[%s21276_s11 + $0xc0] sm:$0xff]  }
 0xa51   : > { %21685 = vst [vmem:[#allocation35_spill] sm:$0xff] %v20453_v44 }
 0xa52   : > { %v20461_v46 = vpop.f32.mrf.mxu1 }
 0xa53   : > { %15179 = vmatpush3.bf16.msra.mxu0 %v15575_v6  ;;  %15219 = vmatpush3.bf16.msra.mxu1 %v15576_v12 }
 0xa54   : > { %v20463_v42 = vpop.f32.mrf.mxu1  ;;  %15180 = vmatprep.subr.bf16.mxu0 %v15577_v8  ;;  %15220 = vmatprep.subr.bf16.mxu1 %v15578_v52 }
 0xa55   : > { %15109 = vmatmul.mubr.msk.bf16.gmra.mxu0 %vm3704_vm2, %v20311_v61  ;;  %15149 = vmatmul.mubr.msk.bf16.gmra.mxu1 %vm3704_vm2, %v19793_v17 }
 0xa56   : > { %v20475_v50 = vpop.f32.mrf.mxu1  ;;  %15112 = vmatprep.mubr.msk.bf16.mxu0 %vm3704_vm2, %v20331_v51  ;;  %15152 = vmatprep.mubr.msk.bf16.mxu1 %vm3704_vm2, %v19817_v38 }
 0xa57   : > { %15181 = vmatpush3.bf16.msra.mxu0 %v15577_v8  ;;  %15221 = vmatpush3.bf16.msra.mxu1 %v15578_v52 }
 0xa58   : > { %v20481_v23 = vpop.f32.mrf.mxu1  ;;  %15182 = vmatprep.subr.bf16.mxu0 %v15579_v57  ;;  %15222 = vmatprep.subr.bf16.mxu1 %v15580_v0 }
 0xa59   : > { %21686 = vst [vmem:[#allocation31_spill] sm:$0xff] %v20481_v23 }
 0xa5a   : > { %v20493_v6 = vpop.f32.mrf.mxu1 }
 0xa5b   : > { %15183 = vmatpush3.bf16.msra.mxu0 %v15579_v57  ;;  %15223 = vmatpush3.bf16.msra.mxu1 %v15580_v0 }
 0xa5c   : > { %v20495_v12 = vpop.f32.mrf.mxu1  ;;  %15256 = vmatprep.subr.bf16.mxu0 %v20486_v24  ;;  %15296 = vmatprep.subr.bf16.mxu1 %v20491_v16 }
 0xa5d   : > { %15113 = vmatmul.mubr.msk.bf16.gmra.mxu0 %vm3704_vm2, %v20339_v25  ;;  %15153 = vmatmul.mubr.msk.bf16.gmra.mxu1 %vm3704_vm2, %v19811_v56 }
 0xa5e   : > { %v20503_v8 = vpop.f32.mrf.mxu1  ;;  %15116 = vmatprep.mubr.msk.bf16.mxu0 %vm3704_vm2, %v20347_v2  ;;  %15156 = vmatprep.mubr.msk.bf16.mxu1 %vm3704_vm2, %v19841_v18 }
 0xa60   : > { %v20509_v52 = vpop.f32.mrf.mxu1 }
 0xa61   : > { %21687 = vst [vmem:[#allocation28_spill] sm:$0xff] %v20509_v52 }
 0xa62   : > { %v20511_v57 = vpop.f32.mrf.mxu1 }
 0xa64   : > { %v20513_v0 = vpop.f32.mrf.mxu1 }
 0xa65   : > { %15117 = vmatmul.mubr.msk.bf16.gmra.mxu0 %vm3704_vm2, %v20355_v43  ;;  %15157 = vmatmul.mubr.msk.bf16.gmra.mxu1 %vm3704_vm2, %v19834_v22 }
 0xa66   : > { %v20519_v23 = vpop.f32.mrf.mxu1  ;;  %15120 = vmatprep.mubr.msk.bf16.mxu0 %vm3704_vm2, %v20363_v48  ;;  %15160 = vmatprep.mubr.msk.bf16.mxu1 %vm3704_vm2, %v19994_v27 }
 0xa68   : > { %v20525_v44 = vpop.f32.mrf.mxu1 }
 0xa6a   : > { %v20527_v52 = vpop.f32.mrf.mxu1 }
 0xa6b   : > { %21688 = vst [vmem:[#allocation14_spill] sm:$0xff] %v20527_v52 }
 0xa6c   : > { %v20529_v18 = vpop.f32.mrf.mxu1 }
 0xa6d   : > { %15121 = vmatmul.mubr.msk.bf16.gmra.mxu0 %vm3704_vm2, %v20371_v33  ;;  %15161 = vmatmul.mubr.msk.bf16.gmra.mxu1 %vm3704_vm2, %v19860_v19 }
 0xa6e   : > { %v20535_v22 = vpop.f32.mrf.mxu1  ;;  %15124 = vmatprep.mubr.msk.bf16.mxu0 %vm3704_vm2, %v20379_v35  ;;  %15164 = vmatprep.mubr.msk.bf16.mxu1 %vm3704_vm2, %v19981_v7 }
 0xa70   : > { %v20541_v27 = vpop.f32.mrf.mxu1 }
 0xa71   : > { %21689 = vst [vmem:[#allocation21_spill] sm:$0xff] %v20541_v27 }
 0xa72   : > { %v20543_v56 = vpop.f32.mrf.mxu1 }
 0xa73   : > { %21690 = vst [vmem:[#allocation26_spill] sm:$0xff] %v20543_v56 }
 0xa74   : > { %v20545_v52 = vpop.f32.mrf.mxu1 }
 0xa75   : > { %15125 = vmatmul.mubr.msk.bf16.gmra.mxu0 %vm3704_vm2, %v20387_v37  ;;  %15165 = vmatmul.mubr.msk.bf16.gmra.mxu1 %vm3704_vm2, %v19886_v13 }
 0xa76   : > { %v20551_v19 = vpop.f32.mrf.mxu1  ;;  %15128 = vmatprep.mubr.msk.bf16.mxu0 %vm3704_vm2, %v20395_v5  ;;  %15168 = vmatprep.mubr.msk.bf16.mxu1 %vm3704_vm2, %v19962_v20  ;;  %v13654_v20 = vadd.f32 %v20417_v55, %v20411_v62  ;;  %v15583_v55 = vld [vmem:[%s21276_s11 + $0xf0] sm:$0xff]  }
 0xa78   : > { %v20557_v7 = vpop.f32.mrf.mxu1 }
 0xa79   : > { %21691 = vst [vmem:[#allocation36_spill] sm:$0xff] %v20557_v7 }
 0xa7a   : > { %v20559_v27 = vpop.f32.mrf.mxu1 }
 0xa7b   : > { %21692 = vst [vmem:[#allocation16_spill] sm:$0xff] %v20559_v27  ;;  %v13657_v27 = vadd.f32 %v20429_v14, %v20423_v54  ;;  %v15584_v54 = vld [vmem:[%s21276_s11 + $0x110] sm:$0xff]   ;;  %v15586_v14 = vld [vmem:[%s21276_s11 + $0x108] sm:$0xff]  }
 0xa7c   : > { %v20561_v56 = vpop.f32.mrf.mxu1 }
 0xa7d   : > { %21693 = vst [vmem:[#allocation37_spill] sm:$0xff] %v20561_v56  ;;  %15129 = vmatmul.mubr.msk.bf16.gmra.mxu0 %vm3704_vm2, %v20403_v40  ;;  %15169 = vmatmul.mubr.msk.bf16.gmra.mxu1 %vm3704_vm2, %v19906_v29  ;;  %v20577_v56 = vpack.c.bf16 %v13657_v27, %v13654_v20  ;;  %v20585_v29 = vpop.f32.mrf.mxu0 }
 0xa7e   : > { %15132 = vmatprep.mubr.msk.bf16.mxu0 %vm3704_vm2, %v20413_v32  ;;  %15172 = vmatprep.mubr.msk.bf16.mxu1 %vm3704_vm2, %v19938_v9  ;;  %v20575_v13 = vpop.f32.mrf.mxu1 }
 0xa7f   : > { %21694 = vst [vmem:[#allocation38_spill] sm:$0xff] %v20575_v13  ;;  %v20593_v20 = vpop.f32.mrf.mxu0 }
 0xa80   : > { %v20579_v7 = vpop.f32.mrf.mxu1 }
 0xa81   : > { %21695 = vst [vmem:[#allocation12_spill] sm:$0xff] %v20579_v7 }
 0xa82   : > { %v20591_v62 = vpop.f32.mrf.mxu1 }
 0xa83   : > { %21696 = vst [vmem:[#allocation23_spill] sm:$0xff] %v20591_v62 }
 0xa84   : > { %v20595_v27 = vpop.f32.mrf.mxu1 }
 0xa85   : > { %15133 = vmatmul.mubr.msk.bf16.gmra.mxu0 %vm3704_vm2, %v20577_v56  ;;  %15173 = vmatmul.mubr.msk.bf16.gmra.mxu1 %vm3704_vm2, %v19928_v1  ;;  %21697 = vst [vmem:[#allocation30_spill] sm:$0xff] %v20595_v27 }
 0xa86   : > { %15184 = vmatprep.mubr.msk.bf16.mxu0 %vm3704_vm2, %v20271_v36  ;;  %15224 = vmatprep.mubr.msk.bf16.mxu1 %vm3704_vm2, %v20289_v45  ;;  %v20607_v36 = vpop.f32.mrf.mxu0  ;;  %v20613_v45 = vpop.f32.mrf.mxu1 }
 0xa87   : > { %21698 = vst [vmem:[#allocation40_spill] sm:$0xff] %v20613_v45 }
 0xa88   : > { %v20623_v27 = vpop.f32.mrf.mxu0  ;;  %v20625_v62 = vpop.f32.mrf.mxu1 }
 0xa89   : > { %21699 = vst [vmem:[#allocation32_spill] sm:$0xff] %v20625_v62 }
 0xa8d   : > { %15185 = vmatmul.mubr.msk.bf16.vlgmr.msra.gmra.mxu0 %vm3704_vm2, %v20291_v4  ;;  %15225 = vmatmul.mubr.msk.bf16.vlgmr.msra.gmra.mxu1 %vm3704_vm2, %v20303_v31  ;;  %v15585_v31 = vld [vmem:[%s21276_s11 + $0xe8] sm:$0xff]  }
 0xa8e   : > { %15188 = vmatprep.mubr.msk.bf16.mxu0 %vm3704_vm2, %v20305_v59  ;;  %15228 = vmatprep.mubr.msk.bf16.mxu1 %vm3704_vm2, %v20311_v61  ;;  %v15587_v61 = vld [vmem:[%s21276_s11 + $0xe0] sm:$0xff]  }
 0xa8f   : > { %15257 = vmatpush3.bf16.msra.mxu0 %v20486_v24  ;;  %15297 = vmatpush3.bf16.msra.mxu1 %v20491_v16  ;;  %v15588_v24 = vld [vmem:[%s21276_s11 + $0x100] sm:$0xff]  }
 0xa90   : > { %15258 = vmatprep.subr.bf16.mxu0 %v15583_v55  ;;  %15298 = vmatprep.subr.bf16.mxu1 %v15584_v54 }
 0xa93   : > { %15259 = vmatpush3.bf16.msra.mxu0 %v15583_v55  ;;  %15299 = vmatpush3.bf16.msra.mxu1 %v15584_v54 }
 0xa94   : > { %15260 = vmatprep.subr.bf16.mxu0 %v15585_v31  ;;  %15300 = vmatprep.subr.bf16.mxu1 %v15586_v14 }
 0xa95   : > { %v15026_v16 = vpop.f32.mrf.mxu0  ;;  %15189 = vmatmul.mubr.msk.bf16.gmra.mxu0 %vm3704_vm2, %v20313_v15  ;;  %15229 = vmatmul.mubr.msk.bf16.gmra.mxu1 %vm3704_vm2, %v20331_v51  ;;  %v15066_v62 = vpop.f32.mrf.mxu1 }
 0xa96   : > { %v9339_v55 = vadd.f32 %v15026_v16, %v20431_v30  ;;  %15192 = vmatprep.mubr.msk.bf16.mxu0 %vm3704_vm2, %v20333_v10  ;;  %15232 = vmatprep.mubr.msk.bf16.mxu1 %vm3704_vm2, %v20339_v25 }
 0xa97   : > { %v9330_v54 = vpop.f32.mrf.mxu0  ;;  %v9569_v45 = vpop.f32.mrf.mxu1  ;;  %15261 = vmatpush3.bf16.msra.mxu0 %v15585_v31  ;;  %15301 = vmatpush3.bf16.msra.mxu1 %v15586_v14 }
 0xa98   : > { %v9331_v1 = vadd.f32 %v9330_v54, %v20433_v53  ;;  %v20643_v9 = vadd.f32 %v15066_v62, %v9339_v55  ;;  %15262 = vmatprep.subr.bf16.mxu0 %v15587_v61  ;;  %15302 = vmatprep.subr.bf16.mxu1 %v15588_v24 }
 0xa99   : > { %v15027_v51 = vpop.f32.mrf.mxu0  ;;  %v15067_v16 = vpop.f32.mrf.mxu1 }
 0xa9a   : > { %v9342_v7 = vadd.f32 %v15027_v51, %v20445_v63  ;;  %v20646_v30 = vadd.f32 %v9569_v45, %v9331_v1 }
 0xa9b   : > { %15263 = vmatpush3.bf16.msra.mxu0 %v15587_v61  ;;  %15303 = vmatpush3.bf16.msra.mxu1 %v15588_v24  ;;  %v20658_v25 = vpop.f32.mrf.mxu0  ;;  %v20660_v1 = vpop.f32.mrf.mxu1 }
 0xa9c   : > { %v20648_v13 = vadd.f32 %v15067_v16, %v9342_v7 }
 0xa9d   : > { %15193 = vmatmul.mubr.msk.bf16.gmra.mxu0 %vm3704_vm2, %v20341_v58  ;;  %15233 = vmatmul.mubr.msk.bf16.gmra.mxu1 %vm3704_vm2, %v20347_v2 }
 0xa9e   : > { %15196 = vmatprep.mubr.msk.bf16.mxu0 %vm3704_vm2, %v20349_v34  ;;  %15236 = vmatprep.mubr.msk.bf16.mxu1 %vm3704_vm2, %v20355_v43 }
 0xaa5   : > { %v15030_v53 = vpop.f32.mrf.mxu0  ;;  %15197 = vmatmul.mubr.msk.bf16.gmra.mxu0 %vm3704_vm2, %v20357_v26  ;;  %15237 = vmatmul.mubr.msk.bf16.gmra.mxu1 %vm3704_vm2, %v20363_v48  ;;  %v15070_v7 = vpop.f32.mrf.mxu1 }
 0xaa6   : > { %v9355_v2 = vadd.f32 %v15030_v53, %v20461_v46  ;;  %15200 = vmatprep.mubr.msk.bf16.mxu0 %vm3704_vm2, %v20365_v28  ;;  %15240 = vmatprep.mubr.msk.bf16.mxu1 %vm3704_vm2, %v20371_v33 }
 0xaa7   : > { %v9346_v43 = vpop.f32.mrf.mxu0  ;;  %v9585_v63 = vpop.f32.mrf.mxu1 }
 0xaa8   : > { %v9347_v62 = vadd.f32 %v9346_v43, %v20463_v42  ;;  %v20672_v45 = vadd.f32 %v15070_v7, %v9355_v2 }
 0xaa9   : > { %v15031_v31 = vpop.f32.mrf.mxu0  ;;  %v15071_v48 = vpop.f32.mrf.mxu1 }
 0xaaa   : > { %v9358_v14 = vadd.f32 %v15031_v31, %v20475_v50  ;;  %v20675_v61 = vadd.f32 %v9585_v63, %v9347_v62 }
 0xaab   : > { %v20687_v33 = vpop.f32.mrf.mxu0  ;;  %v20689_v46 = vpop.f32.mrf.mxu1 }
 0xaac   : > { %v20677_v24 = vadd.f32 %v15071_v48, %v9358_v14 }
 0xaad   : > { %15201 = vmatmul.mubr.msk.bf16.gmra.mxu0 %vm3704_vm2, %v20373_v39  ;;  %15241 = vmatmul.mubr.msk.bf16.gmra.mxu1 %vm3704_vm2, %v20379_v35 }
 0xaae   : > { %15204 = vmatprep.mubr.msk.bf16.mxu0 %vm3704_vm2, %v20381_v11  ;;  %15244 = vmatprep.mubr.msk.bf16.mxu1 %vm3704_vm2, %v20387_v37 }
 0xab5   : > { %v15034_v42 = vpop.f32.mrf.mxu0  ;;  %15205 = vmatmul.mubr.msk.bf16.gmra.mxu0 %vm3704_vm2, %v20389_v47  ;;  %15245 = vmatmul.mubr.msk.bf16.gmra.mxu1 %vm3704_vm2, %v20395_v5  ;;  %v15074_v50 = vpop.f32.mrf.mxu1 }
 0xab6   : > { %v9371_v35 = vadd.f32 %v15034_v42, %v20493_v6  ;;  %15208 = vmatprep.mubr.msk.bf16.mxu0 %vm3704_vm2, %v20397_v21  ;;  %15248 = vmatprep.mubr.msk.bf16.mxu1 %vm3704_vm2, %v20403_v40  ;;  %v13766_v40 = vadd.f32 %v20593_v20, %v20585_v29  ;;  %v13769_v6 = vadd.f32 %v20623_v27, %v20607_v36 }
 0xab7   : > { %v9362_v37 = vpop.f32.mrf.mxu0  ;;  %v9601_v55 = vpop.f32.mrf.mxu1 }
 0xab8   : > { %v9363_v54 = vadd.f32 %v9362_v37, %v20495_v12  ;;  %v20701_v51 = vadd.f32 %v15074_v50, %v9371_v35  ;;  %v20720_v12 = vpack.c.bf16 %v13769_v6, %v13766_v40  ;;  %v21702_v37 = vld [vmem:[#allocation43_spill] sm:$0xff] }
 0xab9   : > { %v15035_v16 = vpop.f32.mrf.mxu0  ;;  %v15075_v5 = vpop.f32.mrf.mxu1 }
 0xaba   : > { %v9374_v53 = vadd.f32 %v15035_v16, %v20503_v8  ;;  %v20704_v7 = vadd.f32 %v9601_v55, %v9363_v54 }
 0xabb   : > { %v20722_v8 = vpop.f32.mrf.mxu0  ;;  %v20724_v43 = vpop.f32.mrf.mxu1 }
 0xabc   : > { %v20706_v2 = vadd.f32 %v15075_v5, %v9374_v53  ;;  %v21703_v5 = vld [vmem:[#allocation21_spill] sm:$0xff] }
 0xabd   : > { %15209 = vmatmul.mubr.msk.bf16.gmra.mxu0 %vm3704_vm2, %v20405_v49  ;;  %15249 = vmatmul.mubr.msk.bf16.gmra.mxu1 %vm3704_vm2, %v20413_v32  ;;  %v21700_v32 = vmov 0  }
 0xabe   : > { %15212 = vmatprep.mubr.msk.bf16.mxu0 %vm3704_vm2, %v20415_v41  ;;  %15252 = vmatprep.mubr.msk.bf16.mxu1 %vm3704_vm2, %v20577_v56 }
 0xac5   : > { %v15038_v63 = vpop.f32.mrf.mxu0  ;;  %15213 = vmatmul.mubr.msk.bf16.gmra.mxu0 %vm3704_vm2, %v20720_v12  ;;  %15253 = vmatmul.mubr.bf16.gmra.mxu1 %v21700_v32  ;;  %v15078_v62 = vpop.f32.mrf.mxu1 }
 0xac6   : > { %v9387_v56 = vadd.f32 %v15038_v63, %v20511_v57  ;;  %15264 = vmatprep.mubr.msk.bf16.mxu0 %vm3704_vm2, %v19778_v60  ;;  %15304 = vmatprep.mubr.msk.bf16.mxu1 %vm3704_vm2, %v20291_v4 }
 0xac7   : > { %v9378_v29 = vpop.f32.mrf.mxu0  ;;  %v9617_v20 = vpop.f32.mrf.mxu1 }
 0xac8   : > { %v9379_v27 = vadd.f32 %v9378_v29, %v20513_v0  ;;  %v20735_v36 = vadd.f32 %v15078_v62, %v9387_v56  ;;  %v21704_v62 = vld [vmem:[#allocation17_spill] sm:$0xff]  ;;  %v21706_v56 = vld [vmem:[#allocation10_spill] sm:$0xff] }
 0xac9   : > { %v15039_v31 = vpop.f32.mrf.mxu0  ;;  %v15079_v14 = vpop.f32.mrf.mxu1 }
 0xaca   : > { %v9390_v48 = vadd.f32 %v15039_v31, %v20519_v23  ;;  %v20738_v42 = vadd.f32 %v9617_v20, %v9379_v27  ;;  %v21707_v20 = vld [vmem:[#allocation26_spill] sm:$0xff]  ;;  %v21708_v31 = vld [vmem:[#allocation7_spill] sm:$0xff] }
 0xacb   : > { %v9381_v50 = vpop.f32.mrf.mxu0  ;;  %v9620_v60 = vpop.f32.mrf.mxu1 }
 0xacc   : > { %v9382_v57 = vadd.f32 %v9381_v50, %v20525_v44  ;;  %v20741_v35 = vadd.f32 %v15079_v14, %v9390_v48 }
 0xacd   : > { %15265 = vmatmul.mubr.msk.bf16.vlgmr.msra.gmra.mxu0 %vm3704_vm2, %v19988_v3  ;;  %15305 = vmatmul.mubr.msk.bf16.vlgmr.msra.gmra.mxu1 %vm3704_vm2, %v20305_v59  ;;  %v21701_v3 = vld [vmem:[#allocation14_spill] sm:$0xff] }
 0xace   : > { %v20747_v4 = vadd.f32 %v9620_v60, %v9382_v57  ;;  %15268 = vmatprep.mubr.msk.bf16.mxu0 %vm3704_vm2, %v19793_v17  ;;  %15308 = vmatprep.mubr.msk.bf16.mxu1 %vm3704_vm2, %v20313_v15 }
 0xad5   : > { %v15042_v23 = vpop.f32.mrf.mxu0  ;;  %15269 = vmatmul.mubr.msk.bf16.gmra.mxu0 %vm3704_vm2, %v19817_v38  ;;  %15309 = vmatmul.mubr.msk.bf16.gmra.mxu1 %vm3704_vm2, %v20333_v10  ;;  %v15082_v44 = vpop.f32.mrf.mxu1 }
 0xad6   : > { %v9403_v0 = vadd.f32 %v15042_v23, %v21701_v3  ;;  %15272 = vmatprep.mubr.msk.bf16.mxu0 %vm3704_vm2, %v21702_v37  ;;  %15312 = vmatprep.mubr.msk.bf16.mxu1 %vm3704_vm2, %v20341_v58  ;;  %v21705_v58 = vld [vmem:[#allocation9_spill] sm:$0xff] }
 0xad7   : > { %v9394_v17 = vpop.f32.mrf.mxu0  ;;  %v9633_v59 = vpop.f32.mrf.mxu1 }
 0xad8   : > { %v9395_v15 = vadd.f32 %v9394_v17, %v20529_v18  ;;  %v20763_v55 = vadd.f32 %v15082_v44, %v9403_v0  ;;  %v21709_v44 = vld [vmem:[#allocation36_spill] sm:$0xff]  ;;  %v21710_v17 = vld [vmem:[#allocation22_spill] sm:$0xff] }
 0xad9   : > { %v15043_v54 = vpop.f32.mrf.mxu0  ;;  %v15083_v38 = vpop.f32.mrf.mxu1 }
 0xada   : > { %v9406_v16 = vadd.f32 %v15043_v54, %v20535_v22  ;;  %v20766_v10 = vadd.f32 %v9633_v59, %v9395_v15  ;;  %v21712_v59 = vld [vmem:[#allocation13_spill] sm:$0xff]  ;;  %v21713_v54 = vld [vmem:[#allocation16_spill] sm:$0xff] }
 0xadb   : > { %v9397_v53 = vpop.f32.mrf.mxu0  ;;  %v9636_v63 = vpop.f32.mrf.mxu1 }
 0xadc   : > { %v9398_v40 = vadd.f32 %v9397_v53, %v21703_v5  ;;  %v20769_v6 = vadd.f32 %v15083_v38, %v9406_v16  ;;  %v21714_v16 = vld [vmem:[#allocation27_spill] sm:$0xff]  ;;  %v21715_v5 = vld [vmem:[#allocation37_spill] sm:$0xff] }
 0xadd   : > { %15273 = vmatmul.mubr.msk.bf16.gmra.mxu0 %vm3704_vm2, %v21704_v62  ;;  %15313 = vmatmul.mubr.msk.bf16.gmra.mxu1 %vm3704_vm2, %v20349_v34 }
 0xade   : > { %v20775_v18 = vadd.f32 %v9636_v63, %v9398_v40  ;;  %15276 = vmatprep.mubr.msk.bf16.mxu0 %vm3704_vm2, %v21705_v58  ;;  %15316 = vmatprep.mubr.msk.bf16.mxu1 %vm3704_vm2, %v20357_v26  ;;  %v21716_v58 = vld [vmem:[#allocation38_spill] sm:$0xff] }
 0xae5   : > { %v15046_v22 = vpop.f32.mrf.mxu0  ;;  %15277 = vmatmul.mubr.msk.bf16.gmra.mxu0 %vm3704_vm2, %v21706_v56  ;;  %15317 = vmatmul.mubr.msk.bf16.gmra.mxu1 %vm3704_vm2, %v20365_v28  ;;  %v15086_v29 = vpop.f32.mrf.mxu1 }
 0xae6   : > { %v9419_v27 = vadd.f32 %v15046_v22, %v21707_v20  ;;  %15280 = vmatprep.mubr.msk.bf16.mxu0 %vm3704_vm2, %v21708_v31  ;;  %15320 = vmatprep.mubr.msk.bf16.mxu1 %vm3704_vm2, %v20373_v39 }
 0xae7   : > { %v9410_v34 = vpop.f32.mrf.mxu0  ;;  %v9649_v14 = vpop.f32.mrf.mxu1 }
 0xae8   : > { %v9411_v26 = vadd.f32 %v9410_v34, %v20545_v52  ;;  %v20791_v48 = vadd.f32 %v15086_v29, %v9419_v27  ;;  %v21711_v52 = vld [vmem:[#allocation24_spill] sm:$0xff]  ;;  %v21718_v34 = vld [vmem:[#allocation39_spill] sm:$0xff] }
 0xae9   : > { %v15047_v50 = vpop.f32.mrf.mxu0  ;;  %v15087_v57 = vpop.f32.mrf.mxu1  ;;  %v21717_v29 = vld [vmem:[#allocation12_spill] sm:$0xff] }
 0xaea   : > { %v9422_v60 = vadd.f32 %v15047_v50, %v20551_v19  ;;  %v20794_v28 = vadd.f32 %v9649_v14, %v9411_v26  ;;  %v21719_v14 = vld [vmem:[#allocation19_spill] sm:$0xff] }
 0xaeb   : > { %v9413_v23 = vpop.f32.mrf.mxu0  ;;  %v9652_v37 = vpop.f32.mrf.mxu1 }
 0xaec   : > { %v9414_v3 = vadd.f32 %v9413_v23, %v21709_v44  ;;  %v20797_v0 = vadd.f32 %v15087_v57, %v9422_v60  ;;  %v21720_v57 = vld [vmem:[#allocation23_spill] sm:$0xff] }
 0xaed   : > { %15281 = vmatmul.mubr.msk.bf16.gmra.mxu0 %vm3704_vm2, %v21710_v17  ;;  %15321 = vmatmul.mubr.msk.bf16.gmra.mxu1 %vm3704_vm2, %v20381_v11 }
 0xaee   : > { %v20803_v39 = vadd.f32 %v9652_v37, %v9414_v3  ;;  %15284 = vmatprep.mubr.msk.bf16.mxu0 %vm3704_vm2, %v21711_v52  ;;  %15324 = vmatprep.mubr.msk.bf16.mxu1 %vm3704_vm2, %v20389_v47 }
 0xaf5   : > { %v15050_v19 = vpop.f32.mrf.mxu0  ;;  %15285 = vmatmul.mubr.msk.bf16.gmra.mxu0 %vm3704_vm2, %v21712_v59  ;;  %15325 = vmatmul.mubr.msk.bf16.gmra.mxu1 %vm3704_vm2, %v20397_v21  ;;  %v15090_v15 = vpop.f32.mrf.mxu1  ;;  %v21722_v59 = vld [vmem:[#allocation40_spill] sm:$0xff] }
 0xaf6   : > { %v9435_v38 = vadd.f32 %v15050_v19, %v21713_v54  ;;  %15288 = vmatprep.mubr.msk.bf16.mxu0 %vm3704_vm2, %v21714_v16  ;;  %15328 = vmatprep.mubr.msk.bf16.mxu1 %vm3704_vm2, %v20405_v49  ;;  %v21723_v16 = vld [vmem:[#allocation32_spill] sm:$0xff] }
 0xaf7   : > { %v9426_v11 = vpop.f32.mrf.mxu0  ;;  %v9665_v53 = vpop.f32.mrf.mxu1 }
 0xaf8   : > { %v9427_v47 = vadd.f32 %v9426_v11, %v21715_v5  ;;  %v20819_v40 = vadd.f32 %v15090_v15, %v9435_v38  ;;  %v21724_v5 = vld [vmem:[#allocation35_spill] sm:$0xff] }
 0xaf9   : > { %v15051_v63 = vpop.f32.mrf.mxu0  ;;  %v15091_v62 = vpop.f32.mrf.mxu1 }
 0xafa   : > { %v9438_v22 = vadd.f32 %v15051_v63, %v21716_v58  ;;  %v20822_v21 = vadd.f32 %v9665_v53, %v9427_v47  ;;  %v9334_v47 = vadd.f32 %v20658_v25, %v21724_v5 }
 0xafb   : > { %v9429_v56 = vpop.f32.mrf.mxu0  ;;  %v9668_v31 = vpop.f32.mrf.mxu1 }
 0xafc   : > { %v9430_v20 = vadd.f32 %v9429_v56, %v21717_v29  ;;  %v20825_v27 = vadd.f32 %v15091_v62, %v9438_v22 }
 0xafd   : > { %15289 = vmatmul.mubr.msk.bf16.gmra.mxu0 %vm3704_vm2, %v21718_v34  ;;  %15329 = vmatmul.mubr.msk.bf16.gmra.mxu1 %vm3704_vm2, %v20415_v41  ;;  %v21721_v41 = vld [vmem:[#allocation30_spill] sm:$0xff]  ;;  %v9697_v34 = vadd.f32 %v20660_v1, %v9334_v47  ;;  %v21726_v47 = vld [vmem:[#allocation28_spill] sm:$0xff] }
 0xafe   : > { %v20831_v49 = vadd.f32 %v9668_v31, %v9430_v20  ;;  %15292 = vmatprep.mubr.msk.bf16.mxu0 %vm3704_vm2, %v21719_v14  ;;  %15332 = vmatprep.mubr.msk.bf16.mxu1 %vm3704_vm2, %v20720_v12 }
 0xb05   : > { %v15054_v26 = vpop.f32.mrf.mxu0  ;;  %v15094_v50 = vpop.f32.mrf.mxu1  ;;  %15293 = vmatmul.mubr.bf16.gmra.mxu0 %v21700_v32  ;;  %15333 = vmatmul.mubr.bf16.gmra.mxu1 %v21700_v32 }
 0xb06   : > { %v9451_v60 = vadd.f32 %v15054_v26, %v21720_v57 }
 0xb07   : > { %v9442_v23 = vpop.f32.mrf.mxu0  ;;  %v9681_v44 = vpop.f32.mrf.mxu1 }
 0xb08   : > { %v20840_v3 = vadd.f32 %v15094_v50, %v9451_v60  ;;  %v9443_v37 = vadd.f32 %v9442_v23, %v21721_v41 }
 0xb09   : > { %v15055_v17 = vpop.f32.mrf.mxu0  ;;  %v15095_v52 = vpop.f32.mrf.mxu1 }
 0xb0a   : > { %v20843_v19 = vadd.f32 %v9681_v44, %v9443_v37  ;;  %v9454_v12 = vadd.f32 %v15055_v17, %v21722_v59  ;;  %v21725_v44 = vld [vmem:[#allocation31_spill] sm:$0xff] }
 0xb0b   : > { %v9445_v15 = vpop.f32.mrf.mxu0  ;;  %v9684_v54 = vpop.f32.mrf.mxu1  ;;  %v9350_v41 = vadd.f32 %v20687_v33, %v21725_v44 }
 0xb0c   : > { %v20846_v38 = vadd.f32 %v15095_v52, %v9454_v12  ;;  %v9446_v32 = vadd.f32 %v9445_v15, %v21723_v16 }
 0xb0d   : > { %v15106_v11 = vpop.f32.mrf.mxu0  ;;  %v15146_v53 = vpop.f32.mrf.mxu1  ;;  %v9701_v15 = vadd.f32 %v20689_v46, %v9350_v41 }
 0xb0e   : > { %v20851_v63 = vadd.f32 %v9684_v54, %v9446_v32  ;;  %v9927_v62 = vadd.f32 %v15106_v11, %v20643_v9 }
 0xb0f   : > { %v9798_v58 = vpop.f32.mrf.mxu0  ;;  %v10027_v22 = vpop.f32.mrf.mxu1 }
 0xb10   : > { %v20854_v56 = vadd.f32 %v15146_v53, %v9927_v62  ;;  %v9925_v29 = vadd.f32 %v9798_v58, %v20646_v30  ;;  %v9366_v62 = vadd.f32 %v20722_v8, %v21726_v47 }
 0xb11   : > { %v15107_v20 = vpop.f32.mrf.mxu0  ;;  %v15147_v31 = vpop.f32.mrf.mxu1 }
 0xb12   : > { %v20858_v14 = vadd.f32 %v10027_v22, %v9925_v29  ;;  %v9928_v26 = vadd.f32 %v15107_v20, %v20648_v13 }
 0xb13   : > { %v9801_v50 = vpop.f32.mrf.mxu0  ;;  %v10030_v25 = vpop.f32.mrf.mxu1 }
 0xb14   : > { %v20861_v57 = vadd.f32 %v15147_v31, %v9928_v26  ;;  %v9926_v60 = vadd.f32 %v9801_v50, %v9697_v34  ;;  %v9705_v34 = vadd.f32 %v20724_v43, %v9366_v62 }
 0xb15   : > { %v15110_v9 = vpop.f32.mrf.mxu0  ;;  %v15150_v23 = vpop.f32.mrf.mxu1 }
 0xb16   : > { %v20865_v37 = vadd.f32 %v10030_v25, %v9926_v60  ;;  %v9931_v30 = vadd.f32 %v15110_v9, %v20672_v45 }
 0xb17   : > { %v9814_v17 = vpop.f32.mrf.mxu0  ;;  %v10043_v1 = vpop.f32.mrf.mxu1 }
 0xb18   : > { %v20868_v52 = vadd.f32 %v15150_v23, %v9931_v30  ;;  %v9929_v13 = vadd.f32 %v9814_v17, %v20675_v61 }
 0xb19   : > { %v15111_v59 = vpop.f32.mrf.mxu0  ;;  %v15151_v12 = vpop.f32.mrf.mxu1 }
 0xb1a   : > { %v20872_v54 = vadd.f32 %v10043_v1, %v9929_v13  ;;  %v9932_v16 = vadd.f32 %v15111_v59, %v20677_v24 }
 0xb1b   : > { %v9817_v32 = vpop.f32.mrf.mxu0  ;;  %v10046_v33 = vpop.f32.mrf.mxu1 }
 0xb1c   : > { %v20875_v11 = vadd.f32 %v15151_v12, %v9932_v16  ;;  %v9930_v53 = vadd.f32 %v9817_v32, %v9701_v15 }
 0xb1d   : > { %v15114_v45 = vpop.f32.mrf.mxu0  ;;  %v15154_v5 = vpop.f32.mrf.mxu1 }
 0xb1e   : > { %v20879_v58 = vadd.f32 %v10046_v33, %v9930_v53  ;;  %v9935_v61 = vadd.f32 %v15114_v45, %v20701_v51 }
 0xb1f   : > { %v9830_v22 = vpop.f32.mrf.mxu0  ;;  %v10059_v46 = vpop.f32.mrf.mxu1 }
 0xb20   : > { %v20882_v29 = vadd.f32 %v15154_v5, %v9935_v61  ;;  %v9933_v24 = vadd.f32 %v9830_v22, %v20704_v7 }
 0xb21   : > { %v15115_v20 = vpop.f32.mrf.mxu0  ;;  %v15155_v31 = vpop.f32.mrf.mxu1 }
 0xb22   : > { %v20886_v26 = vadd.f32 %v10059_v46, %v9933_v24  ;;  %v9936_v50 = vadd.f32 %v15115_v20, %v20706_v2 }
 0xb23   : > { %v9833_v25 = vpop.f32.mrf.mxu0  ;;  %v10062_v8 = vpop.f32.mrf.mxu1 }
 0xb24   : > { %v20889_v60 = vadd.f32 %v15155_v31, %v9936_v50  ;;  %v9934_v9 = vadd.f32 %v9833_v25, %v9705_v34 }
 0xb25   : > { %v15118_v51 = vpop.f32.mrf.mxu0  ;;  %v15158_v23 = vpop.f32.mrf.mxu1 }
 0xb26   : > { %v20891_v44 = vadd.f32 %v10062_v8, %v9934_v9  ;;  %v9939_v41 = vadd.f32 %v15118_v51, %v20735_v36 }
 0xb27   : > { %v9846_v7 = vpop.f32.mrf.mxu0  ;;  %v10075_v30 = vpop.f32.mrf.mxu1 }
 0xb28   : > { %v20894_v17 = vadd.f32 %v15158_v23, %v9939_v41  ;;  %v9937_v43 = vadd.f32 %v9846_v7, %v20738_v42 }
 0xb29   : > { %v15119_v1 = vpop.f32.mrf.mxu0  ;;  %v15159_v13 = vpop.f32.mrf.mxu1 }
 0xb2a   : > { %v20897_v2 = vadd.f32 %v10075_v30, %v9937_v43  ;;  %v9940_v59 = vadd.f32 %v15119_v1, %v20741_v35 }
 0xb2b   : > { %v9849_v12 = vpop.f32.mrf.mxu0  ;;  %v10078_v15 = vpop.f32.mrf.mxu1 }
 0xb2c   : > { %v20900_v16 = vadd.f32 %v15159_v13, %v9940_v59  ;;  %v9938_v32 = vadd.f32 %v9849_v12, %v20747_v4 }
 0xb2d   : > { %v15122_v33 = vpop.f32.mrf.mxu0  ;;  %v15162_v36 = vpop.f32.mrf.mxu1 }
 0xb2e   : > { %v20903_v53 = vadd.f32 %v10078_v15, %v9938_v32  ;;  %v9943_v45 = vadd.f32 %v15122_v33, %v20763_v55 }
 0xb2f   : > { %v9862_v5 = vpop.f32.mrf.mxu0  ;;  %v10091_v42 = vpop.f32.mrf.mxu1 }
 0xb30   : > { %v20906_v47 = vadd.f32 %v15162_v36, %v9943_v45  ;;  %v9941_v62 = vadd.f32 %v9862_v5, %v20766_v10 }
 0xb31   : > { %v15123_v61 = vpop.f32.mrf.mxu0  ;;  %v15163_v35 = vpop.f32.mrf.mxu1 }
 0xb32   : > { %v20909_v22 = vadd.f32 %v10091_v42, %v9941_v62  ;;  %v9944_v46 = vadd.f32 %v15123_v61, %v20769_v6 }
 0xb33   : > { %v9865_v24 = vpop.f32.mrf.mxu0  ;;  %v10094_v4 = vpop.f32.mrf.mxu1 }
 0xb34   : > { %v20912_v20 = vadd.f32 %v15163_v35, %v9944_v46  ;;  %v9942_v31 = vadd.f32 %v9865_v24, %v20775_v18 }
 0xb35   : > { %v15126_v34 = vpop.f32.mrf.mxu0  ;;  %v15166_v55 = vpop.f32.mrf.mxu1 }
 0xb36   : > { %v20915_v50 = vadd.f32 %v10094_v4, %v9942_v31  ;;  %v9947_v25 = vadd.f32 %v15126_v34, %v20791_v48 }
 0xb37   : > { %v9878_v8 = vpop.f32.mrf.mxu0  ;;  %v10107_v10 = vpop.f32.mrf.mxu1 }
 0xb38   : > { %v20918_v9 = vadd.f32 %v15166_v55, %v9947_v25  ;;  %v9945_v51 = vadd.f32 %v9878_v8, %v20794_v28 }
 0xb39   : > { %v15127_v23 = vpop.f32.mrf.mxu0  ;;  %v15167_v6 = vpop.f32.mrf.mxu1 }
 0xb3a   : > { %v20921_v41 = vadd.f32 %v10107_v10, %v9945_v51  ;;  %v9948_v7 = vadd.f32 %v15127_v23, %v20797_v0 }
 0xb3b   : > { %v9881_v30 = vpop.f32.mrf.mxu0  ;;  %v10110_v18 = vpop.f32.mrf.mxu1 }
 0xb3c   : > { %v20924_v43 = vadd.f32 %v15167_v6, %v9948_v7  ;;  %v9946_v1 = vadd.f32 %v9881_v30, %v20803_v39 }
 0xb3d   : > { %v15130_v13 = vpop.f32.mrf.mxu0  ;;  %v15170_v48 = vpop.f32.mrf.mxu1 }
 0xb3e   : > { %v20927_v59 = vadd.f32 %v10110_v18, %v9946_v1  ;;  %v9951_v12 = vadd.f32 %v15130_v13, %v20819_v40 }
 0xb3f   : > { %v9894_v15 = vpop.f32.mrf.mxu0  ;;  %v10123_v28 = vpop.f32.mrf.mxu1 }
 0xb40   : > { %v20930_v32 = vadd.f32 %v15170_v48, %v9951_v12  ;;  %v9949_v33 = vadd.f32 %v9894_v15, %v20822_v21 }
 0xb41   : > { %v15131_v36 = vpop.f32.mrf.mxu0  ;;  %v15171_v0 = vpop.f32.mrf.mxu1 }
 0xb42   : > { %v20933_v45 = vadd.f32 %v10123_v28, %v9949_v33  ;;  %v9952_v5 = vadd.f32 %v15131_v36, %v20825_v27 }
 0xb43   : > { %v9897_v42 = vpop.f32.mrf.mxu0  ;;  %v10126_v39 = vpop.f32.mrf.mxu1 }
 0xb44   : > { %v20936_v62 = vadd.f32 %v15171_v0, %v9952_v5  ;;  %v9950_v61 = vadd.f32 %v9897_v42, %v20831_v49 }
 0xb45   : > { %v15134_v35 = vpop.f32.mrf.mxu0  ;;  %v15174_v40 = vpop.f32.mrf.mxu1 }
 0xb46   : > { %v20939_v46 = vadd.f32 %v10126_v39, %v9950_v61  ;;  %v9955_v24 = vadd.f32 %v15134_v35, %v20840_v3 }
 0xb47   : > { %v9910_v4 = vpop.f32.mrf.mxu0  ;;  %v10139_v21 = vpop.f32.mrf.mxu1 }
 0xb48   : > { %v20942_v31 = vadd.f32 %v15174_v40, %v9955_v24  ;;  %v9953_v34 = vadd.f32 %v9910_v4, %v20843_v19 }
 0xb49   : > { %v15135_v55 = vpop.f32.mrf.mxu0  ;;  %v15175_v27 = vpop.f32.mrf.mxu1 }
 0xb4a   : > { %v20945_v25 = vadd.f32 %v10139_v21, %v9953_v34  ;;  %v9956_v8 = vadd.f32 %v15135_v55, %v20846_v38 }
 0xb4b   : > { %v9913_v10 = vpop.f32.mrf.mxu0  ;;  %v10142_v49 = vpop.f32.mrf.mxu1 }
 0xb4c   : > { %v20948_v51 = vadd.f32 %v15175_v27, %v9956_v8  ;;  %v9954_v23 = vadd.f32 %v9913_v10, %v20851_v63 }
 0xb4d   : > { %v15186_v6 = vpop.f32.mrf.mxu0  ;;  %v15226_v3 = vpop.f32.mrf.mxu1 }
 0xb4e   : > { %v20951_v7 = vadd.f32 %v10142_v49, %v9954_v23  ;;  %v10385_v30 = vadd.f32 %v15186_v6, %v20854_v56 }
 0xb4f   : > { %v10256_v18 = vpop.f32.mrf.mxu0  ;;  %v10482_v19 = vpop.f32.mrf.mxu1 }
 0xb50   : > { %21727 = vst [vmem:[#allocation42_spill] sm:$0xff] %v20951_v7  ;;  %v20954_v1 = vadd.f32 %v15226_v3, %v10385_v30  ;;  %v10383_v13 = vadd.f32 %v10256_v18, %v20858_v14 }
 0xb51   : > { %v15187_v48 = vpop.f32.mrf.mxu0  ;;  %v15227_v38 = vpop.f32.mrf.mxu1 }
 0xb52   : > { %v20957_v12 = vadd.f32 %v10482_v19, %v10383_v13  ;;  %v10386_v15 = vadd.f32 %v15187_v48, %v20861_v57 }
 0xb53   : > { %v20960_v28 = vpop.f32.mrf.mxu0  ;;  %v20962_v63 = vpop.f32.mrf.mxu1 }
 0xb54   : > { %v20964_v33 = vadd.f32 %v15227_v38, %v10386_v15 }
 0xb55   : > { %v15190_v36 = vpop.f32.mrf.mxu0  ;;  %v15230_v56 = vpop.f32.mrf.mxu1 }
 0xb56   : > { %v10389_v0 = vadd.f32 %v15190_v36, %v20868_v52 }
 0xb57   : > { %v20967_v5 = vpop.f32.mrf.mxu0  ;;  %v20969_v42 = vpop.f32.mrf.mxu1 }
 0xb58   : > { %v20971_v14 = vadd.f32 %v15230_v56, %v10389_v0 }
 0xb59   : > { %v15191_v39 = vpop.f32.mrf.mxu0  ;;  %v15231_v61 = vpop.f32.mrf.mxu1 }
 0xb5a   : > { %v10390_v57 = vadd.f32 %v15191_v39, %v20875_v11 }
 0xb5b   : > { %v20974_v35 = vpop.f32.mrf.mxu0  ;;  %v20976_v40 = vpop.f32.mrf.mxu1 }
 0xb5c   : > { %v20978_v24 = vadd.f32 %v15231_v61, %v10390_v57 }
 0xb5d   : > { %v15194_v4 = vpop.f32.mrf.mxu0  ;;  %v15234_v21 = vpop.f32.mrf.mxu1 }
 0xb5e   : > { %v10393_v52 = vadd.f32 %v15194_v4, %v20882_v29 }
 0xb5f   : > { %v20981_v34 = vpop.f32.mrf.mxu0  ;;  %v20983_v55 = vpop.f32.mrf.mxu1 }
 0xb60   : > { %v20985_v27 = vadd.f32 %v15234_v21, %v10393_v52 }
 0xb61   : > { %v15195_v8 = vpop.f32.mrf.mxu0  ;;  %v15235_v10 = vpop.f32.mrf.mxu1 }
 0xb62   : > { %v10394_v11 = vadd.f32 %v15195_v8, %v20889_v60 }
 0xb63   : > { %v20988_v49 = vpop.f32.mrf.mxu0  ;;  %v20990_v23 = vpop.f32.mrf.mxu1 }
 0xb64   : > { %v20992_v6 = vadd.f32 %v15235_v10, %v10394_v11 }
 0xb65   : > { %v15198_v3 = vpop.f32.mrf.mxu0  ;;  %v15238_v30 = vpop.f32.mrf.mxu1 }
 0xb66   : > { %v10397_v29 = vadd.f32 %v15198_v3, %v20894_v17 }
 0xb67   : > { %v20995_v18 = vpop.f32.mrf.mxu0  ;;  %v20997_v19 = vpop.f32.mrf.mxu1 }
 0xb68   : > { %v20999_v13 = vadd.f32 %v15238_v30, %v10397_v29 }
 0xb69   : > { %v15199_v48 = vpop.f32.mrf.mxu0  ;;  %v15239_v38 = vpop.f32.mrf.mxu1 }
 0xb6a   : > { %v10398_v60 = vadd.f32 %v15199_v48, %v20900_v16 }
 0xb6b   : > { %v21002_v15 = vpop.f32.mrf.mxu0  ;;  %v21004_v36 = vpop.f32.mrf.mxu1 }
 0xb6c   : > { %v21006_v56 = vadd.f32 %v15239_v38, %v10398_v60 }
 0xb6d   : > { %v15202_v0 = vpop.f32.mrf.mxu0  ;;  %v15242_v39 = vpop.f32.mrf.mxu1 }
 0xb6e   : > { %21728 = vst [vmem:[#allocation11_spill] sm:$0xff] %v21006_v56  ;;  %v10401_v17 = vadd.f32 %v15202_v0, %v20906_v47 }
 0xb6f   : > { %v21009_v61 = vpop.f32.mrf.mxu0  ;;  %v21011_v57 = vpop.f32.mrf.mxu1 }
 0xb70   : > { %v21013_v4 = vadd.f32 %v15242_v39, %v10401_v17 }
 0xb71   : > { %v15203_v21 = vpop.f32.mrf.mxu0  ;;  %v15243_v52 = vpop.f32.mrf.mxu1 }
 0xb72   : > { %21729 = vst [vmem:[#allocation20_spill] sm:$0xff] %v21013_v4  ;;  %v10402_v16 = vadd.f32 %v15203_v21, %v20912_v20 }
 0xb73   : > { %v10323_v8 = vpop.f32.mrf.mxu0  ;;  %v21016_v10 = vpop.f32.mrf.mxu1 }
 0xb74   : > { %v21018_v11 = vadd.f32 %v15243_v52, %v10402_v16 }
 0xb75   : > { %v15206_v3 = vpop.f32.mrf.mxu0  ;;  %v15246_v30 = vpop.f32.mrf.mxu1 }
 0xb76   : > { %21730 = vst [vmem:[#allocation8_spill] sm:$0xff] %v21018_v11  ;;  %v10405_v29 = vadd.f32 %v15206_v3, %v20918_v9 }
 0xb77   : > { %v10336_v47 = vpop.f32.mrf.mxu0  ;;  %v21021_v48 = vpop.f32.mrf.mxu1 }
 0xb78   : > { %v21023_v38 = vadd.f32 %v15246_v30, %v10405_v29 }
 0xb79   : > { %v15207_v60 = vpop.f32.mrf.mxu0  ;;  %v15247_v0 = vpop.f32.mrf.mxu1 }
 0xb7a   : > { %21731 = vst [vmem:[#allocation41_spill] sm:$0xff] %v21023_v38  ;;  %v10406_v39 = vadd.f32 %v15207_v60, %v20924_v43 }
 0xb7b   : > { %v10339_v17 = vpop.f32.mrf.mxu0  ;;  %v21026_v20 = vpop.f32.mrf.mxu1 }
 0xb7c   : > { %v21028_v21 = vadd.f32 %v15247_v0, %v10406_v39 }
 0xb7d   : > { %v15210_v52 = vpop.f32.mrf.mxu0  ;;  %v15250_v16 = vpop.f32.mrf.mxu1 }
 0xb7e   : > { %21732 = vst [vmem:[#allocation18_spill] sm:$0xff] %v21028_v21  ;;  %v10409_v7 = vadd.f32 %v15210_v52, %v20930_v32 }
 0xb7f   : > { %v10352_v11 = vpop.f32.mrf.mxu0  ;;  %v21031_v9 = vpop.f32.mrf.mxu1 }
 0xb80   : > { %v21033_v3 = vadd.f32 %v15250_v16, %v10409_v7 }
 0xb81   : > { %v15211_v30 = vpop.f32.mrf.mxu0  ;;  %v15251_v29 = vpop.f32.mrf.mxu1 }
 0xb82   : > { %21733 = vst [vmem:[#allocation34_spill] sm:$0xff] %v21033_v3  ;;  %v10410_v38 = vadd.f32 %v15211_v30, %v20936_v62 }
 0xb83   : > { %v21036_v4 = vpop.f32.mrf.mxu0  ;;  %v21038_v43 = vpop.f32.mrf.mxu1 }
 0xb84   : > { %v21040_v60 = vadd.f32 %v15251_v29, %v10410_v38  ;;  %v10384_v38 = vadd.f32 %v20960_v28, %v20865_v37  ;;  %v10387_v37 = vadd.f32 %v20967_v5, %v20872_v54  ;;  %v10388_v28 = vadd.f32 %v20974_v35, %v20879_v58  ;;  %v21087_v5 = vld [vmem:[%s21278_s13] ss:$0 sm:$0xff] }
 0xb85   : > { %v15214_v0 = vpop.f32.mrf.mxu0  ;;  %v15254_v39 = vpop.f32.mrf.mxu1  ;;  %v10396_v54 = vadd.f32 %v21002_v15, %v20903_v53  ;;  %v10399_v58 = vadd.f32 %v21009_v61, %v20909_v22 }
 0xb86   : > { %21734 = vst [vmem:[#allocation25_spill] sm:$0xff] %v21040_v60  ;;  %v10413_v21 = vadd.f32 %v15214_v0, %v20942_v31  ;;  %v10614_v22 = vadd.f32 %v20976_v40, %v10388_v28 }
 0xb87   : > { %v21043_v32 = vpop.f32.mrf.mxu0  ;;  %v21045_v52 = vpop.f32.mrf.mxu1 }
 0xb88   : > { %v21047_v7 = vadd.f32 %v15254_v39, %v10413_v21  ;;  %v21062_v21 = vld [vmem:[%s21277_s12] ss:$0 sm:$0xff] }
 0xb89   : > { %v15215_v16 = vpop.f32.mrf.mxu0  ;;  %v15255_v3 = vpop.f32.mrf.mxu1 }
 0xb8a   : > { %21735 = vst [vmem:[#allocation15_spill] sm:$0xff] %v21047_v7  ;;  %v10414_v62 = vadd.f32 %v15215_v16, %v20948_v51  ;;  %v10610_v16 = vadd.f32 %v20962_v63, %v10384_v38  ;;  %v10395_v63 = vadd.f32 %v20995_v18, %v20897_v2  ;;  %v10613_v18 = vadd.f32 %v20969_v42, %v10387_v37 }
 0xb8b   : > { %v21050_v30 = vpop.f32.mrf.mxu0  ;;  %v21052_v56 = vpop.f32.mrf.mxu1  ;;  %v21104_v42 = vadd.f32 %v21004_v36, %v10396_v54 }
 0xb8c   : > { %21736 = vst [vmem:[#allocation29_spill] sm:$0xff] %v21052_v56  ;;  %v21056_v29 = vadd.f32 %v15255_v3, %v10414_v62  ;;  %v10392_v3 = vadd.f32 %v20988_v49, %v20891_v44  ;;  %v10403_v44 = vadd.f32 %v10336_v47, %v20921_v41  ;;  %v21098_v61 = vadd.f32 %v20997_v19, %v10395_v63 }
 0xb8d   : > { %v15266_v31 = vpop.f32.mrf.mxu0  ;;  %v15306_v0 = vpop.f32.mrf.mxu1 }
 0xb8e   : > { %v10837_v60 = vadd.f32 %v15266_v31, %v20954_v1  ;;  %v10391_v1 = vadd.f32 %v20981_v34, %v20886_v26  ;;  %v10400_v26 = vadd.f32 %v10323_v8, %v20915_v50  ;;  %v10404_v34 = vadd.f32 %v10339_v17, %v20927_v59 }
 0xb8f   : > { %v10708_v39 = vpop.f32.mrf.mxu0  ;;  %v10934_v51 = vpop.f32.mrf.mxu1  ;;  %v21095_v41 = vadd.f32 %v20990_v23, %v10392_v3  ;;  %v10407_v59 = vadd.f32 %v10352_v11, %v20933_v45  ;;  %v21115_v45 = vadd.f32 %v21021_v48, %v10403_v44 }
 0xb90   : > { %v11063_v7 = vadd.f32 %v15306_v0, %v10837_v60  ;;  %v10835_v56 = vadd.f32 %v10708_v39, %v20957_v12  ;;  %v10617_v50 = vadd.f32 %v20983_v55, %v10391_v1  ;;  %v21109_v0 = vadd.f32 %v21011_v57, %v10399_v58 }
 0xb91   : > { %v15267_v62 = vpop.f32.mrf.mxu0  ;;  %v15307_v31 = vpop.f32.mrf.mxu1  ;;  %v21112_v19 = vadd.f32 %v21016_v10, %v10400_v26  ;;  %v21118_v11 = vadd.f32 %v21026_v20, %v10404_v34  ;;  %v21123_v57 = vadd.f32 %v21031_v9, %v10407_v59  ;;  %v21127_v10 = vadd.f32 %v21036_v4, %v20939_v46 }
 0xb92   : > { %v11102_v60 = vmul.f32 %v21062_v21, %v11063_v7  ;;  %v11061_v12 = vadd.f32 %v10934_v51, %v10835_v56  ;;  %v10838_v38 = vadd.f32 %v15267_v62, %v20964_v33 }
 0xb93   : > { %v10711_v2 = vpop.f32.mrf.mxu0  ;;  %v10937_v35 = vpop.f32.mrf.mxu1 }
 0xb94   : > { %v11100_v33 = vmul.f32 %v21062_v21, %v11061_v12  ;;  %v11064_v49 = vadd.f32 %v15307_v31, %v10838_v38  ;;  %v10836_v53 = vadd.f32 %v10711_v2, %v10610_v16  ;;  %v11141_v8 = vadd.f32 %v21087_v5, %v11102_v60 }
 0xb95   : > { %v15270_v15 = vpop.f32.mrf.mxu0  ;;  %v15310_v56 = vpop.f32.mrf.mxu1 }
 0xb96   : > { %v11103_v47 = vmul.f32 %v21062_v21, %v11064_v49  ;;  %v11139_v40 = vadd.f32 %v21087_v5, %v11100_v33  ;;  %v11062_v55 = vadd.f32 %v10937_v35, %v10836_v53  ;;  %v10841_v23 = vadd.f32 %v15270_v15, %v20971_v14 }
 0xb97   : > { %v10724_v17 = vpop.f32.mrf.mxu0  ;;  %v10950_v7 = vpop.f32.mrf.mxu1  ;;  %vm11173_vm2 = vcmp.ge.f32.partialorder %v11141_v8, 0.0  ;;  %v11205_v63 = vmul.f32 0.01, %v11141_v8  ;;  %v10411_v53 = vadd.f32 %v21043_v32, %v20945_v25 }
 0xb98   : > { %v11142_v36 = vadd.f32 %v21087_v5, %v11103_v47  ;;  %v11101_v39 = vmul.f32 %v21062_v21, %v11062_v55  ;;  %v11067_v51 = vadd.f32 %v15310_v56, %v10841_v23  ;;  %v10839_v14 = vadd.f32 %v10724_v17, %v10613_v18 }
 0xb99   : > { %v15271_v16 = vpop.f32.mrf.mxu0  ;;  %v15311_v37 = vpop.f32.mrf.mxu1  ;;  %v11203_v20 = vmul.f32 0.01, %v11139_v40  ;;  %vm11171_vm7 = vcmp.ge.f32.partialorder %v11139_v40, 0.0  ;;  %v11237_v56 = vsel %vm11173_vm2, %v11141_v8, %v11205_v63 }
 0xb9a   : > { %v10842_v48 = vadd.f32 %v15271_v16, %v20978_v24  ;;  %v11140_v28 = vadd.f32 %v21087_v5, %v11101_v39  ;;  %v11106_v1 = vmul.f32 %v21062_v21, %v11067_v51  ;;  %v11065_v3 = vadd.f32 %v10950_v7, %v10839_v14 }
 0xb9b   : > { %v10727_v62 = vpop.f32.mrf.mxu0  ;;  %v10953_v31 = vpop.f32.mrf.mxu1  ;;  %v11206_v12 = vmul.f32 0.01, %v11142_v36  ;;  %vm11174_vm9 = vcmp.ge.f32.partialorder %v11142_v36, 0.0  ;;  %v11235_v44 = vsel %vm11171_vm7, %v11139_v40, %v11203_v20 }
 0xb9c   : > { %v11068_v60 = vadd.f32 %v15311_v37, %v10842_v48  ;;  %v10840_v9 = vadd.f32 %v10727_v62, %v10614_v22  ;;  %vm11172_vm8 = vcmp.ge.f32.partialorder %v11140_v28, 0.0  ;;  %v11204_v38 = vmul.f32 0.01, %v11140_v28 }
 0xb9d   : > { %v11104_v46 = vmul.f32 %v21062_v21, %v11065_v3  ;;  %v15274_v4 = vpop.f32.mrf.mxu0  ;;  %v15314_v54 = vpop.f32.mrf.mxu1  ;;  %v11145_v35 = vadd.f32 %v21087_v5, %v11106_v1  ;;  %v11238_v59 = vsel %vm11174_vm9, %v11142_v36, %v11206_v12 }
 0xb9e   : > { %v11107_v24 = vmul.f32 %v21062_v21, %v11068_v60  ;;  %v11066_v58 = vadd.f32 %v10953_v31, %v10840_v9  ;;  %v10845_v26 = vadd.f32 %v15274_v4, %v20985_v27  ;;  %v11236_v2 = vsel %vm11172_vm8, %v11140_v28, %v11204_v38 }
 0xb9f   : > { %v11143_v34 = vadd.f32 %v21087_v5, %v11104_v46  ;;  %v10740_v33 = vpop.f32.mrf.mxu0  ;;  %v10966_v49 = vpop.f32.mrf.mxu1  ;;  %v11267_v18 = vadd.f32 %v11236_v2, %v11235_v44  ;;  %vm11177_vm11 = vcmp.ge.f32.partialorder %v11145_v35, 0.0  ;;  %v11209_v8 = vmul.f32 0.01, %v11145_v35 }
 0xba0   : > { %v11105_v22 = vmul.f32 %v21062_v21, %v11066_v58  ;;  %v11071_v15 = vadd.f32 %v15314_v54, %v10845_v26  ;;  %v10843_v27 = vadd.f32 %v10740_v33, %v10617_v50  ;;  %v11146_v17 = vadd.f32 %v21087_v5, %v11107_v24 }
 0xba1   : > { %v11207_v47 = vmul.f32 0.01, %v11143_v34  ;;  %v15275_v40 = vpop.f32.mrf.mxu0  ;;  %v15315_v55 = vpop.f32.mrf.mxu1  ;;  %v11268_v23 = vadd.f32 %v11267_v18, %v11237_v56  ;;  %vm11175_vm10 = vcmp.ge.f32.partialorder %v11143_v34, 0.0  ;;  %v21154_v24 = vadd.f32 %v21038_v43, %v21127_v10  ;;  %v21737_v10 = vld [vmem:[#allocation11_spill] sm:$0xff] }
 0xba2   : > { %v11144_v7 = vadd.f32 %v21087_v5, %v11105_v22  ;;  %v11110_v25 = vmul.f32 %v21062_v21, %v11071_v15  ;;  %v11069_v32 = vadd.f32 %v10966_v49, %v10843_v27  ;;  %v10846_v39 = vadd.f32 %v15275_v40, %v20992_v6 }
 0xba3   : > { %v10743_v51 = vpop.f32.mrf.mxu0  ;;  %v10969_v14 = vpop.f32.mrf.mxu1  ;;  %v11269_v36 = vadd.f32 %v11268_v23, %v11238_v59  ;;  %v11239_v16 = vsel %vm11175_vm10, %v11143_v34, %v11207_v47  ;;  %vm11178_vm13 = vcmp.ge.f32.partialorder %v11146_v17, 0.0  ;;  %v11210_v6 = vmul.f32 0.01, %v11146_v17 }
 0xba4   : > { %vm11176_vm12 = vcmp.ge.f32.partialorder %v11144_v7, 0.0  ;;  %v11208_v50 = vmul.f32 0.01, %v11144_v7  ;;  %v11108_v37 = vmul.f32 %v21062_v21, %v11069_v32  ;;  %v11072_v48 = vadd.f32 %v15315_v55, %v10846_v39 }
 0xba5   : > { %v10844_v20 = vadd.f32 %v10743_v51, %v21095_v41  ;;  %v15278_v28 = vpop.f32.mrf.mxu0  ;;  %v15318_v1 = vpop.f32.mrf.mxu1  ;;  %v11270_v3 = vadd.f32 %v11269_v36, %v11239_v16  ;;  %v11149_v63 = vadd.f32 %v21087_v5, %v11110_v25  ;;  %v21160_v18 = vadd.f32 %v21045_v52, %v10411_v53  ;;  %v21738_v16 = vld [vmem:[#allocation20_spill] sm:$0xff] }
 0xba6   : > { %v11240_v62 = vsel %vm11176_vm12, %v11144_v7, %v11208_v50  ;;  %v10849_v31 = vadd.f32 %v15278_v28, %v20999_v13  ;;  %v11147_v60 = vadd.f32 %v21087_v5, %v11108_v37  ;;  %v11111_v9 = vmul.f32 %v21062_v21, %v11072_v48 }
 0xba7   : > { %v10756_v12 = vpop.f32.mrf.mxu0  ;;  %v10982_v38 = vpop.f32.mrf.mxu1  ;;  %v11271_v46 = vadd.f32 %v11270_v3, %v11240_v62  ;;  %v11070_v4 = vadd.f32 %v10969_v14, %v10844_v20  ;;  %v11241_v13 = vsel %vm11177_vm11, %v11145_v35, %v11209_v8  ;;  %vm11181_vm15 = vcmp.ge.f32.partialorder %v11149_v63, 0.0 }
 0xba8   : > { %v11075_v54 = vadd.f32 %v15318_v1, %v10849_v31  ;;  %v10847_v41 = vadd.f32 %v10756_v12, %v21098_v61  ;;  %vm11179_vm14 = vcmp.ge.f32.partialorder %v11147_v60, 0.0  ;;  %v11211_v58 = vmul.f32 0.01, %v11147_v60 }
 0xba9   : > { %v15279_v26 = vpop.f32.mrf.mxu0  ;;  %v15319_v44 = vpop.f32.mrf.mxu1  ;;  %v11272_v2 = vadd.f32 %v11271_v46, %v11241_v13  ;;  %v11150_v34 = vadd.f32 %v21087_v5, %v11111_v9  ;;  %v11109_v33 = vmul.f32 %v21062_v21, %v11070_v4  ;;  %v11242_v61 = vsel %vm11178_vm13, %v11146_v17, %v11210_v6 }
 0xbaa   : > { %v11073_v49 = vadd.f32 %v10982_v38, %v10847_v41  ;;  %v11114_v43 = vmul.f32 %v21062_v21, %v11075_v54  ;;  %v10850_v22 = vadd.f32 %v15279_v26, %v21737_v10  ;;  %v11213_v27 = vmul.f32 0.01, %v11149_v63  ;;  %v21739_v38 = vld [vmem:[#allocation8_spill] sm:$0xff] }
 0xbab   : > { %v10759_v35 = vpop.f32.mrf.mxu0  ;;  %v10985_v15 = vpop.f32.mrf.mxu1  ;;  %v11273_v56 = vadd.f32 %v11272_v2, %v11242_v61  ;;  %v11148_v59 = vadd.f32 %v21087_v5, %v11109_v33  ;;  %v11243_v40 = vsel %vm11179_vm14, %v11147_v60, %v11211_v58  ;;  %v11214_v7 = vmul.f32 0.01, %v11150_v34 }
 0xbac   : > { %v11112_v47 = vmul.f32 %v21062_v21, %v11073_v49  ;;  %v11076_v55 = vadd.f32 %v15319_v44, %v10850_v22  ;;  %v10848_v52 = vadd.f32 %v10759_v35, %v21104_v42  ;;  %v11153_v32 = vadd.f32 %v21087_v5, %v11114_v43 }
 0xbad   : > { %v15282_v53 = vpop.f32.mrf.mxu0  ;;  %v15322_v23 = vpop.f32.mrf.mxu1  ;;  %v11274_v17 = vadd.f32 %v11273_v56, %v11243_v40  ;;  %vm11180_vm0 = vcmp.ge.f32.partialorder %v11148_v59, 0.0  ;;  %v11212_v25 = vmul.f32 0.01, %v11148_v59  ;;  %vm11182_vm1 = vcmp.ge.f32.partialorder %v11150_v34, 0.0  ;;  %v21741_v40 = vld [vmem:[#allocation41_spill] sm:$0xff] }
 0xbae   : > { %v11151_v39 = vadd.f32 %v21087_v5, %v11112_v47  ;;  %v11115_v51 = vmul.f32 %v21062_v21, %v11076_v55  ;;  %v11074_v14 = vadd.f32 %v10985_v15, %v10848_v52  ;;  %v10853_v37 = vadd.f32 %v15282_v53, %v21738_v16  ;;  %v21740_v47 = vld [vmem:[#allocation42_spill] sm:$0xff] }
 0xbaf   : > { %v10772_v8 = vpop.f32.mrf.mxu0  ;;  %v10998_v36 = vpop.f32.mrf.mxu1  ;;  %v11244_v50 = vsel %vm11180_vm0, %v11148_v59, %v11212_v25  ;;  %v11245_v48 = vsel %vm11181_vm15, %v11149_v63, %v11213_v27  ;;  %v11246_v9 = vsel %vm11182_vm1, %v11150_v34, %v11214_v7  ;;  %vm11185_vm4 = vcmp.ge.f32.partialorder %v11153_v32, 0.0 }
 0xbb0   : > { %v10851_v42 = vadd.f32 %v10772_v8, %v21109_v0  ;;  %v11275_v20 = vadd.f32 %v11274_v17, %v11244_v50  ;;  %vm11183_vm3 = vcmp.ge.f32.partialorder %v11151_v39, 0.0  ;;  %v11215_v28 = vmul.f32 0.01, %v11151_v39 }
 0xbb1   : > { %v15283_v1 = vpop.f32.mrf.mxu0  ;;  %v15323_v3 = vpop.f32.mrf.mxu1  ;;  %v11154_v62 = vadd.f32 %v21087_v5, %v11115_v51  ;;  %v11113_v31 = vmul.f32 %v21062_v21, %v11074_v14  ;;  %v11079_v6 = vadd.f32 %v15322_v23, %v10853_v37  ;;  %v11217_v54 = vmul.f32 0.01, %v11153_v32 }
 0xbb2   : > { %v11077_v60 = vadd.f32 %v10998_v36, %v10851_v42  ;;  %v11276_v12 = vadd.f32 %v11275_v20, %v11245_v48  ;;  %v10854_v46 = vadd.f32 %v15283_v1, %v21739_v38  ;;  %v11247_v63 = vsel %vm11183_vm3, %v11151_v39, %v11215_v28  ;;  %v21742_v48 = vld [vmem:[#allocation18_spill] sm:$0xff] }
 0xbb3   : > { %v10775_v4 = vpop.f32.mrf.mxu0  ;;  %v11001_v0 = vpop.f32.mrf.mxu1  ;;  %v11152_v41 = vadd.f32 %v21087_v5, %v11113_v31  ;;  %v11118_v13 = vmul.f32 %v21062_v21, %v11079_v6  ;;  %v11218_v49 = vmul.f32 0.01, %v11154_v62  ;;  %v10412_v27 = vadd.f32 %v21050_v30, %v21740_v47 }
 0xbb4   : > { %v11277_v58 = vadd.f32 %v11276_v12, %v11246_v9  ;;  %v11116_v26 = vmul.f32 %v21062_v21, %v11077_v60  ;;  %v11080_v44 = vadd.f32 %v15323_v3, %v10854_v46  ;;  %v10852_v2 = vadd.f32 %v10775_v4, %v21112_v19  ;;  %v21743_v46 = vld [vmem:[#allocation34_spill] sm:$0xff] }
 0xbb5   : > { %v15286_v33 = vpop.f32.mrf.mxu0  ;;  %v15326_v34 = vpop.f32.mrf.mxu1  ;;  %vm11184_vm5 = vcmp.ge.f32.partialorder %v11152_v41, 0.0  ;;  %v11216_v61 = vmul.f32 0.01, %v11152_v41  ;;  %v11157_v43 = vadd.f32 %v21087_v5, %v11118_v13  ;;  %vm11186_vm6 = vcmp.ge.f32.partialorder %v11154_v62, 0.0 }
 0xbb6   : > { %v11278_v10 = vadd.f32 %v11277_v58, %v11247_v63  ;;  %v11155_v22 = vadd.f32 %v21087_v5, %v11116_v26  ;;  %v11119_v35 = vmul.f32 %v21062_v21, %v11080_v44  ;;  %v11078_v15 = vadd.f32 %v11001_v0, %v10852_v2  ;;  %v21744_v63 = vld [vmem:[#allocation29_spill] sm:$0xff] }
 0xbb7   : > { %v10788_v56 = vpop.f32.mrf.mxu0  ;;  %v11014_v59 = vpop.f32.mrf.mxu1  ;;  %v11248_v19 = vsel %vm11184_vm5, %v11152_v41, %v11216_v61  ;;  %v10857_v55 = vadd.f32 %v15286_v33, %v21741_v40  ;;  %v11249_v52 = vsel %vm11185_vm4, %v11153_v32, %v11217_v54  ;;  %v11250_v8 = vsel %vm11186_vm6, %v11154_v62, %v11218_v49 }
 0xbb8   : > { %v11279_v53 = vadd.f32 %v11278_v10, %v11248_v19  ;;  %v11219_v23 = vmul.f32 0.01, %v11155_v22  ;;  %v11158_v17 = vadd.f32 %v21087_v5, %v11119_v35  ;;  %vm11187_vm2 = vcmp.ge.f32.partialorder %v11155_v22, 0.0 }
 0xbb9   : > { %v15287_v7 = vpop.f32.mrf.mxu0  ;;  %v15327_v25 = vpop.f32.mrf.mxu1  ;;  %v11117_v39 = vmul.f32 %v21062_v21, %v11078_v15  ;;  %v11083_v51 = vadd.f32 %v15326_v34, %v10857_v55  ;;  %v10855_v14 = vadd.f32 %v10788_v56, %v21115_v45  ;;  %vm11189_vm7 = vcmp.ge.f32.partialorder %v11157_v43, 0.0  ;;  %v21745_v55 = vld [vmem:[#allocation25_spill] sm:$0xff] }
 0xbba   : > { %v11280_v30 = vadd.f32 %v11279_v53, %v11249_v52  ;;  %v11221_v36 = vmul.f32 0.01, %v11157_v43  ;;  %v10858_v20 = vadd.f32 %v15287_v7, %v21742_v48  ;;  %v11251_v28 = vsel %vm11187_vm2, %v11155_v22, %v11219_v23 }
 0xbbb   : > { %v10791_v50 = vpop.f32.mrf.mxu0  ;;  %v11017_v16 = vpop.f32.mrf.mxu1  ;;  %v11156_v32 = vadd.f32 %v21087_v5, %v11117_v39  ;;  %v11122_v37 = vmul.f32 %v21062_v21, %v11083_v51  ;;  %v11081_v42 = vadd.f32 %v11014_v59, %v10855_v14  ;;  %vm11190_vm8 = vcmp.ge.f32.partialorder %v11158_v17, 0.0 }
 0xbbc   : > { %v11281_v1 = vadd.f32 %v11280_v30, %v11250_v8  ;;  %v10856_v3 = vadd.f32 %v10791_v50, %v21118_v11  ;;  %v11222_v62 = vmul.f32 0.01, %v11158_v17  ;;  %v11084_v12 = vadd.f32 %v15327_v25, %v10858_v20  ;;  %v21746_v30 = vld [vmem:[#allocation15_spill] sm:$0xff] }
 0xbbd   : > { %v15290_v31 = vpop.f32.mrf.mxu0  ;;  %v15330_v45 = vpop.f32.mrf.mxu1  ;;  %vm11188_vm9 = vcmp.ge.f32.partialorder %v11156_v32, 0.0  ;;  %v11220_v6 = vmul.f32 0.01, %v11156_v32  ;;  %v11120_v60 = vmul.f32 %v21062_v21, %v11081_v42  ;;  %v10638_v41 = vadd.f32 %v21744_v63, %v10412_v27 }
 0xbbe   : > { %v11282_v9 = vadd.f32 %v11281_v1, %v11251_v28  ;;  %v11082_v38 = vadd.f32 %v11017_v16, %v10856_v3  ;;  %v10861_v4 = vadd.f32 %v15290_v31, %v21743_v46  ;;  %v11161_v58 = vadd.f32 %v21087_v5, %v11122_v37 }
 0xbbf   : > { %v10804_v0 = vpop.f32.mrf.mxu0  ;;  %v11030_v54 = vpop.f32.mrf.mxu1  ;;  %v11252_v13 = vsel %vm11188_vm9, %v11156_v32, %v11220_v6  ;;  %v11159_v11 = vadd.f32 %v21087_v5, %v11120_v60  ;;  %v11123_v44 = vmul.f32 %v21062_v21, %v11084_v12  ;;  %v11253_v61 = vsel %vm11189_vm7, %v11157_v43, %v11221_v36 }
 0xbc0   : > { %v11283_v26 = vadd.f32 %v11282_v9, %v11252_v13  ;;  %v11121_v2 = vmul.f32 %v21062_v21, %v11082_v38  ;;  %v11087_v33 = vadd.f32 %v15330_v45, %v10861_v4  ;;  %v11254_v10 = vsel %vm11190_vm8, %v11158_v17, %v11222_v62 }
 0xbc1   : > { %v15291_v34 = vpop.f32.mrf.mxu0  ;;  %v15331_v49 = vpop.f32.mrf.mxu1  ;;  %v11223_v22 = vmul.f32 0.01, %v11159_v11  ;;  %v10859_v35 = vadd.f32 %v10804_v0, %v21123_v57  ;;  %vm11191_vm10 = vcmp.ge.f32.partialorder %v11159_v11, 0.0  ;;  %v11162_v56 = vadd.f32 %v21087_v5, %v11123_v44 }
 0xbc2   : > { %v11284_v15 = vadd.f32 %v11283_v26, %v11253_v61  ;;  %v11160_v59 = vadd.f32 %v21087_v5, %v11121_v2  ;;  %v11126_v19 = vmul.f32 %v21062_v21, %v11087_v33  ;;  %v10862_v52 = vadd.f32 %v15291_v34, %v21745_v55 }
 0xbc3   : > { %v10807_v47 = vpop.f32.mrf.mxu0  ;;  %v11033_v27 = vpop.f32.mrf.mxu1  ;;  %v11085_v40 = vadd.f32 %v11030_v54, %v10859_v35  ;;  %vm11193_vm11 = vcmp.ge.f32.partialorder %v11161_v58, 0.0  ;;  %v11225_v53 = vmul.f32 0.01, %v11161_v58  ;;  %v11255_v7 = vsel %vm11191_vm10, %v11159_v11, %v11223_v22 }
 0xbc4   : > { %v10860_v43 = vadd.f32 %v10807_v47, %v21154_v24  ;;  %v11285_v23 = vadd.f32 %v11284_v15, %v11254_v10  ;;  %vm11192_vm12 = vcmp.ge.f32.partialorder %v11160_v59, 0.0  ;;  %v11224_v25 = vmul.f32 0.01, %v11160_v59 }
 0xbc5   : > { %v15294_v57 = vpop.f32.mrf.mxu0  ;;  %v15334_v17 = vpop.f32.mrf.mxu1  ;;  %v11124_v39 = vmul.f32 %v21062_v21, %v11085_v40  ;;  %v11088_v51 = vadd.f32 %v15331_v49, %v10862_v52  ;;  %vm11194_vm13 = vcmp.ge.f32.partialorder %v11162_v56, 0.0  ;;  %v11226_v32 = vmul.f32 0.01, %v11162_v56 }
 0xbc6   : > { %v11286_v14 = vadd.f32 %v11285_v23, %v11255_v7  ;;  %v11086_v8 = vadd.f32 %v11033_v27, %v10860_v43  ;;  %v10865_v36 = vadd.f32 %v15294_v57, %v21746_v30  ;;  %v11256_v24 = vsel %vm11192_vm12, %v11160_v59, %v11224_v25 }
 0xbc7   : > { %v10820_v50 = vpop.f32.mrf.mxu0  ;;  %v11046_v16 = vpop.f32.mrf.mxu1  ;;  %v11165_v37 = vadd.f32 %v21087_v5, %v11126_v19  ;;  %v11163_v42 = vadd.f32 %v21087_v5, %v11124_v39  ;;  %v11127_v20 = vmul.f32 %v21062_v21, %v11088_v51  ;;  %v11257_v31 = vsel %vm11193_vm11, %v11161_v58, %v11225_v53 }
 0xbc8   : > { %v11287_v48 = vadd.f32 %v11286_v14, %v11256_v24  ;;  %v11125_v28 = vmul.f32 %v21062_v21, %v11086_v8  ;;  %v10863_v1 = vadd.f32 %v10820_v50, %v21160_v18  ;;  %v11091_v62 = vadd.f32 %v15334_v17, %v10865_v36 }
 0xbc9   : > { %v15295_v3 = vpop.f32.mrf.mxu0  ;;  %vm11195_vm14 = vcmp.ge.f32.partialorder %v11163_v42, 0.0  ;;  %v11227_v45 = vmul.f32 0.01, %v11163_v42  ;;  %v15335_v6 = vpop.f32.mrf.mxu1  ;;  %v11258_v46 = vsel %vm11194_vm13, %v11162_v56, %v11226_v32  ;;  %v11166_v4 = vadd.f32 %v21087_v5, %v11127_v20 }
 0xbca   : > { %v11288_v60 = vadd.f32 %v11287_v48, %v11257_v31  ;;  %v11164_v9 = vadd.f32 %v21087_v5, %v11125_v28  ;;  %v10866_v12 = vadd.f32 %v15295_v3, %v21056_v29  ;;  %v11089_v0 = vadd.f32 %v11046_v16, %v10863_v1 }
 0xbcb   : > { %v10823_v38 = vpop.f32.mrf.mxu0  ;;  %v11229_v18 = vmul.f32 0.01, %v11165_v37  ;;  %v11259_v63 = vsel %vm11195_vm14, %v11163_v42, %v11227_v45  ;;  %v11130_v11 = vmul.f32 %v21062_v21, %v11091_v62  ;;  %v11049_v2 = vpop.f32.mrf.mxu1  ;;  %vm11197_vm0 = vcmp.ge.f32.partialorder %v11165_v37, 0.0 }
 0xbcc   : > { %v10864_v54 = vadd.f32 %v10823_v38, %v10638_v41  ;;  %v11289_v13 = vadd.f32 %v11288_v60, %v11258_v46  ;;  %vm11196_vm15 = vcmp.ge.f32.partialorder %v11164_v9, 0.0  ;;  %v11228_v58 = vmul.f32 0.01, %v11164_v9 }
 0xbcd   : > { %v11128_v26 = vmul.f32 %v21062_v21, %v11089_v0  ;;  %v11092_v44 = vadd.f32 %v15335_v6, %v10866_v12  ;;  %v11230_v34 = vmul.f32 0.01, %v11166_v4  ;;  %vm11198_vm1 = vcmp.ge.f32.partialorder %v11166_v4, 0.0 }
 0xbce   : > { %v11290_v29 = vadd.f32 %v11289_v13, %v11259_v63  ;;  %v11090_v33 = vadd.f32 %v11049_v2, %v10864_v54  ;;  %v11260_v49 = vsel %vm11196_vm15, %v11164_v9, %v11228_v58  ;;  %v11261_v35 = vsel %vm11197_vm0, %v11165_v37, %v11229_v18 }
 0xbcf   : > { %v11167_v61 = vadd.f32 %v21087_v5, %v11128_v26  ;;  %v11131_v10 = vmul.f32 %v21062_v21, %v11092_v44  ;;  %v11169_v15 = vadd.f32 %v21087_v5, %v11130_v11  ;;  %v11262_v27 = vsel %vm11198_vm1, %v11166_v4, %v11230_v34 }
 0xbd0   : > { %v11291_v41 = vadd.f32 %v11290_v29, %v11260_v49  ;;  %v11129_v22 = vmul.f32 %v21062_v21, %v11090_v33  ;;  %v11305_v8 = vlaneseq }
 0xbd1   : > { %v11231_v56 = vmul.f32 0.01, %v11167_v61  ;;  %vm11199_vm3 = vcmp.ge.f32.partialorder %v11167_v61, 0.0  ;;  %v11170_v19 = vadd.f32 %v21087_v5, %v11131_v10  ;;  %v11233_v55 = vmul.f32 0.01, %v11169_v15 }
 0xbd2   : > { %v11292_v59 = vadd.f32 %v11291_v41, %v11261_v35  ;;  %v11168_v47 = vadd.f32 %v21087_v5, %v11129_v22  ;;  %vm11201_vm5 = vcmp.ge.f32.partialorder %v11169_v15, 0.0  ;;  %v11306_v36 = vand.u32 127, %v11305_v8 }
 0xbd3   : > { %v11263_v52 = vsel %vm11199_vm3, %v11167_v61, %v11231_v56  ;;  %v11234_v23 = vmul.f32 0.01, %v11170_v19  ;;  %vm11202_vm6 = vcmp.ge.f32.partialorder %v11170_v19, 0.0  ;;  %v11265_v17 = vsel %vm11201_vm5, %v11169_v15, %v11233_v55 }
 0xbd4   : > { %v11293_v40 = vadd.f32 %v11292_v59, %v11262_v27  ;;  %vm11200_vm4 = vcmp.ge.f32.partialorder %v11168_v47, 0.0  ;;  %v11232_v43 = vmul.f32 0.01, %v11168_v47  ;;  %vm11307_vm2 = vcmp.lt.s32.totalorder %v11306_v36, 2 }
 0xbd5   : > { %v11266_v25 = vsel %vm11202_vm6, %v11170_v19, %v11234_v23 }
 0xbd6   : > { %v11294_v53 = vadd.f32 %v11293_v40, %v11263_v52  ;;  %v11264_v21 = vsel %vm11200_vm4, %v11168_v47, %v11232_v43 }
 0xbd8   : > { %v11295_v57 = vadd.f32 %v11294_v53, %v11264_v21 }
 0xbda   : > { %v11296_v7 = vadd.f32 %v11295_v57, %v11265_v17 }
 0xbdc   : > { %v11297_v39 = vadd.f32 %v11296_v7, %v11266_v25 }
 0xbde   : > { %v11298_v51 = vrot.slane %v11297_v39, 4 }
 0xbe0   : > { %v11299_v14 = vadd.f32 %v11298_v51, %v11297_v39 }
 0xbe2   : > { %v11300_v30 = vrot.slane %v11299_v14, 2 }
 0xbe4   : > { %v11301_v5 = vadd.f32 %v11300_v30, %v11299_v14 }
 0xbe6   : > { %v11302_v50 = vrot.slane %v11301_v5, 1 }
 0xbe8   : > { %v11303_v16 = vadd.f32 %v11302_v50, %v11301_v5 }
 0xbea   : > { %v11304_v32 = vmul.f32 0.00390625, %v11303_v16 }
 0xbec   : > { %v11308_v24 = vsel %vm11307_vm2, %v11304_v32, -1e+30 }
 0xbed   : > { %11309 = vmax.xlane.f32.xlu0 %v11308_v24 }
 0xc76   : > { %v11310_v37 = vpop.xlane.xlu0 %11309 }
 0xc77   : > { %v11311_v42 = vsub.f32 %v11308_v24, %v11310_v37 }
 0xc79   : > { %v11312_v48 = vmul.f32 1.442695, %v11311_v42 }
 0xc7b   : > { %15589 = vpow2.f32 %v11312_v48 }
 0xc88   : > { %v15590_v20 = vpop.eup %15589 }
 0xc89   : > { %11314 = vadd.xlane.f32.xlu0 %v15590_v20 }
 0xd12   : > { %v11315_v28 = vpop.xlane.xlu0 %11314 }
 0xd13   : > { %15591 = vrcp.f32 %v11315_v28 }
 0xd20   : > { %v15592_v1 = vpop.eup %15591 }
 0xd21   : > { %v11317_v3 = vmul.f32 %v15592_v1, %v15590_v20 }
 0xd23   : > { %11318 = vst [vmem:[%s459_s25] sm:$0x1] %v11317_v3 }
 0xd24   : > { %15798 = shalt.err (!%p15795_p3)
}
 0xd25   : > { %s15799_s2 = scalar_lea.hbm %s11330_s28, 16  ;;  %s15803_s25 = scalar_lea.hbm %s21279_s14, 32 }
 0xd26   : > { %p15800_p4 = scmp.ne.s32.totalorder %s11330_s28, %s15799_s2  ;;  %p15804_p9 = scmp.lt.s32.totalorder %s11330_s28, %s21279_s14 }
 0xd27   : > { %p15805_p10 = scmp.lt.s32.totalorder %s15803_s25, %s15799_s2 }
 0xd28   : > { %p15801_p7 = pnand %p15800_p4, %p15962_p5 }
 0xd29   : > { %p15806_p11 = por %p15805_p10, %p15804_p9 }
 0xd2a   : > { %p15802_p8 = pneg %p15801_p7 }
 0xd2c   : > { %p15807_p12 = pnand %p15806_p11, %p15802_p8 }
 0xd2e   : > { %15810 = shalt.err (!%p15807_p12)
}
 0xd2f   : > { %15345 = dma.vmem_to_hbm [thread:$0]  (%p15962_p5), %s11333_s26, 16, %s11330_s28, %s11320_s15  }
 0xd30 PF: > { %p15351_p13 = scmp.ge.s32.totalorder %s15845_s16, 2  ;;  %s11344_s0 = sand.u32 1, %s15833_s29  }
 0xd31   : > { %s11345_s18 = scalar_lea.sflag [#allocation3], %s11344_s0 }
 0xd32   : > { %p15348_p0 = pnand %p15351_p13, %p15966_p6 }
 0xd34   : > { %p15349_p1 = pneg %p15348_p0 }
 0xd36   : > { %15828 = dma.done.wait (%p15349_p1), %s11345_s18, 16  }
 0xd37   : > { %15830 = vsyncadd (%p15349_p1), %s11345_s18, 4294967280  ;;  %s21747_s2 = sld [smem:[#allocation5_spill]]  ;;  %p24_p2 = scmp.ge.s32.totalorder %s15949_s19, 4  }
 0xd38   : > { %s21748_s15 = sld [smem:[#allocation6_spill]]  ;;  %s21749_s29 = smov %s15837_s30 }
 0xd39   : > { %s21751_s16 = smov %s15949_s19  ;;  %26 = sbr.rel (!%p24_p2) target bundleno = 7 (0x7), region = 144 }
 0xd3d   : > { %s21750_s30 = smov %s21747_s2 }
 0xd3e   :  { %11349 = vsyncpa [#allocation3], 1 }
 0xd3f   :  { %11351 = vsyncpa [#allocation3 + $0x1], 1 }

</bundles_post_ra>
